<compile_context>
chip_gen: v5e
topology: v5e:2x2
jax: 0.10.0
libtpu: 0.0.40
codegen_flags: <defaults>
</compile_context>

<pallas_src>
import jax
import jax.numpy as jnp
from jax.experimental import pallas as pl
from jax.experimental.pallas import tpu as pltpu

HIDDEN = 1000       # PyTorch hidden width
HIDDEN_PAD = 1024   # padded to a multiple of 128 (lane-dense)
OUT_PAD = 128       # lane-dense output width; true output dim is 1 (column 0)


# ----------------------------------------------------------------------------
# Fused Score MLP kernel: Linear -> LeakyReLU -> [Dropout eval = id] -> Linear
# ----------------------------------------------------------------------------
def _score_mlp_kernel(x_ref, w1_ref, b1_ref, w2_ref, b2_ref, o_ref):
    # First GEMM on the MXU: bf16 inputs, f32 accumulation.
    h = jnp.dot(x_ref[...].astype(jnp.bfloat16), w1_ref[...],
                preferred_element_type=jnp.float32)
    h = h + b1_ref[...]                       # f32 bias
    h = jnp.where(h > 0.0, h, 0.01 * h)       # nn.LeakyReLU default slope 0.01
    # Dropout(0.3) is identity in eval mode.
    # TODO(synk): training-mode dropout (pltpu.prng_seed + stateful_bernoulli) omitted.
    # Second linear, widened to 128 zero-padded output lanes for a dense store.
    o_ref[...] = jnp.dot(h.astype(jnp.bfloat16), w2_ref[...],
                         preferred_element_type=jnp.float32) + b2_ref[...]


def _row_tile():
    """Row-tile size: 512 on 128 MiB-VMEM chips (v5e/v6e), 256 on v7x (64 MiB)."""
    try:
        if pltpu.get_tpu_info().vmem_capacity_bytes <= 64 * 1024 * 1024:
            return 256
    except Exception:
        pass
    return 512


def prepare_score_params(w1, b1, w2, b2):
    """Pad hidden 1000->1024, widen the 1-column head to 128 lanes, cast weights to bf16.

    w1: (D, 1000) f32, b1: (1000,) f32, w2: (1000, 1) f32, b2: (1,) f32
    """
    d = w1.shape[0]
    w1p = (jnp.zeros((d, HIDDEN_PAD), jnp.float32)
           .at[:, :HIDDEN].set(w1).astype(jnp.bfloat16))
    b1p = jnp.zeros((1, HIDDEN_PAD), jnp.float32).at[0, :HIDDEN].set(b1)
    w2p = (jnp.zeros((HIDDEN_PAD, OUT_PAD), jnp.float32)
           .at[:HIDDEN, 0].set(w2[:, 0]).astype(jnp.bfloat16))
    b2p = jnp.zeros((1, OUT_PAD), jnp.float32).at[0, 0].set(b2[0])
    return {"w1": w1p, "b1": b1p, "w2": w2p, "b2": b2p}


def score_forward(x, params, tm=None):
    """x: (N, embeds_dim) f32 -> (N, 1) f32 scores (Score.forward)."""
    if tm is None:
        tm = _row_tile()
    n, d = x.shape
    n_pad = pl.cdiv(n, tm) * tm
    if n_pad != n:
        x = jnp.pad(x, ((0, n_pad - n), (0, 0)))

    out = pl.pallas_call(
        _score_mlp_kernel,
        out_shape=jax.ShapeDtypeStruct((n_pad, OUT_PAD), jnp.float32),
        grid_spec=pltpu.PrefetchScalarGridSpec(
            num_scalar_prefetch=0,
            grid=(n_pad // tm,),
            in_specs=[
                pl.BlockSpec((tm, d), lambda i: (i, 0)),            # row tile (pipelined)
                pl.BlockSpec((d, HIDDEN_PAD), lambda i: (0, 0)),    # resident w1 (bf16)
                pl.BlockSpec((1, HIDDEN_PAD), lambda i: (0, 0)),    # resident b1 (f32)
                pl.BlockSpec((HIDDEN_PAD, OUT_PAD), lambda i: (0, 0)),  # resident w2 (bf16)
                pl.BlockSpec((1, OUT_PAD), lambda i: (0, 0)),       # resident b2 (f32)
            ],
            out_specs=pl.BlockSpec((tm, OUT_PAD), lambda i: (i, 0)),
        ),
        compiler_params=pltpu.CompilerParams(
            dimension_semantics=("parallel",),      # shard row grid across TCs (v7x)
            vmem_limit_bytes=48 * 1024 * 1024,      # headroom above default scoped VMEM
        ),
    )(x, params["w1"], params["b1"], params["w2"], params["b2"])

    # True output dimension is 1 -> take lane 0 and drop row padding.
    return out[:n, 0:1]


if __name__ == "__main__":
    key = jax.random.PRNGKey(0)
    kx, k1, k2, k3, k4 = jax.random.split(key, 5)

    # Small demo shapes consistent with the module: 64 inputs, embeds_dim=256.
    N, D = 64, 256
    x = jax.random.normal(kx, (N, D), jnp.float32)
    w1 = jax.random.normal(k1, (D, HIDDEN), jnp.float32) * 0.05
    b1 = jax.random.normal(k2, (HIDDEN,), jnp.float32) * 0.05
    w2 = jax.random.normal(k3, (HIDDEN, 1), jnp.float32) * 0.05
    b2 = jax.random.normal(k4, (1,), jnp.float32) * 0.05

    params = prepare_score_params(w1, b1, w2, b2)
    out = jax.block_until_ready(score_forward(x, params))
    assert out.shape == (N, 1)

    # Pure-f32 reference of Score.forward (kernel uses bf16 matmul inputs ->
    # loose tolerance).
    h_ref = x @ w1 + b1
    h_ref = jnp.where(h_ref > 0, h_ref, 0.01 * h_ref)
    ref = h_ref @ w2 + b2
    max_err = float(jnp.max(jnp.abs(out - ref)))
    assert max_err < 5e-2, f"max abs error {max_err}"

    print("KERNEL_OK")
</pallas_src>

<mosaic_0001>
module attributes {stable_mosaic.version = 11 : i64} {
  func.func @_score_mlp_kernel(%arg0: i32, %arg1: memref<512x256xf32, #tpu.memory_space<vmem>>, %arg2: memref<256x1024xbf16, #tpu.memory_space<vmem>>, %arg3: memref<1x1024xf32, #tpu.memory_space<vmem>>, %arg4: memref<1024x128xbf16, #tpu.memory_space<vmem>>, %arg5: memref<1x128xf32, #tpu.memory_space<vmem>>, %arg6: memref<512x128xf32, #tpu.memory_space<vmem>>) attributes {dimension_semantics = [#tpu.dimension_semantics<parallel>], iteration_bounds = array<i64: 1>, scalar_prefetch = 0 : i64, scratch_operands = 0 : i64, tpu.core_type = #tpu.core_type<tc>, window_params = [{transform_indices = @transform_0, window_bounds = array<i64: 512, 256>}, {pipeline_mode = #tpu.pipeline_mode<synchronous>, transform_indices = @transform_1, window_bounds = array<i64: 256, 1024>}, {pipeline_mode = #tpu.pipeline_mode<synchronous>, transform_indices = @transform_2, window_bounds = array<i64: 1, 1024>}, {pipeline_mode = #tpu.pipeline_mode<synchronous>, transform_indices = @transform_3, window_bounds = array<i64: 1024, 128>}, {pipeline_mode = #tpu.pipeline_mode<synchronous>, transform_indices = @transform_4, window_bounds = array<i64: 1, 128>}, {transform_indices = @transform_5, window_bounds = array<i64: 512, 128>}]} {
    %c0 = arith.constant 0 : index
    %c0_0 = arith.constant 0 : index
    %0 = vector.load %arg1[%c0, %c0_0] : memref<512x256xf32, #tpu.memory_space<vmem>>, vector<512x256xf32>
    %1 = arith.truncf %0 : vector<512x256xf32> to vector<512x256xbf16>
    %c0_1 = arith.constant 0 : index
    %c0_2 = arith.constant 0 : index
    %2 = vector.load %arg2[%c0_1, %c0_2] : memref<256x1024xbf16, #tpu.memory_space<vmem>>, vector<256x1024xbf16>
    %cst = arith.constant dense<0.000000e+00> : vector<512x1024xf32>
    %3 = tpu.matmul %1, %2, %cst {dimension_numbers = #tpu.dot_dimension_numbers<[1], [0], [0], [1], [0, 0, 1, 1], [], []>} : vector<512x256xbf16>, vector<256x1024xbf16>, vector<512x1024xf32> -> vector<512x1024xf32>
    %c0_3 = arith.constant 0 : index
    %c0_4 = arith.constant 0 : index
    %4 = vector.load %arg3[%c0_3, %c0_4] : memref<1x1024xf32, #tpu.memory_space<vmem>>, vector<1x1024xf32>
    %5 = vector.broadcast %4 : vector<1x1024xf32> to vector<512x1024xf32>
    %6 = arith.addf %3, %5 : vector<512x1024xf32>
    %cst_5 = arith.constant 0.000000e+00 : f32
    %7 = vector.broadcast %cst_5 : f32 to vector<512x1024xf32>
    %8 = arith.cmpf ogt, %6, %7 : vector<512x1024xf32>
    %cst_6 = arith.constant 0.00999999977 : f32
    %9 = vector.broadcast %cst_6 : f32 to vector<512x1024xf32>
    %10 = arith.mulf %9, %6 : vector<512x1024xf32>
    %11 = arith.select %8, %6, %10 : vector<512x1024xi1>, vector<512x1024xf32>
    %12 = arith.truncf %11 : vector<512x1024xf32> to vector<512x1024xbf16>
    %c0_7 = arith.constant 0 : index
    %c0_8 = arith.constant 0 : index
    %13 = vector.load %arg4[%c0_7, %c0_8] : memref<1024x128xbf16, #tpu.memory_space<vmem>>, vector<1024x128xbf16>
    %cst_9 = arith.constant dense<0.000000e+00> : vector<512x128xf32>
    %14 = tpu.matmul %12, %13, %cst_9 {dimension_numbers = #tpu.dot_dimension_numbers<[1], [0], [0], [1], [0, 0, 1, 1], [], []>} : vector<512x1024xbf16>, vector<1024x128xbf16>, vector<512x128xf32> -> vector<512x128xf32>
    %c0_10 = arith.constant 0 : index
    %c0_11 = arith.constant 0 : index
    %15 = vector.load %arg5[%c0_10, %c0_11] : memref<1x128xf32, #tpu.memory_space<vmem>>, vector<1x128xf32>
    %16 = vector.broadcast %15 : vector<1x128xf32> to vector<512x128xf32>
    %17 = arith.addf %14, %16 : vector<512x128xf32>
    %c0_12 = arith.constant 0 : index
    %c0_13 = arith.constant 0 : index
    %18 = vector.load %arg6[%c0_12, %c0_13] : memref<512x128xf32, #tpu.memory_space<vmem>>, vector<512x128xf32>
    tpu.vector_store %arg6[%c0_12, %c0_13], %17 {strides = array<i32>} : memref<512x128xf32, #tpu.memory_space<vmem>>, vector<512x128xf32>,
    return
  }
  func.func @transform_0(%arg0: i32) -> (i32, i32) {
    %c0_i32 = arith.constant 0 : i32
    %c0_i32_0 = arith.constant 0 : i32
    return %arg0, %c0_i32 : i32, i32
  }
  func.func @transform_1(%arg0: i32) -> (i32, i32) {
    %c0_i32 = arith.constant 0 : i32
    %c0_i32_0 = arith.constant 0 : i32
    %c0_i32_1 = arith.constant 0 : i32
    return %c0_i32, %c0_i32_0 : i32, i32
  }
  func.func @transform_2(%arg0: i32) -> (i32, i32) {
    %c0_i32 = arith.constant 0 : i32
    %c0_i32_0 = arith.constant 0 : i32
    %c0_i32_1 = arith.constant 0 : i32
    return %c0_i32, %c0_i32_0 : i32, i32
  }
  func.func @transform_3(%arg0: i32) -> (i32, i32) {
    %c0_i32 = arith.constant 0 : i32
    %c0_i32_0 = arith.constant 0 : i32
    %c0_i32_1 = arith.constant 0 : i32
    return %c0_i32, %c0_i32_0 : i32, i32
  }
  func.func @transform_4(%arg0: i32) -> (i32, i32) {
    %c0_i32 = arith.constant 0 : i32
    %c0_i32_0 = arith.constant 0 : i32
    %c0_i32_1 = arith.constant 0 : i32
    return %c0_i32, %c0_i32_0 : i32, i32
  }
  func.func @transform_5(%arg0: i32) -> (i32, i32) {
    %c0_i32 = arith.constant 0 : i32
    %c0_i32_0 = arith.constant 0 : i32
    return %arg0, %c0_i32 : i32, i32
  }
}

</mosaic_0001>

<bundles_post_ra>
// kernel: tpu_custom_call.1
= control target key start
LH: loop header
LB: loop body
LE: loop exit
PB: predicated region body
PF: predicated region fallthrough
CT: control target
= control target key end

     0   :  { %10 = vsyncpa [#allocation3], 0  ;;  %s12411_s0 = inlined_call_operand.hbm [shape: f32[512,256], index: 0, kind: input, shape index: {}]   ;;  %s12412_s1 = inlined_call_operand.hbm [shape: bf16[256,1024], index: 1, kind: input, shape index: {}]   ;;  %s12413_s2 = inlined_call_operand.hbm [shape: f32[1,1024], index: 2, kind: input, shape index: {}]   ;;  %s12414_s3 = inlined_call_operand.hbm [shape: bf16[1024,128], index: 3, kind: input, shape index: {}]   ;;  %s12415_s4 = inlined_call_operand.vmem [shape: f32[1,128], index: 4, kind: input, shape index: {}]   ;;  %s12416_s5 = inlined_call_operand.hbm [shape: f32[512,128], index: 5, kind: output, shape index: {}]  }
   0x1   :  { %11 = vsyncpa [#allocation6], 0 }
   0x2   :  { %12 = vsyncpa [#allocation9], 0  ;;  %s31_s20 = sshll.u32 %s12412_s1, 4  ;;  %s32_s20 = int_to_ptr.hbm [resolvable:$true] %s31_s20 }
   0x3   :  { %13 = vsyncpa [#allocation4], 0  ;;  %s8615_s21 = smov [#allocation5]   ;;  %s18_s25 = sshll.u32 %s12411_s0, 4  ;;  %s19_s25 = int_to_ptr.hbm [resolvable:$true] %s18_s25 }
   0x4   :  { %s33_s22 = sshll.u32 %s8615_s21, 4  ;;  %s8616_s26 = smov 512   ;;  %s34_s22 = int_to_ptr.vmem [resolvable:$true] %s33_s22 }
   0x5   :  { %s8617_s27 = smov 32   ;;  %s8618_s28 = smov [#allocation2]  }
   0x6   :  { %39 = dma.hbm_to_vmem [thread:$0]  %s32_s20, 16384, %s34_s22, [#allocation6], %s8616_s26, %s8616_s26, %s8617_s27  }
   0x7   :  { %s20_s29 = sshll.u32 %s8618_s28, 4  ;;  %s8619_s30 = smov 256   ;;  %s21_s29 = int_to_ptr.vmem [resolvable:$true] %s20_s29 }
   0x8   :  { %s8620_s6 = smov 16   ;;  %s45_s8 = sshll.u32 %s12413_s2, 4  ;;  %s46_s8 = int_to_ptr.hbm [resolvable:$true] %s45_s8 }
   0x9   :  { %26 = dma.hbm_to_vmem [thread:$0]  %s19_s25, 16384, %s21_s29, [#allocation3], %s8619_s30, %s8619_s30, %s8620_s6  }
   0xa   :  { %s8621_s9 = smov [#allocation7]   ;;  %s55_s12 = sshll.u32 %s12414_s3, 4  ;;  %s56_s12 = int_to_ptr.hbm [resolvable:$true] %s55_s12 }
   0xb   :  { %s47_s10 = sshll.u32 %s8621_s9, 4  ;;  %s8622_s13 = smov [#allocation8]   ;;  %s48_s10 = int_to_ptr.vmem [resolvable:$true] %s47_s10 }
   0xc   :  { %50 = dma.hbm_to_vmem [thread:$0]  %s46_s8, 128, %s48_s10, [#allocation6]  }
   0xd   :  { %s57_s14 = sshll.u32 %s8622_s13, 4  ;;  %s8623_s15 = smov 64   ;;  %s58_s14 = int_to_ptr.vmem [resolvable:$true] %s57_s14 }
   0xe   :  { %s8624_s16 = smov 4  }
   0xf   :  { %63 = dma.hbm_to_vmem [thread:$0]  %s56_s12, 8192, %s58_s14, [#allocation9], %s8623_s15, %s8623_s15, %s8624_s16  }
  0x10   :  { %8607 = dma.done.wait [#allocation3], 16384  }
  0x11   :  { %8608 = vsyncadd [#allocation3], 4294950912 }
  0x12   :  { %8609 = dma.done.wait [#allocation6], 16512  }
  0x13   :  { %8610 = vsyncadd [#allocation6], 4294950784 }
  0x14   :  { %8611 = dma.done.wait [#allocation9], 8192  }
  0x15   :  { %8612 = vsyncadd [#allocation9], 4294959104  ;;  %v7735_v0 = vld [vmem:[#allocation5 + $0x1c0] sm:$0xf]  ;;  %v8333_v5 = vld [vmem:[#allocation5 + $0x1c4] sm:$0xf] }
  0x16   :  { %v8337_v1 = vld [vmem:[#allocation5 + $0x1dc] sm:$0xf0]  ;;  %v7737_v6 = vld [vmem:[#allocation5 + $0x1e0] sm:$0xf0]  ;;  %s7494_s22 = sshll.u32 %s12416_s5, 4  ;;  %s8626_s23 = smov 128   ;;  %s7495_s22 = int_to_ptr.hbm [resolvable:$true] %s7494_s22 }
  0x17   :  { %v7991_v2 = vld [vmem:[#allocation5 + $0x3c0] sm:$0xf]  ;;  %v7736_v3 = vor.u32 %v8337_v1, %v7735_v0  ;;  %v7740_v8 = vor.u32 %v8333_v5, %v7737_v6  ;;  %v8397_v9 = vld [vmem:[#allocation5 + $0x3c4] sm:$0xf]  ;;  %s8627_s24 = smov 8  }
  0x18   :  { %v8401_v4 = vld [vmem:[#allocation5 + $0x3dc] sm:$0xf0]  ;;  %v7993_v10 = vld [vmem:[#allocation5 + $0x3e0] sm:$0xf0] }
  0x19   :  { %v7992_v7 = vor.u32 %v8401_v4, %v7991_v2  ;;  %v7703_v11 = vld [vmem:[#allocation5 + $0x180] sm:$0xf]  ;;  %1060 = vmatpush.bf16.msra.mxu0 %v7736_v3  ;;  %v7996_v12 = vor.u32 %v8397_v9, %v7993_v10  ;;  %1398 = vmatpush.bf16.msra.mxu2 %v7740_v8  ;;  %v8325_v18 = vld [vmem:[#allocation5 + $0x184] sm:$0xf] }
  0x1a   :  { %v8329_v13 = vld [vmem:[#allocation5 + $0x19c] sm:$0xf0]  ;;  %v7705_v19 = vld [vmem:[#allocation5 + $0x1a0] sm:$0xf0] }
  0x1b   :  { %v7959_v14 = vld [vmem:[#allocation5 + $0x380] sm:$0xf]  ;;  %1229 = vmatpush.bf16.msra.mxu1 %v7992_v7  ;;  %v7704_v16 = vor.u32 %v8329_v13, %v7703_v11  ;;  %v8389_v20 = vld [vmem:[#allocation5 + $0x384] sm:$0xf]  ;;  %1567 = vmatpush.bf16.msra.mxu3 %v7996_v12  ;;  %v7708_v21 = vor.u32 %v8325_v18, %v7705_v19 }
  0x1c   :  { %v8393_v15 = vld [vmem:[#allocation5 + $0x39c] sm:$0xf0]  ;;  %v7961_v22 = vld [vmem:[#allocation5 + $0x3a0] sm:$0xf0] }
  0x1d   :  { %v7960_v17 = vor.u32 %v8393_v15, %v7959_v14  ;;  %v7671_v23 = vld [vmem:[#allocation5 + $0x140] sm:$0xf]  ;;  %v7964_v25 = vor.u32 %v8389_v20, %v7961_v22  ;;  %v8317_v28 = vld [vmem:[#allocation5 + $0x144] sm:$0xf]  ;;  %1061 = vmatpush.bf16.msra.mxu0 %v7704_v16  ;;  %1399 = vmatpush.bf16.msra.mxu2 %v7708_v21 }
  0x1e   :  { %v8321_v24 = vld [vmem:[#allocation5 + $0x15c] sm:$0xf0]  ;;  %v7673_v30 = vld [vmem:[#allocation5 + $0x160] sm:$0xf0] }
  0x1f   :  { %v7927_v26 = vld [vmem:[#allocation5 + $0x340] sm:$0xf]  ;;  %v7672_v29 = vor.u32 %v8321_v24, %v7671_v23  ;;  %v8381_v31 = vld [vmem:[#allocation5 + $0x344] sm:$0xf]  ;;  %1230 = vmatpush.bf16.msra.mxu1 %v7960_v17  ;;  %v7676_v34 = vor.u32 %v8317_v28, %v7673_v30  ;;  %1568 = vmatpush.bf16.msra.mxu3 %v7964_v25  ;;  %v8334_v30 = vld [vmem:[#allocation5 + $0x1cc] sm:$0xf] }
  0x20   :  { %v8385_v27 = vld [vmem:[#allocation5 + $0x35c] sm:$0xf0]  ;;  %v7929_v32 = vld [vmem:[#allocation5 + $0x360] sm:$0xf0] }
  0x21   :  { %v7928_v33 = vor.u32 %v8385_v27, %v7927_v26  ;;  %v7639_v35 = vld [vmem:[#allocation5 + $0x100] sm:$0xf]  ;;  %v7932_v38 = vor.u32 %v8381_v31, %v7929_v32  ;;  %v8309_v40 = vld [vmem:[#allocation5 + $0x104] sm:$0xf]  ;;  %1062 = vmatpush.bf16.msra.mxu0 %v7672_v29  ;;  %1400 = vmatpush.bf16.msra.mxu2 %v7676_v34  ;;  %v84_v29 = vld [vmem:[#allocation2 + $0x10] sm:$0xff] }
  0x22   :  { %v8313_v36 = vld [vmem:[#allocation5 + $0x11c] sm:$0xf0]  ;;  %v7641_v41 = vld [vmem:[#allocation5 + $0x120] sm:$0xf0]  ;;  %v7745_v31 = vld [vmem:[#allocation5 + $0x1e8] sm:$0xf0] }
  0x23   :  { %v7895_v37 = vld [vmem:[#allocation5 + $0x300] sm:$0xf]  ;;  %v8373_v42 = vld [vmem:[#allocation5 + $0x304] sm:$0xf]  ;;  %v7640_v44 = vor.u32 %v8313_v36, %v7639_v35  ;;  %1231 = vmatpush.bf16.msra.mxu1 %v7928_v33  ;;  %v7644_v46 = vor.u32 %v8309_v40, %v7641_v41  ;;  %1569 = vmatpush.bf16.msra.mxu3 %v7932_v38  ;;  %v8398_v33 = vld [vmem:[#allocation5 + $0x3cc] sm:$0xf]  ;;  %v7748_v40 = vor.u32 %v8334_v30, %v7745_v31 }
  0x24   :  { %v8377_v39 = vld [vmem:[#allocation5 + $0x31c] sm:$0xf0]  ;;  %v7897_v43 = vld [vmem:[#allocation5 + $0x320] sm:$0xf0]  ;;  %v8001_v34 = vld [vmem:[#allocation5 + $0x3e8] sm:$0xf0] }
  0x25   :  { %v7896_v45 = vor.u32 %v8377_v39, %v7895_v37  ;;  %v7607_v47 = vld [vmem:[#allocation5 + $0xc0] sm:$0xf]  ;;  %v7900_v50 = vor.u32 %v8373_v42, %v7897_v43  ;;  %v8301_v52 = vld [vmem:[#allocation5 + $0xc4] sm:$0xf]  ;;  %1063 = vmatpush.bf16.msra.mxu0 %v7640_v44  ;;  %1401 = vmatpush.bf16.msra.mxu2 %v7644_v46  ;;  %v83_v37 = vld [vmem:[#allocation2 + $0x8] sm:$0xff]  ;;  %v8004_v44 = vor.u32 %v8398_v33, %v8001_v34 }
  0x26   :  { %v8305_v48 = vld [vmem:[#allocation5 + $0xdc] sm:$0xf0]  ;;  %v7609_v53 = vld [vmem:[#allocation5 + $0xe0] sm:$0xf0]  ;;  %v85_v38 = vld [vmem:[#allocation2 + $0x18] sm:$0xff] }
  0x27   :  { %v7863_v49 = vld [vmem:[#allocation5 + $0x2c0] sm:$0xf]  ;;  %v8365_v54 = vld [vmem:[#allocation5 + $0x2c4] sm:$0xf]  ;;  %v7608_v56 = vor.u32 %v8305_v48, %v7607_v47  ;;  %1232 = vmatpush.bf16.msra.mxu1 %v7896_v45  ;;  %v7612_v58 = vor.u32 %v8301_v52, %v7609_v53  ;;  %1570 = vmatpush.bf16.msra.mxu3 %v7900_v50  ;;  %v7743_v41 = vld [vmem:[#allocation5 + $0x1c8] sm:$0xf]  ;;  %v8672_v47 = vpack.c.bf16 %v85_v38, %v83_v37 }
  0x28   :  { %v8369_v51 = vld [vmem:[#allocation5 + $0x2dc] sm:$0xf0]  ;;  %v7865_v55 = vld [vmem:[#allocation5 + $0x2e0] sm:$0xf0]  ;;  %v8338_v42 = vld [vmem:[#allocation5 + $0x1e4] sm:$0xf0] }
  0x29   :  { %v7864_v57 = vor.u32 %v8369_v51, %v7863_v49  ;;  %v7575_v59 = vld [vmem:[#allocation5 + $0x80] sm:$0xf]  ;;  %v7868_v62 = vor.u32 %v8365_v54, %v7865_v55  ;;  %v8293_v0 = vld [vmem:[#allocation5 + $0x84] sm:$0xf]  ;;  %1064 = vmatpush.bf16.msra.mxu0 %v7608_v56  ;;  %1402 = vmatpush.bf16.msra.mxu2 %v7612_v58  ;;  %v7999_v45 = vld [vmem:[#allocation5 + $0x3c8] sm:$0xf]  ;;  %v7744_v48 = vor.u32 %v8338_v42, %v7743_v41 }
  0x2a   :  { %v8297_v60 = vld [vmem:[#allocation5 + $0x9c] sm:$0xf0]  ;;  %v7577_v1 = vld [vmem:[#allocation5 + $0xa0] sm:$0xf0]  ;;  %v8402_v46 = vld [vmem:[#allocation5 + $0x3e4] sm:$0xf0] }
  0x2b   :  { %v7831_v61 = vld [vmem:[#allocation5 + $0x280] sm:$0xf]  ;;  %v8357_v2 = vld [vmem:[#allocation5 + $0x284] sm:$0xf]  ;;  %v7576_v4 = vor.u32 %v8297_v60, %v7575_v59  ;;  %1233 = vmatpush.bf16.msra.mxu1 %v7864_v57  ;;  %v7580_v6 = vor.u32 %v8293_v0, %v7577_v1  ;;  %1571 = vmatpush.bf16.msra.mxu3 %v7868_v62  ;;  %v8000_v49 = vor.u32 %v8402_v46, %v7999_v45  ;;  %v88_v51 = vld [vmem:[#allocation2 + $0x30] sm:$0xff] }
  0x2c   :  { %v8361_v63 = vld [vmem:[#allocation5 + $0x29c] sm:$0xf0]  ;;  %v7833_v3 = vld [vmem:[#allocation5 + $0x2a0] sm:$0xf0]  ;;  %v87_v52 = vld [vmem:[#allocation2 + $0x28] sm:$0xff] }
  0x2d   :  { %v7832_v5 = vor.u32 %v8361_v63, %v7831_v61  ;;  %v7543_v7 = vld [vmem:[#allocation5 + $0x40] sm:$0xf]  ;;  %v7836_v10 = vor.u32 %v8357_v2, %v7833_v3  ;;  %v8285_v12 = vld [vmem:[#allocation5 + $0x44] sm:$0xf]  ;;  %1065 = vmatpush.bf16.msra.mxu0 %v7576_v4  ;;  %1403 = vmatpush.bf16.msra.mxu2 %v7580_v6  ;;  %v89_v53 = vld [vmem:[#allocation2 + $0x38] sm:$0xff] }
  0x2e   :  { %v8289_v8 = vld [vmem:[#allocation5 + $0x5c] sm:$0xf0]  ;;  %v7545_v13 = vld [vmem:[#allocation5 + $0x60] sm:$0xf0]  ;;  %v8680_v55 = vpack.c.bf16 %v89_v53, %v87_v52  ;;  %v92_v57 = vld [vmem:[#allocation2 + $0x50] sm:$0xff] }
  0x2f   :  { %v7799_v9 = vld [vmem:[#allocation5 + $0x240] sm:$0xf]  ;;  %v8349_v14 = vld [vmem:[#allocation5 + $0x244] sm:$0xf]  ;;  %v7544_v16 = vor.u32 %v8289_v8, %v7543_v7  ;;  %1234 = vmatpush.bf16.msra.mxu1 %v7832_v5  ;;  %v7548_v21 = vor.u32 %v8285_v12, %v7545_v13  ;;  %1572 = vmatpush.bf16.msra.mxu3 %v7836_v10  ;;  %v91_v58 = vld [vmem:[#allocation2 + $0x48] sm:$0xff] }
  0x30   :  { %v8353_v11 = vld [vmem:[#allocation5 + $0x25c] sm:$0xf0]  ;;  %v7801_v15 = vld [vmem:[#allocation5 + $0x260] sm:$0xf0]  ;;  %v93_v59 = vld [vmem:[#allocation2 + $0x58] sm:$0xff] }
  0x31   :  { %v7511_v17 = vld [vmem:[#allocation5] sm:$0xf]  ;;  %v7800_v20 = vor.u32 %v8353_v11, %v7799_v9  ;;  %v8277_v23 = vld [vmem:[#allocation5 + $0x4] sm:$0xf]  ;;  %v7804_v25 = vor.u32 %v8349_v14, %v7801_v15  ;;  %1066 = vmatpush.bf16.msra.mxu0 %v7544_v16  ;;  %1404 = vmatpush.bf16.msra.mxu2 %v7548_v21  ;;  %v8688_v61 = vpack.c.bf16 %v93_v59, %v91_v58  ;;  %v8326_v62 = vld [vmem:[#allocation5 + $0x18c] sm:$0xf] }
  0x32   :  { %v8281_v18 = vld [vmem:[#allocation5 + $0x1c] sm:$0xf0]  ;;  %v7513_v24 = vld [vmem:[#allocation5 + $0x20] sm:$0xf0]  ;;  %v7713_v63 = vld [vmem:[#allocation5 + $0x1a8] sm:$0xf0] }
  0x33   :  { %v7767_v19 = vld [vmem:[#allocation5 + $0x200] sm:$0xf]  ;;  %v8341_v26 = vld [vmem:[#allocation5 + $0x204] sm:$0xf]  ;;  %v7512_v32 = vor.u32 %v8281_v18, %v7511_v17  ;;  %1235 = vmatpush.bf16.msra.mxu1 %v7800_v20  ;;  %v7516_v36 = vor.u32 %v8277_v23, %v7513_v24  ;;  %1573 = vmatpush.bf16.msra.mxu3 %v7804_v25  ;;  %12987 = vst [vmem:[#allocation16_spill] sm:$0xff] %v8688_v61  ;;  %v96_v11 = vld [vmem:[#allocation2 + $0x70] sm:$0xff] }
  0x34   :  { %v8345_v22 = vld [vmem:[#allocation5 + $0x21c] sm:$0xf0]  ;;  %v7769_v27 = vld [vmem:[#allocation5 + $0x220] sm:$0xf0]  ;;  %v7711_v0 = vld [vmem:[#allocation5 + $0x188] sm:$0xf]  ;;  %v7716_v1 = vor.u32 %v8326_v62, %v7713_v63 }
  0x35   :  { %v82_v28 = vld [vmem:[#allocation2] sm:$0xff]  ;;  %v7768_v35 = vor.u32 %v8345_v22, %v7767_v19  ;;  %v7772_v39 = vor.u32 %v8341_v26, %v7769_v27  ;;  %1067 = vmatpush.bf16.msra.mxu0 %v7512_v32  ;;  %1405 = vmatpush.bf16.msra.mxu2 %v7516_v36  ;;  %v8330_v2 = vld [vmem:[#allocation5 + $0x1a4] sm:$0xf0]  ;;  %v8390_v3 = vld [vmem:[#allocation5 + $0x38c] sm:$0xf] }
  0x36   :  { %v8670_v43 = vpack.c.bf16 %v84_v29, %v82_v28  ;;  %v86_v50 = vld [vmem:[#allocation2 + $0x20] sm:$0xff]  ;;  %v7969_v4 = vld [vmem:[#allocation5 + $0x3a8] sm:$0xf0]  ;;  %v7712_v5 = vor.u32 %v8330_v2, %v7711_v0  ;;  %v7967_v7 = vld [vmem:[#allocation5 + $0x388] sm:$0xf] }
  0x37   :  { %1236 = vmatpush.bf16.msra.mxu1 %v7768_v35  ;;  %1574 = vmatpush.bf16.msra.mxu3 %v7772_v39  ;;  %v8678_v54 = vpack.c.bf16 %v88_v51, %v86_v50  ;;  %v90_v56 = vld [vmem:[#allocation2 + $0x40] sm:$0xff]  ;;  %v7972_v6 = vor.u32 %v8390_v3, %v7969_v4  ;;  %v8394_v8 = vld [vmem:[#allocation5 + $0x3a4] sm:$0xf0]  ;;  %v97_v13 = vld [vmem:[#allocation2 + $0x78] sm:$0xff] }
  0x38   :  { %1068 = vmatmul.bf16.vlgmr.msra.gmra.mxu0 %v8670_v43  ;;  %1406 = vmatmul.bf16.vlgmr.msra.gmra.mxu2 %v8670_v43  ;;  %v8686_v60 = vpack.c.bf16 %v92_v57, %v90_v56  ;;  %v7968_v9 = vor.u32 %v8394_v8, %v7967_v7  ;;  %v94_v10 = vld [vmem:[#allocation2 + $0x60] sm:$0xff]  ;;  %v95_v12 = vld [vmem:[#allocation2 + $0x68] sm:$0xff]  ;;  %v100_v17 = vld [vmem:[#allocation2 + $0x90] sm:$0xff] }
  0x39   :  { %2074 = vmatpush.bf16.msrb.mxu2 %v7748_v40  ;;  %1736 = vmatpush.bf16.msrb.mxu0 %v7744_v48  ;;  %v8694_v14 = vpack.c.bf16 %v96_v11, %v94_v10  ;;  %v8696_v15 = vpack.c.bf16 %v97_v13, %v95_v12  ;;  %v98_v16 = vld [vmem:[#allocation2 + $0x80] sm:$0xff]  ;;  %v99_v18 = vld [vmem:[#allocation2 + $0x88] sm:$0xff]  ;;  %v101_v19 = vld [vmem:[#allocation2 + $0x98] sm:$0xff] }
  0x3a   :  { %1237 = vmatmul.bf16.vlgmr.msra.gmra.mxu1 %v8672_v47  ;;  %1575 = vmatmul.bf16.vlgmr.msra.gmra.mxu3 %v8672_v47  ;;  %12986 = vst [vmem:[#allocation15_spill] sm:$0xff] %v8686_v60  ;;  %v8702_v20 = vpack.c.bf16 %v100_v17, %v98_v16  ;;  %v8704_v21 = vpack.c.bf16 %v101_v19, %v99_v18  ;;  %v102_v22 = vld [vmem:[#allocation2 + $0xa0] sm:$0xff]  ;;  %v104_v23 = vld [vmem:[#allocation2 + $0xb0] sm:$0xff]  ;;  %v103_v24 = vld [vmem:[#allocation2 + $0xa8] sm:$0xff] }
  0x3b   :  { %2243 = vmatpush.bf16.msrb.mxu3 %v8004_v44  ;;  %1905 = vmatpush.bf16.msrb.mxu1 %v8000_v49  ;;  %v105_v25 = vld [vmem:[#allocation2 + $0xb8] sm:$0xff]  ;;  %v8710_v26 = vpack.c.bf16 %v104_v23, %v102_v22  ;;  %v106_v28 = vld [vmem:[#allocation2 + $0xc0] sm:$0xff]  ;;  %v108_v29 = vld [vmem:[#allocation2 + $0xd0] sm:$0xff] }
  0x3c   :  { %v8712_v27 = vpack.c.bf16 %v105_v25, %v103_v24  ;;  %v107_v30 = vld [vmem:[#allocation2 + $0xc8] sm:$0xff]  ;;  %v109_v31 = vld [vmem:[#allocation2 + $0xd8] sm:$0xff]  ;;  %v8718_v32 = vpack.c.bf16 %v108_v29, %v106_v28  ;;  %v110_v44 = vld [vmem:[#allocation2 + $0xe0] sm:$0xff] }
  0x3d   :  { %2075 = vmatpush.bf16.msrb.mxu2 %v7716_v1  ;;  %1737 = vmatpush.bf16.msrb.mxu0 %v7712_v5  ;;  %v8720_v33 = vpack.c.bf16 %v109_v31, %v107_v30  ;;  %v8318_v34 = vld [vmem:[#allocation5 + $0x14c] sm:$0xf]  ;;  %v7679_v36 = vld [vmem:[#allocation5 + $0x148] sm:$0xf]  ;;  %v112_v45 = vld [vmem:[#allocation2 + $0xf0] sm:$0xff] }
  0x3e   :  { %v7681_v35 = vld [vmem:[#allocation5 + $0x168] sm:$0xf0]  ;;  %v8322_v38 = vld [vmem:[#allocation5 + $0x164] sm:$0xf0]  ;;  %v113_v48 = vld [vmem:[#allocation2 + $0xf8] sm:$0xff]  ;;  %v8726_v51 = vpack.c.bf16 %v112_v45, %v110_v44 }
  0x3f   :  { %2244 = vmatpush.bf16.msrb.mxu3 %v7972_v6  ;;  %1906 = vmatpush.bf16.msrb.mxu1 %v7968_v9  ;;  %v7684_v37 = vor.u32 %v8318_v34, %v7681_v35  ;;  %v8382_v39 = vld [vmem:[#allocation5 + $0x34c] sm:$0xf]  ;;  %v7680_v41 = vor.u32 %v8322_v38, %v7679_v36  ;;  %v7935_v49 = vld [vmem:[#allocation5 + $0x348] sm:$0xf]  ;;  %v402_v56 = vld [vmem:[#allocation7] sm:$0xff] }
  0x40   :  { %v7937_v40 = vld [vmem:[#allocation5 + $0x368] sm:$0xf0]  ;;  %v8386_v50 = vld [vmem:[#allocation5 + $0x364] sm:$0xf0]  ;;  %v114_v57 = vld [vmem:[#allocation2 + $0x100] sm:$0xff]  ;;  %v8734_v59 = vperm.slane %v402_v56, 0 }
  0x41   :  { %v7940_v42 = vor.u32 %v8382_v39, %v7937_v40  ;;  %2076 = vmatpush.bf16.msrb.mxu2 %v7684_v37  ;;  %1738 = vmatpush.bf16.msrb.mxu0 %v7680_v41  ;;  %v111_v46 = vld [vmem:[#allocation2 + $0xe8] sm:$0xff]  ;;  %v7936_v52 = vor.u32 %v8386_v50, %v7935_v49  ;;  %v116_v58 = vld [vmem:[#allocation2 + $0x110] sm:$0xff]  ;;  %v117_v63 = vld [vmem:[#allocation2 + $0x118] sm:$0xff]  ;;  %v8744_v6 = vperm.slane %v402_v56, 1 }
  0x42   :  { %v8728_v53 = vpack.c.bf16 %v113_v48, %v111_v46  ;;  %v115_v62 = vld [vmem:[#allocation2 + $0x108] sm:$0xff]  ;;  %v8736_v0 = vpack.c.bf16 %v116_v58, %v114_v57  ;;  %v118_v18 = vld [vmem:[#allocation2 + $0x120] sm:$0xff]  ;;  %v120_v19 = vld [vmem:[#allocation2 + $0x130] sm:$0xff] }
  0x43   :  { %2245 = vmatpush.bf16.msrb.mxu3 %v7940_v42  ;;  %1907 = vmatpush.bf16.msrb.mxu1 %v7936_v52  ;;  %v8738_v2 = vpack.c.bf16 %v117_v63, %v115_v62  ;;  %v119_v23 = vld [vmem:[#allocation2 + $0x128] sm:$0xff]  ;;  %v121_v24 = vld [vmem:[#allocation2 + $0x138] sm:$0xff]  ;;  %v8753_v30 = vpack.c.bf16 %v120_v19, %v118_v18 }
  0x44   :  { %v8758_v37 = vpack.c.bf16 %v121_v24, %v119_v23 }
  0x48   :  { %1073 = vmatmul.bf16.gmra.mxu0 %v8678_v54  ;;  %1411 = vmatmul.bf16.gmra.mxu2 %v8678_v54 }
  0x4a   :  { %1242 = vmatmul.bf16.gmra.mxu1 %v8680_v55  ;;  %1580 = vmatmul.bf16.gmra.mxu3 %v8680_v55 }
  0x58   :  { %1078 = vmatmul.bf16.gmra.mxu0 %v8686_v60  ;;  %1416 = vmatmul.bf16.gmra.mxu2 %v8686_v60 }
  0x5a   :  { %1247 = vmatmul.bf16.gmra.mxu1 %v8688_v61  ;;  %1585 = vmatmul.bf16.gmra.mxu3 %v8688_v61 }
  0x68   :  { %1083 = vmatmul.bf16.gmra.mxu0 %v8694_v14  ;;  %1421 = vmatmul.bf16.gmra.mxu2 %v8694_v14 }
  0x6a   :  { %1252 = vmatmul.bf16.gmra.mxu1 %v8696_v15  ;;  %1590 = vmatmul.bf16.gmra.mxu3 %v8696_v15 }
  0x78   :  { %1088 = vmatmul.bf16.gmra.mxu0 %v8702_v20  ;;  %1426 = vmatmul.bf16.gmra.mxu2 %v8702_v20 }
  0x7a   :  { %1257 = vmatmul.bf16.gmra.mxu1 %v8704_v21  ;;  %1595 = vmatmul.bf16.gmra.mxu3 %v8704_v21 }
  0x88   :  { %1093 = vmatmul.bf16.gmra.mxu0 %v8710_v26  ;;  %1431 = vmatmul.bf16.gmra.mxu2 %v8710_v26 }
  0x8a   :  { %1262 = vmatmul.bf16.gmra.mxu1 %v8712_v27  ;;  %1600 = vmatmul.bf16.gmra.mxu3 %v8712_v27 }
  0x98   :  { %1098 = vmatmul.bf16.gmra.mxu0 %v8718_v32  ;;  %1436 = vmatmul.bf16.gmra.mxu2 %v8718_v32 }
  0x9a   :  { %1267 = vmatmul.bf16.gmra.mxu1 %v8720_v33  ;;  %1605 = vmatmul.bf16.gmra.mxu3 %v8720_v33 }
  0xa8   :  { %1103 = vmatmul.bf16.gmra.mxu0 %v8726_v51  ;;  %1441 = vmatmul.bf16.gmra.mxu2 %v8726_v51 }
  0xaa   :  { %1272 = vmatmul.bf16.gmra.mxu1 %v8728_v53  ;;  %1610 = vmatmul.bf16.gmra.mxu3 %v8728_v53 }
  0xb5   :  { %v1069_v1 = vpop.f32.mrf.mxu0 }
  0xb6   :  { %v1070_v3 = vadd.f32 %v1069_v1, %v8734_v59 }
  0xb7   :  { %v1238_v4 = vpop.f32.mrf.mxu1 }
  0xb8   :  { %v1239_v5 = vadd.f32 %v1238_v4, %v1070_v3  ;;  %1108 = vmatmul.bf16.gmra.mxu0 %v8736_v0  ;;  %1446 = vmatmul.bf16.gmra.mxu2 %v8736_v0  ;;  %v122_v3 = vld [vmem:[#allocation2 + $0x140] sm:$0xff]  ;;  %v124_v4 = vld [vmem:[#allocation2 + $0x150] sm:$0xff] }
  0xba   :  { %1277 = vmatmul.bf16.gmra.mxu1 %v8738_v2  ;;  %1615 = vmatmul.bf16.gmra.mxu3 %v8738_v2  ;;  %v4276_v16 = vmul.f32 0.01, %v1239_v5  ;;  %vm3764_vm0 = vcmp.gt.f32.partialorder %v1239_v5, 0.0 }
  0xbb   :  { %v1407_v7 = vpop.f32.mrf.mxu2 }
  0xbc   :  { %v1408_v8 = vadd.f32 %v1407_v7, %v8744_v6  ;;  %v8749_v25 = vsel %vm3764_vm0, %v1239_v5, %v4276_v16  ;;  %v123_v7 = vld [vmem:[#allocation2 + $0x148] sm:$0xff] }
  0xbd   :  { %v1576_v9 = vpop.f32.mrf.mxu3  ;;  %v1071_v10 = vpop.f32.mrf.mxu0  ;;  %12988 = vst [vmem:[#allocation17_spill] sm:$0xff] %v8749_v25 }
  0xbe   :  { %v1072_v11 = vadd.f32 %v1071_v10, %v8734_v59  ;;  %v1577_v13 = vadd.f32 %v1576_v9, %v1408_v8  ;;  %v125_v8 = vld [vmem:[#allocation2 + $0x158] sm:$0xff]  ;;  %v8773_v10 = vpack.c.bf16 %v124_v4, %v122_v3 }
  0xbf   :  { %v1240_v12 = vpop.f32.mrf.mxu1  ;;  %v8780_v18 = vpack.c.bf16 %v125_v8, %v123_v7 }
  0xc0   :  { %v1241_v17 = vadd.f32 %v1240_v12, %v1072_v11  ;;  %v4277_v40 = vmul.f32 0.01, %v1577_v13  ;;  %vm3765_vm2 = vcmp.gt.f32.partialorder %v1577_v13, 0.0 }
  0xc2   :  { %vm3772_vm1 = vcmp.gt.f32.partialorder %v1241_v17, 0.0  ;;  %v4284_v22 = vmul.f32 0.01, %v1241_v17  ;;  %v8765_v45 = vsel %vm3765_vm2, %v1577_v13, %v4277_v40  ;;  %v8314_v40 = vld [vmem:[#allocation5 + $0x124] sm:$0xf0] }
  0xc3   :  { %v1409_v29 = vpop.f32.mrf.mxu2  ;;  %12990 = vst [vmem:[#allocation19_spill] sm:$0xff] %v8765_v45 }
  0xc4   :  { %v8751_v28 = vsel %vm3772_vm1, %v1241_v17, %v4284_v22  ;;  %v1410_v34 = vadd.f32 %v1409_v29, %v8744_v6 }
  0xc5   :  { %12989 = vst [vmem:[#allocation18_spill] sm:$0xff] %v8751_v28  ;;  %v1578_v35 = vpop.f32.mrf.mxu3  ;;  %v1074_v36 = vpop.f32.mrf.mxu0 }
  0xc6   :  { %v1075_v38 = vadd.f32 %v1074_v36, %v8734_v59  ;;  %v1579_v41 = vadd.f32 %v1578_v35, %v1410_v34  ;;  %v8310_v36 = vld [vmem:[#allocation5 + $0x10c] sm:$0xf] }
  0xc7   :  { %v1243_v39 = vpop.f32.mrf.mxu1 }
  0xc8   :  { %v1244_v42 = vadd.f32 %v1243_v39, %v1075_v38  ;;  %1113 = vmatmul.bf16.gmra.mxu0 %v8753_v30  ;;  %vm3773_vm3 = vcmp.gt.f32.partialorder %v1579_v41, 0.0  ;;  %v4285_v44 = vmul.f32 0.01, %v1579_v41  ;;  %1451 = vmatmul.bf16.gmra.mxu2 %v8753_v30  ;;  %v7649_v38 = vld [vmem:[#allocation5 + $0x128] sm:$0xf0] }
  0xc9   :  { %v7647_v39 = vld [vmem:[#allocation5 + $0x108] sm:$0xf] }
  0xca   :  { %1282 = vmatmul.bf16.gmra.mxu1 %v8758_v37  ;;  %1620 = vmatmul.bf16.gmra.mxu3 %v8758_v37  ;;  %v8767_v46 = vsel %vm3773_vm3, %v1579_v41, %v4285_v44  ;;  %v4292_v63 = vmul.f32 0.01, %v1244_v42  ;;  %vm3780_vm4 = vcmp.gt.f32.partialorder %v1244_v42, 0.0 }
  0xcb   :  { %12991 = vst [vmem:[#allocation20_spill] sm:$0xff] %v8767_v46  ;;  %v1412_v49 = vpop.f32.mrf.mxu2 }
  0xcc   :  { %v1413_v50 = vadd.f32 %v1412_v49, %v8744_v6  ;;  %v8775_v11 = vsel %vm3780_vm4, %v1244_v42, %v4292_v63  ;;  %v7652_v49 = vor.u32 %v8310_v36, %v7649_v38 }
  0xcd   :  { %v1581_v52 = vpop.f32.mrf.mxu3  ;;  %v1076_v56 = vpop.f32.mrf.mxu0  ;;  %12992 = vst [vmem:[#allocation21_spill] sm:$0xff] %v8775_v11 }
  0xce   :  { %v1077_v57 = vadd.f32 %v1076_v56, %v8734_v59  ;;  %v1582_v62 = vadd.f32 %v1581_v52, %v1413_v50  ;;  %v7648_v50 = vor.u32 %v8314_v40, %v7647_v39  ;;  %v8374_v52 = vld [vmem:[#allocation5 + $0x30c] sm:$0xf]  ;;  %2077 = vmatpush.bf16.msrb.mxu2 %v7652_v49 }
  0xcf   :  { %v1245_v58 = vpop.f32.mrf.mxu1  ;;  %v7905_v56 = vld [vmem:[#allocation5 + $0x328] sm:$0xf0] }
  0xd0   :  { %v1246_v1 = vadd.f32 %v1245_v58, %v1077_v57  ;;  %v4293_v24 = vmul.f32 0.01, %v1582_v62  ;;  %vm3781_vm6 = vcmp.gt.f32.partialorder %v1582_v62, 0.0  ;;  %v7908_v3 = vor.u32 %v8374_v52, %v7905_v56  ;;  %1739 = vmatpush.bf16.msrb.mxu0 %v7648_v50 }
  0xd2   :  { %vm3788_vm5 = vcmp.gt.f32.partialorder %v1246_v1, 0.0  ;;  %v4300_v5 = vmul.f32 0.01, %v1246_v1  ;;  %v8789_v41 = vsel %vm3781_vm6, %v1582_v62, %v4293_v24  ;;  %2246 = vmatpush.bf16.msrb.mxu3 %v7908_v3  ;;  %v8378_v24 = vld [vmem:[#allocation5 + $0x324] sm:$0xf0] }
  0xd3   :  { %v1414_v9 = vpop.f32.mrf.mxu2  ;;  %12994 = vst [vmem:[#allocation23_spill] sm:$0xff] %v8789_v41 }
  0xd4   :  { %v8777_v12 = vsel %vm3788_vm5, %v1246_v1, %v4300_v5  ;;  %v1415_v13 = vadd.f32 %v1414_v9, %v8744_v6  ;;  %v126_v9 = vld [vmem:[#allocation2 + $0x160] sm:$0xff] }
  0xd5   :  { %12993 = vst [vmem:[#allocation22_spill] sm:$0xff] %v8777_v12  ;;  %v1583_v16 = vpop.f32.mrf.mxu3  ;;  %v1079_v17 = vpop.f32.mrf.mxu0 }
  0xd6   :  { %v1080_v22 = vadd.f32 %v1079_v17, %v8734_v59  ;;  %v1584_v29 = vadd.f32 %v1583_v16, %v1415_v13  ;;  %v128_v13 = vld [vmem:[#allocation2 + $0x170] sm:$0xff]  ;;  %v127_v16 = vld [vmem:[#allocation2 + $0x168] sm:$0xff] }
  0xd7   :  { %v1248_v23 = vpop.f32.mrf.mxu1  ;;  %v7903_v17 = vld [vmem:[#allocation5 + $0x308] sm:$0xf]  ;;  %v8797_v36 = vpack.c.bf16 %v128_v13, %v126_v9 }
  0xd8   :  { %v1249_v34 = vadd.f32 %v1248_v23, %v1080_v22  ;;  %1118 = vmatmul.bf16.gmra.mxu0 %v8773_v10  ;;  %vm3789_vm7 = vcmp.gt.f32.partialorder %v1584_v29, 0.0  ;;  %v4301_v35 = vmul.f32 0.01, %v1584_v29  ;;  %1456 = vmatmul.bf16.gmra.mxu2 %v8773_v10  ;;  %v129_v23 = vld [vmem:[#allocation2 + $0x178] sm:$0xff] }
  0xd9   :  { %v8804_v50 = vpack.c.bf16 %v129_v23, %v127_v16 }
  0xda   :  { %1287 = vmatmul.bf16.gmra.mxu1 %v8780_v18  ;;  %1625 = vmatmul.bf16.gmra.mxu3 %v8780_v18  ;;  %v8791_v42 = vsel %vm3789_vm7, %v1584_v29, %v4301_v35  ;;  %v4308_v7 = vmul.f32 0.01, %v1249_v34  ;;  %vm3796_vm8 = vcmp.gt.f32.partialorder %v1249_v34, 0.0  ;;  %v7904_v29 = vor.u32 %v8378_v24, %v7903_v17 }
  0xdb   :  { %12995 = vst [vmem:[#allocation24_spill] sm:$0xff] %v8791_v42  ;;  %v1417_v44 = vpop.f32.mrf.mxu2 }
  0xdc   :  { %v1418_v58 = vadd.f32 %v1417_v44, %v8744_v6  ;;  %v8799_v38 = vsel %vm3796_vm8, %v1249_v34, %v4308_v7  ;;  %1908 = vmatpush.bf16.msrb.mxu1 %v7904_v29 }
  0xdd   :  { %v1586_v63 = vpop.f32.mrf.mxu3  ;;  %v1081_v1 = vpop.f32.mrf.mxu0  ;;  %12996 = vst [vmem:[#allocation25_spill] sm:$0xff] %v8799_v38 }
  0xde   :  { %v1082_v4 = vadd.f32 %v1081_v1, %v8734_v59  ;;  %v1587_v62 = vadd.f32 %v1586_v63, %v1418_v58 }
  0xdf   :  { %v1250_v5 = vpop.f32.mrf.mxu1 }
  0xe0   :  { %v1251_v8 = vadd.f32 %v1250_v5, %v1082_v4  ;;  %v4309_v63 = vmul.f32 0.01, %v1587_v62  ;;  %vm3797_vm10 = vcmp.gt.f32.partialorder %v1587_v62, 0.0 }
  0xe2   :  { %vm3804_vm9 = vcmp.gt.f32.partialorder %v1251_v8, 0.0  ;;  %v4316_v22 = vmul.f32 0.01, %v1251_v8  ;;  %v8813_v4 = vsel %vm3797_vm10, %v1587_v62, %v4309_v63  ;;  %v132_v62 = vld [vmem:[#allocation2 + $0x190] sm:$0xff] }
  0xe3   :  { %v1419_v35 = vpop.f32.mrf.mxu2  ;;  %12998 = vst [vmem:[#allocation27_spill] sm:$0xff] %v8813_v4 }
  0xe4   :  { %v8801_v39 = vsel %vm3804_vm9, %v1251_v8, %v4316_v22  ;;  %v1420_v40 = vadd.f32 %v1419_v35, %v8744_v6  ;;  %v130_v35 = vld [vmem:[#allocation2 + $0x180] sm:$0xff] }
  0xe5   :  { %12997 = vst [vmem:[#allocation26_spill] sm:$0xff] %v8801_v39  ;;  %v1588_v44 = vpop.f32.mrf.mxu3  ;;  %v1084_v49 = vpop.f32.mrf.mxu0 }
  0xe6   :  { %v1085_v56 = vadd.f32 %v1084_v49, %v8734_v59  ;;  %v1589_v1 = vadd.f32 %v1588_v44, %v1420_v40  ;;  %v131_v44 = vld [vmem:[#allocation2 + $0x188] sm:$0xff]  ;;  %v133_v49 = vld [vmem:[#allocation2 + $0x198] sm:$0xff] }
  0xe7   :  { %v1253_v58 = vpop.f32.mrf.mxu1 }
  0xe8   :  { %v1254_v34 = vadd.f32 %v1253_v58, %v1085_v56  ;;  %1123 = vmatmul.bf16.gmra.mxu0 %v8797_v36  ;;  %vm3805_vm11 = vcmp.gt.f32.partialorder %v1589_v1, 0.0  ;;  %v4317_v3 = vmul.f32 0.01, %v1589_v1  ;;  %1461 = vmatmul.bf16.gmra.mxu2 %v8797_v36  ;;  %v8821_v58 = vpack.c.bf16 %v132_v62, %v130_v35 }
  0xea   :  { %1292 = vmatmul.bf16.gmra.mxu1 %v8804_v50  ;;  %1630 = vmatmul.bf16.gmra.mxu3 %v8804_v50  ;;  %v8815_v5 = vsel %vm3805_vm11, %v1589_v1, %v4317_v3  ;;  %v4324_v24 = vmul.f32 0.01, %v1254_v34  ;;  %vm3812_vm12 = vcmp.gt.f32.partialorder %v1254_v34, 0.0 }
  0xeb   :  { %12999 = vst [vmem:[#allocation28_spill] sm:$0xff] %v8815_v5  ;;  %v1422_v7 = vpop.f32.mrf.mxu2 }
  0xec   :  { %v1423_v9 = vadd.f32 %v1422_v7, %v8744_v6  ;;  %v8823_v63 = vsel %vm3812_vm12, %v1254_v34, %v4324_v24 }
  0xed   :  { %v1591_v13 = vpop.f32.mrf.mxu3  ;;  %v1086_v16 = vpop.f32.mrf.mxu0  ;;  %13000 = vst [vmem:[#allocation29_spill] sm:$0xff] %v8823_v63 }
  0xee   :  { %v1087_v17 = vadd.f32 %v1086_v16, %v8734_v59  ;;  %v1592_v23 = vadd.f32 %v1591_v13, %v1423_v9  ;;  %v8828_v13 = vpack.c.bf16 %v133_v49, %v131_v44  ;;  %v134_v16 = vld [vmem:[#allocation2 + $0x1a0] sm:$0xff] }
  0xef   :  { %v1255_v22 = vpop.f32.mrf.mxu1 }
  0xf0   :  { %v1256_v29 = vadd.f32 %v1255_v22, %v1087_v17  ;;  %v4325_v8 = vmul.f32 0.01, %v1592_v23  ;;  %vm3813_vm14 = vcmp.gt.f32.partialorder %v1592_v23, 0.0 }
  0xf2   :  { %vm3820_vm13 = vcmp.gt.f32.partialorder %v1256_v29, 0.0  ;;  %v4332_v40 = vmul.f32 0.01, %v1256_v29  ;;  %v8837_v24 = vsel %vm3813_vm14, %v1592_v23, %v4325_v8  ;;  %v136_v8 = vld [vmem:[#allocation2 + $0x1b0] sm:$0xff]  ;;  %v135_v23 = vld [vmem:[#allocation2 + $0x1a8] sm:$0xff] }
  0xf3   :  { %v1424_v56 = vpop.f32.mrf.mxu2  ;;  %13002 = vst [vmem:[#allocation31_spill] sm:$0xff] %v8837_v24  ;;  %v8845_v19 = vpack.c.bf16 %v136_v8, %v134_v16 }
  0xf4   :  { %v8825_v1 = vsel %vm3820_vm13, %v1256_v29, %v4332_v40  ;;  %v1425_v3 = vadd.f32 %v1424_v56, %v8744_v6 }
  0xf5   :  { %13001 = vst [vmem:[#allocation30_spill] sm:$0xff] %v8825_v1  ;;  %v1593_v7 = vpop.f32.mrf.mxu3  ;;  %v1089_v9 = vpop.f32.mrf.mxu0 }
  0xf6   :  { %v1090_v17 = vadd.f32 %v1089_v9, %v8734_v59  ;;  %v1594_v52 = vadd.f32 %v1593_v7, %v1425_v3 }
  0xf7   :  { %v1258_v22 = vpop.f32.mrf.mxu1 }
  0xf8   :  { %v1259_v35 = vadd.f32 %v1258_v22, %v1090_v17  ;;  %1128 = vmatmul.bf16.gmra.mxu0 %v8821_v58  ;;  %vm3821_vm15 = vcmp.gt.f32.partialorder %v1594_v52, 0.0  ;;  %v4333_v34 = vmul.f32 0.01, %v1594_v52  ;;  %1466 = vmatmul.bf16.gmra.mxu2 %v8821_v58 }
  0xfa   :  { %1297 = vmatmul.bf16.gmra.mxu1 %v8828_v13  ;;  %1635 = vmatmul.bf16.gmra.mxu3 %v8828_v13  ;;  %v8839_v29 = vsel %vm3821_vm15, %v1594_v52, %v4333_v34  ;;  %v4340_v17 = vmul.f32 0.01, %v1259_v35  ;;  %vm3828_vm0 = vcmp.gt.f32.partialorder %v1259_v35, 0.0  ;;  %v137_v34 = vld [vmem:[#allocation2 + $0x1b8] sm:$0xff] }
  0xfb   :  { %13003 = vst [vmem:[#allocation32_spill] sm:$0xff] %v8839_v29  ;;  %v1427_v62 = vpop.f32.mrf.mxu2 }
  0xfc   :  { %v1428_v44 = vadd.f32 %v1427_v62, %v8744_v6  ;;  %v8847_v40 = vsel %vm3828_vm0, %v1259_v35, %v4340_v17 }
  0xfd   :  { %v1596_v49 = vpop.f32.mrf.mxu3  ;;  %v1091_v56 = vpop.f32.mrf.mxu0  ;;  %13004 = vst [vmem:[#allocation33_spill] sm:$0xff] %v8847_v40 }
  0xfe   :  { %v1092_v3 = vadd.f32 %v1091_v56, %v8734_v59  ;;  %v1597_v9 = vadd.f32 %v1596_v49, %v1428_v44  ;;  %v8852_v49 = vpack.c.bf16 %v137_v34, %v135_v23 }
  0xff   :  { %v1260_v7 = vpop.f32.mrf.mxu1 }
 0x100   :  { %v1261_v22 = vadd.f32 %v1260_v7, %v1092_v3  ;;  %v4341_v24 = vmul.f32 0.01, %v1597_v9  ;;  %vm3829_vm2 = vcmp.gt.f32.partialorder %v1597_v9, 0.0  ;;  %v138_v3 = vld [vmem:[#allocation2 + $0x1c0] sm:$0xff] }
 0x102   :  { %vm3836_vm1 = vcmp.gt.f32.partialorder %v1261_v22, 0.0  ;;  %v4348_v52 = vmul.f32 0.01, %v1261_v22 }
 0x103   :  { %v1429_v57 = vpop.f32.mrf.mxu2 }
 0x104   :  { %v8849_v62 = vsel %vm3836_vm1, %v1261_v22, %v4348_v52  ;;  %v1430_v56 = vadd.f32 %v1429_v57, %v8744_v6  ;;  %v8861_v57 = vsel %vm3829_vm2, %v1597_v9, %v4341_v24  ;;  %v140_v24 = vld [vmem:[#allocation2 + $0x1d0] sm:$0xff]  ;;  %v139_v9 = vld [vmem:[#allocation2 + $0x1c8] sm:$0xff] }
 0x105   :  { %13005 = vst [vmem:[#allocation34_spill] sm:$0xff] %v8849_v62  ;;  %v1598_v48 = vpop.f32.mrf.mxu3  ;;  %v1094_v44 = vpop.f32.mrf.mxu0  ;;  %v8869_v62 = vpack.c.bf16 %v140_v24, %v138_v3  ;;  %v8306_v24 = vld [vmem:[#allocation5 + $0xe4] sm:$0xf0] }
 0x106   :  { %v1095_v7 = vadd.f32 %v1094_v44, %v8734_v59  ;;  %v1599_v29 = vadd.f32 %v1598_v48, %v1430_v56  ;;  %13006 = vst [vmem:[#allocation35_spill] sm:$0xff] %v8861_v57 }
 0x107   :  { %v1263_v31 = vpop.f32.mrf.mxu1 }
 0x108   :  { %v1264_v16 = vadd.f32 %v1263_v31, %v1095_v7  ;;  %1133 = vmatmul.bf16.gmra.mxu0 %v8845_v19  ;;  %vm3837_vm3 = vcmp.gt.f32.partialorder %v1599_v29, 0.0  ;;  %v4349_v35 = vmul.f32 0.01, %v1599_v29  ;;  %1471 = vmatmul.bf16.gmra.mxu2 %v8845_v19 }
 0x10a   :  { %1302 = vmatmul.bf16.gmra.mxu1 %v8852_v49  ;;  %1640 = vmatmul.bf16.gmra.mxu3 %v8852_v49  ;;  %v8863_v17 = vsel %vm3837_vm3, %v1599_v29, %v4349_v35  ;;  %v4356_v44 = vmul.f32 0.01, %v1264_v16  ;;  %vm3844_vm4 = vcmp.gt.f32.partialorder %v1264_v16, 0.0  ;;  %v141_v35 = vld [vmem:[#allocation2 + $0x1d8] sm:$0xff] }
 0x10b   :  { %13007 = vst [vmem:[#allocation36_spill] sm:$0xff] %v8863_v17  ;;  %v1432_v22 = vpop.f32.mrf.mxu2 }
 0x10c   :  { %v1433_v31 = vadd.f32 %v1432_v22, %v8744_v6  ;;  %v8871_v48 = vsel %vm3844_vm4, %v1264_v16, %v4356_v44  ;;  %v7617_v44 = vld [vmem:[#allocation5 + $0xe8] sm:$0xf0] }
 0x10d   :  { %v1601_v8 = vpop.f32.mrf.mxu3  ;;  %v1096_v52 = vpop.f32.mrf.mxu0  ;;  %13008 = vst [vmem:[#allocation37_spill] sm:$0xff] %v8871_v48 }
 0x10e   :  { %v1097_v23 = vadd.f32 %v1096_v52, %v8734_v59  ;;  %v1602_v56 = vadd.f32 %v1601_v8, %v1433_v31  ;;  %v8876_v8 = vpack.c.bf16 %v141_v35, %v139_v9 }
 0x10f   :  { %v1265_v34 = vpop.f32.mrf.mxu1 }
 0x110   :  { %v1266_v7 = vadd.f32 %v1265_v34, %v1097_v23  ;;  %v4357_v63 = vmul.f32 0.01, %v1602_v56  ;;  %vm3845_vm6 = vcmp.gt.f32.partialorder %v1602_v56, 0.0 }
 0x112   :  { %vm3852_vm5 = vcmp.gt.f32.partialorder %v1266_v7, 0.0  ;;  %v4364_v29 = vmul.f32 0.01, %v1266_v7 }
 0x113   :  { %v1434_v40 = vpop.f32.mrf.mxu2 }
 0x114   :  { %v8873_v22 = vsel %vm3852_vm5, %v1266_v7, %v4364_v29  ;;  %v1435_v52 = vadd.f32 %v1434_v40, %v8744_v6  ;;  %v8302_v40 = vld [vmem:[#allocation5 + $0xcc] sm:$0xf]  ;;  %v7615_v7 = vld [vmem:[#allocation5 + $0xc8] sm:$0xf]  ;;  %v8885_v29 = vsel %vm3845_vm6, %v1602_v56, %v4357_v63 }
 0x115   :  { %13009 = vst [vmem:[#allocation38_spill] sm:$0xff] %v8873_v22  ;;  %v1603_v57 = vpop.f32.mrf.mxu3  ;;  %v1099_v31 = vpop.f32.mrf.mxu0  ;;  %v7616_v35 = vor.u32 %v8306_v24, %v7615_v7  ;;  %v7871_v7 = vld [vmem:[#allocation5 + $0x2c8] sm:$0xf] }
 0x116   :  { %v1100_v34 = vadd.f32 %v1099_v31, %v8734_v59  ;;  %v1604_v1 = vadd.f32 %v1603_v57, %v1435_v52  ;;  %13010 = vst [vmem:[#allocation39_spill] sm:$0xff] %v8885_v29  ;;  %v8366_v52 = vld [vmem:[#allocation5 + $0x2cc] sm:$0xf] }
 0x117   :  { %v1268_v17 = vpop.f32.mrf.mxu1  ;;  %v7873_v31 = vld [vmem:[#allocation5 + $0x2e8] sm:$0xf0]  ;;  %1740 = vmatpush.bf16.msrb.mxu0 %v7616_v35 }
 0x118   :  { %v1269_v3 = vadd.f32 %v1268_v17, %v1100_v34  ;;  %1138 = vmatmul.bf16.gmra.mxu0 %v8869_v62  ;;  %vm3853_vm7 = vcmp.gt.f32.partialorder %v1604_v1, 0.0  ;;  %v4365_v16 = vmul.f32 0.01, %v1604_v1  ;;  %1476 = vmatmul.bf16.gmra.mxu2 %v8869_v62  ;;  %v7620_v17 = vor.u32 %v8302_v40, %v7617_v44  ;;  %v144_v40 = vld [vmem:[#allocation2 + $0x1f0] sm:$0xff]  ;;  %v143_v44 = vld [vmem:[#allocation2 + $0x1e8] sm:$0xff] }
 0x119   :  { %v7876_v4 = vor.u32 %v8366_v52, %v7873_v31  ;;  %v8370_v34 = vld [vmem:[#allocation5 + $0x2e4] sm:$0xf0] }
 0x11a   :  { %1307 = vmatmul.bf16.gmra.mxu1 %v8876_v8  ;;  %1645 = vmatmul.bf16.gmra.mxu3 %v8876_v8  ;;  %v8887_v9 = vsel %vm3853_vm7, %v1604_v1, %v4365_v16  ;;  %v4372_v1 = vmul.f32 0.01, %v1269_v3  ;;  %v142_v16 = vld [vmem:[#allocation2 + $0x1e0] sm:$0xff]  ;;  %vm3860_vm8 = vcmp.gt.f32.partialorder %v1269_v3, 0.0  ;;  %v7872_v29 = vor.u32 %v8370_v34, %v7871_v7 }
 0x11b   :  { %13011 = vst [vmem:[#allocation40_spill] sm:$0xff] %v8887_v9  ;;  %v1437_v57 = vpop.f32.mrf.mxu2  ;;  %2078 = vmatpush.bf16.msrb.mxu2 %v7620_v17  ;;  %2247 = vmatpush.bf16.msrb.mxu3 %v7876_v4  ;;  %v8893_v31 = vpack.c.bf16 %v144_v40, %v142_v16 }
 0x11c   :  { %v1438_v23 = vadd.f32 %v1437_v57, %v8744_v6  ;;  %v145_v57 = vld [vmem:[#allocation2 + $0x1f8] sm:$0xff]  ;;  %1909 = vmatpush.bf16.msrb.mxu1 %v7872_v29 }
 0x11d   :  { %v1606_v48 = vpop.f32.mrf.mxu3  ;;  %v1101_v22 = vpop.f32.mrf.mxu0 }
 0x11e   :  { %v1102_v5 = vadd.f32 %v1101_v22, %v8734_v59  ;;  %v1607_v63 = vadd.f32 %v1606_v48, %v1438_v23  ;;  %v8895_v22 = vsel %vm3860_vm8, %v1269_v3, %v4372_v1  ;;  %v8900_v48 = vpack.c.bf16 %v145_v57, %v143_v44  ;;  %v146_v23 = vld [vmem:[#allocation2 + $0x200] sm:$0xff] }
 0x11f   :  { %v1270_v38 = vpop.f32.mrf.mxu1  ;;  %13012 = vst [vmem:[#allocation41_spill] sm:$0xff] %v8895_v22 }
 0x120   :  { %v1271_v56 = vadd.f32 %v1270_v38, %v1102_v5  ;;  %v4373_v7 = vmul.f32 0.01, %v1607_v63  ;;  %vm3861_vm10 = vcmp.gt.f32.partialorder %v1607_v63, 0.0 }
 0x122   :  { %vm3868_vm9 = vcmp.gt.f32.partialorder %v1271_v56, 0.0  ;;  %v4380_v24 = vmul.f32 0.01, %v1271_v56  ;;  %v8909_v29 = vsel %vm3861_vm10, %v1607_v63, %v4373_v7  ;;  %v148_v63 = vld [vmem:[#allocation2 + $0x210] sm:$0xff] }
 0x123   :  { %v1439_v52 = vpop.f32.mrf.mxu2  ;;  %13014 = vst [vmem:[#allocation43_spill] sm:$0xff] %v8909_v29 }
 0x124   :  { %v8897_v17 = vsel %vm3868_vm9, %v1271_v56, %v4380_v24  ;;  %v1440_v4 = vadd.f32 %v1439_v52, %v8744_v6 }
 0x125   :  { %13013 = vst [vmem:[#allocation42_spill] sm:$0xff] %v8897_v17  ;;  %v1608_v38 = vpop.f32.mrf.mxu3  ;;  %v1104_v5 = vpop.f32.mrf.mxu0  ;;  %v8917_v17 = vpack.c.bf16 %v148_v63, %v146_v23 }
 0x126   :  { %v1105_v35 = vadd.f32 %v1104_v5, %v8734_v59  ;;  %v1609_v16 = vadd.f32 %v1608_v38, %v1440_v4 }
 0x127   :  { %v1273_v34 = vpop.f32.mrf.mxu1 }
 0x128   :  { %v1274_v3 = vadd.f32 %v1273_v34, %v1105_v35  ;;  %1143 = vmatmul.bf16.gmra.mxu0 %v8893_v31  ;;  %vm3869_vm11 = vcmp.gt.f32.partialorder %v1609_v16, 0.0  ;;  %v4381_v1 = vmul.f32 0.01, %v1609_v16  ;;  %1481 = vmatmul.bf16.gmra.mxu2 %v8893_v31 }
 0x12a   :  { %1312 = vmatmul.bf16.gmra.mxu1 %v8900_v48  ;;  %1650 = vmatmul.bf16.gmra.mxu3 %v8900_v48  ;;  %v8911_v56 = vsel %vm3869_vm11, %v1609_v16, %v4381_v1  ;;  %v4388_v35 = vmul.f32 0.01, %v1274_v3  ;;  %vm3876_vm12 = vcmp.gt.f32.partialorder %v1274_v3, 0.0  ;;  %v147_v16 = vld [vmem:[#allocation2 + $0x208] sm:$0xff]  ;;  %v149_v1 = vld [vmem:[#allocation2 + $0x218] sm:$0xff] }
 0x12b   :  { %13015 = vst [vmem:[#allocation44_spill] sm:$0xff] %v8911_v56  ;;  %v1442_v40 = vpop.f32.mrf.mxu2 }
 0x12c   :  { %v1443_v24 = vadd.f32 %v1442_v40, %v8744_v6  ;;  %v8919_v44 = vsel %vm3876_vm12, %v1274_v3, %v4388_v35 }
 0x12d   :  { %v1611_v57 = vpop.f32.mrf.mxu3  ;;  %v1106_v52 = vpop.f32.mrf.mxu0  ;;  %13016 = vst [vmem:[#allocation45_spill] sm:$0xff] %v8919_v44 }
 0x12e   :  { %v1107_v4 = vadd.f32 %v1106_v52, %v8734_v59  ;;  %v1612_v5 = vadd.f32 %v1611_v57, %v1443_v24  ;;  %v8924_v57 = vpack.c.bf16 %v149_v1, %v147_v16 }
 0x12f   :  { %v1275_v38 = vpop.f32.mrf.mxu1 }
 0x130   :  { %v1276_v34 = vadd.f32 %v1275_v38, %v1107_v4  ;;  %v4389_v9 = vmul.f32 0.01, %v1612_v5  ;;  %vm3877_vm14 = vcmp.gt.f32.partialorder %v1612_v5, 0.0  ;;  %v150_v4 = vld [vmem:[#allocation2 + $0x220] sm:$0xff] }
 0x132   :  { %vm3884_vm13 = vcmp.gt.f32.partialorder %v1276_v34, 0.0  ;;  %v4396_v7 = vmul.f32 0.01, %v1276_v34 }
 0x133   :  { %v1444_v22 = vpop.f32.mrf.mxu2 }
 0x134   :  { %v8921_v40 = vsel %vm3884_vm13, %v1276_v34, %v4396_v7  ;;  %v1445_v52 = vadd.f32 %v1444_v22, %v8744_v6  ;;  %v8933_v22 = vsel %vm3877_vm14, %v1612_v5, %v4389_v9  ;;  %v152_v9 = vld [vmem:[#allocation2 + $0x230] sm:$0xff]  ;;  %v151_v5 = vld [vmem:[#allocation2 + $0x228] sm:$0xff] }
 0x135   :  { %13017 = vst [vmem:[#allocation46_spill] sm:$0xff] %v8921_v40  ;;  %v1613_v29 = vpop.f32.mrf.mxu3  ;;  %v1109_v24 = vpop.f32.mrf.mxu0  ;;  %v8941_v40 = vpack.c.bf16 %v152_v9, %v150_v4 }
 0x136   :  { %v1110_v38 = vadd.f32 %v1109_v24, %v8734_v59  ;;  %v1614_v39 = vadd.f32 %v1613_v29, %v1445_v52  ;;  %13018 = vst [vmem:[#allocation47_spill] sm:$0xff] %v8933_v22 }
 0x137   :  { %v1278_v56 = vpop.f32.mrf.mxu1 }
 0x138   :  { %v1279_v23 = vadd.f32 %v1278_v56, %v1110_v38  ;;  %1148 = vmatmul.bf16.gmra.mxu0 %v8917_v17  ;;  %vm3885_vm15 = vcmp.gt.f32.partialorder %v1614_v39, 0.0  ;;  %v4397_v3 = vmul.f32 0.01, %v1614_v39  ;;  %1486 = vmatmul.bf16.gmra.mxu2 %v8917_v17 }
 0x13a   :  { %1317 = vmatmul.bf16.gmra.mxu1 %v8924_v57  ;;  %1655 = vmatmul.bf16.gmra.mxu3 %v8924_v57  ;;  %v8935_v35 = vsel %vm3885_vm15, %v1614_v39, %v4397_v3  ;;  %v4404_v24 = vmul.f32 0.01, %v1279_v23  ;;  %vm3892_vm0 = vcmp.gt.f32.partialorder %v1279_v23, 0.0  ;;  %v153_v3 = vld [vmem:[#allocation2 + $0x238] sm:$0xff] }
 0x13b   :  { %13019 = vst [vmem:[#allocation48_spill] sm:$0xff] %v8935_v35  ;;  %v1447_v34 = vpop.f32.mrf.mxu2 }
 0x13c   :  { %v1448_v56 = vadd.f32 %v1447_v34, %v8744_v6  ;;  %v8943_v29 = vsel %vm3892_vm0, %v1279_v23, %v4404_v24 }
 0x13d   :  { %v1616_v63 = vpop.f32.mrf.mxu3  ;;  %v1111_v7 = vpop.f32.mrf.mxu0  ;;  %13020 = vst [vmem:[#allocation49_spill] sm:$0xff] %v8943_v29 }
 0x13e   :  { %v1112_v16 = vadd.f32 %v1111_v7, %v8734_v59  ;;  %v1617_v52 = vadd.f32 %v1616_v63, %v1448_v56  ;;  %v8948_v63 = vpack.c.bf16 %v153_v3, %v151_v5 }
 0x13f   :  { %v1280_v1 = vpop.f32.mrf.mxu1 }
 0x140   :  { %v1281_v38 = vadd.f32 %v1280_v1, %v1112_v16  ;;  %v4405_v41 = vmul.f32 0.01, %v1617_v52  ;;  %vm3893_vm2 = vcmp.gt.f32.partialorder %v1617_v52, 0.0  ;;  %v154_v16 = vld [vmem:[#allocation2 + $0x240] sm:$0xff] }
 0x142   :  { %vm3900_vm1 = vcmp.gt.f32.partialorder %v1281_v38, 0.0  ;;  %v4412_v39 = vmul.f32 0.01, %v1281_v38 }
 0x143   :  { %v1449_v44 = vpop.f32.mrf.mxu2 }
 0x144   :  { %v8945_v34 = vsel %vm3900_vm1, %v1281_v38, %v4412_v39  ;;  %v1450_v7 = vadd.f32 %v1449_v44, %v8744_v6  ;;  %v8957_v44 = vsel %vm3893_vm2, %v1617_v52, %v4405_v41  ;;  %v156_v41 = vld [vmem:[#allocation2 + $0x250] sm:$0xff]  ;;  %v155_v52 = vld [vmem:[#allocation2 + $0x248] sm:$0xff] }
 0x145   :  { %13021 = vst [vmem:[#allocation50_spill] sm:$0xff] %v8945_v34  ;;  %v1618_v22 = vpop.f32.mrf.mxu3  ;;  %v1114_v56 = vpop.f32.mrf.mxu0  ;;  %v8965_v34 = vpack.c.bf16 %v156_v41, %v154_v16  ;;  %v8298_v41 = vld [vmem:[#allocation5 + $0xa4] sm:$0xf0] }
 0x146   :  { %v1115_v1 = vadd.f32 %v1114_v56, %v8734_v59  ;;  %v1619_v42 = vadd.f32 %v1618_v22, %v1450_v7  ;;  %13022 = vst [vmem:[#allocation51_spill] sm:$0xff] %v8957_v44 }
 0x147   :  { %v1283_v35 = vpop.f32.mrf.mxu1 }
 0x148   :  { %v1284_v4 = vadd.f32 %v1283_v35, %v1115_v1  ;;  %1153 = vmatmul.bf16.gmra.mxu0 %v8941_v40  ;;  %vm3901_vm3 = vcmp.gt.f32.partialorder %v1619_v42, 0.0  ;;  %v4413_v23 = vmul.f32 0.01, %v1619_v42  ;;  %1491 = vmatmul.bf16.gmra.mxu2 %v8941_v40 }
 0x14a   :  { %1322 = vmatmul.bf16.gmra.mxu1 %v8948_v63  ;;  %1660 = vmatmul.bf16.gmra.mxu3 %v8948_v63  ;;  %v8959_v24 = vsel %vm3901_vm3, %v1619_v42, %v4413_v23  ;;  %v4420_v56 = vmul.f32 0.01, %v1284_v4  ;;  %vm3908_vm4 = vcmp.gt.f32.partialorder %v1284_v4, 0.0  ;;  %v157_v23 = vld [vmem:[#allocation2 + $0x258] sm:$0xff] }
 0x14b   :  { %13023 = vst [vmem:[#allocation52_spill] sm:$0xff] %v8959_v24  ;;  %v1452_v38 = vpop.f32.mrf.mxu2 }
 0x14c   :  { %v1453_v35 = vadd.f32 %v1452_v38, %v8744_v6  ;;  %v8967_v22 = vsel %vm3908_vm4, %v1284_v4, %v4420_v56  ;;  %v7585_v56 = vld [vmem:[#allocation5 + $0xa8] sm:$0xf0] }
 0x14d   :  { %v1621_v9 = vpop.f32.mrf.mxu3  ;;  %v1116_v39 = vpop.f32.mrf.mxu0  ;;  %13024 = vst [vmem:[#allocation53_spill] sm:$0xff] %v8967_v22 }
 0x14e   :  { %v1117_v5 = vadd.f32 %v1116_v39, %v8734_v59  ;;  %v1622_v7 = vadd.f32 %v1621_v9, %v1453_v35  ;;  %v8972_v9 = vpack.c.bf16 %v157_v23, %v155_v52 }
 0x14f   :  { %v1285_v3 = vpop.f32.mrf.mxu1 }
 0x150   :  { %v1286_v1 = vadd.f32 %v1285_v3, %v1117_v5  ;;  %v4421_v11 = vmul.f32 0.01, %v1622_v7  ;;  %vm3909_vm6 = vcmp.gt.f32.partialorder %v1622_v7, 0.0 }
 0x152   :  { %vm3916_vm5 = vcmp.gt.f32.partialorder %v1286_v1, 0.0  ;;  %v4428_v42 = vmul.f32 0.01, %v1286_v1 }
 0x153   :  { %v1454_v29 = vpop.f32.mrf.mxu2 }
 0x154   :  { %v8969_v38 = vsel %vm3916_vm5, %v1286_v1, %v4428_v42  ;;  %v1455_v39 = vadd.f32 %v1454_v29, %v8744_v6  ;;  %v8294_v29 = vld [vmem:[#allocation5 + $0x8c] sm:$0xf]  ;;  %v7583_v1 = vld [vmem:[#allocation5 + $0x88] sm:$0xf]  ;;  %v8981_v42 = vsel %vm3909_vm6, %v1622_v7, %v4421_v11 }
 0x155   :  { %13025 = vst [vmem:[#allocation54_spill] sm:$0xff] %v8969_v38  ;;  %v1623_v44 = vpop.f32.mrf.mxu3  ;;  %v1119_v35 = vpop.f32.mrf.mxu0  ;;  %v7584_v23 = vor.u32 %v8298_v41, %v7583_v1  ;;  %v7839_v1 = vld [vmem:[#allocation5 + $0x288] sm:$0xf] }
 0x156   :  { %v1120_v3 = vadd.f32 %v1119_v35, %v8734_v59  ;;  %v1624_v12 = vadd.f32 %v1623_v44, %v1455_v39  ;;  %13026 = vst [vmem:[#allocation55_spill] sm:$0xff] %v8981_v42  ;;  %v8358_v39 = vld [vmem:[#allocation5 + $0x28c] sm:$0xf] }
 0x157   :  { %v1288_v24 = vpop.f32.mrf.mxu1  ;;  %v7841_v35 = vld [vmem:[#allocation5 + $0x2a8] sm:$0xf0]  ;;  %1741 = vmatpush.bf16.msrb.mxu0 %v7584_v23 }
 0x158   :  { %v1289_v16 = vadd.f32 %v1288_v24, %v1120_v3  ;;  %1158 = vmatmul.bf16.gmra.mxu0 %v8965_v34  ;;  %vm3917_vm7 = vcmp.gt.f32.partialorder %v1624_v12, 0.0  ;;  %v4429_v4 = vmul.f32 0.01, %v1624_v12  ;;  %1496 = vmatmul.bf16.gmra.mxu2 %v8965_v34  ;;  %v7588_v24 = vor.u32 %v8294_v29, %v7585_v56  ;;  %v160_v29 = vld [vmem:[#allocation2 + $0x270] sm:$0xff]  ;;  %v159_v56 = vld [vmem:[#allocation2 + $0x268] sm:$0xff] }
 0x159   :  { %v7844_v45 = vor.u32 %v8358_v39, %v7841_v35  ;;  %v8362_v3 = vld [vmem:[#allocation5 + $0x2a4] sm:$0xf0] }
 0x15a   :  { %1327 = vmatmul.bf16.gmra.mxu1 %v8972_v9  ;;  %1665 = vmatmul.bf16.gmra.mxu3 %v8972_v9  ;;  %v8983_v52 = vsel %vm3917_vm7, %v1624_v12, %v4429_v4  ;;  %v4436_v12 = vmul.f32 0.01, %v1289_v16  ;;  %v158_v4 = vld [vmem:[#allocation2 + $0x260] sm:$0xff]  ;;  %vm3924_vm8 = vcmp.gt.f32.partialorder %v1289_v16, 0.0  ;;  %v7840_v42 = vor.u32 %v8362_v3, %v7839_v1 }
 0x15b   :  { %13027 = vst [vmem:[#allocation56_spill] sm:$0xff] %v8983_v52  ;;  %v1457_v44 = vpop.f32.mrf.mxu2  ;;  %2079 = vmatpush.bf16.msrb.mxu2 %v7588_v24  ;;  %2248 = vmatpush.bf16.msrb.mxu3 %v7844_v45  ;;  %v8989_v35 = vpack.c.bf16 %v160_v29, %v158_v4 }
 0x15c   :  { %v1458_v5 = vadd.f32 %v1457_v44, %v8744_v6  ;;  %v161_v44 = vld [vmem:[#allocation2 + $0x278] sm:$0xff]  ;;  %1910 = vmatpush.bf16.msrb.mxu1 %v7840_v42 }
 0x15d   :  { %v1626_v22 = vpop.f32.mrf.mxu3  ;;  %v1121_v38 = vpop.f32.mrf.mxu0 }
 0x15e   :  { %v1122_v46 = vadd.f32 %v1121_v38, %v8734_v59  ;;  %v1627_v11 = vadd.f32 %v1626_v22, %v1458_v5  ;;  %v8991_v38 = vsel %vm3924_vm8, %v1289_v16, %v4436_v12  ;;  %v8996_v22 = vpack.c.bf16 %v161_v44, %v159_v56  ;;  %v162_v5 = vld [vmem:[#allocation2 + $0x280] sm:$0xff] }
 0x15f   :  { %v1290_v25 = vpop.f32.mrf.mxu1  ;;  %13028 = vst [vmem:[#allocation57_spill] sm:$0xff] %v8991_v38 }
 0x160   :  { %v1291_v7 = vadd.f32 %v1290_v25, %v1122_v46  ;;  %13030 = vst [vmem:[#allocation59_spill] sm:$0xff] %v8996_v22  ;;  %v4437_v1 = vmul.f32 0.01, %v1627_v11  ;;  %vm3925_vm10 = vcmp.gt.f32.partialorder %v1627_v11, 0.0 }
 0x162   :  { %vm3932_vm9 = vcmp.gt.f32.partialorder %v1291_v7, 0.0  ;;  %v4444_v41 = vmul.f32 0.01, %v1291_v7  ;;  %v9005_v42 = vsel %vm3925_vm10, %v1627_v11, %v4437_v1  ;;  %v164_v11 = vld [vmem:[#allocation2 + $0x290] sm:$0xff] }
 0x163   :  { %v1459_v39 = vpop.f32.mrf.mxu2  ;;  %13031 = vst [vmem:[#allocation60_spill] sm:$0xff] %v9005_v42 }
 0x164   :  { %v8993_v24 = vsel %vm3932_vm9, %v1291_v7, %v4444_v41  ;;  %v1460_v45 = vadd.f32 %v1459_v39, %v8744_v6 }
 0x165   :  { %13029 = vst [vmem:[#allocation58_spill] sm:$0xff] %v8993_v24  ;;  %v1628_v25 = vpop.f32.mrf.mxu3  ;;  %v1124_v46 = vpop.f32.mrf.mxu0  ;;  %v9013_v24 = vpack.c.bf16 %v164_v11, %v162_v5 }
 0x166   :  { %v1125_v23 = vadd.f32 %v1124_v46, %v8734_v59  ;;  %v1629_v4 = vadd.f32 %v1628_v25, %v1460_v45 }
 0x167   :  { %v1293_v3 = vpop.f32.mrf.mxu1  ;;  %13033 = vst [vmem:[#allocation62_spill] sm:$0xff] %v9013_v24 }
 0x168   :  { %v1294_v16 = vadd.f32 %v1293_v3, %v1125_v23  ;;  %1163 = vmatmul.bf16.gmra.mxu0 %v8989_v35  ;;  %vm3933_vm11 = vcmp.gt.f32.partialorder %v1629_v4, 0.0  ;;  %v4445_v12 = vmul.f32 0.01, %v1629_v4  ;;  %1501 = vmatmul.bf16.gmra.mxu2 %v8989_v35 }
 0x16a   :  { %1332 = vmatmul.bf16.gmra.mxu1 %v8996_v22  ;;  %1670 = vmatmul.bf16.gmra.mxu3 %v8996_v22  ;;  %v9007_v7 = vsel %vm3933_vm11, %v1629_v4, %v4445_v12  ;;  %v4452_v23 = vmul.f32 0.01, %v1294_v16  ;;  %vm3940_vm12 = vcmp.gt.f32.partialorder %v1294_v16, 0.0  ;;  %v163_v4 = vld [vmem:[#allocation2 + $0x288] sm:$0xff]  ;;  %v165_v12 = vld [vmem:[#allocation2 + $0x298] sm:$0xff] }
 0x16b   :  { %13032 = vst [vmem:[#allocation61_spill] sm:$0xff] %v9007_v7  ;;  %v1462_v29 = vpop.f32.mrf.mxu2 }
 0x16c   :  { %v1463_v41 = vadd.f32 %v1462_v29, %v8744_v6  ;;  %v9015_v56 = vsel %vm3940_vm12, %v1294_v16, %v4452_v23 }
 0x16d   :  { %v1631_v44 = vpop.f32.mrf.mxu3  ;;  %v1126_v39 = vpop.f32.mrf.mxu0  ;;  %13034 = vst [vmem:[#allocation63_spill] sm:$0xff] %v9015_v56 }
 0x16e   :  { %v1127_v45 = vadd.f32 %v1126_v39, %v8734_v59  ;;  %v1632_v46 = vadd.f32 %v1631_v44, %v1463_v41  ;;  %v9020_v44 = vpack.c.bf16 %v165_v12, %v163_v4 }
 0x16f   :  { %v1295_v25 = vpop.f32.mrf.mxu1 }
 0x170   :  { %v1296_v3 = vadd.f32 %v1295_v25, %v1127_v45  ;;  %13036 = vst [vmem:[#allocation65_spill] sm:$0xff] %v9020_v44  ;;  %v4453_v52 = vmul.f32 0.01, %v1632_v46  ;;  %vm3941_vm14 = vcmp.gt.f32.partialorder %v1632_v46, 0.0  ;;  %v166_v45 = vld [vmem:[#allocation2 + $0x2a0] sm:$0xff] }
 0x172   :  { %vm3948_vm13 = vcmp.gt.f32.partialorder %v1296_v3, 0.0  ;;  %v4460_v1 = vmul.f32 0.01, %v1296_v3 }
 0x173   :  { %v1464_v38 = vpop.f32.mrf.mxu2 }
 0x174   :  { %v9017_v29 = vsel %vm3948_vm13, %v1296_v3, %v4460_v1  ;;  %v1465_v39 = vadd.f32 %v1464_v38, %v8744_v6  ;;  %v9029_v38 = vsel %vm3941_vm14, %v1632_v46, %v4453_v52  ;;  %v168_v52 = vld [vmem:[#allocation2 + $0x2b0] sm:$0xff]  ;;  %v167_v46 = vld [vmem:[#allocation2 + $0x2a8] sm:$0xff] }
 0x175   :  { %13035 = vst [vmem:[#allocation64_spill] sm:$0xff] %v9017_v29  ;;  %v1633_v42 = vpop.f32.mrf.mxu3  ;;  %v1129_v41 = vpop.f32.mrf.mxu0  ;;  %v9037_v29 = vpack.c.bf16 %v168_v52, %v166_v45 }
 0x176   :  { %v1130_v25 = vadd.f32 %v1129_v41, %v8734_v59  ;;  %v1634_v28 = vadd.f32 %v1633_v42, %v1465_v39  ;;  %13037 = vst [vmem:[#allocation66_spill] sm:$0xff] %v9029_v38 }
 0x177   :  { %v1298_v7 = vpop.f32.mrf.mxu1  ;;  %13039 = vst [vmem:[#allocation68_spill] sm:$0xff] %v9037_v29 }
 0x178   :  { %v1299_v5 = vadd.f32 %v1298_v7, %v1130_v25  ;;  %1168 = vmatmul.bf16.gmra.mxu0 %v9013_v24  ;;  %vm3949_vm15 = vcmp.gt.f32.partialorder %v1634_v28, 0.0  ;;  %v4461_v16 = vmul.f32 0.01, %v1634_v28  ;;  %1506 = vmatmul.bf16.gmra.mxu2 %v9013_v24 }
 0x17a   :  { %1337 = vmatmul.bf16.gmra.mxu1 %v9020_v44  ;;  %1675 = vmatmul.bf16.gmra.mxu3 %v9020_v44  ;;  %v9031_v23 = vsel %vm3949_vm15, %v1634_v28, %v4461_v16  ;;  %v4468_v41 = vmul.f32 0.01, %v1299_v5  ;;  %vm3956_vm0 = vcmp.gt.f32.partialorder %v1299_v5, 0.0  ;;  %v169_v16 = vld [vmem:[#allocation2 + $0x2b8] sm:$0xff] }
 0x17b   :  { %13038 = vst [vmem:[#allocation67_spill] sm:$0xff] %v9031_v23  ;;  %v1467_v3 = vpop.f32.mrf.mxu2 }
 0x17c   :  { %v1468_v7 = vadd.f32 %v1467_v3, %v8744_v6  ;;  %v9039_v42 = vsel %vm3956_vm0, %v1299_v5, %v4468_v41 }
 0x17d   :  { %v1636_v11 = vpop.f32.mrf.mxu3  ;;  %v1131_v1 = vpop.f32.mrf.mxu0  ;;  %13040 = vst [vmem:[#allocation69_spill] sm:$0xff] %v9039_v42 }
 0x17e   :  { %v1132_v4 = vadd.f32 %v1131_v1, %v8734_v59  ;;  %v1637_v39 = vadd.f32 %v1636_v11, %v1468_v7  ;;  %v9044_v11 = vpack.c.bf16 %v169_v16, %v167_v46 }
 0x17f   :  { %v1300_v12 = vpop.f32.mrf.mxu1 }
 0x180   :  { %v1301_v25 = vadd.f32 %v1300_v12, %v1132_v4  ;;  %13042 = vst [vmem:[#allocation71_spill] sm:$0xff] %v9044_v11  ;;  %v4469_v44 = vmul.f32 0.01, %v1637_v39  ;;  %vm3957_vm2 = vcmp.gt.f32.partialorder %v1637_v39, 0.0  ;;  %v170_v4 = vld [vmem:[#allocation2 + $0x2c0] sm:$0xff] }
 0x182   :  { %vm3964_vm1 = vcmp.gt.f32.partialorder %v1301_v25, 0.0  ;;  %v4476_v28 = vmul.f32 0.01, %v1301_v25 }
 0x183   :  { %v1469_v56 = vpop.f32.mrf.mxu2 }
 0x184   :  { %v9041_v3 = vsel %vm3964_vm1, %v1301_v25, %v4476_v28  ;;  %v1470_v1 = vadd.f32 %v1469_v56, %v8744_v6  ;;  %v9053_v56 = vsel %vm3957_vm2, %v1637_v39, %v4469_v44  ;;  %v172_v44 = vld [vmem:[#allocation2 + $0x2d0] sm:$0xff]  ;;  %v171_v39 = vld [vmem:[#allocation2 + $0x2c8] sm:$0xff] }
 0x185   :  { %13041 = vst [vmem:[#allocation70_spill] sm:$0xff] %v9041_v3  ;;  %v1638_v38 = vpop.f32.mrf.mxu3  ;;  %v1134_v7 = vpop.f32.mrf.mxu0  ;;  %v9061_v3 = vpack.c.bf16 %v172_v44, %v170_v4  ;;  %v8290_v44 = vld [vmem:[#allocation5 + $0x64] sm:$0xf0] }
 0x186   :  { %v1135_v12 = vadd.f32 %v1134_v7, %v8734_v59  ;;  %v1639_v24 = vadd.f32 %v1638_v38, %v1470_v1  ;;  %13043 = vst [vmem:[#allocation72_spill] sm:$0xff] %v9053_v56 }
 0x187   :  { %v1303_v23 = vpop.f32.mrf.mxu1  ;;  %13045 = vst [vmem:[#allocation74_spill] sm:$0xff] %v9061_v3 }
 0x188   :  { %v1304_v45 = vadd.f32 %v1303_v23, %v1135_v12  ;;  %1173 = vmatmul.bf16.gmra.mxu0 %v9037_v29  ;;  %vm3965_vm3 = vcmp.gt.f32.partialorder %v1639_v24, 0.0  ;;  %v4477_v5 = vmul.f32 0.01, %v1639_v24  ;;  %1511 = vmatmul.bf16.gmra.mxu2 %v9037_v29 }
 0x18a   :  { %1342 = vmatmul.bf16.gmra.mxu1 %v9044_v11  ;;  %1680 = vmatmul.bf16.gmra.mxu3 %v9044_v11  ;;  %v9055_v41 = vsel %vm3965_vm3, %v1639_v24, %v4477_v5  ;;  %v4484_v7 = vmul.f32 0.01, %v1304_v45  ;;  %vm3972_vm4 = vcmp.gt.f32.partialorder %v1304_v45, 0.0  ;;  %v173_v5 = vld [vmem:[#allocation2 + $0x2d8] sm:$0xff] }
 0x18b   :  { %13044 = vst [vmem:[#allocation73_spill] sm:$0xff] %v9055_v41  ;;  %v1472_v25 = vpop.f32.mrf.mxu2 }
 0x18c   :  { %v1473_v23 = vadd.f32 %v1472_v25, %v8744_v6  ;;  %v9063_v38 = vsel %vm3972_vm4, %v1304_v45, %v4484_v7  ;;  %v7553_v7 = vld [vmem:[#allocation5 + $0x68] sm:$0xf0] }
 0x18d   :  { %v1641_v52 = vpop.f32.mrf.mxu3  ;;  %v1136_v28 = vpop.f32.mrf.mxu0  ;;  %13046 = vst [vmem:[#allocation75_spill] sm:$0xff] %v9063_v38 }
 0x18e   :  { %v1137_v46 = vadd.f32 %v1136_v28, %v8734_v59  ;;  %v1642_v1 = vadd.f32 %v1641_v52, %v1473_v23  ;;  %v9068_v52 = vpack.c.bf16 %v173_v5, %v171_v39 }
 0x18f   :  { %v1305_v16 = vpop.f32.mrf.mxu1 }
 0x190   :  { %v1306_v12 = vadd.f32 %v1305_v16, %v1137_v46  ;;  %13048 = vst [vmem:[#allocation77_spill] sm:$0xff] %v9068_v52  ;;  %v4485_v11 = vmul.f32 0.01, %v1642_v1  ;;  %vm3973_vm6 = vcmp.gt.f32.partialorder %v1642_v1, 0.0 }
 0x192   :  { %vm3980_vm5 = vcmp.gt.f32.partialorder %v1306_v12, 0.0  ;;  %v4492_v24 = vmul.f32 0.01, %v1306_v12 }
 0x193   :  { %v1474_v42 = vpop.f32.mrf.mxu2 }
 0x194   :  { %v9065_v25 = vsel %vm3980_vm5, %v1306_v12, %v4492_v24  ;;  %v1475_v28 = vadd.f32 %v1474_v42, %v8744_v6  ;;  %v8286_v42 = vld [vmem:[#allocation5 + $0x4c] sm:$0xf]  ;;  %v7551_v12 = vld [vmem:[#allocation5 + $0x48] sm:$0xf]  ;;  %v9077_v24 = vsel %vm3973_vm6, %v1642_v1, %v4485_v11 }
 0x195   :  { %13047 = vst [vmem:[#allocation76_spill] sm:$0xff] %v9065_v25  ;;  %v1643_v56 = vpop.f32.mrf.mxu3  ;;  %v1139_v23 = vpop.f32.mrf.mxu0  ;;  %v7552_v5 = vor.u32 %v8290_v44, %v7551_v12  ;;  %v7807_v12 = vld [vmem:[#allocation5 + $0x248] sm:$0xf] }
 0x196   :  { %v1140_v16 = vadd.f32 %v1139_v23, %v8734_v59  ;;  %v1644_v29 = vadd.f32 %v1643_v56, %v1475_v28  ;;  %13049 = vst [vmem:[#allocation78_spill] sm:$0xff] %v9077_v24  ;;  %v8350_v28 = vld [vmem:[#allocation5 + $0x24c] sm:$0xf] }
 0x197   :  { %v1308_v41 = vpop.f32.mrf.mxu1  ;;  %v7809_v23 = vld [vmem:[#allocation5 + $0x268] sm:$0xf0]  ;;  %1742 = vmatpush.bf16.msrb.mxu0 %v7552_v5 }
 0x198   :  { %v1309_v4 = vadd.f32 %v1308_v41, %v1140_v16  ;;  %1178 = vmatmul.bf16.gmra.mxu0 %v9061_v3  ;;  %vm3981_vm7 = vcmp.gt.f32.partialorder %v1644_v29, 0.0  ;;  %v4493_v45 = vmul.f32 0.01, %v1644_v29  ;;  %1516 = vmatmul.bf16.gmra.mxu2 %v9061_v3  ;;  %v7556_v41 = vor.u32 %v8286_v42, %v7553_v7  ;;  %v176_v42 = vld [vmem:[#allocation2 + $0x2f0] sm:$0xff]  ;;  %v175_v7 = vld [vmem:[#allocation2 + $0x2e8] sm:$0xff] }
 0x199   :  { %v8354_v16 = vld [vmem:[#allocation5 + $0x264] sm:$0xf0] }
 0x19a   :  { %1347 = vmatmul.bf16.gmra.mxu1 %v9068_v52  ;;  %1685 = vmatmul.bf16.gmra.mxu3 %v9068_v52  ;;  %v9079_v39 = vsel %vm3981_vm7, %v1644_v29, %v4493_v45  ;;  %v7812_v52 = vor.u32 %v8350_v28, %v7809_v23  ;;  %v4500_v11 = vmul.f32 0.01, %v1309_v4  ;;  %v174_v45 = vld [vmem:[#allocation2 + $0x2e0] sm:$0xff]  ;;  %vm3988_vm8 = vcmp.gt.f32.partialorder %v1309_v4, 0.0 }
 0x19b   :  { %13050 = vst [vmem:[#allocation79_spill] sm:$0xff] %v9079_v39  ;;  %v1477_v56 = vpop.f32.mrf.mxu2  ;;  %2080 = vmatpush.bf16.msrb.mxu2 %v7556_v41  ;;  %v7808_v24 = vor.u32 %v8354_v16, %v7807_v12  ;;  %v9085_v23 = vpack.c.bf16 %v176_v42, %v174_v45 }
 0x19c   :  { %v1478_v46 = vadd.f32 %v1477_v56, %v8744_v6  ;;  %2249 = vmatpush.bf16.msrb.mxu3 %v7812_v52  ;;  %v177_v56 = vld [vmem:[#allocation2 + $0x2f8] sm:$0xff] }
 0x19d   :  { %v1646_v38 = vpop.f32.mrf.mxu3  ;;  %v1141_v25 = vpop.f32.mrf.mxu0  ;;  %13051 = vst [vmem:[#allocation80_spill] sm:$0xff] %v9085_v23  ;;  %v9092_v52 = vpack.c.bf16 %v177_v56, %v175_v7  ;;  %1911 = vmatpush.bf16.msrb.mxu1 %v7808_v24 }
 0x19e   :  { %v1142_v3 = vadd.f32 %v1141_v25, %v8734_v59  ;;  %v1647_v29 = vadd.f32 %v1646_v38, %v1478_v46  ;;  %v9087_v25 = vsel %vm3988_vm8, %v1309_v4, %v4500_v11  ;;  %v178_v46 = vld [vmem:[#allocation2 + $0x300] sm:$0xff] }
 0x19f   :  { %v1310_v22 = vpop.f32.mrf.mxu1  ;;  %13052 = vst [vmem:[#allocation81_spill] sm:$0xff] %v9087_v25 }
 0x1a0   :  { %v1311_v1 = vadd.f32 %v1310_v22, %v1142_v3  ;;  %13054 = vst [vmem:[#allocation83_spill] sm:$0xff] %v9092_v52  ;;  %v4501_v12 = vmul.f32 0.01, %v1647_v29  ;;  %vm3989_vm10 = vcmp.gt.f32.partialorder %v1647_v29, 0.0 }
 0x1a2   :  { %vm3996_vm9 = vcmp.gt.f32.partialorder %v1311_v1, 0.0  ;;  %v4508_v44 = vmul.f32 0.01, %v1311_v1  ;;  %v9101_v24 = vsel %vm3989_vm10, %v1647_v29, %v4501_v12  ;;  %v180_v29 = vld [vmem:[#allocation2 + $0x310] sm:$0xff] }
 0x1a3   :  { %v1479_v28 = vpop.f32.mrf.mxu2  ;;  %13055 = vst [vmem:[#allocation84_spill] sm:$0xff] %v9101_v24 }
 0x1a4   :  { %v9089_v41 = vsel %vm3996_vm9, %v1311_v1, %v4508_v44  ;;  %v1480_v38 = vadd.f32 %v1479_v28, %v8744_v6 }
 0x1a5   :  { %13053 = vst [vmem:[#allocation82_spill] sm:$0xff] %v9089_v41  ;;  %v1648_v22 = vpop.f32.mrf.mxu3  ;;  %v1144_v3 = vpop.f32.mrf.mxu0  ;;  %v9109_v41 = vpack.c.bf16 %v180_v29, %v178_v46 }
 0x1a6   :  { %v1145_v5 = vadd.f32 %v1144_v3, %v8734_v59  ;;  %v1649_v45 = vadd.f32 %v1648_v22, %v1480_v38 }
 0x1a7   :  { %v1313_v16 = vpop.f32.mrf.mxu1  ;;  %13057 = vst [vmem:[#allocation86_spill] sm:$0xff] %v9109_v41 }
 0x1a8   :  { %v1314_v4 = vadd.f32 %v1313_v16, %v1145_v5  ;;  %1183 = vmatmul.bf16.gmra.mxu0 %v9085_v23  ;;  %vm3997_vm11 = vcmp.gt.f32.partialorder %v1649_v45, 0.0  ;;  %v4509_v11 = vmul.f32 0.01, %v1649_v45  ;;  %1521 = vmatmul.bf16.gmra.mxu2 %v9085_v23 }
 0x1aa   :  { %1352 = vmatmul.bf16.gmra.mxu1 %v9092_v52  ;;  %1690 = vmatmul.bf16.gmra.mxu3 %v9092_v52  ;;  %v9103_v1 = vsel %vm3997_vm11, %v1649_v45, %v4509_v11  ;;  %v4516_v5 = vmul.f32 0.01, %v1314_v4  ;;  %vm4004_vm12 = vcmp.gt.f32.partialorder %v1314_v4, 0.0  ;;  %v179_v45 = vld [vmem:[#allocation2 + $0x308] sm:$0xff]  ;;  %v181_v11 = vld [vmem:[#allocation2 + $0x318] sm:$0xff] }
 0x1ab   :  { %13056 = vst [vmem:[#allocation85_spill] sm:$0xff] %v9103_v1  ;;  %v1482_v42 = vpop.f32.mrf.mxu2 }
 0x1ac   :  { %v1483_v44 = vadd.f32 %v1482_v42, %v8744_v6  ;;  %v9111_v7 = vsel %vm4004_vm12, %v1314_v4, %v4516_v5 }
 0x1ad   :  { %v1651_v56 = vpop.f32.mrf.mxu3  ;;  %v1146_v28 = vpop.f32.mrf.mxu0  ;;  %13058 = vst [vmem:[#allocation87_spill] sm:$0xff] %v9111_v7 }
 0x1ae   :  { %v1147_v38 = vadd.f32 %v1146_v28, %v8734_v59  ;;  %v1652_v3 = vadd.f32 %v1651_v56, %v1483_v44  ;;  %v9116_v56 = vpack.c.bf16 %v181_v11, %v179_v45 }
 0x1af   :  { %v1315_v22 = vpop.f32.mrf.mxu1 }
 0x1b0   :  { %v1316_v16 = vadd.f32 %v1315_v22, %v1147_v38  ;;  %13060 = vst [vmem:[#allocation89_spill] sm:$0xff] %v9116_v56  ;;  %v4517_v39 = vmul.f32 0.01, %v1652_v3  ;;  %vm4005_vm14 = vcmp.gt.f32.partialorder %v1652_v3, 0.0  ;;  %v182_v38 = vld [vmem:[#allocation2 + $0x320] sm:$0xff] }
 0x1b2   :  { %vm4012_vm13 = vcmp.gt.f32.partialorder %v1316_v16, 0.0  ;;  %v4524_v12 = vmul.f32 0.01, %v1316_v16 }
 0x1b3   :  { %v1484_v25 = vpop.f32.mrf.mxu2 }
 0x1b4   :  { %v9113_v42 = vsel %vm4012_vm13, %v1316_v16, %v4524_v12  ;;  %v1485_v28 = vadd.f32 %v1484_v25, %v8744_v6  ;;  %v9125_v25 = vsel %vm4005_vm14, %v1652_v3, %v4517_v39  ;;  %v184_v39 = vld [vmem:[#allocation2 + $0x330] sm:$0xff]  ;;  %v183_v3 = vld [vmem:[#allocation2 + $0x328] sm:$0xff] }
 0x1b5   :  { %13059 = vst [vmem:[#allocation88_spill] sm:$0xff] %v9113_v42  ;;  %v1653_v24 = vpop.f32.mrf.mxu3  ;;  %v1149_v44 = vpop.f32.mrf.mxu0  ;;  %v9133_v42 = vpack.c.bf16 %v184_v39, %v182_v38 }
 0x1b6   :  { %v1150_v22 = vadd.f32 %v1149_v44, %v8734_v59  ;;  %v1654_v52 = vadd.f32 %v1653_v24, %v1485_v28  ;;  %13061 = vst [vmem:[#allocation90_spill] sm:$0xff] %v9125_v25 }
 0x1b7   :  { %v1318_v1 = vpop.f32.mrf.mxu1  ;;  %13063 = vst [vmem:[#allocation92_spill] sm:$0xff] %v9133_v42 }
 0x1b8   :  { %v1319_v46 = vadd.f32 %v1318_v1, %v1150_v22  ;;  %1188 = vmatmul.bf16.gmra.mxu0 %v9109_v41  ;;  %vm4013_vm15 = vcmp.gt.f32.partialorder %v1654_v52, 0.0  ;;  %v4525_v4 = vmul.f32 0.01, %v1654_v52  ;;  %1526 = vmatmul.bf16.gmra.mxu2 %v9109_v41 }
 0x1ba   :  { %1357 = vmatmul.bf16.gmra.mxu1 %v9116_v56  ;;  %1695 = vmatmul.bf16.gmra.mxu3 %v9116_v56  ;;  %v9127_v5 = vsel %vm4013_vm15, %v1654_v52, %v4525_v4  ;;  %v4532_v44 = vmul.f32 0.01, %v1319_v46  ;;  %vm4020_vm0 = vcmp.gt.f32.partialorder %v1319_v46, 0.0  ;;  %v185_v4 = vld [vmem:[#allocation2 + $0x338] sm:$0xff] }
 0x1bb   :  { %13062 = vst [vmem:[#allocation91_spill] sm:$0xff] %v9127_v5  ;;  %v1487_v16 = vpop.f32.mrf.mxu2 }
 0x1bc   :  { %v1488_v1 = vadd.f32 %v1487_v16, %v8744_v6  ;;  %v9135_v24 = vsel %vm4020_vm0, %v1319_v46, %v4532_v44 }
 0x1bd   :  { %v1656_v29 = vpop.f32.mrf.mxu3  ;;  %v1151_v12 = vpop.f32.mrf.mxu0  ;;  %13064 = vst [vmem:[#allocation93_spill] sm:$0xff] %v9135_v24 }
 0x1be   :  { %v1152_v45 = vadd.f32 %v1151_v12, %v8734_v59  ;;  %v1657_v28 = vadd.f32 %v1656_v29, %v1488_v1  ;;  %v9140_v29 = vpack.c.bf16 %v185_v4, %v183_v3 }
 0x1bf   :  { %v1320_v11 = vpop.f32.mrf.mxu1 }
 0x1c0   :  { %v1321_v22 = vadd.f32 %v1320_v11, %v1152_v45  ;;  %13066 = vst [vmem:[#allocation95_spill] sm:$0xff] %v9140_v29  ;;  %v4533_v56 = vmul.f32 0.01, %v1657_v28  ;;  %vm4021_vm2 = vcmp.gt.f32.partialorder %v1657_v28, 0.0  ;;  %v186_v45 = vld [vmem:[#allocation2 + $0x340] sm:$0xff] }
 0x1c2   :  { %vm4028_vm1 = vcmp.gt.f32.partialorder %v1321_v22, 0.0  ;;  %v4540_v52 = vmul.f32 0.01, %v1321_v22 }
 0x1c3   :  { %v1489_v7 = vpop.f32.mrf.mxu2 }
 0x1c4   :  { %v9137_v16 = vsel %vm4028_vm1, %v1321_v22, %v4540_v52  ;;  %v1490_v12 = vadd.f32 %v1489_v7, %v8744_v6  ;;  %v9149_v7 = vsel %vm4021_vm2, %v1657_v28, %v4533_v56  ;;  %v188_v56 = vld [vmem:[#allocation2 + $0x350] sm:$0xff]  ;;  %v187_v28 = vld [vmem:[#allocation2 + $0x348] sm:$0xff] }
 0x1c5   :  { %13065 = vst [vmem:[#allocation94_spill] sm:$0xff] %v9137_v16  ;;  %v1658_v25 = vpop.f32.mrf.mxu3  ;;  %v1154_v1 = vpop.f32.mrf.mxu0  ;;  %v9157_v16 = vpack.c.bf16 %v188_v56, %v186_v45  ;;  %v8282_v56 = vld [vmem:[#allocation5 + $0x24] sm:$0xf0] }
 0x1c6   :  { %v1155_v11 = vadd.f32 %v1154_v1, %v8734_v59  ;;  %v1659_v41 = vadd.f32 %v1658_v25, %v1490_v12  ;;  %13067 = vst [vmem:[#allocation96_spill] sm:$0xff] %v9149_v7 }
 0x1c7   :  { %v1323_v5 = vpop.f32.mrf.mxu1  ;;  %13069 = vst [vmem:[#allocation98_spill] sm:$0xff] %v9157_v16 }
 0x1c8   :  { %v1324_v38 = vadd.f32 %v1323_v5, %v1155_v11  ;;  %1193 = vmatmul.bf16.gmra.mxu0 %v9133_v42  ;;  %vm4029_vm3 = vcmp.gt.f32.partialorder %v1659_v41, 0.0  ;;  %v4541_v46 = vmul.f32 0.01, %v1659_v41  ;;  %1531 = vmatmul.bf16.gmra.mxu2 %v9133_v42 }
 0x1ca   :  { %1362 = vmatmul.bf16.gmra.mxu1 %v9140_v29  ;;  %1700 = vmatmul.bf16.gmra.mxu3 %v9140_v29  ;;  %v9151_v44 = vsel %vm4029_vm3, %v1659_v41, %v4541_v46  ;;  %v4548_v1 = vmul.f32 0.01, %v1324_v38  ;;  %vm4036_vm4 = vcmp.gt.f32.partialorder %v1324_v38, 0.0  ;;  %v189_v46 = vld [vmem:[#allocation2 + $0x358] sm:$0xff] }
 0x1cb   :  { %13068 = vst [vmem:[#allocation97_spill] sm:$0xff] %v9151_v44  ;;  %v1492_v22 = vpop.f32.mrf.mxu2 }
 0x1cc   :  { %v1493_v5 = vadd.f32 %v1492_v22, %v8744_v6  ;;  %v9159_v25 = vsel %vm4036_vm4, %v1324_v38, %v4548_v1  ;;  %v7521_v1 = vld [vmem:[#allocation5 + $0x28] sm:$0xf0] }
 0x1cd   :  { %v1661_v39 = vpop.f32.mrf.mxu3  ;;  %v1156_v52 = vpop.f32.mrf.mxu0  ;;  %13070 = vst [vmem:[#allocation99_spill] sm:$0xff] %v9159_v25 }
 0x1ce   :  { %v1157_v3 = vadd.f32 %v1156_v52, %v8734_v59  ;;  %v1662_v12 = vadd.f32 %v1661_v39, %v1493_v5  ;;  %v9164_v39 = vpack.c.bf16 %v189_v46, %v187_v28 }
 0x1cf   :  { %v1325_v4 = vpop.f32.mrf.mxu1 }
 0x1d0   :  { %v1326_v11 = vadd.f32 %v1325_v4, %v1157_v3  ;;  %13072 = vst [vmem:[#allocation101_spill] sm:$0xff] %v9164_v39  ;;  %v4549_v29 = vmul.f32 0.01, %v1662_v12  ;;  %vm4037_vm6 = vcmp.gt.f32.partialorder %v1662_v12, 0.0 }
 0x1d2   :  { %vm4044_vm5 = vcmp.gt.f32.partialorder %v1326_v11, 0.0  ;;  %v4556_v41 = vmul.f32 0.01, %v1326_v11 }
 0x1d3   :  { %v1494_v24 = vpop.f32.mrf.mxu2 }
 0x1d4   :  { %v9161_v22 = vsel %vm4044_vm5, %v1326_v11, %v4556_v41  ;;  %v1495_v52 = vadd.f32 %v1494_v24, %v8744_v6  ;;  %v8278_v24 = vld [vmem:[#allocation5 + $0xc] sm:$0xf]  ;;  %v7519_v11 = vld [vmem:[#allocation5 + $0x8] sm:$0xf]  ;;  %v9173_v41 = vsel %vm4037_vm6, %v1662_v12, %v4549_v29 }
 0x1d5   :  { %13071 = vst [vmem:[#allocation100_spill] sm:$0xff] %v9161_v22  ;;  %v1663_v7 = vpop.f32.mrf.mxu3  ;;  %v1159_v5 = vpop.f32.mrf.mxu0  ;;  %v7520_v46 = vor.u32 %v8282_v56, %v7519_v11  ;;  %v7775_v11 = vld [vmem:[#allocation5 + $0x208] sm:$0xf] }
 0x1d6   :  { %v1160_v4 = vadd.f32 %v1159_v5, %v8734_v59  ;;  %v1664_v42 = vadd.f32 %v1663_v7, %v1495_v52  ;;  %13073 = vst [vmem:[#allocation102_spill] sm:$0xff] %v9173_v41  ;;  %v8342_v52 = vld [vmem:[#allocation5 + $0x20c] sm:$0xf] }
 0x1d7   :  { %v1328_v44 = vpop.f32.mrf.mxu1  ;;  %v7777_v5 = vld [vmem:[#allocation5 + $0x228] sm:$0xf0]  ;;  %1743 = vmatpush.bf16.msrb.mxu0 %v7520_v46 }
 0x1d8   :  { %v1329_v45 = vadd.f32 %v1328_v44, %v1160_v4  ;;  %1198 = vmatmul.bf16.gmra.mxu0 %v9157_v16  ;;  %vm4045_vm7 = vcmp.gt.f32.partialorder %v1664_v42, 0.0  ;;  %v4557_v38 = vmul.f32 0.01, %v1664_v42  ;;  %1536 = vmatmul.bf16.gmra.mxu2 %v9157_v16  ;;  %v7524_v44 = vor.u32 %v8278_v24, %v7521_v1  ;;  %v192_v24 = vld [vmem:[#allocation2 + $0x370] sm:$0xff]  ;;  %v191_v1 = vld [vmem:[#allocation2 + $0x368] sm:$0xff] }
 0x1d9   :  { %v8346_v4 = vld [vmem:[#allocation5 + $0x224] sm:$0xf0] }
 0x1da   :  { %1367 = vmatmul.bf16.gmra.mxu1 %v9164_v39  ;;  %1705 = vmatmul.bf16.gmra.mxu3 %v9164_v39  ;;  %v9175_v28 = vsel %vm4045_vm7, %v1664_v42, %v4557_v38  ;;  %v7780_v39 = vor.u32 %v8342_v52, %v7777_v5  ;;  %v4564_v29 = vmul.f32 0.01, %v1329_v45  ;;  %v190_v38 = vld [vmem:[#allocation2 + $0x360] sm:$0xff]  ;;  %vm4052_vm8 = vcmp.gt.f32.partialorder %v1329_v45, 0.0 }
 0x1db   :  { %13074 = vst [vmem:[#allocation103_spill] sm:$0xff] %v9175_v28  ;;  %v1497_v7 = vpop.f32.mrf.mxu2  ;;  %2081 = vmatpush.bf16.msrb.mxu2 %v7524_v44  ;;  %v7776_v41 = vor.u32 %v8346_v4, %v7775_v11  ;;  %v9181_v5 = vpack.c.bf16 %v192_v24, %v190_v38 }
 0x1dc   :  { %v1498_v3 = vadd.f32 %v1497_v7, %v8744_v6  ;;  %2250 = vmatpush.bf16.msrb.mxu3 %v7780_v39  ;;  %v193_v7 = vld [vmem:[#allocation2 + $0x378] sm:$0xff] }
 0x1dd   :  { %v1666_v25 = vpop.f32.mrf.mxu3  ;;  %v1161_v22 = vpop.f32.mrf.mxu0  ;;  %13075 = vst [vmem:[#allocation104_spill] sm:$0xff] %v9181_v5  ;;  %v9188_v39 = vpack.c.bf16 %v193_v7, %v191_v1  ;;  %1912 = vmatpush.bf16.msrb.mxu1 %v7776_v41 }
 0x1de   :  { %v1162_v16 = vadd.f32 %v1161_v22, %v8734_v59  ;;  %v1667_v42 = vadd.f32 %v1666_v25, %v1498_v3  ;;  %v9183_v22 = vsel %vm4052_vm8, %v1329_v45, %v4564_v29  ;;  %v194_v3 = vld [vmem:[#allocation2 + $0x380] sm:$0xff] }
 0x1df   :  { %v1330_v23 = vpop.f32.mrf.mxu1  ;;  %13076 = vst [vmem:[#allocation105_spill] sm:$0xff] %v9183_v22 }
 0x1e0   :  { %v1331_v12 = vadd.f32 %v1330_v23, %v1162_v16  ;;  %13078 = vst [vmem:[#allocation107_spill] sm:$0xff] %v9188_v39  ;;  %v4565_v11 = vmul.f32 0.01, %v1667_v42  ;;  %vm4053_vm10 = vcmp.gt.f32.partialorder %v1667_v42, 0.0 }
 0x1e2   :  { %vm4060_vm9 = vcmp.gt.f32.partialorder %v1331_v12, 0.0  ;;  %v4572_v56 = vmul.f32 0.01, %v1331_v12  ;;  %v9197_v41 = vsel %vm4053_vm10, %v1667_v42, %v4565_v11  ;;  %v196_v42 = vld [vmem:[#allocation2 + $0x390] sm:$0xff] }
 0x1e3   :  { %v1499_v52 = vpop.f32.mrf.mxu2  ;;  %13079 = vst [vmem:[#allocation108_spill] sm:$0xff] %v9197_v41 }
 0x1e4   :  { %v9185_v44 = vsel %vm4060_vm9, %v1331_v12, %v4572_v56  ;;  %v1500_v25 = vadd.f32 %v1499_v52, %v8744_v6 }
 0x1e5   :  { %13077 = vst [vmem:[#allocation106_spill] sm:$0xff] %v9185_v44  ;;  %v1668_v23 = vpop.f32.mrf.mxu3  ;;  %v1164_v16 = vpop.f32.mrf.mxu0  ;;  %v9205_v44 = vpack.c.bf16 %v196_v42, %v194_v3 }
 0x1e6   :  { %v1165_v46 = vadd.f32 %v1164_v16, %v8734_v59  ;;  %v1669_v38 = vadd.f32 %v1668_v23, %v1500_v25 }
 0x1e7   :  { %v1333_v4 = vpop.f32.mrf.mxu1  ;;  %13081 = vst [vmem:[#allocation110_spill] sm:$0xff] %v9205_v44 }
 0x1e8   :  { %v1334_v45 = vadd.f32 %v1333_v4, %v1165_v46  ;;  %1203 = vmatmul.bf16.gmra.mxu0 %v9181_v5  ;;  %vm4061_vm11 = vcmp.gt.f32.partialorder %v1669_v38, 0.0  ;;  %v4573_v29 = vmul.f32 0.01, %v1669_v38  ;;  %1541 = vmatmul.bf16.gmra.mxu2 %v9181_v5 }
 0x1ea   :  { %1372 = vmatmul.bf16.gmra.mxu1 %v9188_v39  ;;  %1710 = vmatmul.bf16.gmra.mxu3 %v9188_v39  ;;  %v9199_v12 = vsel %vm4061_vm11, %v1669_v38, %v4573_v29  ;;  %v4580_v46 = vmul.f32 0.01, %v1334_v45  ;;  %vm4068_vm12 = vcmp.gt.f32.partialorder %v1334_v45, 0.0  ;;  %v195_v38 = vld [vmem:[#allocation2 + $0x388] sm:$0xff]  ;;  %v197_v29 = vld [vmem:[#allocation2 + $0x398] sm:$0xff] }
 0x1eb   :  { %13080 = vst [vmem:[#allocation109_spill] sm:$0xff] %v9199_v12  ;;  %v1502_v24 = vpop.f32.mrf.mxu2 }
 0x1ec   :  { %v1503_v56 = vadd.f32 %v1502_v24, %v8744_v6  ;;  %v9207_v1 = vsel %vm4068_vm12, %v1334_v45, %v4580_v46 }
 0x1ed   :  { %v1671_v7 = vpop.f32.mrf.mxu3  ;;  %v1166_v52 = vpop.f32.mrf.mxu0  ;;  %13082 = vst [vmem:[#allocation111_spill] sm:$0xff] %v9207_v1 }
 0x1ee   :  { %v1167_v25 = vadd.f32 %v1166_v52, %v8734_v59  ;;  %v1672_v16 = vadd.f32 %v1671_v7, %v1503_v56  ;;  %v9212_v7 = vpack.c.bf16 %v197_v29, %v195_v38 }
 0x1ef   :  { %v1335_v23 = vpop.f32.mrf.mxu1 }
 0x1f0   :  { %v1336_v4 = vadd.f32 %v1335_v23, %v1167_v25  ;;  %13084 = vst [vmem:[#allocation113_spill] sm:$0xff] %v9212_v7  ;;  %v4581_v28 = vmul.f32 0.01, %v1672_v16  ;;  %vm4069_vm14 = vcmp.gt.f32.partialorder %v1672_v16, 0.0  ;;  %v198_v25 = vld [vmem:[#allocation2 + $0x3a0] sm:$0xff] }
 0x1f2   :  { %vm4076_vm13 = vcmp.gt.f32.partialorder %v1336_v4, 0.0  ;;  %v4588_v11 = vmul.f32 0.01, %v1336_v4 }
 0x1f3   :  { %v1504_v22 = vpop.f32.mrf.mxu2 }
 0x1f4   :  { %v9209_v24 = vsel %vm4076_vm13, %v1336_v4, %v4588_v11  ;;  %v1505_v52 = vadd.f32 %v1504_v22, %v8744_v6  ;;  %v9221_v22 = vsel %vm4069_vm14, %v1672_v16, %v4581_v28  ;;  %v200_v28 = vld [vmem:[#allocation2 + $0x3b0] sm:$0xff]  ;;  %v199_v16 = vld [vmem:[#allocation2 + $0x3a8] sm:$0xff] }
 0x1f5   :  { %13083 = vst [vmem:[#allocation112_spill] sm:$0xff] %v9209_v24  ;;  %v1673_v41 = vpop.f32.mrf.mxu3  ;;  %v1169_v56 = vpop.f32.mrf.mxu0  ;;  %v9229_v24 = vpack.c.bf16 %v200_v28, %v198_v25 }
 0x1f6   :  { %v1170_v23 = vadd.f32 %v1169_v56, %v8734_v59  ;;  %v1674_v39 = vadd.f32 %v1673_v41, %v1505_v52  ;;  %13085 = vst [vmem:[#allocation114_spill] sm:$0xff] %v9221_v22 }
 0x1f7   :  { %v1338_v12 = vpop.f32.mrf.mxu1  ;;  %13087 = vst [vmem:[#allocation116_spill] sm:$0xff] %v9229_v24 }
 0x1f8   :  { %v1339_v3 = vadd.f32 %v1338_v12, %v1170_v23  ;;  %1208 = vmatmul.bf16.gmra.mxu0 %v9205_v44  ;;  %vm4077_vm15 = vcmp.gt.f32.partialorder %v1674_v39, 0.0  ;;  %v4589_v45 = vmul.f32 0.01, %v1674_v39  ;;  %1546 = vmatmul.bf16.gmra.mxu2 %v9205_v44 }
 0x1fa   :  { %1377 = vmatmul.bf16.gmra.mxu1 %v9212_v7  ;;  %1715 = vmatmul.bf16.gmra.mxu3 %v9212_v7  ;;  %v9223_v46 = vsel %vm4077_vm15, %v1674_v39, %v4589_v45  ;;  %v4596_v56 = vmul.f32 0.01, %v1339_v3  ;;  %vm4084_vm0 = vcmp.gt.f32.partialorder %v1339_v3, 0.0  ;;  %v201_v45 = vld [vmem:[#allocation2 + $0x3b8] sm:$0xff] }
 0x1fb   :  { %13086 = vst [vmem:[#allocation115_spill] sm:$0xff] %v9223_v46  ;;  %v1507_v4 = vpop.f32.mrf.mxu2 }
 0x1fc   :  { %v1508_v12 = vadd.f32 %v1507_v4, %v8744_v6  ;;  %v9231_v41 = vsel %vm4084_vm0, %v1339_v3, %v4596_v56 }
 0x1fd   :  { %v1676_v42 = vpop.f32.mrf.mxu3  ;;  %v1171_v11 = vpop.f32.mrf.mxu0  ;;  %13088 = vst [vmem:[#allocation117_spill] sm:$0xff] %v9231_v41 }
 0x1fe   :  { %v1172_v38 = vadd.f32 %v1171_v11, %v8734_v59  ;;  %v1677_v52 = vadd.f32 %v1676_v42, %v1508_v12  ;;  %v9236_v42 = vpack.c.bf16 %v201_v45, %v199_v16 }
 0x1ff   :  { %v1340_v29 = vpop.f32.mrf.mxu1 }
 0x200   :  { %v1341_v23 = vadd.f32 %v1340_v29, %v1172_v38  ;;  %13090 = vst [vmem:[#allocation119_spill] sm:$0xff] %v9236_v42  ;;  %v4597_v7 = vmul.f32 0.01, %v1677_v52  ;;  %vm4085_vm2 = vcmp.gt.f32.partialorder %v1677_v52, 0.0  ;;  %v202_v38 = vld [vmem:[#allocation2 + $0x3c0] sm:$0xff] }
 0x202   :  { %vm4092_vm1 = vcmp.gt.f32.partialorder %v1341_v23, 0.0  ;;  %v4604_v39 = vmul.f32 0.01, %v1341_v23 }
 0x203   :  { %v1509_v1 = vpop.f32.mrf.mxu2 }
 0x204   :  { %v9233_v4 = vsel %vm4092_vm1, %v1341_v23, %v4604_v39  ;;  %v1510_v11 = vadd.f32 %v1509_v1, %v8744_v6  ;;  %v9245_v1 = vsel %vm4085_vm2, %v1677_v52, %v4597_v7  ;;  %v204_v7 = vld [vmem:[#allocation2 + $0x3d0] sm:$0xff]  ;;  %v203_v52 = vld [vmem:[#allocation2 + $0x3c8] sm:$0xff] }
 0x205   :  { %13089 = vst [vmem:[#allocation118_spill] sm:$0xff] %v9233_v4  ;;  %v1678_v22 = vpop.f32.mrf.mxu3  ;;  %v1174_v12 = vpop.f32.mrf.mxu0  ;;  %v9253_v4 = vpack.c.bf16 %v204_v7, %v202_v38  ;;  %v8339_v7 = vld [vmem:[#allocation5 + $0x1ec] sm:$0xf0] }
 0x206   :  { %v1175_v29 = vadd.f32 %v1174_v12, %v8734_v59  ;;  %v1679_v44 = vadd.f32 %v1678_v22, %v1510_v11  ;;  %13091 = vst [vmem:[#allocation120_spill] sm:$0xff] %v9245_v1 }
 0x207   :  { %v1343_v46 = vpop.f32.mrf.mxu1  ;;  %13093 = vst [vmem:[#allocation122_spill] sm:$0xff] %v9253_v4 }
 0x208   :  { %v1344_v25 = vadd.f32 %v1343_v46, %v1175_v29  ;;  %1213 = vmatmul.bf16.gmra.mxu0 %v9229_v24  ;;  %vm4093_vm3 = vcmp.gt.f32.partialorder %v1679_v44, 0.0  ;;  %v4605_v3 = vmul.f32 0.01, %v1679_v44  ;;  %1551 = vmatmul.bf16.gmra.mxu2 %v9229_v24 }
 0x20a   :  { %1382 = vmatmul.bf16.gmra.mxu1 %v9236_v42  ;;  %1720 = vmatmul.bf16.gmra.mxu3 %v9236_v42  ;;  %v9247_v56 = vsel %vm4093_vm3, %v1679_v44, %v4605_v3  ;;  %v4612_v12 = vmul.f32 0.01, %v1344_v25  ;;  %vm4100_vm4 = vcmp.gt.f32.partialorder %v1344_v25, 0.0  ;;  %v205_v3 = vld [vmem:[#allocation2 + $0x3d8] sm:$0xff] }
 0x20b   :  { %13092 = vst [vmem:[#allocation121_spill] sm:$0xff] %v9247_v56  ;;  %v1512_v23 = vpop.f32.mrf.mxu2 }
 0x20c   :  { %v1513_v46 = vadd.f32 %v1512_v23, %v8744_v6  ;;  %v9255_v22 = vsel %vm4100_vm4, %v1344_v25, %v4612_v12  ;;  %v7753_v12 = vld [vmem:[#allocation5 + $0x1f0] sm:$0xf0] }
 0x20d   :  { %v1681_v28 = vpop.f32.mrf.mxu3  ;;  %v1176_v39 = vpop.f32.mrf.mxu0  ;;  %13094 = vst [vmem:[#allocation123_spill] sm:$0xff] %v9255_v22 }
 0x20e   :  { %v1177_v16 = vadd.f32 %v1176_v39, %v8734_v59  ;;  %v1682_v11 = vadd.f32 %v1681_v28, %v1513_v46  ;;  %v9260_v28 = vpack.c.bf16 %v205_v3, %v203_v52 }
 0x20f   :  { %v1345_v45 = vpop.f32.mrf.mxu1 }
 0x210   :  { %v1346_v29 = vadd.f32 %v1345_v45, %v1177_v16  ;;  %13096 = vst [vmem:[#allocation125_spill] sm:$0xff] %v9260_v28  ;;  %v4613_v42 = vmul.f32 0.01, %v1682_v11  ;;  %vm4101_vm6 = vcmp.gt.f32.partialorder %v1682_v11, 0.0 }
 0x212   :  { %vm4108_vm5 = vcmp.gt.f32.partialorder %v1346_v29, 0.0  ;;  %v4620_v44 = vmul.f32 0.01, %v1346_v29 }
 0x213   :  { %v1514_v41 = vpop.f32.mrf.mxu2 }
 0x214   :  { %v9257_v23 = vsel %vm4108_vm5, %v1346_v29, %v4620_v44  ;;  %v1515_v39 = vadd.f32 %v1514_v41, %v8744_v6  ;;  %v8335_v41 = vld [vmem:[#allocation5 + $0x1d4] sm:$0xf]  ;;  %v7751_v29 = vld [vmem:[#allocation5 + $0x1d0] sm:$0xf]  ;;  %v9269_v44 = vsel %vm4101_vm6, %v1682_v11, %v4613_v42 }
 0x215   :  { %13095 = vst [vmem:[#allocation124_spill] sm:$0xff] %v9257_v23  ;;  %v1683_v1 = vpop.f32.mrf.mxu3  ;;  %v1179_v46 = vpop.f32.mrf.mxu0  ;;  %v7752_v3 = vor.u32 %v8339_v7, %v7751_v29  ;;  %v8007_v29 = vld [vmem:[#allocation5 + $0x3d0] sm:$0xf] }
 0x216   :  { %v1180_v45 = vadd.f32 %v1179_v46, %v8734_v59  ;;  %v1684_v24 = vadd.f32 %v1683_v1, %v1515_v39  ;;  %13097 = vst [vmem:[#allocation126_spill] sm:$0xff] %v9269_v44  ;;  %v8399_v39 = vld [vmem:[#allocation5 + $0x3d4] sm:$0xf] }
 0x217   :  { %v1348_v56 = vpop.f32.mrf.mxu1  ;;  %v8009_v46 = vld [vmem:[#allocation5 + $0x3f0] sm:$0xf0]  ;;  %2412 = vmatpush.bf16.msra.mxu0 %v7752_v3 }
 0x218   :  { %v1349_v38 = vadd.f32 %v1348_v56, %v1180_v45  ;;  %1218 = vmatmul.bf16.gmra.mxu0 %v9253_v4  ;;  %vm4109_vm7 = vcmp.gt.f32.partialorder %v1684_v24, 0.0  ;;  %v4621_v25 = vmul.f32 0.01, %v1684_v24  ;;  %1556 = vmatmul.bf16.gmra.mxu2 %v9253_v4  ;;  %v7756_v56 = vor.u32 %v8335_v41, %v7753_v12  ;;  %v208_v41 = vld [vmem:[#allocation2 + $0x3f0] sm:$0xff]  ;;  %v207_v12 = vld [vmem:[#allocation2 + $0x3e8] sm:$0xff] }
 0x219   :  { %v8403_v45 = vld [vmem:[#allocation5 + $0x3ec] sm:$0xf0] }
 0x21a   :  { %1387 = vmatmul.bf16.gmra.mxu1 %v9260_v28  ;;  %1725 = vmatmul.bf16.gmra.mxu3 %v9260_v28  ;;  %v9271_v52 = vsel %vm4109_vm7, %v1684_v24, %v4621_v25  ;;  %v8012_v28 = vor.u32 %v8399_v39, %v8009_v46  ;;  %v4628_v42 = vmul.f32 0.01, %v1349_v38  ;;  %v206_v25 = vld [vmem:[#allocation2 + $0x3e0] sm:$0xff]  ;;  %vm4116_vm8 = vcmp.gt.f32.partialorder %v1349_v38, 0.0 }
 0x21b   :  { %13098 = vst [vmem:[#allocation127_spill] sm:$0xff] %v9271_v52  ;;  %v1517_v1 = vpop.f32.mrf.mxu2  ;;  %2750 = vmatpush.bf16.msra.mxu2 %v7756_v56  ;;  %v8008_v44 = vor.u32 %v8403_v45, %v8007_v29  ;;  %v9277_v46 = vpack.c.bf16 %v208_v41, %v206_v25 }
 0x21c   :  { %v1518_v16 = vadd.f32 %v1517_v1, %v8744_v6  ;;  %2919 = vmatpush.bf16.msra.mxu3 %v8012_v28  ;;  %v209_v1 = vld [vmem:[#allocation2 + $0x3f8] sm:$0xff] }
 0x21d   :  { %v1686_v22 = vpop.f32.mrf.mxu3  ;;  %v1181_v23 = vpop.f32.mrf.mxu0  ;;  %v9284_v28 = vpack.c.bf16 %v209_v1, %v207_v12  ;;  %2581 = vmatpush.bf16.msra.mxu1 %v8008_v44 }
 0x21e   :  { %v1182_v4 = vadd.f32 %v1181_v23, %v8734_v59  ;;  %v1687_v24 = vadd.f32 %v1686_v22, %v1518_v16  ;;  %v9279_v23 = vsel %vm4116_vm8, %v1349_v38, %v4628_v42 }
 0x21f   :  { %v1350_v5 = vpop.f32.mrf.mxu1  ;;  %13099 = vst [vmem:[#allocation128_spill] sm:$0xff] %v9279_v23 }
 0x220   :  { %v1351_v11 = vadd.f32 %v1350_v5, %v1182_v4  ;;  %v4629_v29 = vmul.f32 0.01, %v1687_v24  ;;  %vm4117_vm10 = vcmp.gt.f32.partialorder %v1687_v24, 0.0 }
 0x222   :  { %vm4124_vm9 = vcmp.gt.f32.partialorder %v1351_v11, 0.0  ;;  %v4636_v7 = vmul.f32 0.01, %v1351_v11  ;;  %v9293_v44 = vsel %vm4117_vm10, %v1687_v24, %v4629_v29 }
 0x223   :  { %v1519_v39 = vpop.f32.mrf.mxu2  ;;  %13101 = vst [vmem:[#allocation130_spill] sm:$0xff] %v9293_v44 }
 0x224   :  { %v9281_v56 = vsel %vm4124_vm9, %v1351_v11, %v4636_v7  ;;  %v1520_v22 = vadd.f32 %v1519_v39, %v8744_v6 }
 0x225   :  { %13100 = vst [vmem:[#allocation129_spill] sm:$0xff] %v9281_v56  ;;  %v1688_v5 = vpop.f32.mrf.mxu3  ;;  %v1184_v4 = vpop.f32.mrf.mxu0 }
 0x226   :  { %v1185_v3 = vadd.f32 %v1184_v4, %v8734_v59  ;;  %v1689_v25 = vadd.f32 %v1688_v5, %v1520_v22 }
 0x227   :  { %v1353_v45 = vpop.f32.mrf.mxu1 }
 0x228   :  { %v1354_v38 = vadd.f32 %v1353_v45, %v1185_v3  ;;  %1223 = vmatmul.bf16.gmra.mxu0 %v9277_v46  ;;  %vm4125_vm11 = vcmp.gt.f32.partialorder %v1689_v25, 0.0  ;;  %v4637_v42 = vmul.f32 0.01, %v1689_v25  ;;  %1561 = vmatmul.bf16.gmra.mxu2 %v9277_v46 }
 0x22a   :  { %1392 = vmatmul.bf16.gmra.mxu1 %v9284_v28  ;;  %1730 = vmatmul.bf16.gmra.mxu3 %v9284_v28  ;;  %v9295_v11 = vsel %vm4125_vm11, %v1689_v25, %v4637_v42  ;;  %v4644_v3 = vmul.f32 0.01, %v1354_v38  ;;  %vm4132_vm12 = vcmp.gt.f32.partialorder %v1354_v38, 0.0 }
 0x22b   :  { %13102 = vst [vmem:[#allocation131_spill] sm:$0xff] %v9295_v11  ;;  %v1522_v41 = vpop.f32.mrf.mxu2 }
 0x22c   :  { %v1523_v7 = vadd.f32 %v1522_v41, %v8744_v6  ;;  %v9301_v25 = vsel %vm4132_vm12, %v1354_v38, %v4644_v3 }
 0x22d   :  { %v1691_v1 = vpop.f32.mrf.mxu3  ;;  %v1186_v39 = vpop.f32.mrf.mxu0  ;;  %13103 = vst [vmem:[#allocation132_spill] sm:$0xff] %v9301_v25 }
 0x22e   :  { %v1187_v22 = vadd.f32 %v1186_v39, %v8734_v59  ;;  %v1692_v4 = vadd.f32 %v1691_v1, %v1523_v7 }
 0x22f   :  { %v1355_v5 = vpop.f32.mrf.mxu1 }
 0x230   :  { %v1356_v45 = vadd.f32 %v1355_v5, %v1187_v22  ;;  %v4645_v1 = vmul.f32 0.01, %v1692_v4  ;;  %vm4133_vm14 = vcmp.gt.f32.partialorder %v1692_v4, 0.0 }
 0x232   :  { %vm4140_vm13 = vcmp.gt.f32.partialorder %v1356_v45, 0.0  ;;  %v4652_v24 = vmul.f32 0.01, %v1356_v45  ;;  %v9313_v3 = vsel %vm4133_vm14, %v1692_v4, %v4645_v1 }
 0x233   :  { %v1524_v29 = vpop.f32.mrf.mxu2  ;;  %13105 = vst [vmem:[#allocation134_spill] sm:$0xff] %v9313_v3 }
 0x234   :  { %v9303_v42 = vsel %vm4140_vm13, %v1356_v45, %v4652_v24  ;;  %v1525_v12 = vadd.f32 %v1524_v29, %v8744_v6 }
 0x235   :  { %13104 = vst [vmem:[#allocation133_spill] sm:$0xff] %v9303_v42  ;;  %v1693_v16 = vpop.f32.mrf.mxu3  ;;  %v1189_v41 = vpop.f32.mrf.mxu0 }
 0x236   :  { %v1190_v39 = vadd.f32 %v1189_v41, %v8734_v59  ;;  %v1694_v22 = vadd.f32 %v1693_v16, %v1525_v12 }
 0x237   :  { %v1358_v7 = vpop.f32.mrf.mxu1 }
 0x238   :  { %v1359_v5 = vadd.f32 %v1358_v7, %v1190_v39  ;;  %1744 = vmatmul.bf16.vlgmr.msrb.gmra.mxu0 %v8670_v43  ;;  %vm4141_vm15 = vcmp.gt.f32.partialorder %v1694_v22, 0.0  ;;  %v4653_v38 = vmul.f32 0.01, %v1694_v22  ;;  %2082 = vmatmul.bf16.vlgmr.msrb.gmra.mxu2 %v8670_v43 }
 0x23a   :  { %1913 = vmatmul.bf16.vlgmr.msrb.gmra.mxu1 %v8672_v47  ;;  %2251 = vmatmul.bf16.vlgmr.msrb.gmra.mxu3 %v8672_v47  ;;  %v9315_v45 = vsel %vm4141_vm15, %v1694_v22, %v4653_v38  ;;  %v4660_v25 = vmul.f32 0.01, %v1359_v5  ;;  %vm4148_vm0 = vcmp.gt.f32.partialorder %v1359_v5, 0.0 }
 0x23b   :  { %13106 = vst [vmem:[#allocation135_spill] sm:$0xff] %v9315_v45  ;;  %v1527_v24 = vpop.f32.mrf.mxu2 }
 0x23c   :  { %v1528_v12 = vadd.f32 %v1527_v24, %v8744_v6  ;;  %v9321_v22 = vsel %vm4148_vm0, %v1359_v5, %v4660_v25 }
 0x23d   :  { %v1696_v29 = vpop.f32.mrf.mxu3  ;;  %v1191_v41 = vpop.f32.mrf.mxu0  ;;  %13107 = vst [vmem:[#allocation136_spill] sm:$0xff] %v9321_v22 }
 0x23e   :  { %v1192_v39 = vadd.f32 %v1191_v41, %v8734_v59  ;;  %v1697_v44 = vadd.f32 %v1696_v29, %v1528_v12 }
 0x23f   :  { %v1360_v7 = vpop.f32.mrf.mxu1 }
 0x240   :  { %v1361_v42 = vadd.f32 %v1360_v7, %v1192_v39  ;;  %v4661_v29 = vmul.f32 0.01, %v1697_v44  ;;  %vm4149_vm2 = vcmp.gt.f32.partialorder %v1697_v44, 0.0 }
 0x242   :  { %vm4156_vm1 = vcmp.gt.f32.partialorder %v1361_v42, 0.0  ;;  %v4668_v4 = vmul.f32 0.01, %v1361_v42 }
 0x243   :  { %v1529_v1 = vpop.f32.mrf.mxu2 }
 0x244   :  { %v9323_v38 = vsel %vm4156_vm1, %v1361_v42, %v4668_v4  ;;  %v1530_v16 = vadd.f32 %v1529_v1, %v8744_v6  ;;  %v9333_v42 = vsel %vm4149_vm2, %v1697_v44, %v4661_v29 }
 0x245   :  { %13108 = vst [vmem:[#allocation137_spill] sm:$0xff] %v9323_v38  ;;  %v1698_v3 = vpop.f32.mrf.mxu3  ;;  %v1194_v24 = vpop.f32.mrf.mxu0 }
 0x246   :  { %v1195_v41 = vadd.f32 %v1194_v24, %v8734_v59  ;;  %v1699_v39 = vadd.f32 %v1698_v3, %v1530_v16  ;;  %13109 = vst [vmem:[#allocation138_spill] sm:$0xff] %v9333_v42 }
 0x247   :  { %v1363_v12 = vpop.f32.mrf.mxu1 }
 0x248   :  { %v1364_v7 = vadd.f32 %v1363_v12, %v1195_v41  ;;  %1749 = vmatmul.bf16.gmra.mxu0 %v8678_v54  ;;  %vm4157_vm3 = vcmp.gt.f32.partialorder %v1699_v39, 0.0  ;;  %v4669_v25 = vmul.f32 0.01, %v1699_v39  ;;  %2087 = vmatmul.bf16.gmra.mxu2 %v8678_v54 }
 0x24a   :  { %1918 = vmatmul.bf16.gmra.mxu1 %v8680_v55  ;;  %2256 = vmatmul.bf16.gmra.mxu3 %v8680_v55  ;;  %v9335_v5 = vsel %vm4157_vm3, %v1699_v39, %v4669_v25  ;;  %v4676_v22 = vmul.f32 0.01, %v1364_v7  ;;  %vm4164_vm4 = vcmp.gt.f32.partialorder %v1364_v7, 0.0 }
 0x24b   :  { %13110 = vst [vmem:[#allocation139_spill] sm:$0xff] %v9335_v5  ;;  %v1532_v4 = vpop.f32.mrf.mxu2 }
 0x24c   :  { %v1533_v16 = vadd.f32 %v1532_v4, %v8744_v6  ;;  %v9341_v39 = vsel %vm4164_vm4, %v1364_v7, %v4676_v22  ;;  %v7721_v7 = vld [vmem:[#allocation5 + $0x1b0] sm:$0xf0] }
 0x24d   :  { %v1701_v1 = vpop.f32.mrf.mxu3  ;;  %v1196_v24 = vpop.f32.mrf.mxu0  ;;  %13111 = vst [vmem:[#allocation140_spill] sm:$0xff] %v9341_v39  ;;  %v7977_v39 = vld [vmem:[#allocation5 + $0x3b0] sm:$0xf0] }
 0x24e   :  { %v1197_v41 = vadd.f32 %v1196_v24, %v8734_v59  ;;  %v1702_v45 = vadd.f32 %v1701_v1, %v1533_v16 }
 0x24f   :  { %v1365_v12 = vpop.f32.mrf.mxu1 }
 0x250   :  { %v1366_v38 = vadd.f32 %v1365_v12, %v1197_v41  ;;  %v4677_v1 = vmul.f32 0.01, %v1702_v45  ;;  %vm4165_vm6 = vcmp.gt.f32.partialorder %v1702_v45, 0.0 }
 0x252   :  { %vm4172_vm5 = vcmp.gt.f32.partialorder %v1366_v38, 0.0  ;;  %v4684_v44 = vmul.f32 0.01, %v1366_v38 }
 0x253   :  { %v1534_v29 = vpop.f32.mrf.mxu2 }
 0x254   :  { %v9343_v25 = vsel %vm4172_vm5, %v1366_v38, %v4684_v44  ;;  %v1535_v3 = vadd.f32 %v1534_v29, %v8744_v6  ;;  %v8327_v38 = vld [vmem:[#allocation5 + $0x194] sm:$0xf]  ;;  %v7719_v44 = vld [vmem:[#allocation5 + $0x190] sm:$0xf] }
 0x255   :  { %13112 = vst [vmem:[#allocation141_spill] sm:$0xff] %v9343_v25  ;;  %v1703_v42 = vpop.f32.mrf.mxu3  ;;  %v1199_v4 = vpop.f32.mrf.mxu0  ;;  %v8331_v29 = vld [vmem:[#allocation5 + $0x1ac] sm:$0xf0] }
 0x256   :  { %v1200_v24 = vadd.f32 %v1199_v4, %v8734_v59  ;;  %v1704_v41 = vadd.f32 %v1703_v42, %v1535_v3  ;;  %v9353_v4 = vsel %vm4165_vm6, %v1702_v45, %v4677_v1  ;;  %v7724_v3 = vor.u32 %v8327_v38, %v7721_v7  ;;  %v8395_v7 = vld [vmem:[#allocation5 + $0x3ac] sm:$0xf0] }
 0x257   :  { %v1368_v16 = vpop.f32.mrf.mxu1  ;;  %13113 = vst [vmem:[#allocation142_spill] sm:$0xff] %v9353_v4 }
 0x258   :  { %v1369_v12 = vadd.f32 %v1368_v16, %v1200_v24  ;;  %1754 = vmatmul.bf16.gmra.mxu0 %v8686_v60  ;;  %vm4173_vm7 = vcmp.gt.f32.partialorder %v1704_v41, 0.0  ;;  %v4685_v22 = vmul.f32 0.01, %v1704_v41  ;;  %2092 = vmatmul.bf16.gmra.mxu2 %v8686_v60  ;;  %v7720_v24 = vor.u32 %v8331_v29, %v7719_v44  ;;  %v8391_v16 = vld [vmem:[#allocation5 + $0x394] sm:$0xf] }
 0x259   :  { %v7980_v52 = vor.u32 %v8391_v16, %v7977_v39  ;;  %2751 = vmatpush.bf16.msra.mxu2 %v7724_v3 }
 0x25a   :  { %1923 = vmatmul.bf16.gmra.mxu1 %v8688_v61  ;;  %2261 = vmatmul.bf16.gmra.mxu3 %v8688_v61  ;;  %v9355_v5 = vsel %vm4173_vm7, %v1704_v41, %v4685_v22  ;;  %v4692_v1 = vmul.f32 0.01, %v1369_v12  ;;  %vm4180_vm8 = vcmp.gt.f32.partialorder %v1369_v12, 0.0  ;;  %v7975_v22 = vld [vmem:[#allocation5 + $0x390] sm:$0xf] }
 0x25b   :  { %13114 = vst [vmem:[#allocation143_spill] sm:$0xff] %v9355_v5  ;;  %v1537_v42 = vpop.f32.mrf.mxu2  ;;  %2413 = vmatpush.bf16.msra.mxu0 %v7720_v24  ;;  %2920 = vmatpush.bf16.msra.mxu3 %v7980_v52  ;;  %v7976_v44 = vor.u32 %v8395_v7, %v7975_v22 }
 0x25c   :  { %v1538_v11 = vadd.f32 %v1537_v42, %v8744_v6  ;;  %v9361_v42 = vsel %vm4180_vm8, %v1369_v12, %v4692_v1 }
 0x25d   :  { %v1706_v23 = vpop.f32.mrf.mxu3  ;;  %v1201_v56 = vpop.f32.mrf.mxu0  ;;  %13115 = vst [vmem:[#allocation144_spill] sm:$0xff] %v9361_v42  ;;  %2582 = vmatpush.bf16.msra.mxu1 %v7976_v44 }
 0x25e   :  { %v1202_v61 = vadd.f32 %v1201_v56, %v8734_v59  ;;  %v1707_v45 = vadd.f32 %v1706_v23, %v1538_v11 }
 0x25f   :  { %v1370_v60 = vpop.f32.mrf.mxu1 }
 0x260   :  { %v1371_v41 = vadd.f32 %v1370_v60, %v1202_v61  ;;  %v4693_v23 = vmul.f32 0.01, %v1707_v45  ;;  %vm4181_vm10 = vcmp.gt.f32.partialorder %v1707_v45, 0.0 }
 0x262   :  { %vm4188_vm9 = vcmp.gt.f32.partialorder %v1371_v41, 0.0  ;;  %v4700_v38 = vmul.f32 0.01, %v1371_v41  ;;  %v9373_v16 = vsel %vm4181_vm10, %v1707_v45, %v4693_v23 }
 0x263   :  { %v1539_v29 = vpop.f32.mrf.mxu2  ;;  %13117 = vst [vmem:[#allocation146_spill] sm:$0xff] %v9373_v16  ;;  %v8383_v16 = vld [vmem:[#allocation5 + $0x354] sm:$0xf] }
 0x264   :  { %v9363_v25 = vsel %vm4188_vm9, %v1371_v41, %v4700_v38  ;;  %v1540_v56 = vadd.f32 %v1539_v29, %v8744_v6 }
 0x265   :  { %13116 = vst [vmem:[#allocation145_spill] sm:$0xff] %v9363_v25  ;;  %v1708_v39 = vpop.f32.mrf.mxu3  ;;  %v1204_v3 = vpop.f32.mrf.mxu0 }
 0x266   :  { %v1205_v60 = vadd.f32 %v1204_v3, %v8734_v59  ;;  %v1709_v11 = vadd.f32 %v1708_v39, %v1540_v56 }
 0x267   :  { %v1373_v61 = vpop.f32.mrf.mxu1 }
 0x268   :  { %v1374_v24 = vadd.f32 %v1373_v61, %v1205_v60  ;;  %1759 = vmatmul.bf16.gmra.mxu0 %v8694_v14  ;;  %vm4189_vm11 = vcmp.gt.f32.partialorder %v1709_v11, 0.0  ;;  %v4701_v12 = vmul.f32 0.01, %v1709_v11  ;;  %2097 = vmatmul.bf16.gmra.mxu2 %v8694_v14 }
 0x26a   :  { %1928 = vmatmul.bf16.gmra.mxu1 %v8696_v15  ;;  %2266 = vmatmul.bf16.gmra.mxu3 %v8696_v15  ;;  %v9375_v1 = vsel %vm4189_vm11, %v1709_v11, %v4701_v12  ;;  %v4708_v3 = vmul.f32 0.01, %v1374_v24  ;;  %vm4196_vm12 = vcmp.gt.f32.partialorder %v1374_v24, 0.0 }
 0x26b   :  { %13118 = vst [vmem:[#allocation147_spill] sm:$0xff] %v9375_v1  ;;  %v1542_v41 = vpop.f32.mrf.mxu2  ;;  %v7945_v1 = vld [vmem:[#allocation5 + $0x370] sm:$0xf0] }
 0x26c   :  { %v1543_v38 = vadd.f32 %v1542_v41, %v8744_v6  ;;  %v9381_v23 = vsel %vm4196_vm12, %v1374_v24, %v4708_v3 }
 0x26d   :  { %v1711_v7 = vpop.f32.mrf.mxu3  ;;  %v1206_v44 = vpop.f32.mrf.mxu0  ;;  %13119 = vst [vmem:[#allocation148_spill] sm:$0xff] %v9381_v23 }
 0x26e   :  { %v1207_v29 = vadd.f32 %v1206_v44, %v8734_v59  ;;  %v1712_v39 = vadd.f32 %v1711_v7, %v1543_v38 }
 0x26f   :  { %v1375_v56 = vpop.f32.mrf.mxu1 }
 0x270   :  { %v1376_v60 = vadd.f32 %v1375_v56, %v1207_v29  ;;  %v4709_v7 = vmul.f32 0.01, %v1712_v39  ;;  %vm4197_vm14 = vcmp.gt.f32.partialorder %v1712_v39, 0.0 }
 0x272   :  { %vm4204_vm13 = vcmp.gt.f32.partialorder %v1376_v60, 0.0  ;;  %v4716_v45 = vmul.f32 0.01, %v1376_v60  ;;  %v9393_v3 = vsel %vm4197_vm14, %v1712_v39, %v4709_v7 }
 0x273   :  { %v1544_v61 = vpop.f32.mrf.mxu2  ;;  %13121 = vst [vmem:[#allocation150_spill] sm:$0xff] %v9393_v3 }
 0x274   :  { %v9383_v11 = vsel %vm4204_vm13, %v1376_v60, %v4716_v45  ;;  %v1545_v12 = vadd.f32 %v1544_v61, %v8744_v6 }
 0x275   :  { %13120 = vst [vmem:[#allocation149_spill] sm:$0xff] %v9383_v11  ;;  %v1713_v22 = vpop.f32.mrf.mxu3  ;;  %v1209_v41 = vpop.f32.mrf.mxu0 }
 0x276   :  { %v1210_v44 = vadd.f32 %v1209_v41, %v8734_v59  ;;  %v1714_v29 = vadd.f32 %v1713_v22, %v1545_v12 }
 0x277   :  { %v1378_v38 = vpop.f32.mrf.mxu1 }
 0x278   :  { %v1379_v56 = vadd.f32 %v1378_v38, %v1210_v44  ;;  %1764 = vmatmul.bf16.gmra.mxu0 %v8702_v20  ;;  %vm4205_vm15 = vcmp.gt.f32.partialorder %v1714_v29, 0.0  ;;  %v4717_v24 = vmul.f32 0.01, %v1714_v29  ;;  %2102 = vmatmul.bf16.gmra.mxu2 %v8702_v20 }
 0x27a   :  { %1933 = vmatmul.bf16.gmra.mxu1 %v8704_v21  ;;  %2271 = vmatmul.bf16.gmra.mxu3 %v8704_v21  ;;  %v9395_v60 = vsel %vm4205_vm15, %v1714_v29, %v4717_v24  ;;  %v4724_v23 = vmul.f32 0.01, %v1379_v56  ;;  %vm4212_vm0 = vcmp.gt.f32.partialorder %v1379_v56, 0.0 }
 0x27b   :  { %13122 = vst [vmem:[#allocation151_spill] sm:$0xff] %v9395_v60  ;;  %v1547_v45 = vpop.f32.mrf.mxu2 }
 0x27c   :  { %v1548_v61 = vadd.f32 %v1547_v45, %v8744_v6  ;;  %v9401_v29 = vsel %vm4212_vm0, %v1379_v56, %v4724_v23 }
 0x27d   :  { %v1716_v12 = vpop.f32.mrf.mxu3  ;;  %v1211_v41 = vpop.f32.mrf.mxu0  ;;  %13123 = vst [vmem:[#allocation152_spill] sm:$0xff] %v9401_v29 }
 0x27e   :  { %v1212_v44 = vadd.f32 %v1211_v41, %v8734_v59  ;;  %v1717_v52 = vadd.f32 %v1716_v12, %v1548_v61 }
 0x27f   :  { %v1380_v38 = vpop.f32.mrf.mxu1 }
 0x280   :  { %v1381_v11 = vadd.f32 %v1380_v38, %v1212_v44  ;;  %v4725_v12 = vmul.f32 0.01, %v1717_v52  ;;  %vm4213_vm2 = vcmp.gt.f32.partialorder %v1717_v52, 0.0 }
 0x282   :  { %vm4220_vm1 = vcmp.gt.f32.partialorder %v1381_v11, 0.0  ;;  %v4732_v39 = vmul.f32 0.01, %v1381_v11 }
 0x283   :  { %v1549_v7 = vpop.f32.mrf.mxu2 }
 0x284   :  { %v9403_v24 = vsel %vm4220_vm1, %v1381_v11, %v4732_v39  ;;  %v1550_v22 = vadd.f32 %v1549_v7, %v8744_v6  ;;  %v9413_v11 = vsel %vm4213_vm2, %v1717_v52, %v4725_v12 }
 0x285   :  { %13124 = vst [vmem:[#allocation153_spill] sm:$0xff] %v9403_v24  ;;  %v1718_v3 = vpop.f32.mrf.mxu3  ;;  %v1214_v45 = vpop.f32.mrf.mxu0 }
 0x286   :  { %v1215_v41 = vadd.f32 %v1214_v45, %v8734_v59  ;;  %v1719_v44 = vadd.f32 %v1718_v3, %v1550_v22  ;;  %13125 = vst [vmem:[#allocation154_spill] sm:$0xff] %v9413_v11 }
 0x287   :  { %v1383_v61 = vpop.f32.mrf.mxu1 }
 0x288   :  { %v1384_v38 = vadd.f32 %v1383_v61, %v1215_v41  ;;  %1769 = vmatmul.bf16.gmra.mxu0 %v8710_v26  ;;  %vm4221_vm3 = vcmp.gt.f32.partialorder %v1719_v44, 0.0  ;;  %v4733_v23 = vmul.f32 0.01, %v1719_v44  ;;  %2107 = vmatmul.bf16.gmra.mxu2 %v8710_v26 }
 0x28a   :  { %1938 = vmatmul.bf16.gmra.mxu1 %v8712_v27  ;;  %2276 = vmatmul.bf16.gmra.mxu3 %v8712_v27  ;;  %v9415_v56 = vsel %vm4221_vm3, %v1719_v44, %v4733_v23  ;;  %v4740_v29 = vmul.f32 0.01, %v1384_v38  ;;  %vm4228_vm4 = vcmp.gt.f32.partialorder %v1384_v38, 0.0 }
 0x28b   :  { %13126 = vst [vmem:[#allocation155_spill] sm:$0xff] %v9415_v56  ;;  %v1552_v39 = vpop.f32.mrf.mxu2 }
 0x28c   :  { %v1553_v22 = vadd.f32 %v1552_v39, %v8744_v6  ;;  %v9421_v44 = vsel %vm4228_vm4, %v1384_v38, %v4740_v29 }
 0x28d   :  { %v1721_v7 = vpop.f32.mrf.mxu3  ;;  %v1216_v45 = vpop.f32.mrf.mxu0  ;;  %13127 = vst [vmem:[#allocation156_spill] sm:$0xff] %v9421_v44 }
 0x28e   :  { %v1217_v41 = vadd.f32 %v1216_v45, %v8734_v59  ;;  %v1722_v60 = vadd.f32 %v1721_v7, %v1553_v22 }
 0x28f   :  { %v1385_v61 = vpop.f32.mrf.mxu1 }
 0x290   :  { %v1386_v24 = vadd.f32 %v1385_v61, %v1217_v41  ;;  %v4741_v7 = vmul.f32 0.01, %v1722_v60  ;;  %vm4229_vm6 = vcmp.gt.f32.partialorder %v1722_v60, 0.0 }
 0x292   :  { %vm4236_vm5 = vcmp.gt.f32.partialorder %v1386_v24, 0.0  ;;  %v4748_v52 = vmul.f32 0.01, %v1386_v24 }
 0x293   :  { %v1554_v12 = vpop.f32.mrf.mxu2 }
 0x294   :  { %v9423_v23 = vsel %vm4236_vm5, %v1386_v24, %v4748_v52  ;;  %v1555_v3 = vadd.f32 %v1554_v12, %v8744_v6  ;;  %v9433_v24 = vsel %vm4229_vm6, %v1722_v60, %v4741_v7  ;;  %v8319_v12 = vld [vmem:[#allocation5 + $0x154] sm:$0xf] }
 0x295   :  { %13128 = vst [vmem:[#allocation157_spill] sm:$0xff] %v9423_v23  ;;  %v1723_v11 = vpop.f32.mrf.mxu3  ;;  %v1219_v39 = vpop.f32.mrf.mxu0  ;;  %v8323_v23 = vld [vmem:[#allocation5 + $0x16c] sm:$0xf0] }
 0x296   :  { %v1220_v45 = vadd.f32 %v1219_v39, %v8734_v59  ;;  %v1724_v41 = vadd.f32 %v1723_v11, %v1555_v3  ;;  %13129 = vst [vmem:[#allocation158_spill] sm:$0xff] %v9433_v24  ;;  %v7689_v39 = vld [vmem:[#allocation5 + $0x170] sm:$0xf0]  ;;  %v7687_v11 = vld [vmem:[#allocation5 + $0x150] sm:$0xf] }
 0x297   :  { %v1388_v22 = vpop.f32.mrf.mxu1  ;;  %v7692_v44 = vor.u32 %v8319_v12, %v7689_v39  ;;  %v7943_v3 = vld [vmem:[#allocation5 + $0x350] sm:$0xf] }
 0x298   :  { %v1389_v61 = vadd.f32 %v1388_v22, %v1220_v45  ;;  %1774 = vmatmul.bf16.gmra.mxu0 %v8718_v32  ;;  %vm4237_vm7 = vcmp.gt.f32.partialorder %v1724_v41, 0.0  ;;  %v4749_v29 = vmul.f32 0.01, %v1724_v41  ;;  %2112 = vmatmul.bf16.gmra.mxu2 %v8718_v32  ;;  %v8387_v24 = vld [vmem:[#allocation5 + $0x36c] sm:$0xf0] }
 0x299   :  { %2752 = vmatpush.bf16.msra.mxu2 %v7692_v44  ;;  %v7944_v39 = vor.u32 %v8387_v24, %v7943_v3 }
 0x29a   :  { %1943 = vmatmul.bf16.gmra.mxu1 %v8720_v33  ;;  %2281 = vmatmul.bf16.gmra.mxu3 %v8720_v33  ;;  %v9435_v38 = vsel %vm4237_vm7, %v1724_v41, %v4749_v29  ;;  %v7688_v41 = vor.u32 %v8323_v23, %v7687_v11  ;;  %v7948_v29 = vor.u32 %v8383_v16, %v7945_v1  ;;  %v4756_v25 = vmul.f32 0.01, %v1389_v61 }
 0x29b   :  { %13130 = vst [vmem:[#allocation159_spill] sm:$0xff] %v9435_v38  ;;  %v1557_v52 = vpop.f32.mrf.mxu2  ;;  %vm4244_vm8 = vcmp.gt.f32.partialorder %v1389_v61, 0.0  ;;  %2583 = vmatpush.bf16.msra.mxu1 %v7944_v39 }
 0x29c   :  { %v1558_v45 = vadd.f32 %v1557_v52, %v8744_v6  ;;  %2414 = vmatpush.bf16.msra.mxu0 %v7688_v41  ;;  %2921 = vmatpush.bf16.msra.mxu3 %v7948_v29  ;;  %v9441_v38 = vsel %vm4244_vm8, %v1389_v61, %v4756_v25 }
 0x29d   :  { %v1726_v22 = vpop.f32.mrf.mxu3  ;;  %v1221_v56 = vpop.f32.mrf.mxu0  ;;  %13131 = vst [vmem:[#allocation160_spill] sm:$0xff] %v9441_v38  ;;  %v7913_v38 = vld [vmem:[#allocation5 + $0x330] sm:$0xf0] }
 0x29e   :  { %v1222_v60 = vadd.f32 %v1221_v56, %v8734_v59  ;;  %v1727_v42 = vadd.f32 %v1726_v22, %v1558_v45 }
 0x29f   :  { %v1390_v7 = vpop.f32.mrf.mxu1 }
 0x2a0   :  { %v1391_v4 = vadd.f32 %v1390_v7, %v1222_v60  ;;  %v4757_v45 = vmul.f32 0.01, %v1727_v42  ;;  %vm4245_vm10 = vcmp.gt.f32.partialorder %v1727_v42, 0.0 }
 0x2a2   :  { %vm4252_vm9 = vcmp.gt.f32.partialorder %v1391_v4, 0.0  ;;  %v4764_v52 = vmul.f32 0.01, %v1391_v4 }
 0x2a3   :  { %v1559_v12 = vpop.f32.mrf.mxu2 }
 0x2a4   :  { %v9443_v5 = vsel %vm4252_vm9, %v1391_v4, %v4764_v52  ;;  %v1560_v56 = vadd.f32 %v1559_v12, %v8744_v6  ;;  %v9453_v4 = vsel %vm4245_vm10, %v1727_v42, %v4757_v45 }
 0x2a5   :  { %13132 = vst [vmem:[#allocation161_spill] sm:$0xff] %v9443_v5  ;;  %v1728_v16 = vpop.f32.mrf.mxu3  ;;  %v1224_v1 = vpop.f32.mrf.mxu0 }
 0x2a6   :  { %v1225_v23 = vadd.f32 %v1224_v1, %v8734_v59  ;;  %v1729_v22 = vadd.f32 %v1728_v16, %v1560_v56  ;;  %13133 = vst [vmem:[#allocation162_spill] sm:$0xff] %v9453_v4  ;;  %v8483_v1 = vld [vmem:[#allocation7] sm:$0xff] }
 0x2a7   :  { %v1393_v11 = vpop.f32.mrf.mxu1 }
 0x2a8   :  { %v1394_v60 = vadd.f32 %v1393_v11, %v1225_v23  ;;  %1779 = vmatmul.bf16.gmra.mxu0 %v8726_v51  ;;  %vm4253_vm11 = vcmp.gt.f32.partialorder %v1729_v22, 0.0  ;;  %v4765_v25 = vmul.f32 0.01, %v1729_v22  ;;  %2117 = vmatmul.bf16.gmra.mxu2 %v8726_v51  ;;  %v9461_v23 = vperm.slane %v8483_v1, 2 }
 0x2aa   :  { %1948 = vmatmul.bf16.gmra.mxu1 %v8728_v53  ;;  %2286 = vmatmul.bf16.gmra.mxu3 %v8728_v53  ;;  %v9455_v61 = vsel %vm4253_vm11, %v1729_v22, %v4765_v25  ;;  %v4772_v56 = vmul.f32 0.01, %v1394_v60  ;;  %vm4260_vm12 = vcmp.gt.f32.partialorder %v1394_v60, 0.0 }
 0x2ab   :  { %13134 = vst [vmem:[#allocation163_spill] sm:$0xff] %v9455_v61  ;;  %v1562_v24 = vpop.f32.mrf.mxu2 }
 0x2ac   :  { %v1563_v7 = vadd.f32 %v1562_v24, %v8744_v6  ;;  %v9463_v45 = vsel %vm4260_vm12, %v1394_v60, %v4772_v56 }
 0x2ad   :  { %v1731_v41 = vpop.f32.mrf.mxu3  ;;  %v1226_v29 = vpop.f32.mrf.mxu0  ;;  %13135 = vst [vmem:[#allocation164_spill] sm:$0xff] %v9463_v45 }
 0x2ae   :  { %v1227_v52 = vadd.f32 %v1226_v29, %v8734_v59  ;;  %v1732_v39 = vadd.f32 %v1731_v41, %v1563_v7 }
 0x2af   :  { %v1395_v12 = vpop.f32.mrf.mxu1 }
 0x2b0   :  { %v1396_v16 = vadd.f32 %v1395_v12, %v1227_v52  ;;  %v4773_v29 = vmul.f32 0.01, %v1732_v39  ;;  %vm4261_vm14 = vcmp.gt.f32.partialorder %v1732_v39, 0.0 }
 0x2b2   :  { %vm4268_vm13 = vcmp.gt.f32.partialorder %v1396_v16, 0.0  ;;  %v4780_v42 = vmul.f32 0.01, %v1396_v16  ;;  %v9477_v56 = vsel %vm4261_vm14, %v1732_v39, %v4773_v29 }
 0x2b3   :  { %v1564_v11 = vpop.f32.mrf.mxu2  ;;  %13137 = vst [vmem:[#allocation166_spill] sm:$0xff] %v9477_v56 }
 0x2b4   :  { %v9465_v22 = vsel %vm4268_vm13, %v1396_v16, %v4780_v42  ;;  %v1565_v25 = vadd.f32 %v1564_v11, %v8744_v6  ;;  %v9474_v6 = vperm.slane %v8483_v1, 3 }
 0x2b5   :  { %13136 = vst [vmem:[#allocation165_spill] sm:$0xff] %v9465_v22  ;;  %v1733_v24 = vpop.f32.mrf.mxu3  ;;  %v1745_v3 = vpop.f32.mrf.mxu0 }
 0x2b6   :  { %v1746_v7 = vadd.f32 %v1745_v3, %v9461_v23  ;;  %v1734_v52 = vadd.f32 %v1733_v24, %v1565_v25 }
 0x2b7   :  { %v1914_v41 = vpop.f32.mrf.mxu1 }
 0x2b8   :  { %v1915_v12 = vadd.f32 %v1914_v41, %v1746_v7  ;;  %1784 = vmatmul.bf16.gmra.mxu0 %v8736_v0  ;;  %vm4269_vm15 = vcmp.gt.f32.partialorder %v1734_v52, 0.0  ;;  %v4781_v60 = vmul.f32 0.01, %v1734_v52  ;;  %2122 = vmatmul.bf16.gmra.mxu2 %v8736_v0 }
 0x2ba   :  { %1953 = vmatmul.bf16.gmra.mxu1 %v8738_v2  ;;  %2291 = vmatmul.bf16.gmra.mxu3 %v8738_v2  ;;  %v9479_v3 = vsel %vm4269_vm15, %v1734_v52, %v4781_v60  ;;  %v4278_v1 = vmul.f32 0.01, %v1915_v12  ;;  %vm3766_vm0 = vcmp.gt.f32.partialorder %v1915_v12, 0.0 }
 0x2bb   :  { %13138 = vst [vmem:[#allocation167_spill] sm:$0xff] %v9479_v3  ;;  %v2083_v16 = vpop.f32.mrf.mxu2 }
 0x2bc   :  { %v2084_v11 = vadd.f32 %v2083_v16, %v9474_v6  ;;  %v9485_v29 = vsel %vm3766_vm0, %v1915_v12, %v4278_v1 }
 0x2bd   :  { %v2252_v25 = vpop.f32.mrf.mxu3  ;;  %v1747_v24 = vpop.f32.mrf.mxu0  ;;  %13139 = vst [vmem:[#allocation168_spill] sm:$0xff] %v9485_v29 }
 0x2be   :  { %v1748_v7 = vadd.f32 %v1747_v24, %v9461_v23  ;;  %v2253_v59 = vadd.f32 %v2252_v25, %v2084_v11 }
 0x2bf   :  { %v1916_v41 = vpop.f32.mrf.mxu1 }
 0x2c0   :  { %v1917_v44 = vadd.f32 %v1916_v41, %v1748_v7  ;;  %v4279_v25 = vmul.f32 0.01, %v2253_v59  ;;  %vm3767_vm2 = vcmp.gt.f32.partialorder %v2253_v59, 0.0 }
 0x2c2   :  { %vm3774_vm1 = vcmp.gt.f32.partialorder %v1917_v44, 0.0  ;;  %v4286_v39 = vmul.f32 0.01, %v1917_v44  ;;  %v9497_v12 = vsel %vm3767_vm2, %v2253_v59, %v4279_v25 }
 0x2c3   :  { %v2085_v60 = vpop.f32.mrf.mxu2  ;;  %13141 = vst [vmem:[#allocation170_spill] sm:$0xff] %v9497_v12 }
 0x2c4   :  { %v9487_v52 = vsel %vm3774_vm1, %v1917_v44, %v4286_v39  ;;  %v2086_v16 = vadd.f32 %v2085_v60, %v9474_v6 }
 0x2c5   :  { %13140 = vst [vmem:[#allocation169_spill] sm:$0xff] %v9487_v52  ;;  %v2254_v56 = vpop.f32.mrf.mxu3  ;;  %v1750_v3 = vpop.f32.mrf.mxu0 }
 0x2c6   :  { %v1751_v24 = vadd.f32 %v1750_v3, %v9461_v23  ;;  %v2255_v7 = vadd.f32 %v2254_v56, %v2086_v16 }
 0x2c7   :  { %v1919_v11 = vpop.f32.mrf.mxu1 }
 0x2c8   :  { %v1920_v41 = vadd.f32 %v1919_v11, %v1751_v24  ;;  %1789 = vmatmul.bf16.gmra.mxu0 %v8753_v30  ;;  %vm3775_vm3 = vcmp.gt.f32.partialorder %v2255_v7, 0.0  ;;  %v4287_v44 = vmul.f32 0.01, %v2255_v7  ;;  %2127 = vmatmul.bf16.gmra.mxu2 %v8753_v30 }
 0x2ca   :  { %1958 = vmatmul.bf16.gmra.mxu1 %v8758_v37  ;;  %2296 = vmatmul.bf16.gmra.mxu3 %v8758_v37  ;;  %v9499_v1 = vsel %vm3775_vm3, %v2255_v7, %v4287_v44  ;;  %v4294_v45 = vmul.f32 0.01, %v1920_v41  ;;  %vm3782_vm4 = vcmp.gt.f32.partialorder %v1920_v41, 0.0 }
 0x2cb   :  { %13142 = vst [vmem:[#allocation171_spill] sm:$0xff] %v9499_v1  ;;  %v2088_v56 = vpop.f32.mrf.mxu2 }
 0x2cc   :  { %v2089_v39 = vadd.f32 %v2088_v56, %v9474_v6  ;;  %v9505_v7 = vsel %vm3782_vm4, %v1920_v41, %v4294_v45  ;;  %v7657_v41 = vld [vmem:[#allocation5 + $0x130] sm:$0xf0] }
 0x2cd   :  { %v2257_v60 = vpop.f32.mrf.mxu3  ;;  %v1752_v16 = vpop.f32.mrf.mxu0  ;;  %13143 = vst [vmem:[#allocation172_spill] sm:$0xff] %v9505_v7 }
 0x2ce   :  { %v1753_v24 = vadd.f32 %v1752_v16, %v9461_v23  ;;  %v2258_v42 = vadd.f32 %v2257_v60, %v2089_v39 }
 0x2cf   :  { %v1921_v11 = vpop.f32.mrf.mxu1 }
 0x2d0   :  { %v1922_v22 = vadd.f32 %v1921_v11, %v1753_v24  ;;  %v4295_v60 = vmul.f32 0.01, %v2258_v42  ;;  %vm3783_vm6 = vcmp.gt.f32.partialorder %v2258_v42, 0.0 }
 0x2d2   :  { %vm3790_vm5 = vcmp.gt.f32.partialorder %v1922_v22, 0.0  ;;  %v4302_v59 = vmul.f32 0.01, %v1922_v22 }
 0x2d3   :  { %v2090_v25 = vpop.f32.mrf.mxu2 }
 0x2d4   :  { %v9507_v44 = vsel %vm3790_vm5, %v1922_v22, %v4302_v59  ;;  %v2091_v3 = vadd.f32 %v2090_v25, %v9474_v6  ;;  %v8311_v22 = vld [vmem:[#allocation5 + $0x114] sm:$0xf]  ;;  %v7655_v59 = vld [vmem:[#allocation5 + $0x110] sm:$0xf] }
 0x2d5   :  { %13144 = vst [vmem:[#allocation173_spill] sm:$0xff] %v9507_v44  ;;  %v2259_v4 = vpop.f32.mrf.mxu3  ;;  %v1755_v56 = vpop.f32.mrf.mxu0  ;;  %v8315_v25 = vld [vmem:[#allocation5 + $0x12c] sm:$0xf0] }
 0x2d6   :  { %v1756_v16 = vadd.f32 %v1755_v56, %v9461_v23  ;;  %v2260_v24 = vadd.f32 %v2259_v4, %v2091_v3  ;;  %v9517_v56 = vsel %vm3783_vm6, %v2258_v42, %v4295_v60  ;;  %v7660_v3 = vor.u32 %v8311_v22, %v7657_v41  ;;  %v8379_v41 = vld [vmem:[#allocation5 + $0x32c] sm:$0xf0] }
 0x2d7   :  { %v1924_v39 = vpop.f32.mrf.mxu1  ;;  %13145 = vst [vmem:[#allocation174_spill] sm:$0xff] %v9517_v56 }
 0x2d8   :  { %v1925_v11 = vadd.f32 %v1924_v39, %v1756_v16  ;;  %1794 = vmatmul.bf16.gmra.mxu0 %v8773_v10  ;;  %vm3791_vm7 = vcmp.gt.f32.partialorder %v2260_v24, 0.0  ;;  %v4303_v45 = vmul.f32 0.01, %v2260_v24  ;;  %2132 = vmatmul.bf16.gmra.mxu2 %v8773_v10  ;;  %v7656_v16 = vor.u32 %v8315_v25, %v7655_v59  ;;  %v8375_v39 = vld [vmem:[#allocation5 + $0x314] sm:$0xf] }
 0x2d9   :  { %v7916_v1 = vor.u32 %v8375_v39, %v7913_v38  ;;  %2753 = vmatpush.bf16.msra.mxu2 %v7660_v3 }
 0x2da   :  { %1963 = vmatmul.bf16.gmra.mxu1 %v8780_v18  ;;  %2301 = vmatmul.bf16.gmra.mxu3 %v8780_v18  ;;  %v9519_v61 = vsel %vm3791_vm7, %v2260_v24, %v4303_v45  ;;  %v4310_v60 = vmul.f32 0.01, %v1925_v11  ;;  %vm3798_vm8 = vcmp.gt.f32.partialorder %v1925_v11, 0.0  ;;  %v7911_v45 = vld [vmem:[#allocation5 + $0x310] sm:$0xf] }
 0x2db   :  { %13146 = vst [vmem:[#allocation175_spill] sm:$0xff] %v9519_v61  ;;  %v2093_v4 = vpop.f32.mrf.mxu2  ;;  %2415 = vmatpush.bf16.msra.mxu0 %v7656_v16  ;;  %2922 = vmatpush.bf16.msra.mxu3 %v7916_v1  ;;  %v7912_v59 = vor.u32 %v8379_v41, %v7911_v45 }
 0x2dc   :  { %v2094_v7 = vadd.f32 %v2093_v4, %v9474_v6  ;;  %v9525_v4 = vsel %vm3798_vm8, %v1925_v11, %v4310_v60 }
 0x2dd   :  { %v2262_v44 = vpop.f32.mrf.mxu3  ;;  %v1757_v12 = vpop.f32.mrf.mxu0  ;;  %13147 = vst [vmem:[#allocation176_spill] sm:$0xff] %v9525_v4  ;;  %2584 = vmatpush.bf16.msra.mxu1 %v7912_v59 }
 0x2de   :  { %v1758_v29 = vadd.f32 %v1757_v12, %v9461_v23  ;;  %v2263_v42 = vadd.f32 %v2262_v44, %v2094_v7 }
 0x2df   :  { %v1926_v52 = vpop.f32.mrf.mxu1 }
 0x2e0   :  { %v1927_v24 = vadd.f32 %v1926_v52, %v1758_v29  ;;  %v4311_v7 = vmul.f32 0.01, %v2263_v42  ;;  %vm3799_vm10 = vcmp.gt.f32.partialorder %v2263_v42, 0.0 }
 0x2e2   :  { %vm3806_vm9 = vcmp.gt.f32.partialorder %v1927_v24, 0.0  ;;  %v4318_v22 = vmul.f32 0.01, %v1927_v24  ;;  %v9537_v39 = vsel %vm3799_vm10, %v2263_v42, %v4311_v7 }
 0x2e3   :  { %v2095_v25 = vpop.f32.mrf.mxu2  ;;  %13149 = vst [vmem:[#allocation178_spill] sm:$0xff] %v9537_v39 }
 0x2e4   :  { %v9527_v5 = vsel %vm3806_vm9, %v1927_v24, %v4318_v22  ;;  %v2096_v38 = vadd.f32 %v2095_v25, %v9474_v6 }
 0x2e5   :  { %13148 = vst [vmem:[#allocation177_spill] sm:$0xff] %v9527_v5  ;;  %v2264_v12 = vpop.f32.mrf.mxu3  ;;  %v1760_v3 = vpop.f32.mrf.mxu0 }
 0x2e6   :  { %v1761_v29 = vadd.f32 %v1760_v3, %v9461_v23  ;;  %v2265_v44 = vadd.f32 %v2264_v12, %v2096_v38 }
 0x2e7   :  { %v1929_v52 = vpop.f32.mrf.mxu1 }
 0x2e8   :  { %v1930_v16 = vadd.f32 %v1929_v52, %v1761_v29  ;;  %1799 = vmatmul.bf16.gmra.mxu0 %v8797_v36  ;;  %vm3807_vm11 = vcmp.gt.f32.partialorder %v2265_v44, 0.0  ;;  %v4319_v11 = vmul.f32 0.01, %v2265_v44  ;;  %2137 = vmatmul.bf16.gmra.mxu2 %v8797_v36 }
 0x2ea   :  { %1968 = vmatmul.bf16.gmra.mxu1 %v8804_v50  ;;  %2306 = vmatmul.bf16.gmra.mxu3 %v8804_v50  ;;  %v9539_v60 = vsel %vm3807_vm11, %v2265_v44, %v4319_v11  ;;  %v4326_v3 = vmul.f32 0.01, %v1930_v16  ;;  %vm3814_vm12 = vcmp.gt.f32.partialorder %v1930_v16, 0.0 }
 0x2eb   :  { %13150 = vst [vmem:[#allocation179_spill] sm:$0xff] %v9539_v60  ;;  %v2098_v24 = vpop.f32.mrf.mxu2 }
 0x2ec   :  { %v2099_v22 = vadd.f32 %v2098_v24, %v9474_v6  ;;  %v9545_v7 = vsel %vm3814_vm12, %v1930_v16, %v4326_v3 }
 0x2ed   :  { %v2267_v41 = vpop.f32.mrf.mxu3  ;;  %v1762_v59 = vpop.f32.mrf.mxu0  ;;  %13151 = vst [vmem:[#allocation180_spill] sm:$0xff] %v9545_v7 }
 0x2ee   :  { %v1763_v25 = vadd.f32 %v1762_v59, %v9461_v23  ;;  %v2268_v12 = vadd.f32 %v2267_v41, %v2099_v22 }
 0x2ef   :  { %v1931_v38 = vpop.f32.mrf.mxu1 }
 0x2f0   :  { %v1932_v29 = vadd.f32 %v1931_v38, %v1763_v25  ;;  %v4327_v41 = vmul.f32 0.01, %v2268_v12  ;;  %vm3815_vm14 = vcmp.gt.f32.partialorder %v2268_v12, 0.0 }
 0x2f2   :  { %vm3822_vm13 = vcmp.gt.f32.partialorder %v1932_v29, 0.0  ;;  %v4334_v42 = vmul.f32 0.01, %v1932_v29  ;;  %v9557_v3 = vsel %vm3815_vm14, %v2268_v12, %v4327_v41 }
 0x2f3   :  { %v2100_v52 = vpop.f32.mrf.mxu2  ;;  %13153 = vst [vmem:[#allocation182_spill] sm:$0xff] %v9557_v3 }
 0x2f4   :  { %v9547_v44 = vsel %vm3822_vm13, %v1932_v29, %v4334_v42  ;;  %v2101_v11 = vadd.f32 %v2100_v52, %v9474_v6 }
 0x2f5   :  { %13152 = vst [vmem:[#allocation181_spill] sm:$0xff] %v9547_v44  ;;  %v2269_v45 = vpop.f32.mrf.mxu3  ;;  %v1765_v24 = vpop.f32.mrf.mxu0 }
 0x2f6   :  { %v1766_v59 = vadd.f32 %v1765_v24, %v9461_v23  ;;  %v2270_v25 = vadd.f32 %v2269_v45, %v2101_v11 }
 0x2f7   :  { %v1934_v22 = vpop.f32.mrf.mxu1 }
 0x2f8   :  { %v1935_v38 = vadd.f32 %v1934_v22, %v1766_v59  ;;  %1804 = vmatmul.bf16.gmra.mxu0 %v8821_v58  ;;  %vm3823_vm15 = vcmp.gt.f32.partialorder %v2270_v25, 0.0  ;;  %v4335_v16 = vmul.f32 0.01, %v2270_v25  ;;  %2142 = vmatmul.bf16.gmra.mxu2 %v8821_v58 }
 0x2fa   :  { %1973 = vmatmul.bf16.gmra.mxu1 %v8828_v13  ;;  %2311 = vmatmul.bf16.gmra.mxu3 %v8828_v13  ;;  %v9559_v29 = vsel %vm3823_vm15, %v2270_v25, %v4335_v16  ;;  %v4342_v7 = vmul.f32 0.01, %v1935_v38  ;;  %vm3830_vm0 = vcmp.gt.f32.partialorder %v1935_v38, 0.0 }
 0x2fb   :  { %13154 = vst [vmem:[#allocation183_spill] sm:$0xff] %v9559_v29  ;;  %v2103_v42 = vpop.f32.mrf.mxu2 }
 0x2fc   :  { %v2104_v52 = vadd.f32 %v2103_v42, %v9474_v6  ;;  %v9565_v25 = vsel %vm3830_vm0, %v1935_v38, %v4342_v7 }
 0x2fd   :  { %v2272_v11 = vpop.f32.mrf.mxu3  ;;  %v1767_v24 = vpop.f32.mrf.mxu0  ;;  %13155 = vst [vmem:[#allocation184_spill] sm:$0xff] %v9565_v25 }
 0x2fe   :  { %v1768_v59 = vadd.f32 %v1767_v24, %v9461_v23  ;;  %v2273_v1 = vadd.f32 %v2272_v11, %v2104_v52 }
 0x2ff   :  { %v1936_v22 = vpop.f32.mrf.mxu1 }
 0x300   :  { %v1937_v44 = vadd.f32 %v1936_v22, %v1768_v59  ;;  %v4343_v11 = vmul.f32 0.01, %v2273_v1  ;;  %vm3831_vm2 = vcmp.gt.f32.partialorder %v2273_v1, 0.0 }
 0x302   :  { %vm3838_vm1 = vcmp.gt.f32.partialorder %v1937_v44, 0.0  ;;  %v4350_v12 = vmul.f32 0.01, %v1937_v44 }
 0x303   :  { %v2105_v41 = vpop.f32.mrf.mxu2 }
 0x304   :  { %v9567_v16 = vsel %vm3838_vm1, %v1937_v44, %v4350_v12  ;;  %v2106_v45 = vadd.f32 %v2105_v41, %v9474_v6  ;;  %v9577_v44 = vsel %vm3831_vm2, %v2273_v1, %v4343_v11 }
 0x305   :  { %13156 = vst [vmem:[#allocation185_spill] sm:$0xff] %v9567_v16  ;;  %v2274_v3 = vpop.f32.mrf.mxu3  ;;  %v1770_v42 = vpop.f32.mrf.mxu0 }
 0x306   :  { %v1771_v24 = vadd.f32 %v1770_v42, %v9461_v23  ;;  %v2275_v59 = vadd.f32 %v2274_v3, %v2106_v45  ;;  %13157 = vst [vmem:[#allocation186_spill] sm:$0xff] %v9577_v44 }
 0x307   :  { %v1939_v52 = vpop.f32.mrf.mxu1 }
 0x308   :  { %v1940_v22 = vadd.f32 %v1939_v52, %v1771_v24  ;;  %1809 = vmatmul.bf16.gmra.mxu0 %v8845_v19  ;;  %vm3839_vm3 = vcmp.gt.f32.partialorder %v2275_v59, 0.0  ;;  %v4351_v7 = vmul.f32 0.01, %v2275_v59  ;;  %2147 = vmatmul.bf16.gmra.mxu2 %v8845_v19 }
 0x30a   :  { %1978 = vmatmul.bf16.gmra.mxu1 %v8852_v49  ;;  %2316 = vmatmul.bf16.gmra.mxu3 %v8852_v49  ;;  %v9579_v38 = vsel %vm3839_vm3, %v2275_v59, %v4351_v7  ;;  %v4358_v25 = vmul.f32 0.01, %v1940_v22  ;;  %vm3846_vm4 = vcmp.gt.f32.partialorder %v1940_v22, 0.0 }
 0x30b   :  { %13158 = vst [vmem:[#allocation187_spill] sm:$0xff] %v9579_v38  ;;  %v2108_v12 = vpop.f32.mrf.mxu2 }
 0x30c   :  { %v2109_v45 = vadd.f32 %v2108_v12, %v9474_v6  ;;  %v9585_v59 = vsel %vm3846_vm4, %v1940_v22, %v4358_v25  ;;  %v7625_v22 = vld [vmem:[#allocation5 + $0xf0] sm:$0xf0] }
 0x30d   :  { %v2277_v41 = vpop.f32.mrf.mxu3  ;;  %v1772_v42 = vpop.f32.mrf.mxu0  ;;  %13159 = vst [vmem:[#allocation188_spill] sm:$0xff] %v9585_v59  ;;  %v7881_v59 = vld [vmem:[#allocation5 + $0x2f0] sm:$0xf0] }
 0x30e   :  { %v1773_v24 = vadd.f32 %v1772_v42, %v9461_v23  ;;  %v2278_v29 = vadd.f32 %v2277_v41, %v2109_v45 }
 0x30f   :  { %v1941_v52 = vpop.f32.mrf.mxu1 }
 0x310   :  { %v1942_v16 = vadd.f32 %v1941_v52, %v1773_v24  ;;  %v4359_v41 = vmul.f32 0.01, %v2278_v29  ;;  %vm3847_vm6 = vcmp.gt.f32.partialorder %v2278_v29, 0.0 }
 0x312   :  { %vm3854_vm5 = vcmp.gt.f32.partialorder %v1942_v16, 0.0  ;;  %v4366_v1 = vmul.f32 0.01, %v1942_v16 }
 0x313   :  { %v2110_v11 = vpop.f32.mrf.mxu2 }
 0x314   :  { %v9587_v7 = vsel %vm3854_vm5, %v1942_v16, %v4366_v1  ;;  %v2111_v3 = vadd.f32 %v2110_v11, %v9474_v6  ;;  %v8303_v16 = vld [vmem:[#allocation5 + $0xd4] sm:$0xf]  ;;  %v7623_v1 = vld [vmem:[#allocation5 + $0xd0] sm:$0xf] }
 0x315   :  { %13160 = vst [vmem:[#allocation189_spill] sm:$0xff] %v9587_v7  ;;  %v2279_v44 = vpop.f32.mrf.mxu3  ;;  %v1775_v12 = vpop.f32.mrf.mxu0  ;;  %v8307_v11 = vld [vmem:[#allocation5 + $0xec] sm:$0xf0] }
 0x316   :  { %v1776_v42 = vadd.f32 %v1775_v12, %v9461_v23  ;;  %v2280_v24 = vadd.f32 %v2279_v44, %v2111_v3  ;;  %v9597_v12 = vsel %vm3847_vm6, %v2278_v29, %v4359_v41  ;;  %v7628_v3 = vor.u32 %v8303_v16, %v7625_v22  ;;  %v8371_v22 = vld [vmem:[#allocation5 + $0x2ec] sm:$0xf0] }
 0x317   :  { %v1944_v45 = vpop.f32.mrf.mxu1  ;;  %13161 = vst [vmem:[#allocation190_spill] sm:$0xff] %v9597_v12 }
 0x318   :  { %v1945_v52 = vadd.f32 %v1944_v45, %v1776_v42  ;;  %1814 = vmatmul.bf16.gmra.mxu0 %v8869_v62  ;;  %vm3855_vm7 = vcmp.gt.f32.partialorder %v2280_v24, 0.0  ;;  %v4367_v25 = vmul.f32 0.01, %v2280_v24  ;;  %2152 = vmatmul.bf16.gmra.mxu2 %v8869_v62  ;;  %v7624_v42 = vor.u32 %v8307_v11, %v7623_v1  ;;  %v8367_v45 = vld [vmem:[#allocation5 + $0x2d4] sm:$0xf] }
 0x319   :  { %v7884_v5 = vor.u32 %v8367_v45, %v7881_v59  ;;  %2754 = vmatpush.bf16.msra.mxu2 %v7628_v3 }
 0x31a   :  { %1983 = vmatmul.bf16.gmra.mxu1 %v8876_v8  ;;  %2321 = vmatmul.bf16.gmra.mxu3 %v8876_v8  ;;  %v9599_v38 = vsel %vm3855_vm7, %v2280_v24, %v4367_v25  ;;  %v4374_v41 = vmul.f32 0.01, %v1945_v52  ;;  %vm3862_vm8 = vcmp.gt.f32.partialorder %v1945_v52, 0.0  ;;  %v7879_v25 = vld [vmem:[#allocation5 + $0x2d0] sm:$0xf] }
 0x31b   :  { %13162 = vst [vmem:[#allocation191_spill] sm:$0xff] %v9599_v38  ;;  %v2113_v44 = vpop.f32.mrf.mxu2  ;;  %2416 = vmatpush.bf16.msra.mxu0 %v7624_v42  ;;  %2923 = vmatpush.bf16.msra.mxu3 %v7884_v5  ;;  %v7880_v1 = vor.u32 %v8371_v22, %v7879_v25 }
 0x31c   :  { %v2114_v39 = vadd.f32 %v2113_v44, %v9474_v6  ;;  %v9605_v44 = vsel %vm3862_vm8, %v1945_v52, %v4374_v41 }
 0x31d   :  { %v2282_v60 = vpop.f32.mrf.mxu3  ;;  %v1777_v4 = vpop.f32.mrf.mxu0  ;;  %13163 = vst [vmem:[#allocation192_spill] sm:$0xff] %v9605_v44  ;;  %2585 = vmatpush.bf16.msra.mxu1 %v7880_v1 }
 0x31e   :  { %v1778_v56 = vadd.f32 %v1777_v4, %v9461_v23  ;;  %v2283_v29 = vadd.f32 %v2282_v60, %v2114_v39 }
 0x31f   :  { %v1946_v61 = vpop.f32.mrf.mxu1 }
 0x320   :  { %v1947_v24 = vadd.f32 %v1946_v61, %v1778_v56  ;;  %v4375_v39 = vmul.f32 0.01, %v2283_v29  ;;  %vm3863_vm10 = vcmp.gt.f32.partialorder %v2283_v29, 0.0 }
 0x322   :  { %vm3870_vm9 = vcmp.gt.f32.partialorder %v1947_v24, 0.0  ;;  %v4382_v16 = vmul.f32 0.01, %v1947_v24  ;;  %v9617_v45 = vsel %vm3863_vm10, %v2283_v29, %v4375_v39 }
 0x323   :  { %v2115_v11 = vpop.f32.mrf.mxu2  ;;  %13165 = vst [vmem:[#allocation194_spill] sm:$0xff] %v9617_v45 }
 0x324   :  { %v9607_v7 = vsel %vm3870_vm9, %v1947_v24, %v4382_v16  ;;  %v2116_v4 = vadd.f32 %v2115_v11, %v9474_v6 }
 0x325   :  { %13164 = vst [vmem:[#allocation193_spill] sm:$0xff] %v9607_v7  ;;  %v2284_v59 = vpop.f32.mrf.mxu3  ;;  %v1780_v3 = vpop.f32.mrf.mxu0 }
 0x326   :  { %v1781_v61 = vadd.f32 %v1780_v3, %v9461_v23  ;;  %v2285_v60 = vadd.f32 %v2284_v59, %v2116_v4 }
 0x327   :  { %v1949_v56 = vpop.f32.mrf.mxu1 }
 0x328   :  { %v1950_v42 = vadd.f32 %v1949_v56, %v1781_v61  ;;  %1819 = vmatmul.bf16.gmra.mxu0 %v8893_v31  ;;  %vm3871_vm11 = vcmp.gt.f32.partialorder %v2285_v60, 0.0  ;;  %v4383_v52 = vmul.f32 0.01, %v2285_v60  ;;  %2157 = vmatmul.bf16.gmra.mxu2 %v8893_v31 }
 0x32a   :  { %1988 = vmatmul.bf16.gmra.mxu1 %v8900_v48  ;;  %2326 = vmatmul.bf16.gmra.mxu3 %v8900_v48  ;;  %v9619_v41 = vsel %vm3871_vm11, %v2285_v60, %v4383_v52  ;;  %v4390_v3 = vmul.f32 0.01, %v1950_v42  ;;  %vm3878_vm12 = vcmp.gt.f32.partialorder %v1950_v42, 0.0 }
 0x32b   :  { %13166 = vst [vmem:[#allocation195_spill] sm:$0xff] %v9619_v41  ;;  %v2118_v24 = vpop.f32.mrf.mxu2 }
 0x32c   :  { %v2119_v16 = vadd.f32 %v2118_v24, %v9474_v6  ;;  %v9625_v39 = vsel %vm3878_vm12, %v1950_v42, %v4390_v3 }
 0x32d   :  { %v2287_v22 = vpop.f32.mrf.mxu3  ;;  %v1782_v1 = vpop.f32.mrf.mxu0  ;;  %13167 = vst [vmem:[#allocation196_spill] sm:$0xff] %v9625_v39 }
 0x32e   :  { %v1783_v11 = vadd.f32 %v1782_v1, %v9461_v23  ;;  %v2288_v59 = vadd.f32 %v2287_v22, %v2119_v16 }
 0x32f   :  { %v1951_v4 = vpop.f32.mrf.mxu1 }
 0x330   :  { %v1952_v61 = vadd.f32 %v1951_v4, %v1783_v11  ;;  %v4391_v22 = vmul.f32 0.01, %v2288_v59  ;;  %vm3879_vm14 = vcmp.gt.f32.partialorder %v2288_v59, 0.0 }
 0x332   :  { %vm3886_vm13 = vcmp.gt.f32.partialorder %v1952_v61, 0.0  ;;  %v4398_v29 = vmul.f32 0.01, %v1952_v61  ;;  %v9637_v3 = vsel %vm3879_vm14, %v2288_v59, %v4391_v22 }
 0x333   :  { %v2120_v56 = vpop.f32.mrf.mxu2  ;;  %13169 = vst [vmem:[#allocation198_spill] sm:$0xff] %v9637_v3 }
 0x334   :  { %v9627_v60 = vsel %vm3886_vm13, %v1952_v61, %v4398_v29  ;;  %v2121_v52 = vadd.f32 %v2120_v56, %v9474_v6 }
 0x335   :  { %13168 = vst [vmem:[#allocation197_spill] sm:$0xff] %v9627_v60  ;;  %v2289_v25 = vpop.f32.mrf.mxu3  ;;  %v1785_v24 = vpop.f32.mrf.mxu0 }
 0x336   :  { %v1786_v1 = vadd.f32 %v1785_v24, %v9461_v23  ;;  %v2290_v11 = vadd.f32 %v2289_v25, %v2121_v52 }
 0x337   :  { %v1954_v16 = vpop.f32.mrf.mxu1 }
 0x338   :  { %v1955_v4 = vadd.f32 %v1954_v16, %v1786_v1  ;;  %1824 = vmatmul.bf16.gmra.mxu0 %v8917_v17  ;;  %vm3887_vm15 = vcmp.gt.f32.partialorder %v2290_v11, 0.0  ;;  %v4399_v42 = vmul.f32 0.01, %v2290_v11  ;;  %2162 = vmatmul.bf16.gmra.mxu2 %v8917_v17 }
 0x33a   :  { %1993 = vmatmul.bf16.gmra.mxu1 %v8924_v57  ;;  %2331 = vmatmul.bf16.gmra.mxu3 %v8924_v57  ;;  %v9639_v61 = vsel %vm3887_vm15, %v2290_v11, %v4399_v42  ;;  %v4406_v39 = vmul.f32 0.01, %v1955_v4  ;;  %vm3894_vm0 = vcmp.gt.f32.partialorder %v1955_v4, 0.0 }
 0x33b   :  { %13170 = vst [vmem:[#allocation199_spill] sm:$0xff] %v9639_v61  ;;  %v2123_v29 = vpop.f32.mrf.mxu2 }
 0x33c   :  { %v2124_v56 = vadd.f32 %v2123_v29, %v9474_v6  ;;  %v9645_v11 = vsel %vm3894_vm0, %v1955_v4, %v4406_v39 }
 0x33d   :  { %v2292_v52 = vpop.f32.mrf.mxu3  ;;  %v1787_v24 = vpop.f32.mrf.mxu0  ;;  %13171 = vst [vmem:[#allocation200_spill] sm:$0xff] %v9645_v11 }
 0x33e   :  { %v1788_v1 = vadd.f32 %v1787_v24, %v9461_v23  ;;  %v2293_v5 = vadd.f32 %v2292_v52, %v2124_v56 }
 0x33f   :  { %v1956_v16 = vpop.f32.mrf.mxu1 }
 0x340   :  { %v1957_v60 = vadd.f32 %v1956_v16, %v1788_v1  ;;  %v4407_v52 = vmul.f32 0.01, %v2293_v5  ;;  %vm3895_vm2 = vcmp.gt.f32.partialorder %v2293_v5, 0.0 }
 0x342   :  { %vm3902_vm1 = vcmp.gt.f32.partialorder %v1957_v60, 0.0  ;;  %v4414_v59 = vmul.f32 0.01, %v1957_v60 }
 0x343   :  { %v2125_v22 = vpop.f32.mrf.mxu2 }
 0x344   :  { %v9647_v42 = vsel %vm3902_vm1, %v1957_v60, %v4414_v59  ;;  %v2126_v25 = vadd.f32 %v2125_v22, %v9474_v6  ;;  %v9657_v60 = vsel %vm3895_vm2, %v2293_v5, %v4407_v52 }
 0x345   :  { %13172 = vst [vmem:[#allocation201_spill] sm:$0xff] %v9647_v42  ;;  %v2294_v3 = vpop.f32.mrf.mxu3  ;;  %v1790_v29 = vpop.f32.mrf.mxu0 }
 0x346   :  { %v1791_v24 = vadd.f32 %v1790_v29, %v9461_v23  ;;  %v2295_v1 = vadd.f32 %v2294_v3, %v2126_v25  ;;  %13173 = vst [vmem:[#allocation202_spill] sm:$0xff] %v9657_v60 }
 0x347   :  { %v1959_v56 = vpop.f32.mrf.mxu1 }
 0x348   :  { %v1960_v16 = vadd.f32 %v1959_v56, %v1791_v24  ;;  %1829 = vmatmul.bf16.gmra.mxu0 %v8941_v40  ;;  %vm3903_vm3 = vcmp.gt.f32.partialorder %v2295_v1, 0.0  ;;  %v4415_v39 = vmul.f32 0.01, %v2295_v1  ;;  %2167 = vmatmul.bf16.gmra.mxu2 %v8941_v40 }
 0x34a   :  { %1998 = vmatmul.bf16.gmra.mxu1 %v8948_v63  ;;  %2336 = vmatmul.bf16.gmra.mxu3 %v8948_v63  ;;  %v9659_v4 = vsel %vm3903_vm3, %v2295_v1, %v4415_v39  ;;  %v4422_v11 = vmul.f32 0.01, %v1960_v16  ;;  %vm3910_vm4 = vcmp.gt.f32.partialorder %v1960_v16, 0.0 }
 0x34b   :  { %13174 = vst [vmem:[#allocation203_spill] sm:$0xff] %v9659_v4  ;;  %v2128_v59 = vpop.f32.mrf.mxu2 }
 0x34c   :  { %v2129_v25 = vadd.f32 %v2128_v59, %v9474_v6  ;;  %v9665_v1 = vsel %vm3910_vm4, %v1960_v16, %v4422_v11  ;;  %v7593_v16 = vld [vmem:[#allocation5 + $0xb0] sm:$0xf0] }
 0x34d   :  { %v2297_v22 = vpop.f32.mrf.mxu3  ;;  %v1792_v29 = vpop.f32.mrf.mxu0  ;;  %13175 = vst [vmem:[#allocation204_spill] sm:$0xff] %v9665_v1  ;;  %v7849_v1 = vld [vmem:[#allocation5 + $0x2b0] sm:$0xf0] }
 0x34e   :  { %v1793_v24 = vadd.f32 %v1792_v29, %v9461_v23  ;;  %v2298_v61 = vadd.f32 %v2297_v22, %v2129_v25 }
 0x34f   :  { %v1961_v56 = vpop.f32.mrf.mxu1 }
 0x350   :  { %v1962_v42 = vadd.f32 %v1961_v56, %v1793_v24  ;;  %v4423_v22 = vmul.f32 0.01, %v2298_v61  ;;  %vm3911_vm6 = vcmp.gt.f32.partialorder %v2298_v61, 0.0 }
 0x352   :  { %vm3918_vm5 = vcmp.gt.f32.partialorder %v1962_v42, 0.0  ;;  %v4430_v5 = vmul.f32 0.01, %v1962_v42 }
 0x353   :  { %v2130_v52 = vpop.f32.mrf.mxu2 }
 0x354   :  { %v9667_v39 = vsel %vm3918_vm5, %v1962_v42, %v4430_v5  ;;  %v2131_v3 = vadd.f32 %v2130_v52, %v9474_v6  ;;  %v8295_v42 = vld [vmem:[#allocation5 + $0x94] sm:$0xf]  ;;  %v7591_v5 = vld [vmem:[#allocation5 + $0x90] sm:$0xf] }
 0x355   :  { %13176 = vst [vmem:[#allocation205_spill] sm:$0xff] %v9667_v39  ;;  %v2299_v60 = vpop.f32.mrf.mxu3  ;;  %v1795_v59 = vpop.f32.mrf.mxu0  ;;  %v8299_v52 = vld [vmem:[#allocation5 + $0xac] sm:$0xf0] }
 0x356   :  { %v1796_v29 = vadd.f32 %v1795_v59, %v9461_v23  ;;  %v2300_v24 = vadd.f32 %v2299_v60, %v2131_v3  ;;  %v9677_v59 = vsel %vm3911_vm6, %v2298_v61, %v4423_v22  ;;  %v7596_v3 = vor.u32 %v8295_v42, %v7593_v16  ;;  %v8363_v16 = vld [vmem:[#allocation5 + $0x2ac] sm:$0xf0] }
 0x357   :  { %v1964_v25 = vpop.f32.mrf.mxu1  ;;  %13177 = vst [vmem:[#allocation206_spill] sm:$0xff] %v9677_v59 }
 0x358   :  { %v1965_v56 = vadd.f32 %v1964_v25, %v1796_v29  ;;  %1834 = vmatmul.bf16.gmra.mxu0 %v8965_v34  ;;  %vm3919_vm7 = vcmp.gt.f32.partialorder %v2300_v24, 0.0  ;;  %v4431_v11 = vmul.f32 0.01, %v2300_v24  ;;  %2172 = vmatmul.bf16.gmra.mxu2 %v8965_v34  ;;  %v7592_v29 = vor.u32 %v8299_v52, %v7591_v5  ;;  %v8359_v25 = vld [vmem:[#allocation5 + $0x294] sm:$0xf] }
 0x359   :  { %v7852_v7 = vor.u32 %v8359_v25, %v7849_v1  ;;  %2755 = vmatpush.bf16.msra.mxu2 %v7596_v3  ;;  %v13181_v25 = vld [vmem:[#allocation59_spill] sm:$0xff] }
 0x35a   :  { %2003 = vmatmul.bf16.gmra.mxu1 %v8972_v9  ;;  %2341 = vmatmul.bf16.gmra.mxu3 %v8972_v9  ;;  %v9679_v4 = vsel %vm3919_vm7, %v2300_v24, %v4431_v11  ;;  %v4438_v22 = vmul.f32 0.01, %v1965_v56  ;;  %vm3926_vm8 = vcmp.gt.f32.partialorder %v1965_v56, 0.0  ;;  %v7847_v11 = vld [vmem:[#allocation5 + $0x290] sm:$0xf] }
 0x35b   :  { %13178 = vst [vmem:[#allocation207_spill] sm:$0xff] %v9679_v4  ;;  %v2133_v60 = vpop.f32.mrf.mxu2  ;;  %2417 = vmatpush.bf16.msra.mxu0 %v7592_v29  ;;  %2924 = vmatpush.bf16.msra.mxu3 %v7852_v7  ;;  %v7848_v5 = vor.u32 %v8363_v16, %v7847_v11  ;;  %v13198_v4 = vld [vmem:[#allocation74_spill] sm:$0xff] }
 0x35c   :  { %v2134_v45 = vadd.f32 %v2133_v60, %v9474_v6  ;;  %v9685_v60 = vsel %vm3926_vm8, %v1965_v56, %v4438_v22 }
 0x35d   :  { %v2302_v41 = vpop.f32.mrf.mxu3  ;;  %v1797_v44 = vpop.f32.mrf.mxu0  ;;  %13179 = vst [vmem:[#allocation208_spill] sm:$0xff] %v9685_v60  ;;  %2586 = vmatpush.bf16.msra.mxu1 %v7848_v5 }
 0x35e   :  { %v1798_v12 = vadd.f32 %v1797_v44, %v9461_v23  ;;  %v2303_v61 = vadd.f32 %v2302_v41, %v2134_v45 }
 0x35f   :  { %v1966_v38 = vpop.f32.mrf.mxu1 }
 0x360   :  { %v1967_v24 = vadd.f32 %v1966_v38, %v1798_v12  ;;  %v4439_v45 = vmul.f32 0.01, %v2303_v61  ;;  %vm3927_vm10 = vcmp.gt.f32.partialorder %v2303_v61, 0.0 }
 0x362   :  { %vm3934_vm9 = vcmp.gt.f32.partialorder %v1967_v24, 0.0  ;;  %v4446_v42 = vmul.f32 0.01, %v1967_v24  ;;  %v9697_v22 = vsel %vm3927_vm10, %v2303_v61, %v4439_v45 }
 0x363   :  { %v2135_v52 = vpop.f32.mrf.mxu2  ;;  %13182 = vst [vmem:[#allocation210_spill] sm:$0xff] %v9697_v22 }
 0x364   :  { %v9687_v39 = vsel %vm3934_vm9, %v1967_v24, %v4446_v42  ;;  %v2136_v44 = vadd.f32 %v2135_v52, %v9474_v6 }
 0x365   :  { %13180 = vst [vmem:[#allocation209_spill] sm:$0xff] %v9687_v39  ;;  %v2304_v1 = vpop.f32.mrf.mxu3  ;;  %v1800_v3 = vpop.f32.mrf.mxu0  ;;  %v13192_v39 = vld [vmem:[#allocation68_spill] sm:$0xff] }
 0x366   :  { %v1801_v38 = vadd.f32 %v1800_v3, %v9461_v23  ;;  %v2305_v41 = vadd.f32 %v2304_v1, %v2136_v44 }
 0x367   :  { %v1969_v12 = vpop.f32.mrf.mxu1 }
 0x368   :  { %v1970_v29 = vadd.f32 %v1969_v12, %v1801_v38  ;;  %1839 = vmatmul.bf16.gmra.mxu0 %v8989_v35  ;;  %vm3935_vm11 = vcmp.gt.f32.partialorder %v2305_v41, 0.0  ;;  %v4447_v56 = vmul.f32 0.01, %v2305_v41  ;;  %2177 = vmatmul.bf16.gmra.mxu2 %v8989_v35 }
 0x36a   :  { %2008 = vmatmul.bf16.gmra.mxu1 %v13181_v25  ;;  %2346 = vmatmul.bf16.gmra.mxu3 %v13181_v25  ;;  %v9699_v24 = vsel %vm3935_vm11, %v2305_v41, %v4447_v56  ;;  %v4454_v38 = vmul.f32 0.01, %v1970_v29  ;;  %vm3942_vm12 = vcmp.gt.f32.partialorder %v1970_v29, 0.0 }
 0x36b   :  { %13183 = vst [vmem:[#allocation211_spill] sm:$0xff] %v9699_v24  ;;  %v2138_v11 = vpop.f32.mrf.mxu2  ;;  %v13186_v24 = vld [vmem:[#allocation62_spill] sm:$0xff] }
 0x36c   :  { %v2139_v16 = vadd.f32 %v2138_v11, %v9474_v6  ;;  %v9705_v41 = vsel %vm3942_vm12, %v1970_v29, %v4454_v38  ;;  %v13187_v38 = vld [vmem:[#allocation65_spill] sm:$0xff] }
 0x36d   :  { %v2307_v5 = vpop.f32.mrf.mxu3  ;;  %v1802_v52 = vpop.f32.mrf.mxu0  ;;  %13184 = vst [vmem:[#allocation212_spill] sm:$0xff] %v9705_v41 }
 0x36e   :  { %v1803_v44 = vadd.f32 %v1802_v52, %v9461_v23  ;;  %v2308_v3 = vadd.f32 %v2307_v5, %v2139_v16 }
 0x36f   :  { %v1971_v1 = vpop.f32.mrf.mxu1 }
 0x370   :  { %v1972_v12 = vadd.f32 %v1971_v1, %v1803_v44  ;;  %v4455_v5 = vmul.f32 0.01, %v2308_v3  ;;  %vm3943_vm14 = vcmp.gt.f32.partialorder %v2308_v3, 0.0 }
 0x372   :  { %vm3950_vm13 = vcmp.gt.f32.partialorder %v1972_v12, 0.0  ;;  %v4462_v61 = vmul.f32 0.01, %v1972_v12 }
 0x373   :  { %v2140_v45 = vpop.f32.mrf.mxu2 }
 0x374   :  { %v9707_v56 = vsel %vm3950_vm13, %v1972_v12, %v4462_v61  ;;  %v2141_v42 = vadd.f32 %v2140_v45, %v9474_v6  ;;  %v9717_v12 = vsel %vm3943_vm14, %v2308_v3, %v4455_v5 }
 0x375   :  { %13185 = vst [vmem:[#allocation213_spill] sm:$0xff] %v9707_v56  ;;  %v2309_v7 = vpop.f32.mrf.mxu3  ;;  %v1805_v11 = vpop.f32.mrf.mxu0 }
 0x376   :  { %v1806_v52 = vadd.f32 %v1805_v11, %v9461_v23  ;;  %v2310_v44 = vadd.f32 %v2309_v7, %v2141_v42  ;;  %13188 = vst [vmem:[#allocation214_spill] sm:$0xff] %v9717_v12 }
 0x377   :  { %v1974_v16 = vpop.f32.mrf.mxu1 }
 0x378   :  { %v1975_v1 = vadd.f32 %v1974_v16, %v1806_v52  ;;  %1844 = vmatmul.bf16.gmra.mxu0 %v13186_v24  ;;  %vm3951_vm15 = vcmp.gt.f32.partialorder %v2310_v44, 0.0  ;;  %v4463_v29 = vmul.f32 0.01, %v2310_v44  ;;  %2182 = vmatmul.bf16.gmra.mxu2 %v13186_v24 }
 0x37a   :  { %2013 = vmatmul.bf16.gmra.mxu1 %v13187_v38  ;;  %2351 = vmatmul.bf16.gmra.mxu3 %v13187_v38  ;;  %v9719_v61 = vsel %vm3951_vm15, %v2310_v44, %v4463_v29  ;;  %v4470_v56 = vmul.f32 0.01, %v1975_v1  ;;  %vm3958_vm0 = vcmp.gt.f32.partialorder %v1975_v1, 0.0 }
 0x37b   :  { %13189 = vst [vmem:[#allocation215_spill] sm:$0xff] %v9719_v61  ;;  %v2143_v45 = vpop.f32.mrf.mxu2 }
 0x37c   :  { %v2144_v42 = vadd.f32 %v2143_v45, %v9474_v6  ;;  %v9725_v44 = vsel %vm3958_vm0, %v1975_v1, %v4470_v56 }
 0x37d   :  { %v2312_v11 = vpop.f32.mrf.mxu3  ;;  %v1807_v52 = vpop.f32.mrf.mxu0  ;;  %13190 = vst [vmem:[#allocation216_spill] sm:$0xff] %v9725_v44 }
 0x37e   :  { %v1808_v16 = vadd.f32 %v1807_v52, %v9461_v23  ;;  %v2313_v41 = vadd.f32 %v2312_v11, %v2144_v42 }
 0x37f   :  { %v1976_v22 = vpop.f32.mrf.mxu1 }
 0x380   :  { %v1977_v60 = vadd.f32 %v1976_v22, %v1808_v16  ;;  %v4471_v11 = vmul.f32 0.01, %v2313_v41  ;;  %vm3959_vm2 = vcmp.gt.f32.partialorder %v2313_v41, 0.0 }
 0x382   :  { %vm3966_vm1 = vcmp.gt.f32.partialorder %v1977_v60, 0.0  ;;  %v4478_v3 = vmul.f32 0.01, %v1977_v60  ;;  %v9737_v1 = vsel %vm3959_vm2, %v2313_v41, %v4471_v11 }
 0x383   :  { %v2145_v5 = vpop.f32.mrf.mxu2  ;;  %13194 = vst [vmem:[#allocation218_spill] sm:$0xff] %v9737_v1 }
 0x384   :  { %v9727_v29 = vsel %vm3966_vm1, %v1977_v60, %v4478_v3  ;;  %v2146_v7 = vadd.f32 %v2145_v5, %v9474_v6  ;;  %v13193_v60 = vld [vmem:[#allocation71_spill] sm:$0xff] }
 0x385   :  { %13191 = vst [vmem:[#allocation217_spill] sm:$0xff] %v9727_v29  ;;  %v2314_v12 = vpop.f32.mrf.mxu3  ;;  %v1810_v45 = vpop.f32.mrf.mxu0 }
 0x386   :  { %v1811_v52 = vadd.f32 %v1810_v45, %v9461_v23  ;;  %v2315_v22 = vadd.f32 %v2314_v12, %v2146_v7 }
 0x387   :  { %v1979_v42 = vpop.f32.mrf.mxu1 }
 0x388   :  { %v1980_v16 = vadd.f32 %v1979_v42, %v1811_v52  ;;  %1849 = vmatmul.bf16.gmra.mxu0 %v13192_v39  ;;  %vm3967_vm3 = vcmp.gt.f32.partialorder %v2315_v22, 0.0  ;;  %v4479_v56 = vmul.f32 0.01, %v2315_v22  ;;  %2187 = vmatmul.bf16.gmra.mxu2 %v13192_v39 }
 0x38a   :  { %2018 = vmatmul.bf16.gmra.mxu1 %v13193_v60  ;;  %2356 = vmatmul.bf16.gmra.mxu3 %v13193_v60  ;;  %v9739_v3 = vsel %vm3967_vm3, %v2315_v22, %v4479_v56  ;;  %v4486_v29 = vmul.f32 0.01, %v1980_v16  ;;  %vm3974_vm4 = vcmp.gt.f32.partialorder %v1980_v16, 0.0 }
 0x38b   :  { %13195 = vst [vmem:[#allocation219_spill] sm:$0xff] %v9739_v3  ;;  %v2148_v5 = vpop.f32.mrf.mxu2  ;;  %v8291_v3 = vld [vmem:[#allocation5 + $0x6c] sm:$0xf0] }
 0x38c   :  { %v2149_v7 = vadd.f32 %v2148_v5, %v9474_v6  ;;  %v9745_v22 = vsel %vm3974_vm4, %v1980_v16, %v4486_v29  ;;  %v8287_v16 = vld [vmem:[#allocation5 + $0x54] sm:$0xf] }
 0x38d   :  { %v2317_v45 = vpop.f32.mrf.mxu3  ;;  %v1812_v52 = vpop.f32.mrf.mxu0  ;;  %13196 = vst [vmem:[#allocation220_spill] sm:$0xff] %v9745_v22 }
 0x38e   :  { %v1813_v42 = vadd.f32 %v1812_v52, %v9461_v23  ;;  %v2318_v44 = vadd.f32 %v2317_v45, %v2149_v7 }
 0x38f   :  { %v1981_v61 = vpop.f32.mrf.mxu1 }
 0x390   :  { %v1982_v59 = vadd.f32 %v1981_v61, %v1813_v42  ;;  %v4487_v45 = vmul.f32 0.01, %v2318_v44  ;;  %vm3975_vm6 = vcmp.gt.f32.partialorder %v2318_v44, 0.0 }
 0x392   :  { %vm3982_vm5 = vcmp.gt.f32.partialorder %v1982_v59, 0.0  ;;  %v4494_v41 = vmul.f32 0.01, %v1982_v59 }
 0x393   :  { %v2150_v11 = vpop.f32.mrf.mxu2 }
 0x394   :  { %v9747_v56 = vsel %vm3982_vm5, %v1982_v59, %v4494_v41  ;;  %v2151_v12 = vadd.f32 %v2150_v11, %v9474_v6  ;;  %v13199_v59 = vld [vmem:[#allocation77_spill] sm:$0xff]  ;;  %v7561_v41 = vld [vmem:[#allocation5 + $0x70] sm:$0xf0]  ;;  %v7559_v11 = vld [vmem:[#allocation5 + $0x50] sm:$0xf] }
 0x395   :  { %13197 = vst [vmem:[#allocation221_spill] sm:$0xff] %v9747_v56  ;;  %v2319_v1 = vpop.f32.mrf.mxu3  ;;  %v1815_v5 = vpop.f32.mrf.mxu0  ;;  %v7817_v56 = vld [vmem:[#allocation5 + $0x270] sm:$0xf0] }
 0x396   :  { %v1816_v52 = vadd.f32 %v1815_v5, %v9461_v23  ;;  %v2320_v61 = vadd.f32 %v2319_v1, %v2151_v12  ;;  %v9757_v5 = vsel %vm3975_vm6, %v2318_v44, %v4487_v45  ;;  %v7564_v12 = vor.u32 %v8287_v16, %v7561_v41  ;;  %v8355_v16 = vld [vmem:[#allocation5 + $0x26c] sm:$0xf0] }
 0x397   :  { %v1984_v7 = vpop.f32.mrf.mxu1  ;;  %13200 = vst [vmem:[#allocation222_spill] sm:$0xff] %v9757_v5  ;;  %v13216_v5 = vld [vmem:[#allocation92_spill] sm:$0xff] }
 0x398   :  { %v1985_v42 = vadd.f32 %v1984_v7, %v1816_v52  ;;  %1854 = vmatmul.bf16.gmra.mxu0 %v13198_v4  ;;  %vm3983_vm7 = vcmp.gt.f32.partialorder %v2320_v61, 0.0  ;;  %v4495_v29 = vmul.f32 0.01, %v2320_v61  ;;  %2192 = vmatmul.bf16.gmra.mxu2 %v13198_v4  ;;  %v7560_v52 = vor.u32 %v8291_v3, %v7559_v11  ;;  %v8351_v7 = vld [vmem:[#allocation5 + $0x254] sm:$0xf] }
 0x399   :  { %v7820_v38 = vor.u32 %v8351_v7, %v7817_v56  ;;  %2756 = vmatpush.bf16.msra.mxu2 %v7564_v12  ;;  %v7815_v3 = vld [vmem:[#allocation5 + $0x250] sm:$0xf] }
 0x39a   :  { %2023 = vmatmul.bf16.gmra.mxu1 %v13199_v59  ;;  %2361 = vmatmul.bf16.gmra.mxu3 %v13199_v59  ;;  %v9759_v22 = vsel %vm3983_vm7, %v2320_v61, %v4495_v29  ;;  %v4502_v45 = vmul.f32 0.01, %v1985_v42  ;;  %vm3990_vm8 = vcmp.gt.f32.partialorder %v1985_v42, 0.0  ;;  %v7816_v41 = vor.u32 %v8355_v16, %v7815_v3  ;;  %v13204_v7 = vld [vmem:[#allocation80_spill] sm:$0xff] }
 0x39b   :  { %13201 = vst [vmem:[#allocation223_spill] sm:$0xff] %v9759_v22  ;;  %v2153_v1 = vpop.f32.mrf.mxu2  ;;  %2418 = vmatpush.bf16.msra.mxu0 %v7560_v52  ;;  %2925 = vmatpush.bf16.msra.mxu3 %v7820_v38 }
 0x39c   :  { %v2154_v4 = vadd.f32 %v2153_v1, %v9474_v6  ;;  %v9765_v1 = vsel %vm3990_vm8, %v1985_v42, %v4502_v45  ;;  %2587 = vmatpush.bf16.msra.mxu1 %v7816_v41  ;;  %v13205_v45 = vld [vmem:[#allocation83_spill] sm:$0xff] }
 0x39d   :  { %v2322_v39 = vpop.f32.mrf.mxu3  ;;  %v1817_v59 = vpop.f32.mrf.mxu0  ;;  %13202 = vst [vmem:[#allocation224_spill] sm:$0xff] %v9765_v1  ;;  %v13210_v1 = vld [vmem:[#allocation86_spill] sm:$0xff] }
 0x39e   :  { %v1818_v24 = vadd.f32 %v1817_v59, %v9461_v23  ;;  %v2323_v44 = vadd.f32 %v2322_v39, %v2154_v4 }
 0x39f   :  { %v1986_v25 = vpop.f32.mrf.mxu1 }
 0x3a0   :  { %v1987_v61 = vadd.f32 %v1986_v25, %v1818_v24  ;;  %v4503_v24 = vmul.f32 0.01, %v2323_v44  ;;  %vm3991_vm10 = vcmp.gt.f32.partialorder %v2323_v44, 0.0 }
 0x3a2   :  { %vm3998_vm9 = vcmp.gt.f32.partialorder %v1987_v61, 0.0  ;;  %v4510_v29 = vmul.f32 0.01, %v1987_v61 }
 0x3a3   :  { %v2155_v11 = vpop.f32.mrf.mxu2 }
 0x3a4   :  { %v9767_v60 = vsel %vm3998_vm9, %v1987_v61, %v4510_v29  ;;  %v2156_v56 = vadd.f32 %v2155_v11, %v9474_v6  ;;  %v9777_v61 = vsel %vm3991_vm10, %v2323_v44, %v4503_v24 }
 0x3a5   :  { %13203 = vst [vmem:[#allocation225_spill] sm:$0xff] %v9767_v60  ;;  %v2324_v59 = vpop.f32.mrf.mxu3  ;;  %v1820_v12 = vpop.f32.mrf.mxu0 }
 0x3a6   :  { %v1821_v39 = vadd.f32 %v1820_v12, %v9461_v23  ;;  %v2325_v38 = vadd.f32 %v2324_v59, %v2156_v56  ;;  %13206 = vst [vmem:[#allocation226_spill] sm:$0xff] %v9777_v61 }
 0x3a7   :  { %v1989_v25 = vpop.f32.mrf.mxu1 }
 0x3a8   :  { %v1990_v52 = vadd.f32 %v1989_v25, %v1821_v39  ;;  %1859 = vmatmul.bf16.gmra.mxu0 %v13204_v7  ;;  %vm3999_vm11 = vcmp.gt.f32.partialorder %v2325_v38, 0.0  ;;  %v4511_v42 = vmul.f32 0.01, %v2325_v38  ;;  %2197 = vmatmul.bf16.gmra.mxu2 %v13204_v7 }
 0x3aa   :  { %2028 = vmatmul.bf16.gmra.mxu1 %v13205_v45  ;;  %2366 = vmatmul.bf16.gmra.mxu3 %v13205_v45  ;;  %v9779_v3 = vsel %vm3999_vm11, %v2325_v38, %v4511_v42  ;;  %v4518_v25 = vmul.f32 0.01, %v1990_v52  ;;  %vm4006_vm12 = vcmp.gt.f32.partialorder %v1990_v52, 0.0 }
 0x3ab   :  { %13207 = vst [vmem:[#allocation227_spill] sm:$0xff] %v9779_v3  ;;  %v2158_v29 = vpop.f32.mrf.mxu2 }
 0x3ac   :  { %v2159_v41 = vadd.f32 %v2158_v29, %v9474_v6  ;;  %v9785_v38 = vsel %vm4006_vm12, %v1990_v52, %v4518_v25 }
 0x3ad   :  { %v2327_v11 = vpop.f32.mrf.mxu3  ;;  %v1822_v56 = vpop.f32.mrf.mxu0  ;;  %13208 = vst [vmem:[#allocation228_spill] sm:$0xff] %v9785_v38 }
 0x3ae   :  { %v1823_v59 = vadd.f32 %v1822_v56, %v9461_v23  ;;  %v2328_v39 = vadd.f32 %v2327_v11, %v2159_v41 }
 0x3af   :  { %v1991_v12 = vpop.f32.mrf.mxu1 }
 0x3b0   :  { %v1992_v4 = vadd.f32 %v1991_v12, %v1823_v59  ;;  %v4519_v11 = vmul.f32 0.01, %v2328_v39  ;;  %vm4007_vm14 = vcmp.gt.f32.partialorder %v2328_v39, 0.0 }
 0x3b2   :  { %vm4014_vm13 = vcmp.gt.f32.partialorder %v1992_v4, 0.0  ;;  %v4526_v44 = vmul.f32 0.01, %v1992_v4  ;;  %v9797_v25 = vsel %vm4007_vm14, %v2328_v39, %v4519_v11 }
 0x3b3   :  { %v2160_v24 = vpop.f32.mrf.mxu2  ;;  %13212 = vst [vmem:[#allocation230_spill] sm:$0xff] %v9797_v25 }
 0x3b4   :  { %v9787_v42 = vsel %vm4014_vm13, %v1992_v4, %v4526_v44  ;;  %v2161_v16 = vadd.f32 %v2160_v24, %v9474_v6  ;;  %v13211_v4 = vld [vmem:[#allocation89_spill] sm:$0xff] }
 0x3b5   :  { %13209 = vst [vmem:[#allocation229_spill] sm:$0xff] %v9787_v42  ;;  %v2329_v61 = vpop.f32.mrf.mxu3  ;;  %v1825_v29 = vpop.f32.mrf.mxu0 }
 0x3b6   :  { %v1826_v56 = vadd.f32 %v1825_v29, %v9461_v23  ;;  %v2330_v59 = vadd.f32 %v2329_v61, %v2161_v16 }
 0x3b7   :  { %v1994_v41 = vpop.f32.mrf.mxu1 }
 0x3b8   :  { %v1995_v12 = vadd.f32 %v1994_v41, %v1826_v56  ;;  %1864 = vmatmul.bf16.gmra.mxu0 %v13210_v1  ;;  %vm4015_vm15 = vcmp.gt.f32.partialorder %v2330_v59, 0.0  ;;  %v4527_v52 = vmul.f32 0.01, %v2330_v59  ;;  %2202 = vmatmul.bf16.gmra.mxu2 %v13210_v1 }
 0x3ba   :  { %2033 = vmatmul.bf16.gmra.mxu1 %v13211_v4  ;;  %2371 = vmatmul.bf16.gmra.mxu3 %v13211_v4  ;;  %v9799_v44 = vsel %vm4015_vm15, %v2330_v59, %v4527_v52  ;;  %v4534_v42 = vmul.f32 0.01, %v1995_v12  ;;  %vm4022_vm0 = vcmp.gt.f32.partialorder %v1995_v12, 0.0 }
 0x3bb   :  { %13213 = vst [vmem:[#allocation231_spill] sm:$0xff] %v9799_v44  ;;  %v2163_v24 = vpop.f32.mrf.mxu2 }
 0x3bc   :  { %v2164_v16 = vadd.f32 %v2163_v24, %v9474_v6  ;;  %v9805_v59 = vsel %vm4022_vm0, %v1995_v12, %v4534_v42 }
 0x3bd   :  { %v2332_v29 = vpop.f32.mrf.mxu3  ;;  %v1827_v56 = vpop.f32.mrf.mxu0  ;;  %13214 = vst [vmem:[#allocation232_spill] sm:$0xff] %v9805_v59 }
 0x3be   :  { %v1828_v41 = vadd.f32 %v1827_v56, %v9461_v23  ;;  %v2333_v38 = vadd.f32 %v2332_v29, %v2164_v16 }
 0x3bf   :  { %v1996_v3 = vpop.f32.mrf.mxu1 }
 0x3c0   :  { %v1997_v60 = vadd.f32 %v1996_v3, %v1828_v41  ;;  %v4535_v29 = vmul.f32 0.01, %v2333_v38  ;;  %vm4023_vm2 = vcmp.gt.f32.partialorder %v2333_v38, 0.0 }
 0x3c2   :  { %vm4030_vm1 = vcmp.gt.f32.partialorder %v1997_v60, 0.0  ;;  %v4542_v39 = vmul.f32 0.01, %v1997_v60  ;;  %v9817_v12 = vsel %vm4023_vm2, %v2333_v38, %v4535_v29 }
 0x3c3   :  { %v2165_v11 = vpop.f32.mrf.mxu2  ;;  %13218 = vst [vmem:[#allocation234_spill] sm:$0xff] %v9817_v12 }
 0x3c4   :  { %v9807_v52 = vsel %vm4030_vm1, %v1997_v60, %v4542_v39  ;;  %v2166_v61 = vadd.f32 %v2165_v11, %v9474_v6  ;;  %v13217_v60 = vld [vmem:[#allocation95_spill] sm:$0xff] }
 0x3c5   :  { %13215 = vst [vmem:[#allocation233_spill] sm:$0xff] %v9807_v52  ;;  %v2334_v25 = vpop.f32.mrf.mxu3  ;;  %v1830_v24 = vpop.f32.mrf.mxu0 }
 0x3c6   :  { %v1831_v56 = vadd.f32 %v1830_v24, %v9461_v23  ;;  %v2335_v3 = vadd.f32 %v2334_v25, %v2166_v61 }
 0x3c7   :  { %v1999_v16 = vpop.f32.mrf.mxu1 }
 0x3c8   :  { %v2000_v41 = vadd.f32 %v1999_v16, %v1831_v56  ;;  %1869 = vmatmul.bf16.gmra.mxu0 %v13216_v5  ;;  %vm4031_vm3 = vcmp.gt.f32.partialorder %v2335_v3, 0.0  ;;  %v4543_v42 = vmul.f32 0.01, %v2335_v3  ;;  %2207 = vmatmul.bf16.gmra.mxu2 %v13216_v5 }
 0x3ca   :  { %2038 = vmatmul.bf16.gmra.mxu1 %v13217_v60  ;;  %2376 = vmatmul.bf16.gmra.mxu3 %v13217_v60  ;;  %v9819_v39 = vsel %vm4031_vm3, %v2335_v3, %v4543_v42  ;;  %v4550_v52 = vmul.f32 0.01, %v2000_v41  ;;  %vm4038_vm4 = vcmp.gt.f32.partialorder %v2000_v41, 0.0  ;;  %v13222_v60 = vld [vmem:[#allocation98_spill] sm:$0xff] }
 0x3cb   :  { %13219 = vst [vmem:[#allocation235_spill] sm:$0xff] %v9819_v39  ;;  %v2168_v11 = vpop.f32.mrf.mxu2  ;;  %v8283_v39 = vld [vmem:[#allocation5 + $0x2c] sm:$0xf0] }
 0x3cc   :  { %v2169_v61 = vadd.f32 %v2168_v11, %v9474_v6  ;;  %v9825_v3 = vsel %vm4038_vm4, %v2000_v41, %v4550_v52  ;;  %v8279_v41 = vld [vmem:[#allocation5 + $0x14] sm:$0xf] }
 0x3cd   :  { %v2337_v24 = vpop.f32.mrf.mxu3  ;;  %v1832_v56 = vpop.f32.mrf.mxu0  ;;  %13220 = vst [vmem:[#allocation236_spill] sm:$0xff] %v9825_v3 }
 0x3ce   :  { %v1833_v16 = vadd.f32 %v1832_v56, %v9461_v23  ;;  %v2338_v59 = vadd.f32 %v2337_v24, %v2169_v61 }
 0x3cf   :  { %v2001_v44 = vpop.f32.mrf.mxu1 }
 0x3d0   :  { %v2002_v22 = vadd.f32 %v2001_v44, %v1833_v16  ;;  %v4551_v24 = vmul.f32 0.01, %v2338_v59  ;;  %vm4039_vm6 = vcmp.gt.f32.partialorder %v2338_v59, 0.0 }
 0x3d2   :  { %vm4046_vm5 = vcmp.gt.f32.partialorder %v2002_v22, 0.0  ;;  %v4558_v38 = vmul.f32 0.01, %v2002_v22 }
 0x3d3   :  { %v2170_v29 = vpop.f32.mrf.mxu2 }
 0x3d4   :  { %v9827_v42 = vsel %vm4046_vm5, %v2002_v22, %v4558_v38  ;;  %v2171_v25 = vadd.f32 %v2170_v29, %v9474_v6  ;;  %v13223_v22 = vld [vmem:[#allocation101_spill] sm:$0xff]  ;;  %v7529_v38 = vld [vmem:[#allocation5 + $0x30] sm:$0xf0]  ;;  %v7527_v29 = vld [vmem:[#allocation5 + $0x10] sm:$0xf] }
 0x3d5   :  { %13221 = vst [vmem:[#allocation237_spill] sm:$0xff] %v9827_v42  ;;  %v2339_v12 = vpop.f32.mrf.mxu3  ;;  %v1835_v11 = vpop.f32.mrf.mxu0  ;;  %v7785_v42 = vld [vmem:[#allocation5 + $0x230] sm:$0xf0] }
 0x3d6   :  { %v1836_v56 = vadd.f32 %v1835_v11, %v9461_v23  ;;  %v2340_v44 = vadd.f32 %v2339_v12, %v2171_v25  ;;  %v9837_v11 = vsel %vm4039_vm6, %v2338_v59, %v4551_v24  ;;  %v7532_v25 = vor.u32 %v8279_v41, %v7529_v38  ;;  %v8347_v41 = vld [vmem:[#allocation5 + $0x22c] sm:$0xf0] }
 0x3d7   :  { %v2004_v61 = vpop.f32.mrf.mxu1  ;;  %13224 = vst [vmem:[#allocation238_spill] sm:$0xff] %v9837_v11  ;;  %v13240_v11 = vld [vmem:[#allocation116_spill] sm:$0xff] }
 0x3d8   :  { %v2005_v16 = vadd.f32 %v2004_v61, %v1836_v56  ;;  %1874 = vmatmul.bf16.gmra.mxu0 %v13222_v60  ;;  %vm4047_vm7 = vcmp.gt.f32.partialorder %v2340_v44, 0.0  ;;  %v4559_v52 = vmul.f32 0.01, %v2340_v44  ;;  %2212 = vmatmul.bf16.gmra.mxu2 %v13222_v60  ;;  %v7528_v56 = vor.u32 %v8283_v39, %v7527_v29  ;;  %v8343_v61 = vld [vmem:[#allocation5 + $0x214] sm:$0xf] }
 0x3d9   :  { %v7788_v1 = vor.u32 %v8343_v61, %v7785_v42  ;;  %2757 = vmatpush.bf16.msra.mxu2 %v7532_v25  ;;  %v7783_v39 = vld [vmem:[#allocation5 + $0x210] sm:$0xf] }
 0x3da   :  { %2043 = vmatmul.bf16.gmra.mxu1 %v13223_v22  ;;  %2381 = vmatmul.bf16.gmra.mxu3 %v13223_v22  ;;  %v9839_v3 = vsel %vm4047_vm7, %v2340_v44, %v4559_v52  ;;  %v4566_v24 = vmul.f32 0.01, %v2005_v16  ;;  %vm4054_vm8 = vcmp.gt.f32.partialorder %v2005_v16, 0.0  ;;  %v7784_v38 = vor.u32 %v8347_v41, %v7783_v39  ;;  %v13228_v61 = vld [vmem:[#allocation104_spill] sm:$0xff] }
 0x3db   :  { %13225 = vst [vmem:[#allocation239_spill] sm:$0xff] %v9839_v3  ;;  %v2173_v12 = vpop.f32.mrf.mxu2  ;;  %2419 = vmatpush.bf16.msra.mxu0 %v7528_v56  ;;  %2926 = vmatpush.bf16.msra.mxu3 %v7788_v1 }
 0x3dc   :  { %v2174_v60 = vadd.f32 %v2173_v12, %v9474_v6  ;;  %v9845_v12 = vsel %vm4054_vm8, %v2005_v16, %v4566_v24  ;;  %2588 = vmatpush.bf16.msra.mxu1 %v7784_v38  ;;  %v13229_v24 = vld [vmem:[#allocation107_spill] sm:$0xff] }
 0x3dd   :  { %v2342_v4 = vpop.f32.mrf.mxu3  ;;  %v1837_v22 = vpop.f32.mrf.mxu0  ;;  %13226 = vst [vmem:[#allocation240_spill] sm:$0xff] %v9845_v12  ;;  %v13234_v12 = vld [vmem:[#allocation110_spill] sm:$0xff] }
 0x3de   :  { %v1838_v45 = vadd.f32 %v1837_v22, %v9461_v23  ;;  %v2343_v59 = vadd.f32 %v2342_v4, %v2174_v60 }
 0x3df   :  { %v2006_v7 = vpop.f32.mrf.mxu1 }
 0x3e0   :  { %v2007_v44 = vadd.f32 %v2006_v7, %v1838_v45  ;;  %v4567_v4 = vmul.f32 0.01, %v2343_v59  ;;  %vm4055_vm10 = vcmp.gt.f32.partialorder %v2343_v59, 0.0 }
 0x3e2   :  { %vm4062_vm9 = vcmp.gt.f32.partialorder %v2007_v44, 0.0  ;;  %v4574_v52 = vmul.f32 0.01, %v2007_v44 }
 0x3e3   :  { %v2175_v29 = vpop.f32.mrf.mxu2 }
 0x3e4   :  { %v9847_v5 = vsel %vm4062_vm9, %v2007_v44, %v4574_v52  ;;  %v2176_v42 = vadd.f32 %v2175_v29, %v9474_v6  ;;  %v9857_v44 = vsel %vm4055_vm10, %v2343_v59, %v4567_v4 }
 0x3e5   :  { %13227 = vst [vmem:[#allocation241_spill] sm:$0xff] %v9847_v5  ;;  %v2344_v22 = vpop.f32.mrf.mxu3  ;;  %v1840_v25 = vpop.f32.mrf.mxu0 }
 0x3e6   :  { %v1841_v7 = vadd.f32 %v1840_v25, %v9461_v23  ;;  %v2345_v60 = vadd.f32 %v2344_v22, %v2176_v42  ;;  %13230 = vst [vmem:[#allocation242_spill] sm:$0xff] %v9857_v44 }
 0x3e7   :  { %v2009_v45 = vpop.f32.mrf.mxu1 }
 0x3e8   :  { %v2010_v56 = vadd.f32 %v2009_v45, %v1841_v7  ;;  %1879 = vmatmul.bf16.gmra.mxu0 %v13228_v61  ;;  %vm4063_vm11 = vcmp.gt.f32.partialorder %v2345_v60, 0.0  ;;  %v4575_v16 = vmul.f32 0.01, %v2345_v60  ;;  %2217 = vmatmul.bf16.gmra.mxu2 %v13228_v61 }
 0x3ea   :  { %2048 = vmatmul.bf16.gmra.mxu1 %v13229_v24  ;;  %2386 = vmatmul.bf16.gmra.mxu3 %v13229_v24  ;;  %v9859_v39 = vsel %vm4063_vm11, %v2345_v60, %v4575_v16  ;;  %v4582_v45 = vmul.f32 0.01, %v2010_v56  ;;  %vm4070_vm12 = vcmp.gt.f32.partialorder %v2010_v56, 0.0 }
 0x3eb   :  { %13231 = vst [vmem:[#allocation243_spill] sm:$0xff] %v9859_v39  ;;  %v2178_v52 = vpop.f32.mrf.mxu2 }
 0x3ec   :  { %v2179_v38 = vadd.f32 %v2178_v52, %v9474_v6  ;;  %v9865_v60 = vsel %vm4070_vm12, %v2010_v56, %v4582_v45 }
 0x3ed   :  { %v2347_v29 = vpop.f32.mrf.mxu3  ;;  %v1842_v42 = vpop.f32.mrf.mxu0  ;;  %13232 = vst [vmem:[#allocation244_spill] sm:$0xff] %v9865_v60 }
 0x3ee   :  { %v1843_v22 = vadd.f32 %v1842_v42, %v9461_v23  ;;  %v2348_v7 = vadd.f32 %v2347_v29, %v2179_v38 }
 0x3ef   :  { %v2011_v25 = vpop.f32.mrf.mxu1 }
 0x3f0   :  { %v2012_v1 = vadd.f32 %v2011_v25, %v1843_v22  ;;  %v4583_v29 = vmul.f32 0.01, %v2348_v7  ;;  %vm4071_vm14 = vcmp.gt.f32.partialorder %v2348_v7, 0.0 }
 0x3f2   :  { %vm4078_vm13 = vcmp.gt.f32.partialorder %v2012_v1, 0.0  ;;  %v4590_v59 = vmul.f32 0.01, %v2012_v1  ;;  %v9877_v45 = vsel %vm4071_vm14, %v2348_v7, %v4583_v29 }
 0x3f3   :  { %v2180_v4 = vpop.f32.mrf.mxu2  ;;  %13236 = vst [vmem:[#allocation246_spill] sm:$0xff] %v9877_v45 }
 0x3f4   :  { %v9867_v16 = vsel %vm4078_vm13, %v2012_v1, %v4590_v59  ;;  %v2181_v41 = vadd.f32 %v2180_v4, %v9474_v6  ;;  %v13235_v1 = vld [vmem:[#allocation113_spill] sm:$0xff] }
 0x3f5   :  { %13233 = vst [vmem:[#allocation245_spill] sm:$0xff] %v9867_v16  ;;  %v2349_v44 = vpop.f32.mrf.mxu3  ;;  %v1845_v52 = vpop.f32.mrf.mxu0 }
 0x3f6   :  { %v1846_v42 = vadd.f32 %v1845_v52, %v9461_v23  ;;  %v2350_v22 = vadd.f32 %v2349_v44, %v2181_v41 }
 0x3f7   :  { %v2014_v38 = vpop.f32.mrf.mxu1 }
 0x3f8   :  { %v2015_v25 = vadd.f32 %v2014_v38, %v1846_v42  ;;  %1884 = vmatmul.bf16.gmra.mxu0 %v13234_v12  ;;  %vm4079_vm15 = vcmp.gt.f32.partialorder %v2350_v22, 0.0  ;;  %v4591_v56 = vmul.f32 0.01, %v2350_v22  ;;  %2222 = vmatmul.bf16.gmra.mxu2 %v13234_v12 }
 0x3fa   :  { %2053 = vmatmul.bf16.gmra.mxu1 %v13235_v1  ;;  %2391 = vmatmul.bf16.gmra.mxu3 %v13235_v1  ;;  %v9879_v59 = vsel %vm4079_vm15, %v2350_v22, %v4591_v56  ;;  %v4598_v16 = vmul.f32 0.01, %v2015_v25  ;;  %vm4086_vm0 = vcmp.gt.f32.partialorder %v2015_v25, 0.0 }
 0x3fb   :  { %13237 = vst [vmem:[#allocation247_spill] sm:$0xff] %v9879_v59  ;;  %v2183_v4 = vpop.f32.mrf.mxu2 }
 0x3fc   :  { %v2184_v41 = vadd.f32 %v2183_v4, %v9474_v6  ;;  %v9885_v22 = vsel %vm4086_vm0, %v2015_v25, %v4598_v16 }
 0x3fd   :  { %v2352_v52 = vpop.f32.mrf.mxu3  ;;  %v1847_v42 = vpop.f32.mrf.mxu0  ;;  %13238 = vst [vmem:[#allocation248_spill] sm:$0xff] %v9885_v22 }
 0x3fe   :  { %v1848_v38 = vadd.f32 %v1847_v42, %v9461_v23  ;;  %v2353_v60 = vadd.f32 %v2352_v52, %v2184_v41 }
 0x3ff   :  { %v2016_v39 = vpop.f32.mrf.mxu1 }
 0x400   :  { %v2017_v5 = vadd.f32 %v2016_v39, %v1848_v38  ;;  %v4599_v52 = vmul.f32 0.01, %v2353_v60  ;;  %vm4087_vm2 = vcmp.gt.f32.partialorder %v2353_v60, 0.0 }
 0x402   :  { %vm4094_vm1 = vcmp.gt.f32.partialorder %v2017_v5, 0.0  ;;  %v4606_v7 = vmul.f32 0.01, %v2017_v5  ;;  %v9897_v25 = vsel %vm4087_vm2, %v2353_v60, %v4599_v52 }
 0x403   :  { %v2185_v29 = vpop.f32.mrf.mxu2  ;;  %13242 = vst [vmem:[#allocation250_spill] sm:$0xff] %v9897_v25 }
 0x404   :  { %v9887_v56 = vsel %vm4094_vm1, %v2017_v5, %v4606_v7  ;;  %v2186_v44 = vadd.f32 %v2185_v29, %v9474_v6  ;;  %v13241_v5 = vld [vmem:[#allocation119_spill] sm:$0xff] }
 0x405   :  { %13239 = vst [vmem:[#allocation249_spill] sm:$0xff] %v9887_v56  ;;  %v2354_v45 = vpop.f32.mrf.mxu3  ;;  %v1850_v4 = vpop.f32.mrf.mxu0 }
 0x406   :  { %v1851_v42 = vadd.f32 %v1850_v4, %v9461_v23  ;;  %v2355_v39 = vadd.f32 %v2354_v45, %v2186_v44 }
 0x407   :  { %v2019_v41 = vpop.f32.mrf.mxu1 }
 0x408   :  { %v2020_v38 = vadd.f32 %v2019_v41, %v1851_v42  ;;  %1889 = vmatmul.bf16.gmra.mxu0 %v13240_v11  ;;  %vm4095_vm3 = vcmp.gt.f32.partialorder %v2355_v39, 0.0  ;;  %v4607_v16 = vmul.f32 0.01, %v2355_v39  ;;  %2227 = vmatmul.bf16.gmra.mxu2 %v13240_v11 }
 0x40a   :  { %2058 = vmatmul.bf16.gmra.mxu1 %v13241_v5  ;;  %2396 = vmatmul.bf16.gmra.mxu3 %v13241_v5  ;;  %v9899_v7 = vsel %vm4095_vm3, %v2355_v39, %v4607_v16  ;;  %v4614_v56 = vmul.f32 0.01, %v2020_v38  ;;  %vm4102_vm4 = vcmp.gt.f32.partialorder %v2020_v38, 0.0  ;;  %v13246_v5 = vld [vmem:[#allocation122_spill] sm:$0xff] }
 0x40b   :  { %13243 = vst [vmem:[#allocation251_spill] sm:$0xff] %v9899_v7  ;;  %v2188_v29 = vpop.f32.mrf.mxu2  ;;  %v8340_v7 = vld [vmem:[#allocation5 + $0x1f4] sm:$0xf0] }
 0x40c   :  { %v2189_v44 = vadd.f32 %v2188_v29, %v9474_v6  ;;  %v9905_v39 = vsel %vm4102_vm4, %v2020_v38, %v4614_v56  ;;  %v8336_v38 = vld [vmem:[#allocation5 + $0x1dc] sm:$0xf] }
 0x40d   :  { %v2357_v4 = vpop.f32.mrf.mxu3  ;;  %v1852_v42 = vpop.f32.mrf.mxu0  ;;  %13244 = vst [vmem:[#allocation252_spill] sm:$0xff] %v9905_v39 }
 0x40e   :  { %v1853_v41 = vadd.f32 %v1852_v42, %v9461_v23  ;;  %v2358_v22 = vadd.f32 %v2357_v4, %v2189_v44 }
 0x40f   :  { %v2021_v59 = vpop.f32.mrf.mxu1 }
 0x410   :  { %v2022_v3 = vadd.f32 %v2021_v59, %v1853_v41  ;;  %v4615_v4 = vmul.f32 0.01, %v2358_v22  ;;  %vm4103_vm6 = vcmp.gt.f32.partialorder %v2358_v22, 0.0 }
 0x412   :  { %vm4110_vm5 = vcmp.gt.f32.partialorder %v2022_v3, 0.0  ;;  %v4622_v60 = vmul.f32 0.01, %v2022_v3 }
 0x413   :  { %v2190_v52 = vpop.f32.mrf.mxu2 }
 0x414   :  { %v9907_v16 = vsel %vm4110_vm5, %v2022_v3, %v4622_v60  ;;  %v2191_v45 = vadd.f32 %v2190_v52, %v9474_v6  ;;  %v13247_v3 = vld [vmem:[#allocation125_spill] sm:$0xff] }
 0x415   :  { %13245 = vst [vmem:[#allocation253_spill] sm:$0xff] %v9907_v16  ;;  %v2359_v25 = vpop.f32.mrf.mxu3  ;;  %v1855_v29 = vpop.f32.mrf.mxu0  ;;  %v7761_v60 = vld [vmem:[#allocation5 + $0x1f8] sm:$0xf0]  ;;  %v7759_v52 = vld [vmem:[#allocation5 + $0x1d8] sm:$0xf] }
 0x416   :  { %v1856_v42 = vadd.f32 %v1855_v29, %v9461_v23  ;;  %v2360_v59 = vadd.f32 %v2359_v25, %v2191_v45  ;;  %v9917_v29 = vsel %vm4103_vm6, %v2358_v22, %v4615_v4  ;;  %v7764_v45 = vor.u32 %v8336_v38, %v7761_v60  ;;  %v8017_v16 = vld [vmem:[#allocation5 + $0x3f8] sm:$0xf0]  ;;  %v8404_v38 = vld [vmem:[#allocation5 + $0x3f4] sm:$0xf0] }
 0x417   :  { %v2024_v44 = vpop.f32.mrf.mxu1  ;;  %13248 = vst [vmem:[#allocation254_spill] sm:$0xff] %v9917_v29 }
 0x418   :  { %v2025_v41 = vadd.f32 %v2024_v44, %v1856_v42  ;;  %1894 = vmatmul.bf16.gmra.mxu0 %v13246_v5  ;;  %vm4111_vm7 = vcmp.gt.f32.partialorder %v2360_v59, 0.0  ;;  %v4623_v56 = vmul.f32 0.01, %v2360_v59  ;;  %2232 = vmatmul.bf16.gmra.mxu2 %v13246_v5  ;;  %v7760_v42 = vor.u32 %v8340_v7, %v7759_v52  ;;  %v8400_v44 = vld [vmem:[#allocation5 + $0x3dc] sm:$0xf] }
 0x419   :  { %v8020_v12 = vor.u32 %v8400_v44, %v8017_v16  ;;  %3426 = vmatpush.bf16.msrb.mxu2 %v7764_v45  ;;  %v8015_v7 = vld [vmem:[#allocation5 + $0x3d8] sm:$0xf] }
 0x41a   :  { %2063 = vmatmul.bf16.gmra.mxu1 %v13247_v3  ;;  %2401 = vmatmul.bf16.gmra.mxu3 %v13247_v3  ;;  %v9919_v39 = vsel %vm4111_vm7, %v2360_v59, %v4623_v56  ;;  %v4630_v4 = vmul.f32 0.01, %v2025_v41  ;;  %vm4118_vm8 = vcmp.gt.f32.partialorder %v2025_v41, 0.0  ;;  %v8016_v60 = vor.u32 %v8404_v38, %v8015_v7 }
 0x41b   :  { %13249 = vst [vmem:[#allocation255_spill] sm:$0xff] %v9919_v39  ;;  %v2193_v25 = vpop.f32.mrf.mxu2  ;;  %3088 = vmatpush.bf16.msrb.mxu0 %v7760_v42  ;;  %3595 = vmatpush.bf16.msrb.mxu3 %v8020_v12 }
 0x41c   :  { %v2194_v5 = vadd.f32 %v2193_v25, %v9474_v6  ;;  %v9925_v25 = vsel %vm4118_vm8, %v2025_v41, %v4630_v4  ;;  %3257 = vmatpush.bf16.msrb.mxu1 %v8016_v60 }
 0x41d   :  { %v2362_v1 = vpop.f32.mrf.mxu3  ;;  %v1857_v3 = vpop.f32.mrf.mxu0  ;;  %13250 = vst [vmem:[#allocation256_spill] sm:$0xff] %v9925_v25 }
 0x41e   :  { %v1858_v24 = vadd.f32 %v1857_v3, %v9461_v23  ;;  %v2363_v22 = vadd.f32 %v2362_v1, %v2194_v5 }
 0x41f   :  { %v2026_v61 = vpop.f32.mrf.mxu1 }
 0x420   :  { %v2027_v59 = vadd.f32 %v2026_v61, %v1858_v24  ;;  %v4631_v1 = vmul.f32 0.01, %v2363_v22  ;;  %vm4119_vm10 = vcmp.gt.f32.partialorder %v2363_v22, 0.0 }
 0x422   :  { %vm4126_vm9 = vcmp.gt.f32.partialorder %v2027_v59, 0.0  ;;  %v4638_v56 = vmul.f32 0.01, %v2027_v59  ;;  %v9937_v44 = vsel %vm4119_vm10, %v2363_v22, %v4631_v1 }
 0x423   :  { %v2195_v52 = vpop.f32.mrf.mxu2  ;;  %13252 = vst [vmem:[#allocation258_spill] sm:$0xff] %v9937_v44  ;;  %v13264_v44 = vld [vmem:[#allocation15_spill] sm:$0xff] }
 0x424   :  { %v9927_v11 = vsel %vm4126_vm9, %v2027_v59, %v4638_v56  ;;  %v2196_v16 = vadd.f32 %v2195_v52, %v9474_v6 }
 0x425   :  { %13251 = vst [vmem:[#allocation257_spill] sm:$0xff] %v9927_v11  ;;  %v2364_v3 = vpop.f32.mrf.mxu3  ;;  %v1860_v45 = vpop.f32.mrf.mxu0 }
 0x426   :  { %v1861_v61 = vadd.f32 %v1860_v45, %v9461_v23  ;;  %v2365_v5 = vadd.f32 %v2364_v3, %v2196_v16 }
 0x427   :  { %v2029_v24 = vpop.f32.mrf.mxu1 }
 0x428   :  { %v2030_v42 = vadd.f32 %v2029_v24, %v1861_v61  ;;  %1899 = vmatmul.bf16.gmra.mxu0 %v9277_v46  ;;  %vm4127_vm11 = vcmp.gt.f32.partialorder %v2365_v5, 0.0  ;;  %v4639_v41 = vmul.f32 0.01, %v2365_v5  ;;  %2237 = vmatmul.bf16.gmra.mxu2 %v9277_v46 }
 0x42a   :  { %2068 = vmatmul.bf16.gmra.mxu1 %v9284_v28  ;;  %2406 = vmatmul.bf16.gmra.mxu3 %v9284_v28  ;;  %v9939_v4 = vsel %vm4127_vm11, %v2365_v5, %v4639_v41  ;;  %v4646_v45 = vmul.f32 0.01, %v2030_v42  ;;  %vm4134_vm12 = vcmp.gt.f32.partialorder %v2030_v42, 0.0 }
 0x42b   :  { %13253 = vst [vmem:[#allocation259_spill] sm:$0xff] %v9939_v4  ;;  %v2198_v59 = vpop.f32.mrf.mxu2 }
 0x42c   :  { %v2199_v56 = vadd.f32 %v2198_v59, %v9474_v6  ;;  %v9945_v1 = vsel %vm4134_vm12, %v2030_v42, %v4646_v45 }
 0x42d   :  { %v2367_v38 = vpop.f32.mrf.mxu3  ;;  %v1862_v60 = vpop.f32.mrf.mxu0  ;;  %13254 = vst [vmem:[#allocation260_spill] sm:$0xff] %v9945_v1 }
 0x42e   :  { %v1863_v52 = vadd.f32 %v1862_v60, %v9461_v23  ;;  %v2368_v3 = vadd.f32 %v2367_v38, %v2199_v56 }
 0x42f   :  { %v2031_v16 = vpop.f32.mrf.mxu1 }
 0x430   :  { %v2032_v61 = vadd.f32 %v2031_v16, %v1863_v52  ;;  %v4647_v38 = vmul.f32 0.01, %v2368_v3  ;;  %vm4135_vm14 = vcmp.gt.f32.partialorder %v2368_v3, 0.0 }
 0x432   :  { %vm4142_vm13 = vcmp.gt.f32.partialorder %v2032_v61, 0.0  ;;  %v4654_v22 = vmul.f32 0.01, %v2032_v61  ;;  %v9957_v45 = vsel %vm4135_vm14, %v2368_v3, %v4647_v38 }
 0x433   :  { %v2200_v24 = vpop.f32.mrf.mxu2  ;;  %13256 = vst [vmem:[#allocation262_spill] sm:$0xff] %v9957_v45 }
 0x434   :  { %v9947_v5 = vsel %vm4142_vm13, %v2032_v61, %v4654_v22  ;;  %v2201_v41 = vadd.f32 %v2200_v24, %v9474_v6 }
 0x435   :  { %13255 = vst [vmem:[#allocation261_spill] sm:$0xff] %v9947_v5  ;;  %v2369_v7 = vpop.f32.mrf.mxu3  ;;  %v1865_v59 = vpop.f32.mrf.mxu0 }
 0x436   :  { %v1866_v60 = vadd.f32 %v1865_v59, %v9461_v23  ;;  %v2370_v52 = vadd.f32 %v2369_v7, %v2201_v41 }
 0x437   :  { %v2034_v56 = vpop.f32.mrf.mxu1 }
 0x438   :  { %v2035_v16 = vadd.f32 %v2034_v56, %v1866_v60  ;;  %2420 = vmatmul.bf16.vlgmr.msra.gmra.mxu0 %v8670_v43  ;;  %vm4143_vm15 = vcmp.gt.f32.partialorder %v2370_v52, 0.0  ;;  %v4655_v42 = vmul.f32 0.01, %v2370_v52  ;;  %2758 = vmatmul.bf16.vlgmr.msra.gmra.mxu2 %v8670_v43 }
 0x43a   :  { %2589 = vmatmul.bf16.vlgmr.msra.gmra.mxu1 %v8672_v47  ;;  %2927 = vmatmul.bf16.vlgmr.msra.gmra.mxu3 %v8672_v47  ;;  %v9959_v61 = vsel %vm4143_vm15, %v2370_v52, %v4655_v42  ;;  %v4662_v1 = vmul.f32 0.01, %v2035_v16  ;;  %vm4150_vm0 = vcmp.gt.f32.partialorder %v2035_v16, 0.0 }
 0x43b   :  { %13257 = vst [vmem:[#allocation263_spill] sm:$0xff] %v9959_v61  ;;  %v2203_v22 = vpop.f32.mrf.mxu2 }
 0x43c   :  { %v2204_v24 = vadd.f32 %v2203_v22, %v9474_v6  ;;  %v9965_v52 = vsel %vm4150_vm0, %v2035_v16, %v4662_v1 }
 0x43d   :  { %v2372_v41 = vpop.f32.mrf.mxu3  ;;  %v1867_v59 = vpop.f32.mrf.mxu0  ;;  %13258 = vst [vmem:[#allocation264_spill] sm:$0xff] %v9965_v52 }
 0x43e   :  { %v1868_v60 = vadd.f32 %v1867_v59, %v9461_v23  ;;  %v2373_v12 = vadd.f32 %v2372_v41, %v2204_v24 }
 0x43f   :  { %v2036_v56 = vpop.f32.mrf.mxu1 }
 0x440   :  { %v2037_v5 = vadd.f32 %v2036_v56, %v1868_v60  ;;  %v4663_v41 = vmul.f32 0.01, %v2373_v12  ;;  %vm4151_vm2 = vcmp.gt.f32.partialorder %v2373_v12, 0.0 }
 0x442   :  { %vm4158_vm1 = vcmp.gt.f32.partialorder %v2037_v5, 0.0  ;;  %v4670_v3 = vmul.f32 0.01, %v2037_v5 }
 0x443   :  { %v2205_v38 = vpop.f32.mrf.mxu2 }
 0x444   :  { %v9967_v42 = vsel %vm4158_vm1, %v2037_v5, %v4670_v3  ;;  %v2206_v7 = vadd.f32 %v2205_v38, %v9474_v6  ;;  %v9977_v5 = vsel %vm4151_vm2, %v2373_v12, %v4663_v41 }
 0x445   :  { %13259 = vst [vmem:[#allocation265_spill] sm:$0xff] %v9967_v42  ;;  %v2374_v45 = vpop.f32.mrf.mxu3  ;;  %v1870_v22 = vpop.f32.mrf.mxu0 }
 0x446   :  { %v1871_v59 = vadd.f32 %v1870_v22, %v9461_v23  ;;  %v2375_v60 = vadd.f32 %v2374_v45, %v2206_v7  ;;  %13260 = vst [vmem:[#allocation266_spill] sm:$0xff] %v9977_v5 }
 0x447   :  { %v2039_v24 = vpop.f32.mrf.mxu1 }
 0x448   :  { %v2040_v56 = vadd.f32 %v2039_v24, %v1871_v59  ;;  %2425 = vmatmul.bf16.gmra.mxu0 %v8678_v54  ;;  %vm4159_vm3 = vcmp.gt.f32.partialorder %v2375_v60, 0.0  ;;  %v4671_v1 = vmul.f32 0.01, %v2375_v60  ;;  %2763 = vmatmul.bf16.gmra.mxu2 %v8678_v54 }
 0x44a   :  { %2594 = vmatmul.bf16.gmra.mxu1 %v8680_v55  ;;  %2932 = vmatmul.bf16.gmra.mxu3 %v8680_v55  ;;  %v9979_v16 = vsel %vm4159_vm3, %v2375_v60, %v4671_v1  ;;  %v4678_v52 = vmul.f32 0.01, %v2040_v56  ;;  %vm4166_vm4 = vcmp.gt.f32.partialorder %v2040_v56, 0.0 }
 0x44b   :  { %13261 = vst [vmem:[#allocation267_spill] sm:$0xff] %v9979_v16  ;;  %v2208_v3 = vpop.f32.mrf.mxu2  ;;  %v8332_v16 = vld [vmem:[#allocation5 + $0x1b4] sm:$0xf0] }
 0x44c   :  { %v2209_v7 = vadd.f32 %v2208_v3, %v9474_v6  ;;  %v9985_v60 = vsel %vm4166_vm4, %v2040_v56, %v4678_v52  ;;  %v8328_v56 = vld [vmem:[#allocation5 + $0x19c] sm:$0xf] }
 0x44d   :  { %v2377_v38 = vpop.f32.mrf.mxu3  ;;  %v1872_v22 = vpop.f32.mrf.mxu0  ;;  %13262 = vst [vmem:[#allocation268_spill] sm:$0xff] %v9985_v60 }
 0x44e   :  { %v1873_v59 = vadd.f32 %v1872_v22, %v9461_v23  ;;  %v2378_v61 = vadd.f32 %v2377_v38, %v2209_v7 }
 0x44f   :  { %v2041_v24 = vpop.f32.mrf.mxu1 }
 0x450   :  { %v2042_v42 = vadd.f32 %v2041_v24, %v1873_v59  ;;  %v4679_v38 = vmul.f32 0.01, %v2378_v61  ;;  %vm4167_vm6 = vcmp.gt.f32.partialorder %v2378_v61, 0.0 }
 0x452   :  { %vm4174_vm5 = vcmp.gt.f32.partialorder %v2042_v42, 0.0  ;;  %v4686_v12 = vmul.f32 0.01, %v2042_v42 }
 0x453   :  { %v2210_v41 = vpop.f32.mrf.mxu2 }
 0x454   :  { %v9987_v1 = vsel %vm4174_vm5, %v2042_v42, %v4686_v12  ;;  %v2211_v45 = vadd.f32 %v2210_v41, %v9474_v6  ;;  %v13265_v42 = vld [vmem:[#allocation16_spill] sm:$0xff]  ;;  %v7729_v12 = vld [vmem:[#allocation5 + $0x1b8] sm:$0xf0]  ;;  %v7727_v41 = vld [vmem:[#allocation5 + $0x198] sm:$0xf] }
 0x455   :  { %13263 = vst [vmem:[#allocation269_spill] sm:$0xff] %v9987_v1  ;;  %v2379_v5 = vpop.f32.mrf.mxu3  ;;  %v1875_v3 = vpop.f32.mrf.mxu0  ;;  %v7985_v1 = vld [vmem:[#allocation5 + $0x3b8] sm:$0xf0] }
 0x456   :  { %v1876_v22 = vadd.f32 %v1875_v3, %v9461_v23  ;;  %v2380_v59 = vadd.f32 %v2379_v5, %v2211_v45  ;;  %v9997_v3 = vsel %vm4167_vm6, %v2378_v61, %v4679_v38  ;;  %v7732_v45 = vor.u32 %v8328_v56, %v7729_v12  ;;  %v8396_v56 = vld [vmem:[#allocation5 + $0x3b4] sm:$0xf0] }
 0x457   :  { %v2044_v7 = vpop.f32.mrf.mxu1  ;;  %13266 = vst [vmem:[#allocation270_spill] sm:$0xff] %v9997_v3 }
 0x458   :  { %v2045_v24 = vadd.f32 %v2044_v7, %v1876_v22  ;;  %2430 = vmatmul.bf16.gmra.mxu0 %v13264_v44  ;;  %vm4175_vm7 = vcmp.gt.f32.partialorder %v2380_v59, 0.0  ;;  %v4687_v52 = vmul.f32 0.01, %v2380_v59  ;;  %2768 = vmatmul.bf16.gmra.mxu2 %v13264_v44  ;;  %v7728_v22 = vor.u32 %v8332_v16, %v7727_v41  ;;  %v8392_v7 = vld [vmem:[#allocation5 + $0x39c] sm:$0xf] }
 0x459   :  { %v7988_v39 = vor.u32 %v8392_v7, %v7985_v1  ;;  %3427 = vmatpush.bf16.msrb.mxu2 %v7732_v45  ;;  %v7983_v16 = vld [vmem:[#allocation5 + $0x398] sm:$0xf] }
 0x45a   :  { %2599 = vmatmul.bf16.gmra.mxu1 %v13265_v42  ;;  %2937 = vmatmul.bf16.gmra.mxu3 %v13265_v42  ;;  %v9999_v60 = vsel %vm4175_vm7, %v2380_v59, %v4687_v52  ;;  %v4694_v38 = vmul.f32 0.01, %v2045_v24  ;;  %vm4182_vm8 = vcmp.gt.f32.partialorder %v2045_v24, 0.0  ;;  %v7984_v12 = vor.u32 %v8396_v56, %v7983_v16 }
 0x45b   :  { %13267 = vst [vmem:[#allocation271_spill] sm:$0xff] %v9999_v60  ;;  %v2213_v5 = vpop.f32.mrf.mxu2  ;;  %3089 = vmatpush.bf16.msrb.mxu0 %v7728_v22  ;;  %3596 = vmatpush.bf16.msrb.mxu3 %v7988_v39 }
 0x45c   :  { %v2214_v25 = vadd.f32 %v2213_v5, %v9474_v6  ;;  %v10005_v5 = vsel %vm4182_vm8, %v2045_v24, %v4694_v38  ;;  %3258 = vmatpush.bf16.msrb.mxu1 %v7984_v12 }
 0x45d   :  { %v2382_v11 = vpop.f32.mrf.mxu3  ;;  %v1877_v29 = vpop.f32.mrf.mxu0  ;;  %13268 = vst [vmem:[#allocation272_spill] sm:$0xff] %v10005_v5 }
 0x45e   :  { %v1878_v42 = vadd.f32 %v1877_v29, %v9461_v23  ;;  %v2383_v61 = vadd.f32 %v2382_v11, %v2214_v25 }
 0x45f   :  { %v2046_v44 = vpop.f32.mrf.mxu1 }
 0x460   :  { %v2047_v59 = vadd.f32 %v2046_v44, %v1878_v42  ;;  %v4695_v44 = vmul.f32 0.01, %v2383_v61  ;;  %vm4183_vm10 = vcmp.gt.f32.partialorder %v2383_v61, 0.0 }
 0x462   :  { %vm4190_vm9 = vcmp.gt.f32.partialorder %v2047_v59, 0.0  ;;  %v4702_v52 = vmul.f32 0.01, %v2047_v59  ;;  %v10017_v7 = vsel %vm4183_vm10, %v2383_v61, %v4695_v44 }
 0x463   :  { %v2215_v41 = vpop.f32.mrf.mxu2  ;;  %13270 = vst [vmem:[#allocation274_spill] sm:$0xff] %v10017_v7  ;;  %v8384_v7 = vld [vmem:[#allocation5 + $0x35c] sm:$0xf] }
 0x464   :  { %v10007_v4 = vsel %vm4190_vm9, %v2047_v59, %v4702_v52  ;;  %v2216_v29 = vadd.f32 %v2215_v41, %v9474_v6 }
 0x465   :  { %13269 = vst [vmem:[#allocation273_spill] sm:$0xff] %v10007_v4  ;;  %v2384_v1 = vpop.f32.mrf.mxu3  ;;  %v1880_v45 = vpop.f32.mrf.mxu0 }
 0x466   :  { %v1881_v39 = vadd.f32 %v1880_v45, %v9461_v23  ;;  %v2385_v42 = vadd.f32 %v2384_v1, %v2216_v29 }
 0x467   :  { %v2049_v25 = vpop.f32.mrf.mxu1 }
 0x468   :  { %v2050_v22 = vadd.f32 %v2049_v25, %v1881_v39  ;;  %2435 = vmatmul.bf16.gmra.mxu0 %v8694_v14  ;;  %vm4191_vm11 = vcmp.gt.f32.partialorder %v2385_v42, 0.0  ;;  %v4703_v24 = vmul.f32 0.01, %v2385_v42  ;;  %2773 = vmatmul.bf16.gmra.mxu2 %v8694_v14 }
 0x46a   :  { %2604 = vmatmul.bf16.gmra.mxu1 %v8696_v15  ;;  %2942 = vmatmul.bf16.gmra.mxu3 %v8696_v15  ;;  %v10019_v38 = vsel %vm4191_vm11, %v2385_v42, %v4703_v24  ;;  %v4710_v45 = vmul.f32 0.01, %v2050_v22  ;;  %vm4198_vm12 = vcmp.gt.f32.partialorder %v2050_v22, 0.0 }
 0x46b   :  { %13271 = vst [vmem:[#allocation275_spill] sm:$0xff] %v10019_v38  ;;  %v2218_v59 = vpop.f32.mrf.mxu2  ;;  %v7953_v38 = vld [vmem:[#allocation5 + $0x378] sm:$0xf0] }
 0x46c   :  { %v2219_v52 = vadd.f32 %v2218_v59, %v9474_v6  ;;  %v10025_v44 = vsel %vm4198_vm12, %v2050_v22, %v4710_v45 }
 0x46d   :  { %v2387_v56 = vpop.f32.mrf.mxu3  ;;  %v1882_v12 = vpop.f32.mrf.mxu0  ;;  %13272 = vst [vmem:[#allocation276_spill] sm:$0xff] %v10025_v44 }
 0x46e   :  { %v1883_v41 = vadd.f32 %v1882_v12, %v9461_v23  ;;  %v2388_v1 = vadd.f32 %v2387_v56, %v2219_v52 }
 0x46f   :  { %v2051_v29 = vpop.f32.mrf.mxu1 }
 0x470   :  { %v2052_v39 = vadd.f32 %v2051_v29, %v1883_v41  ;;  %v4711_v56 = vmul.f32 0.01, %v2388_v1  ;;  %vm4199_vm14 = vcmp.gt.f32.partialorder %v2388_v1, 0.0 }
 0x472   :  { %vm4206_vm13 = vcmp.gt.f32.partialorder %v2052_v39, 0.0  ;;  %v4718_v61 = vmul.f32 0.01, %v2052_v39  ;;  %v10037_v45 = vsel %vm4199_vm14, %v2388_v1, %v4711_v56 }
 0x473   :  { %v2220_v25 = vpop.f32.mrf.mxu2  ;;  %13274 = vst [vmem:[#allocation278_spill] sm:$0xff] %v10037_v45 }
 0x474   :  { %v10027_v42 = vsel %vm4206_vm13, %v2052_v39, %v4718_v61  ;;  %v2221_v24 = vadd.f32 %v2220_v25, %v9474_v6 }
 0x475   :  { %13273 = vst [vmem:[#allocation277_spill] sm:$0xff] %v10027_v42  ;;  %v2389_v16 = vpop.f32.mrf.mxu3  ;;  %v1885_v59 = vpop.f32.mrf.mxu0 }
 0x476   :  { %v1886_v12 = vadd.f32 %v1885_v59, %v9461_v23  ;;  %v2390_v41 = vadd.f32 %v2389_v16, %v2221_v24 }
 0x477   :  { %v2054_v52 = vpop.f32.mrf.mxu1 }
 0x478   :  { %v2055_v29 = vadd.f32 %v2054_v52, %v1886_v12  ;;  %2440 = vmatmul.bf16.gmra.mxu0 %v8702_v20  ;;  %vm4207_vm15 = vcmp.gt.f32.partialorder %v2390_v41, 0.0  ;;  %v4719_v22 = vmul.f32 0.01, %v2390_v41  ;;  %2778 = vmatmul.bf16.gmra.mxu2 %v8702_v20 }
 0x47a   :  { %2609 = vmatmul.bf16.gmra.mxu1 %v8704_v21  ;;  %2947 = vmatmul.bf16.gmra.mxu3 %v8704_v21  ;;  %v10039_v39 = vsel %vm4207_vm15, %v2390_v41, %v4719_v22  ;;  %v4726_v44 = vmul.f32 0.01, %v2055_v29  ;;  %vm4214_vm0 = vcmp.gt.f32.partialorder %v2055_v29, 0.0 }
 0x47b   :  { %13275 = vst [vmem:[#allocation279_spill] sm:$0xff] %v10039_v39  ;;  %v2223_v61 = vpop.f32.mrf.mxu2 }
 0x47c   :  { %v2224_v25 = vadd.f32 %v2223_v61, %v9474_v6  ;;  %v10045_v41 = vsel %vm4214_vm0, %v2055_v29, %v4726_v44 }
 0x47d   :  { %v2392_v24 = vpop.f32.mrf.mxu3  ;;  %v1887_v59 = vpop.f32.mrf.mxu0  ;;  %13276 = vst [vmem:[#allocation280_spill] sm:$0xff] %v10045_v41 }
 0x47e   :  { %v1888_v12 = vadd.f32 %v1887_v59, %v9461_v23  ;;  %v2393_v11 = vadd.f32 %v2392_v24, %v2224_v25 }
 0x47f   :  { %v2056_v52 = vpop.f32.mrf.mxu1 }
 0x480   :  { %v2057_v42 = vadd.f32 %v2056_v52, %v1888_v12  ;;  %v4727_v24 = vmul.f32 0.01, %v2393_v11  ;;  %vm4215_vm2 = vcmp.gt.f32.partialorder %v2393_v11, 0.0 }
 0x482   :  { %vm4222_vm1 = vcmp.gt.f32.partialorder %v2057_v42, 0.0  ;;  %v4734_v1 = vmul.f32 0.01, %v2057_v42 }
 0x483   :  { %v2225_v56 = vpop.f32.mrf.mxu2 }
 0x484   :  { %v10047_v22 = vsel %vm4222_vm1, %v2057_v42, %v4734_v1  ;;  %v2226_v16 = vadd.f32 %v2225_v56, %v9474_v6  ;;  %v10057_v42 = vsel %vm4215_vm2, %v2393_v11, %v4727_v24 }
 0x485   :  { %13277 = vst [vmem:[#allocation281_spill] sm:$0xff] %v10047_v22  ;;  %v2394_v45 = vpop.f32.mrf.mxu3  ;;  %v1890_v61 = vpop.f32.mrf.mxu0 }
 0x486   :  { %v1891_v59 = vadd.f32 %v1890_v61, %v9461_v23  ;;  %v2395_v12 = vadd.f32 %v2394_v45, %v2226_v16  ;;  %13278 = vst [vmem:[#allocation282_spill] sm:$0xff] %v10057_v42 }
 0x487   :  { %v2059_v25 = vpop.f32.mrf.mxu1 }
 0x488   :  { %v2060_v52 = vadd.f32 %v2059_v25, %v1891_v59  ;;  %2445 = vmatmul.bf16.gmra.mxu0 %v8710_v26  ;;  %vm4223_vm3 = vcmp.gt.f32.partialorder %v2395_v12, 0.0  ;;  %v4735_v44 = vmul.f32 0.01, %v2395_v12  ;;  %2783 = vmatmul.bf16.gmra.mxu2 %v8710_v26 }
 0x48a   :  { %2614 = vmatmul.bf16.gmra.mxu1 %v8712_v27  ;;  %2952 = vmatmul.bf16.gmra.mxu3 %v8712_v27  ;;  %v10059_v29 = vsel %vm4223_vm3, %v2395_v12, %v4735_v44  ;;  %v4742_v41 = vmul.f32 0.01, %v2060_v52  ;;  %vm4230_vm4 = vcmp.gt.f32.partialorder %v2060_v52, 0.0 }
 0x48b   :  { %13279 = vst [vmem:[#allocation283_spill] sm:$0xff] %v10059_v29  ;;  %v2228_v1 = vpop.f32.mrf.mxu2 }
 0x48c   :  { %v2229_v16 = vadd.f32 %v2228_v1, %v9474_v6  ;;  %v10065_v12 = vsel %vm4230_vm4, %v2060_v52, %v4742_v41 }
 0x48d   :  { %v2397_v56 = vpop.f32.mrf.mxu3  ;;  %v1892_v61 = vpop.f32.mrf.mxu0  ;;  %13280 = vst [vmem:[#allocation284_spill] sm:$0xff] %v10065_v12 }
 0x48e   :  { %v1893_v59 = vadd.f32 %v1892_v61, %v9461_v23  ;;  %v2398_v39 = vadd.f32 %v2397_v56, %v2229_v16 }
 0x48f   :  { %v2061_v25 = vpop.f32.mrf.mxu1 }
 0x490   :  { %v2062_v22 = vadd.f32 %v2061_v25, %v1893_v59  ;;  %v4743_v56 = vmul.f32 0.01, %v2398_v39  ;;  %vm4231_vm6 = vcmp.gt.f32.partialorder %v2398_v39, 0.0 }
 0x492   :  { %vm4238_vm5 = vcmp.gt.f32.partialorder %v2062_v22, 0.0  ;;  %v4750_v11 = vmul.f32 0.01, %v2062_v22 }
 0x493   :  { %v2230_v24 = vpop.f32.mrf.mxu2 }
 0x494   :  { %v10067_v44 = vsel %vm4238_vm5, %v2062_v22, %v4750_v11  ;;  %v2231_v45 = vadd.f32 %v2230_v24, %v9474_v6  ;;  %v10077_v22 = vsel %vm4231_vm6, %v2398_v39, %v4743_v56  ;;  %v8320_v24 = vld [vmem:[#allocation5 + $0x15c] sm:$0xf] }
 0x495   :  { %13281 = vst [vmem:[#allocation285_spill] sm:$0xff] %v10067_v44  ;;  %v2399_v42 = vpop.f32.mrf.mxu3  ;;  %v1895_v1 = vpop.f32.mrf.mxu0  ;;  %v8324_v44 = vld [vmem:[#allocation5 + $0x174] sm:$0xf0] }
 0x496   :  { %v1896_v61 = vadd.f32 %v1895_v1, %v9461_v23  ;;  %v2400_v59 = vadd.f32 %v2399_v42, %v2231_v45  ;;  %13282 = vst [vmem:[#allocation286_spill] sm:$0xff] %v10077_v22  ;;  %v7697_v1 = vld [vmem:[#allocation5 + $0x178] sm:$0xf0]  ;;  %v7695_v42 = vld [vmem:[#allocation5 + $0x158] sm:$0xf] }
 0x497   :  { %v2064_v16 = vpop.f32.mrf.mxu1  ;;  %v7700_v12 = vor.u32 %v8320_v24, %v7697_v1  ;;  %v7951_v45 = vld [vmem:[#allocation5 + $0x358] sm:$0xf] }
 0x498   :  { %v2065_v25 = vadd.f32 %v2064_v16, %v1896_v61  ;;  %2450 = vmatmul.bf16.gmra.mxu0 %v8718_v32  ;;  %vm4239_vm7 = vcmp.gt.f32.partialorder %v2400_v59, 0.0  ;;  %v4751_v41 = vmul.f32 0.01, %v2400_v59  ;;  %2788 = vmatmul.bf16.gmra.mxu2 %v8718_v32  ;;  %v8388_v22 = vld [vmem:[#allocation5 + $0x374] sm:$0xf0] }
 0x499   :  { %3428 = vmatpush.bf16.msrb.mxu2 %v7700_v12  ;;  %v7952_v1 = vor.u32 %v8388_v22, %v7951_v45 }
 0x49a   :  { %2619 = vmatmul.bf16.gmra.mxu1 %v8720_v33  ;;  %2957 = vmatmul.bf16.gmra.mxu3 %v8720_v33  ;;  %v10079_v52 = vsel %vm4239_vm7, %v2400_v59, %v4751_v41  ;;  %v7696_v59 = vor.u32 %v8324_v44, %v7695_v42  ;;  %v7956_v41 = vor.u32 %v8384_v7, %v7953_v38  ;;  %v4758_v4 = vmul.f32 0.01, %v2065_v25 }
 0x49b   :  { %13283 = vst [vmem:[#allocation287_spill] sm:$0xff] %v10079_v52  ;;  %v2233_v11 = vpop.f32.mrf.mxu2  ;;  %vm4246_vm8 = vcmp.gt.f32.partialorder %v2065_v25, 0.0  ;;  %3259 = vmatpush.bf16.msrb.mxu1 %v7952_v1 }
 0x49c   :  { %v2234_v61 = vadd.f32 %v2233_v11, %v9474_v6  ;;  %3090 = vmatpush.bf16.msrb.mxu0 %v7696_v59  ;;  %3597 = vmatpush.bf16.msrb.mxu3 %v7956_v41  ;;  %v10085_v52 = vsel %vm4246_vm8, %v2065_v25, %v4758_v4 }
 0x49d   :  { %v2402_v16 = vpop.f32.mrf.mxu3  ;;  %v1897_v29 = vpop.f32.mrf.mxu0  ;;  %13284 = vst [vmem:[#allocation288_spill] sm:$0xff] %v10085_v52 }
 0x49e   :  { %v1898_v39 = vadd.f32 %v1897_v29, %v9461_v23  ;;  %v2403_v5 = vadd.f32 %v2402_v16, %v2234_v61 }
 0x49f   :  { %v2066_v56 = vpop.f32.mrf.mxu1 }
 0x4a0   :  { %v2067_v3 = vadd.f32 %v2066_v56, %v1898_v39  ;;  %v4759_v61 = vmul.f32 0.01, %v2403_v5  ;;  %vm4247_vm10 = vcmp.gt.f32.partialorder %v2403_v5, 0.0 }
 0x4a2   :  { %vm4254_vm9 = vcmp.gt.f32.partialorder %v2067_v3, 0.0  ;;  %v4766_v11 = vmul.f32 0.01, %v2067_v3 }
 0x4a3   :  { %v2235_v24 = vpop.f32.mrf.mxu2 }
 0x4a4   :  { %v10087_v60 = vsel %vm4254_vm9, %v2067_v3, %v4766_v11  ;;  %v2236_v29 = vadd.f32 %v2235_v24, %v9474_v6  ;;  %v10097_v3 = vsel %vm4247_vm10, %v2403_v5, %v4759_v61 }
 0x4a5   :  { %13285 = vst [vmem:[#allocation289_spill] sm:$0xff] %v10087_v60  ;;  %v2404_v7 = vpop.f32.mrf.mxu3  ;;  %v1900_v38 = vpop.f32.mrf.mxu0 }
 0x4a6   :  { %v1901_v44 = vadd.f32 %v1900_v38, %v9461_v23  ;;  %v2405_v16 = vadd.f32 %v2404_v7, %v2236_v29  ;;  %13286 = vst [vmem:[#allocation290_spill] sm:$0xff] %v10097_v3  ;;  %v8484_v38 = vld [vmem:[#allocation7] sm:$0xff] }
 0x4a7   :  { %v2069_v42 = vpop.f32.mrf.mxu1 }
 0x4a8   :  { %v2070_v39 = vadd.f32 %v2069_v42, %v1901_v44  ;;  %2455 = vmatmul.bf16.gmra.mxu0 %v8726_v51  ;;  %vm4255_vm11 = vcmp.gt.f32.partialorder %v2405_v16, 0.0  ;;  %v4767_v4 = vmul.f32 0.01, %v2405_v16  ;;  %2793 = vmatmul.bf16.gmra.mxu2 %v8726_v51  ;;  %v10105_v44 = vperm.slane %v8484_v38, 4 }
 0x4aa   :  { %2624 = vmatmul.bf16.gmra.mxu1 %v8728_v53  ;;  %2962 = vmatmul.bf16.gmra.mxu3 %v8728_v53  ;;  %v10099_v25 = vsel %vm4255_vm11, %v2405_v16, %v4767_v4  ;;  %v4774_v29 = vmul.f32 0.01, %v2070_v39  ;;  %vm4262_vm12 = vcmp.gt.f32.partialorder %v2070_v39, 0.0 }
 0x4ab   :  { %13287 = vst [vmem:[#allocation291_spill] sm:$0xff] %v10099_v25  ;;  %v2238_v22 = vpop.f32.mrf.mxu2 }
 0x4ac   :  { %v2239_v56 = vadd.f32 %v2238_v22, %v9474_v6  ;;  %v10107_v61 = vsel %vm4262_vm12, %v2070_v39, %v4774_v29 }
 0x4ad   :  { %v2407_v59 = vpop.f32.mrf.mxu3  ;;  %v1902_v41 = vpop.f32.mrf.mxu0  ;;  %13288 = vst [vmem:[#allocation292_spill] sm:$0xff] %v10107_v61 }
 0x4ae   :  { %v1903_v11 = vadd.f32 %v1902_v41, %v9461_v23  ;;  %v2408_v1 = vadd.f32 %v2407_v59, %v2239_v56 }
 0x4af   :  { %v2071_v24 = vpop.f32.mrf.mxu1 }
 0x4b0   :  { %v2072_v7 = vadd.f32 %v2071_v24, %v1903_v11  ;;  %v4775_v41 = vmul.f32 0.01, %v2408_v1  ;;  %vm4263_vm14 = vcmp.gt.f32.partialorder %v2408_v1, 0.0 }
 0x4b2   :  { %vm4270_vm13 = vcmp.gt.f32.partialorder %v2072_v7, 0.0  ;;  %v4782_v5 = vmul.f32 0.01, %v2072_v7  ;;  %v10121_v29 = vsel %vm4263_vm14, %v2408_v1, %v4775_v41 }
 0x4b3   :  { %v2240_v42 = vpop.f32.mrf.mxu2  ;;  %13290 = vst [vmem:[#allocation294_spill] sm:$0xff] %v10121_v29 }
 0x4b4   :  { %v10109_v16 = vsel %vm4270_vm13, %v2072_v7, %v4782_v5  ;;  %v2241_v4 = vadd.f32 %v2240_v42, %v9474_v6  ;;  %v10118_v6 = vperm.slane %v8484_v38, 5 }
 0x4b5   :  { %13289 = vst [vmem:[#allocation293_spill] sm:$0xff] %v10109_v16  ;;  %v2409_v22 = vpop.f32.mrf.mxu3  ;;  %v2421_v45 = vpop.f32.mrf.mxu0 }
 0x4b6   :  { %v2422_v56 = vadd.f32 %v2421_v45, %v10105_v44  ;;  %v2410_v11 = vadd.f32 %v2409_v22, %v2241_v4 }
 0x4b7   :  { %v2590_v59 = vpop.f32.mrf.mxu1 }
 0x4b8   :  { %v2591_v24 = vadd.f32 %v2590_v59, %v2422_v56  ;;  %2460 = vmatmul.bf16.gmra.mxu0 %v8736_v0  ;;  %vm4271_vm15 = vcmp.gt.f32.partialorder %v2410_v11, 0.0  ;;  %v4783_v39 = vmul.f32 0.01, %v2410_v11  ;;  %2798 = vmatmul.bf16.gmra.mxu2 %v8736_v0 }
 0x4ba   :  { %2629 = vmatmul.bf16.gmra.mxu1 %v8738_v2  ;;  %2967 = vmatmul.bf16.gmra.mxu3 %v8738_v2  ;;  %v10123_v45 = vsel %vm4271_vm15, %v2410_v11, %v4783_v39  ;;  %v4280_v38 = vmul.f32 0.01, %v2591_v24  ;;  %vm3768_vm0 = vcmp.gt.f32.partialorder %v2591_v24, 0.0 }
 0x4bb   :  { %13291 = vst [vmem:[#allocation295_spill] sm:$0xff] %v10123_v45  ;;  %v2759_v7 = vpop.f32.mrf.mxu2 }
 0x4bc   :  { %v2760_v42 = vadd.f32 %v2759_v7, %v10118_v6  ;;  %v10129_v41 = vsel %vm3768_vm0, %v2591_v24, %v4280_v38 }
 0x4bd   :  { %v2928_v4 = vpop.f32.mrf.mxu3  ;;  %v2423_v22 = vpop.f32.mrf.mxu0  ;;  %13292 = vst [vmem:[#allocation296_spill] sm:$0xff] %v10129_v41 }
 0x4be   :  { %v2424_v56 = vadd.f32 %v2423_v22, %v10105_v44  ;;  %v2929_v23 = vadd.f32 %v2928_v4, %v2760_v42 }
 0x4bf   :  { %v2592_v59 = vpop.f32.mrf.mxu1 }
 0x4c0   :  { %v2593_v12 = vadd.f32 %v2592_v59, %v2424_v56  ;;  %v4281_v4 = vmul.f32 0.01, %v2929_v23  ;;  %vm3769_vm2 = vcmp.gt.f32.partialorder %v2929_v23, 0.0 }
 0x4c2   :  { %vm3776_vm1 = vcmp.gt.f32.partialorder %v2593_v12, 0.0  ;;  %v4288_v1 = vmul.f32 0.01, %v2593_v12  ;;  %v10141_v24 = vsel %vm3769_vm2, %v2929_v23, %v4281_v4 }
 0x4c3   :  { %v2761_v39 = vpop.f32.mrf.mxu2  ;;  %13294 = vst [vmem:[#allocation298_spill] sm:$0xff] %v10141_v24 }
 0x4c4   :  { %v10131_v11 = vsel %vm3776_vm1, %v2593_v12, %v4288_v1  ;;  %v2762_v7 = vadd.f32 %v2761_v39, %v10118_v6 }
 0x4c5   :  { %13293 = vst [vmem:[#allocation297_spill] sm:$0xff] %v10131_v11  ;;  %v2930_v29 = vpop.f32.mrf.mxu3  ;;  %v2426_v45 = vpop.f32.mrf.mxu0 }
 0x4c6   :  { %v2427_v22 = vadd.f32 %v2426_v45, %v10105_v44  ;;  %v2931_v56 = vadd.f32 %v2930_v29, %v2762_v7 }
 0x4c7   :  { %v2595_v42 = vpop.f32.mrf.mxu1 }
 0x4c8   :  { %v2596_v59 = vadd.f32 %v2595_v42, %v2427_v22  ;;  %2465 = vmatmul.bf16.gmra.mxu0 %v8753_v30  ;;  %vm3777_vm3 = vcmp.gt.f32.partialorder %v2931_v56, 0.0  ;;  %v4289_v12 = vmul.f32 0.01, %v2931_v56  ;;  %2803 = vmatmul.bf16.gmra.mxu2 %v8753_v30 }
 0x4ca   :  { %2634 = vmatmul.bf16.gmra.mxu1 %v8758_v37  ;;  %2972 = vmatmul.bf16.gmra.mxu3 %v8758_v37  ;;  %v10143_v38 = vsel %vm3777_vm3, %v2931_v56, %v4289_v12  ;;  %v4296_v41 = vmul.f32 0.01, %v2596_v59  ;;  %vm3784_vm4 = vcmp.gt.f32.partialorder %v2596_v59, 0.0 }
 0x4cb   :  { %13295 = vst [vmem:[#allocation299_spill] sm:$0xff] %v10143_v38  ;;  %v2764_v29 = vpop.f32.mrf.mxu2 }
 0x4cc   :  { %v2765_v1 = vadd.f32 %v2764_v29, %v10118_v6  ;;  %v10149_v56 = vsel %vm3784_vm4, %v2596_v59, %v4296_v41  ;;  %v7665_v59 = vld [vmem:[#allocation5 + $0x138] sm:$0xf0] }
 0x4cd   :  { %v2933_v39 = vpop.f32.mrf.mxu3  ;;  %v2428_v7 = vpop.f32.mrf.mxu0  ;;  %13296 = vst [vmem:[#allocation300_spill] sm:$0xff] %v10149_v56  ;;  %v7921_v56 = vld [vmem:[#allocation5 + $0x338] sm:$0xf0] }
 0x4ce   :  { %v2429_v22 = vadd.f32 %v2428_v7, %v10105_v44  ;;  %v2934_v5 = vadd.f32 %v2933_v39, %v2765_v1 }
 0x4cf   :  { %v2597_v42 = vpop.f32.mrf.mxu1 }
 0x4d0   :  { %v2598_v11 = vadd.f32 %v2597_v42, %v2429_v22  ;;  %v4297_v39 = vmul.f32 0.01, %v2934_v5  ;;  %vm3785_vm6 = vcmp.gt.f32.partialorder %v2934_v5, 0.0 }
 0x4d2   :  { %vm3792_vm5 = vcmp.gt.f32.partialorder %v2598_v11, 0.0  ;;  %v4304_v23 = vmul.f32 0.01, %v2598_v11 }
 0x4d3   :  { %v2766_v4 = vpop.f32.mrf.mxu2 }
 0x4d4   :  { %v10151_v12 = vsel %vm3792_vm5, %v2598_v11, %v4304_v23  ;;  %v2767_v45 = vadd.f32 %v2766_v4, %v10118_v6  ;;  %v8312_v11 = vld [vmem:[#allocation5 + $0x11c] sm:$0xf]  ;;  %v7663_v23 = vld [vmem:[#allocation5 + $0x118] sm:$0xf] }
 0x4d5   :  { %13297 = vst [vmem:[#allocation301_spill] sm:$0xff] %v10151_v12  ;;  %v2935_v24 = vpop.f32.mrf.mxu3  ;;  %v2431_v29 = vpop.f32.mrf.mxu0  ;;  %v8316_v4 = vld [vmem:[#allocation5 + $0x134] sm:$0xf0] }
 0x4d6   :  { %v2432_v7 = vadd.f32 %v2431_v29, %v10105_v44  ;;  %v2936_v22 = vadd.f32 %v2935_v24, %v2767_v45  ;;  %v10161_v29 = vsel %vm3785_vm6, %v2934_v5, %v4297_v39  ;;  %v7668_v45 = vor.u32 %v8312_v11, %v7665_v59  ;;  %v8380_v59 = vld [vmem:[#allocation5 + $0x334] sm:$0xf0] }
 0x4d7   :  { %v2600_v1 = vpop.f32.mrf.mxu1  ;;  %13298 = vst [vmem:[#allocation302_spill] sm:$0xff] %v10161_v29 }
 0x4d8   :  { %v2601_v42 = vadd.f32 %v2600_v1, %v2432_v7  ;;  %2470 = vmatmul.bf16.gmra.mxu0 %v8773_v10  ;;  %vm3793_vm7 = vcmp.gt.f32.partialorder %v2936_v22, 0.0  ;;  %v4305_v41 = vmul.f32 0.01, %v2936_v22  ;;  %2808 = vmatmul.bf16.gmra.mxu2 %v8773_v10  ;;  %v7664_v7 = vor.u32 %v8316_v4, %v7663_v23  ;;  %v8376_v1 = vld [vmem:[#allocation5 + $0x31c] sm:$0xf] }
 0x4d9   :  { %v7924_v25 = vor.u32 %v8376_v1, %v7921_v56  ;;  %3429 = vmatpush.bf16.msrb.mxu2 %v7668_v45 }
 0x4da   :  { %2639 = vmatmul.bf16.gmra.mxu1 %v8780_v18  ;;  %2977 = vmatmul.bf16.gmra.mxu3 %v8780_v18  ;;  %v10163_v38 = vsel %vm3793_vm7, %v2936_v22, %v4305_v41  ;;  %v4312_v39 = vmul.f32 0.01, %v2601_v42  ;;  %vm3800_vm8 = vcmp.gt.f32.partialorder %v2601_v42, 0.0  ;;  %v7919_v41 = vld [vmem:[#allocation5 + $0x318] sm:$0xf] }
 0x4db   :  { %13299 = vst [vmem:[#allocation303_spill] sm:$0xff] %v10163_v38  ;;  %v2769_v24 = vpop.f32.mrf.mxu2  ;;  %3091 = vmatpush.bf16.msrb.mxu0 %v7664_v7  ;;  %3598 = vmatpush.bf16.msrb.mxu3 %v7924_v25  ;;  %v7920_v23 = vor.u32 %v8380_v59, %v7919_v41 }
 0x4dc   :  { %v2770_v61 = vadd.f32 %v2769_v24, %v10118_v6  ;;  %v10169_v24 = vsel %vm3800_vm8, %v2601_v42, %v4312_v39 }
 0x4dd   :  { %v2938_v16 = vpop.f32.mrf.mxu3  ;;  %v2433_v3 = vpop.f32.mrf.mxu0  ;;  %13300 = vst [vmem:[#allocation304_spill] sm:$0xff] %v10169_v24  ;;  %3260 = vmatpush.bf16.msrb.mxu1 %v7920_v23 }
 0x4de   :  { %v2434_v52 = vadd.f32 %v2433_v3, %v10105_v44  ;;  %v2939_v5 = vadd.f32 %v2938_v16, %v2770_v61 }
 0x4df   :  { %v2602_v60 = vpop.f32.mrf.mxu1 }
 0x4e0   :  { %v2603_v22 = vadd.f32 %v2602_v60, %v2434_v52  ;;  %v4313_v61 = vmul.f32 0.01, %v2939_v5  ;;  %vm3801_vm10 = vcmp.gt.f32.partialorder %v2939_v5, 0.0 }
 0x4e2   :  { %vm3808_vm9 = vcmp.gt.f32.partialorder %v2603_v22, 0.0  ;;  %v4320_v11 = vmul.f32 0.01, %v2603_v22  ;;  %v10181_v1 = vsel %vm3801_vm10, %v2939_v5, %v4313_v61 }
 0x4e3   :  { %v2771_v4 = vpop.f32.mrf.mxu2  ;;  %13302 = vst [vmem:[#allocation306_spill] sm:$0xff] %v10181_v1 }
 0x4e4   :  { %v10171_v12 = vsel %vm3808_vm9, %v2603_v22, %v4320_v11  ;;  %v2772_v3 = vadd.f32 %v2771_v4, %v10118_v6 }
 0x4e5   :  { %13301 = vst [vmem:[#allocation305_spill] sm:$0xff] %v10171_v12  ;;  %v2940_v56 = vpop.f32.mrf.mxu3  ;;  %v2436_v45 = vpop.f32.mrf.mxu0 }
 0x4e6   :  { %v2437_v60 = vadd.f32 %v2436_v45, %v10105_v44  ;;  %v2941_v16 = vadd.f32 %v2940_v56, %v2772_v3 }
 0x4e7   :  { %v2605_v52 = vpop.f32.mrf.mxu1 }
 0x4e8   :  { %v2606_v7 = vadd.f32 %v2605_v52, %v2437_v60  ;;  %2475 = vmatmul.bf16.gmra.mxu0 %v8797_v36  ;;  %vm3809_vm11 = vcmp.gt.f32.partialorder %v2941_v16, 0.0  ;;  %v4321_v42 = vmul.f32 0.01, %v2941_v16  ;;  %2813 = vmatmul.bf16.gmra.mxu2 %v8797_v36 }
 0x4ea   :  { %2644 = vmatmul.bf16.gmra.mxu1 %v8804_v50  ;;  %2982 = vmatmul.bf16.gmra.mxu3 %v8804_v50  ;;  %v10183_v39 = vsel %vm3809_vm11, %v2941_v16, %v4321_v42  ;;  %v4328_v45 = vmul.f32 0.01, %v2606_v7  ;;  %vm3816_vm12 = vcmp.gt.f32.partialorder %v2606_v7, 0.0 }
 0x4eb   :  { %13303 = vst [vmem:[#allocation307_spill] sm:$0xff] %v10183_v39  ;;  %v2774_v22 = vpop.f32.mrf.mxu2 }
 0x4ec   :  { %v2775_v11 = vadd.f32 %v2774_v22, %v10118_v6  ;;  %v10189_v61 = vsel %vm3816_vm12, %v2606_v7, %v4328_v45 }
 0x4ed   :  { %v2943_v59 = vpop.f32.mrf.mxu3  ;;  %v2438_v23 = vpop.f32.mrf.mxu0  ;;  %13304 = vst [vmem:[#allocation308_spill] sm:$0xff] %v10189_v61 }
 0x4ee   :  { %v2439_v4 = vadd.f32 %v2438_v23, %v10105_v44  ;;  %v2944_v56 = vadd.f32 %v2943_v59, %v2775_v11 }
 0x4ef   :  { %v2607_v3 = vpop.f32.mrf.mxu1 }
 0x4f0   :  { %v2608_v60 = vadd.f32 %v2607_v3, %v2439_v4  ;;  %v4329_v59 = vmul.f32 0.01, %v2944_v56  ;;  %vm3817_vm14 = vcmp.gt.f32.partialorder %v2944_v56, 0.0 }
 0x4f2   :  { %vm3824_vm13 = vcmp.gt.f32.partialorder %v2608_v60, 0.0  ;;  %v4336_v5 = vmul.f32 0.01, %v2608_v60  ;;  %v10201_v45 = vsel %vm3817_vm14, %v2944_v56, %v4329_v59 }
 0x4f3   :  { %v2776_v52 = vpop.f32.mrf.mxu2  ;;  %13306 = vst [vmem:[#allocation310_spill] sm:$0xff] %v10201_v45 }
 0x4f4   :  { %v10191_v16 = vsel %vm3824_vm13, %v2608_v60, %v4336_v5  ;;  %v2777_v42 = vadd.f32 %v2776_v52, %v10118_v6 }
 0x4f5   :  { %13305 = vst [vmem:[#allocation309_spill] sm:$0xff] %v10191_v16  ;;  %v2945_v41 = vpop.f32.mrf.mxu3  ;;  %v2441_v22 = vpop.f32.mrf.mxu0 }
 0x4f6   :  { %v2442_v23 = vadd.f32 %v2441_v22, %v10105_v44  ;;  %v2946_v4 = vadd.f32 %v2945_v41, %v2777_v42 }
 0x4f7   :  { %v2610_v11 = vpop.f32.mrf.mxu1 }
 0x4f8   :  { %v2611_v3 = vadd.f32 %v2610_v11, %v2442_v23  ;;  %2480 = vmatmul.bf16.gmra.mxu0 %v8821_v58  ;;  %vm3825_vm15 = vcmp.gt.f32.partialorder %v2946_v4, 0.0  ;;  %v4337_v7 = vmul.f32 0.01, %v2946_v4  ;;  %2818 = vmatmul.bf16.gmra.mxu2 %v8821_v58 }
 0x4fa   :  { %2649 = vmatmul.bf16.gmra.mxu1 %v8828_v13  ;;  %2987 = vmatmul.bf16.gmra.mxu3 %v8828_v13  ;;  %v10203_v60 = vsel %vm3825_vm15, %v2946_v4, %v4337_v7  ;;  %v4344_v61 = vmul.f32 0.01, %v2611_v3  ;;  %vm3832_vm0 = vcmp.gt.f32.partialorder %v2611_v3, 0.0 }
 0x4fb   :  { %13307 = vst [vmem:[#allocation311_spill] sm:$0xff] %v10203_v60  ;;  %v2779_v5 = vpop.f32.mrf.mxu2 }
 0x4fc   :  { %v2780_v52 = vadd.f32 %v2779_v5, %v10118_v6  ;;  %v10209_v4 = vsel %vm3832_vm0, %v2611_v3, %v4344_v61 }
 0x4fd   :  { %v2948_v42 = vpop.f32.mrf.mxu3  ;;  %v2443_v22 = vpop.f32.mrf.mxu0  ;;  %13308 = vst [vmem:[#allocation312_spill] sm:$0xff] %v10209_v4 }
 0x4fe   :  { %v2444_v23 = vadd.f32 %v2443_v22, %v10105_v44  ;;  %v2949_v25 = vadd.f32 %v2948_v42, %v2780_v52 }
 0x4ff   :  { %v2612_v11 = vpop.f32.mrf.mxu1 }
 0x500   :  { %v2613_v16 = vadd.f32 %v2612_v11, %v2444_v23  ;;  %v4345_v42 = vmul.f32 0.01, %v2949_v25  ;;  %vm3833_vm2 = vcmp.gt.f32.partialorder %v2949_v25, 0.0 }
 0x502   :  { %vm3840_vm1 = vcmp.gt.f32.partialorder %v2613_v16, 0.0  ;;  %v4352_v56 = vmul.f32 0.01, %v2613_v16 }
 0x503   :  { %v2781_v59 = vpop.f32.mrf.mxu2 }
 0x504   :  { %v10211_v7 = vsel %vm3840_vm1, %v2613_v16, %v4352_v56  ;;  %v2782_v41 = vadd.f32 %v2781_v59, %v10118_v6  ;;  %v10221_v16 = vsel %vm3833_vm2, %v2949_v25, %v4345_v42 }
 0x505   :  { %13309 = vst [vmem:[#allocation313_spill] sm:$0xff] %v10211_v7  ;;  %v2950_v45 = vpop.f32.mrf.mxu3  ;;  %v2446_v5 = vpop.f32.mrf.mxu0 }
 0x506   :  { %v2447_v22 = vadd.f32 %v2446_v5, %v10105_v44  ;;  %v2951_v23 = vadd.f32 %v2950_v45, %v2782_v41  ;;  %13310 = vst [vmem:[#allocation314_spill] sm:$0xff] %v10221_v16 }
 0x507   :  { %v2615_v52 = vpop.f32.mrf.mxu1 }
 0x508   :  { %v2616_v11 = vadd.f32 %v2615_v52, %v2447_v22  ;;  %2485 = vmatmul.bf16.gmra.mxu0 %v8845_v19  ;;  %vm3841_vm3 = vcmp.gt.f32.partialorder %v2951_v23, 0.0  ;;  %v4353_v61 = vmul.f32 0.01, %v2951_v23  ;;  %2823 = vmatmul.bf16.gmra.mxu2 %v8845_v19 }
 0x50a   :  { %2654 = vmatmul.bf16.gmra.mxu1 %v8852_v49  ;;  %2992 = vmatmul.bf16.gmra.mxu3 %v8852_v49  ;;  %v10223_v3 = vsel %vm3841_vm3, %v2951_v23, %v4353_v61  ;;  %v4360_v4 = vmul.f32 0.01, %v2616_v11  ;;  %vm3848_vm4 = vcmp.gt.f32.partialorder %v2616_v11, 0.0 }
 0x50b   :  { %13311 = vst [vmem:[#allocation315_spill] sm:$0xff] %v10223_v3  ;;  %v2784_v56 = vpop.f32.mrf.mxu2 }
 0x50c   :  { %v2785_v41 = vadd.f32 %v2784_v56, %v10118_v6  ;;  %v10229_v23 = vsel %vm3848_vm4, %v2616_v11, %v4360_v4  ;;  %v7633_v11 = vld [vmem:[#allocation5 + $0xf8] sm:$0xf0] }
 0x50d   :  { %v2953_v59 = vpop.f32.mrf.mxu3  ;;  %v2448_v5 = vpop.f32.mrf.mxu0  ;;  %13312 = vst [vmem:[#allocation316_spill] sm:$0xff] %v10229_v23  ;;  %v7889_v23 = vld [vmem:[#allocation5 + $0x2f8] sm:$0xf0] }
 0x50e   :  { %v2449_v22 = vadd.f32 %v2448_v5, %v10105_v44  ;;  %v2954_v60 = vadd.f32 %v2953_v59, %v2785_v41 }
 0x50f   :  { %v2617_v52 = vpop.f32.mrf.mxu1 }
 0x510   :  { %v2618_v7 = vadd.f32 %v2617_v52, %v2449_v22  ;;  %v4361_v59 = vmul.f32 0.01, %v2954_v60  ;;  %vm3849_vm6 = vcmp.gt.f32.partialorder %v2954_v60, 0.0 }
 0x512   :  { %vm3856_vm5 = vcmp.gt.f32.partialorder %v2618_v7, 0.0  ;;  %v4368_v25 = vmul.f32 0.01, %v2618_v7 }
 0x513   :  { %v2786_v42 = vpop.f32.mrf.mxu2 }
 0x514   :  { %v10231_v61 = vsel %vm3856_vm5, %v2618_v7, %v4368_v25  ;;  %v2787_v45 = vadd.f32 %v2786_v42, %v10118_v6  ;;  %v8304_v7 = vld [vmem:[#allocation5 + $0xdc] sm:$0xf]  ;;  %v7631_v25 = vld [vmem:[#allocation5 + $0xd8] sm:$0xf] }
 0x515   :  { %13313 = vst [vmem:[#allocation317_spill] sm:$0xff] %v10231_v61  ;;  %v2955_v16 = vpop.f32.mrf.mxu3  ;;  %v2451_v56 = vpop.f32.mrf.mxu0  ;;  %v8308_v42 = vld [vmem:[#allocation5 + $0xf4] sm:$0xf0] }
 0x516   :  { %v2452_v5 = vadd.f32 %v2451_v56, %v10105_v44  ;;  %v2956_v22 = vadd.f32 %v2955_v16, %v2787_v45  ;;  %v10241_v56 = vsel %vm3849_vm6, %v2954_v60, %v4361_v59  ;;  %v7636_v45 = vor.u32 %v8304_v7, %v7633_v11  ;;  %v8372_v11 = vld [vmem:[#allocation5 + $0x2f4] sm:$0xf0] }
 0x517   :  { %v2620_v41 = vpop.f32.mrf.mxu1  ;;  %13314 = vst [vmem:[#allocation318_spill] sm:$0xff] %v10241_v56 }
 0x518   :  { %v2621_v52 = vadd.f32 %v2620_v41, %v2452_v5  ;;  %2490 = vmatmul.bf16.gmra.mxu0 %v8869_v62  ;;  %vm3857_vm7 = vcmp.gt.f32.partialorder %v2956_v22, 0.0  ;;  %v4369_v4 = vmul.f32 0.01, %v2956_v22  ;;  %2828 = vmatmul.bf16.gmra.mxu2 %v8869_v62  ;;  %v7632_v5 = vor.u32 %v8308_v42, %v7631_v25  ;;  %v8368_v41 = vld [vmem:[#allocation5 + $0x2dc] sm:$0xf] }
 0x519   :  { %v7892_v12 = vor.u32 %v8368_v41, %v7889_v23  ;;  %3430 = vmatpush.bf16.msrb.mxu2 %v7636_v45 }
 0x51a   :  { %2659 = vmatmul.bf16.gmra.mxu1 %v8876_v8  ;;  %2997 = vmatmul.bf16.gmra.mxu3 %v8876_v8  ;;  %v10243_v3 = vsel %vm3857_vm7, %v2956_v22, %v4369_v4  ;;  %v4376_v59 = vmul.f32 0.01, %v2621_v52  ;;  %vm3864_vm8 = vcmp.gt.f32.partialorder %v2621_v52, 0.0  ;;  %v7887_v4 = vld [vmem:[#allocation5 + $0x2d8] sm:$0xf] }
 0x51b   :  { %13315 = vst [vmem:[#allocation319_spill] sm:$0xff] %v10243_v3  ;;  %v2789_v16 = vpop.f32.mrf.mxu2  ;;  %3092 = vmatpush.bf16.msrb.mxu0 %v7632_v5  ;;  %3599 = vmatpush.bf16.msrb.mxu3 %v7892_v12  ;;  %v7888_v25 = vor.u32 %v8372_v11, %v7887_v4 }
 0x51c   :  { %v2790_v1 = vadd.f32 %v2789_v16, %v10118_v6  ;;  %v10249_v16 = vsel %vm3864_vm8, %v2621_v52, %v4376_v59 }
 0x51d   :  { %v2958_v39 = vpop.f32.mrf.mxu3  ;;  %v2453_v24 = vpop.f32.mrf.mxu0  ;;  %13316 = vst [vmem:[#allocation320_spill] sm:$0xff] %v10249_v16  ;;  %3261 = vmatpush.bf16.msrb.mxu1 %v7888_v25 }
 0x51e   :  { %v2454_v29 = vadd.f32 %v2453_v24, %v10105_v44  ;;  %v2959_v60 = vadd.f32 %v2958_v39, %v2790_v1 }
 0x51f   :  { %v2622_v38 = vpop.f32.mrf.mxu1 }
 0x520   :  { %v2623_v22 = vadd.f32 %v2622_v38, %v2454_v29  ;;  %v4377_v1 = vmul.f32 0.01, %v2959_v60  ;;  %vm3865_vm10 = vcmp.gt.f32.partialorder %v2959_v60, 0.0 }
 0x522   :  { %vm3872_vm9 = vcmp.gt.f32.partialorder %v2623_v22, 0.0  ;;  %v4384_v7 = vmul.f32 0.01, %v2623_v22  ;;  %v10261_v41 = vsel %vm3865_vm10, %v2959_v60, %v4377_v1 }
 0x523   :  { %v2791_v42 = vpop.f32.mrf.mxu2  ;;  %13318 = vst [vmem:[#allocation322_spill] sm:$0xff] %v10261_v41 }
 0x524   :  { %v10251_v61 = vsel %vm3872_vm9, %v2623_v22, %v4384_v7  ;;  %v2792_v24 = vadd.f32 %v2791_v42, %v10118_v6 }
 0x525   :  { %13317 = vst [vmem:[#allocation321_spill] sm:$0xff] %v10251_v61  ;;  %v2960_v23 = vpop.f32.mrf.mxu3  ;;  %v2456_v45 = vpop.f32.mrf.mxu0 }
 0x526   :  { %v2457_v38 = vadd.f32 %v2456_v45, %v10105_v44  ;;  %v2961_v39 = vadd.f32 %v2960_v23, %v2792_v24 }
 0x527   :  { %v2625_v29 = vpop.f32.mrf.mxu1 }
 0x528   :  { %v2626_v5 = vadd.f32 %v2625_v29, %v2457_v38  ;;  %2495 = vmatmul.bf16.gmra.mxu0 %v8893_v31  ;;  %vm3873_vm11 = vcmp.gt.f32.partialorder %v2961_v39, 0.0  ;;  %v4385_v52 = vmul.f32 0.01, %v2961_v39  ;;  %2833 = vmatmul.bf16.gmra.mxu2 %v8893_v31 }
 0x52a   :  { %2664 = vmatmul.bf16.gmra.mxu1 %v8900_v48  ;;  %3002 = vmatmul.bf16.gmra.mxu3 %v8900_v48  ;;  %v10263_v59 = vsel %vm3873_vm11, %v2961_v39, %v4385_v52  ;;  %v4392_v45 = vmul.f32 0.01, %v2626_v5  ;;  %vm3880_vm12 = vcmp.gt.f32.partialorder %v2626_v5, 0.0 }
 0x52b   :  { %13319 = vst [vmem:[#allocation323_spill] sm:$0xff] %v10263_v59  ;;  %v2794_v22 = vpop.f32.mrf.mxu2 }
 0x52c   :  { %v2795_v7 = vadd.f32 %v2794_v22, %v10118_v6  ;;  %v10269_v1 = vsel %vm3880_vm12, %v2626_v5, %v4392_v45 }
 0x52d   :  { %v2963_v11 = vpop.f32.mrf.mxu3  ;;  %v2458_v25 = vpop.f32.mrf.mxu0  ;;  %13320 = vst [vmem:[#allocation324_spill] sm:$0xff] %v10269_v1 }
 0x52e   :  { %v2459_v42 = vadd.f32 %v2458_v25, %v10105_v44  ;;  %v2964_v23 = vadd.f32 %v2963_v11, %v2795_v7 }
 0x52f   :  { %v2627_v24 = vpop.f32.mrf.mxu1 }
 0x530   :  { %v2628_v38 = vadd.f32 %v2627_v24, %v2459_v42  ;;  %v4393_v11 = vmul.f32 0.01, %v2964_v23  ;;  %vm3881_vm14 = vcmp.gt.f32.partialorder %v2964_v23, 0.0 }
 0x532   :  { %vm3888_vm13 = vcmp.gt.f32.partialorder %v2628_v38, 0.0  ;;  %v4400_v60 = vmul.f32 0.01, %v2628_v38  ;;  %v10281_v45 = vsel %vm3881_vm14, %v2964_v23, %v4393_v11 }
 0x533   :  { %v2796_v29 = vpop.f32.mrf.mxu2  ;;  %13322 = vst [vmem:[#allocation326_spill] sm:$0xff] %v10281_v45 }
 0x534   :  { %v10271_v39 = vsel %vm3888_vm13, %v2628_v38, %v4400_v60  ;;  %v2797_v52 = vadd.f32 %v2796_v29, %v10118_v6 }
 0x535   :  { %13321 = vst [vmem:[#allocation325_spill] sm:$0xff] %v10271_v39  ;;  %v2965_v4 = vpop.f32.mrf.mxu3  ;;  %v2461_v22 = vpop.f32.mrf.mxu0 }
 0x536   :  { %v2462_v25 = vadd.f32 %v2461_v22, %v10105_v44  ;;  %v2966_v42 = vadd.f32 %v2965_v4, %v2797_v52 }
 0x537   :  { %v2630_v7 = vpop.f32.mrf.mxu1 }
 0x538   :  { %v2631_v24 = vadd.f32 %v2630_v7, %v2462_v25  ;;  %2500 = vmatmul.bf16.gmra.mxu0 %v8917_v17  ;;  %vm3889_vm15 = vcmp.gt.f32.partialorder %v2966_v42, 0.0  ;;  %v4401_v5 = vmul.f32 0.01, %v2966_v42  ;;  %2838 = vmatmul.bf16.gmra.mxu2 %v8917_v17 }
 0x53a   :  { %2669 = vmatmul.bf16.gmra.mxu1 %v8924_v57  ;;  %3007 = vmatmul.bf16.gmra.mxu3 %v8924_v57  ;;  %v10283_v38 = vsel %vm3889_vm15, %v2966_v42, %v4401_v5  ;;  %v4408_v1 = vmul.f32 0.01, %v2631_v24  ;;  %vm3896_vm0 = vcmp.gt.f32.partialorder %v2631_v24, 0.0 }
 0x53b   :  { %13323 = vst [vmem:[#allocation327_spill] sm:$0xff] %v10283_v38  ;;  %v2799_v60 = vpop.f32.mrf.mxu2 }
 0x53c   :  { %v2800_v29 = vadd.f32 %v2799_v60, %v10118_v6  ;;  %v10289_v42 = vsel %vm3896_vm0, %v2631_v24, %v4408_v1 }
 0x53d   :  { %v2968_v52 = vpop.f32.mrf.mxu3  ;;  %v2463_v22 = vpop.f32.mrf.mxu0  ;;  %13324 = vst [vmem:[#allocation328_spill] sm:$0xff] %v10289_v42 }
 0x53e   :  { %v2464_v25 = vadd.f32 %v2463_v22, %v10105_v44  ;;  %v2969_v12 = vadd.f32 %v2968_v52, %v2800_v29 }
 0x53f   :  { %v2632_v7 = vpop.f32.mrf.mxu1 }
 0x540   :  { %v2633_v39 = vadd.f32 %v2632_v7, %v2464_v25  ;;  %v4409_v52 = vmul.f32 0.01, %v2969_v12  ;;  %vm3897_vm2 = vcmp.gt.f32.partialorder %v2969_v12, 0.0 }
 0x542   :  { %vm3904_vm1 = vcmp.gt.f32.partialorder %v2633_v39, 0.0  ;;  %v4416_v23 = vmul.f32 0.01, %v2633_v39 }
 0x543   :  { %v2801_v11 = vpop.f32.mrf.mxu2 }
 0x544   :  { %v10291_v5 = vsel %vm3904_vm1, %v2633_v39, %v4416_v23  ;;  %v2802_v4 = vadd.f32 %v2801_v11, %v10118_v6  ;;  %v10301_v39 = vsel %vm3897_vm2, %v2969_v12, %v4409_v52 }
 0x545   :  { %13325 = vst [vmem:[#allocation329_spill] sm:$0xff] %v10291_v5  ;;  %v2970_v45 = vpop.f32.mrf.mxu3  ;;  %v2466_v60 = vpop.f32.mrf.mxu0 }
 0x546   :  { %v2467_v22 = vadd.f32 %v2466_v60, %v10105_v44  ;;  %v2971_v25 = vadd.f32 %v2970_v45, %v2802_v4  ;;  %13326 = vst [vmem:[#allocation330_spill] sm:$0xff] %v10301_v39 }
 0x547   :  { %v2635_v29 = vpop.f32.mrf.mxu1 }
 0x548   :  { %v2636_v7 = vadd.f32 %v2635_v29, %v2467_v22  ;;  %2505 = vmatmul.bf16.gmra.mxu0 %v8941_v40  ;;  %vm3905_vm3 = vcmp.gt.f32.partialorder %v2971_v25, 0.0  ;;  %v4417_v1 = vmul.f32 0.01, %v2971_v25  ;;  %2843 = vmatmul.bf16.gmra.mxu2 %v8941_v40 }
 0x54a   :  { %2674 = vmatmul.bf16.gmra.mxu1 %v8948_v63  ;;  %3012 = vmatmul.bf16.gmra.mxu3 %v8948_v63  ;;  %v10303_v24 = vsel %vm3905_vm3, %v2971_v25, %v4417_v1  ;;  %v4424_v42 = vmul.f32 0.01, %v2636_v7  ;;  %vm3912_vm4 = vcmp.gt.f32.partialorder %v2636_v7, 0.0 }
 0x54b   :  { %13327 = vst [vmem:[#allocation331_spill] sm:$0xff] %v10303_v24  ;;  %v2804_v23 = vpop.f32.mrf.mxu2 }
 0x54c   :  { %v2805_v4 = vadd.f32 %v2804_v23, %v10118_v6  ;;  %v10309_v25 = vsel %vm3912_vm4, %v2636_v7, %v4424_v42  ;;  %v7601_v7 = vld [vmem:[#allocation5 + $0xb8] sm:$0xf0] }
 0x54d   :  { %v2973_v11 = vpop.f32.mrf.mxu3  ;;  %v2468_v60 = vpop.f32.mrf.mxu0  ;;  %13328 = vst [vmem:[#allocation332_spill] sm:$0xff] %v10309_v25  ;;  %v7857_v25 = vld [vmem:[#allocation5 + $0x2b8] sm:$0xf0] }
 0x54e   :  { %v2469_v22 = vadd.f32 %v2468_v60, %v10105_v44  ;;  %v2974_v38 = vadd.f32 %v2973_v11, %v2805_v4 }
 0x54f   :  { %v2637_v29 = vpop.f32.mrf.mxu1 }
 0x550   :  { %v2638_v5 = vadd.f32 %v2637_v29, %v2469_v22  ;;  %v4425_v11 = vmul.f32 0.01, %v2974_v38  ;;  %vm3913_vm6 = vcmp.gt.f32.partialorder %v2974_v38, 0.0 }
 0x552   :  { %vm3920_vm5 = vcmp.gt.f32.partialorder %v2638_v5, 0.0  ;;  %v4432_v12 = vmul.f32 0.01, %v2638_v5 }
 0x553   :  { %v2806_v52 = vpop.f32.mrf.mxu2 }
 0x554   :  { %v10311_v1 = vsel %vm3920_vm5, %v2638_v5, %v4432_v12  ;;  %v2807_v45 = vadd.f32 %v2806_v52, %v10118_v6  ;;  %v8296_v5 = vld [vmem:[#allocation5 + $0x9c] sm:$0xf]  ;;  %v7599_v12 = vld [vmem:[#allocation5 + $0x98] sm:$0xf] }
 0x555   :  { %13329 = vst [vmem:[#allocation333_spill] sm:$0xff] %v10311_v1  ;;  %v2975_v39 = vpop.f32.mrf.mxu3  ;;  %v2471_v23 = vpop.f32.mrf.mxu0  ;;  %v8300_v52 = vld [vmem:[#allocation5 + $0xb4] sm:$0xf0] }
 0x556   :  { %v2472_v60 = vadd.f32 %v2471_v23, %v10105_v44  ;;  %v2976_v22 = vadd.f32 %v2975_v39, %v2807_v45  ;;  %v10321_v23 = vsel %vm3913_vm6, %v2974_v38, %v4425_v11  ;;  %v7604_v45 = vor.u32 %v8296_v5, %v7601_v7  ;;  %v8364_v7 = vld [vmem:[#allocation5 + $0x2b4] sm:$0xf0] }
 0x557   :  { %v2640_v4 = vpop.f32.mrf.mxu1  ;;  %13330 = vst [vmem:[#allocation334_spill] sm:$0xff] %v10321_v23 }
 0x558   :  { %v2641_v29 = vadd.f32 %v2640_v4, %v2472_v60  ;;  %2510 = vmatmul.bf16.gmra.mxu0 %v8965_v34  ;;  %vm3921_vm7 = vcmp.gt.f32.partialorder %v2976_v22, 0.0  ;;  %v4433_v42 = vmul.f32 0.01, %v2976_v22  ;;  %2848 = vmatmul.bf16.gmra.mxu2 %v8965_v34  ;;  %v7600_v60 = vor.u32 %v8300_v52, %v7599_v12  ;;  %v8360_v4 = vld [vmem:[#allocation5 + $0x29c] sm:$0xf] }
 0x559   :  { %v7860_v61 = vor.u32 %v8360_v4, %v7857_v25  ;;  %3431 = vmatpush.bf16.msrb.mxu2 %v7604_v45  ;;  %v13334_v4 = vld [vmem:[#allocation59_spill] sm:$0xff] }
 0x55a   :  { %2679 = vmatmul.bf16.gmra.mxu1 %v8972_v9  ;;  %3017 = vmatmul.bf16.gmra.mxu3 %v8972_v9  ;;  %v10323_v24 = vsel %vm3921_vm7, %v2976_v22, %v4433_v42  ;;  %v4440_v11 = vmul.f32 0.01, %v2641_v29  ;;  %vm3928_vm8 = vcmp.gt.f32.partialorder %v2641_v29, 0.0  ;;  %v7855_v42 = vld [vmem:[#allocation5 + $0x298] sm:$0xf] }
 0x55b   :  { %13331 = vst [vmem:[#allocation335_spill] sm:$0xff] %v10323_v24  ;;  %v2809_v39 = vpop.f32.mrf.mxu2  ;;  %3093 = vmatpush.bf16.msrb.mxu0 %v7600_v60  ;;  %3600 = vmatpush.bf16.msrb.mxu3 %v7860_v61  ;;  %v7856_v12 = vor.u32 %v8364_v7, %v7855_v42  ;;  %v13351_v24 = vld [vmem:[#allocation74_spill] sm:$0xff] }
 0x55c   :  { %v2810_v41 = vadd.f32 %v2809_v39, %v10118_v6  ;;  %v10329_v39 = vsel %vm3928_vm8, %v2641_v29, %v4440_v11 }
 0x55d   :  { %v2978_v59 = vpop.f32.mrf.mxu3  ;;  %v2473_v16 = vpop.f32.mrf.mxu0  ;;  %13332 = vst [vmem:[#allocation336_spill] sm:$0xff] %v10329_v39  ;;  %3262 = vmatpush.bf16.msrb.mxu1 %v7856_v12 }
 0x55e   :  { %v2474_v56 = vadd.f32 %v2473_v16, %v10105_v44  ;;  %v2979_v38 = vadd.f32 %v2978_v59, %v2810_v41 }
 0x55f   :  { %v2642_v3 = vpop.f32.mrf.mxu1 }
 0x560   :  { %v2643_v22 = vadd.f32 %v2642_v3, %v2474_v56  ;;  %v4441_v41 = vmul.f32 0.01, %v2979_v38  ;;  %vm3929_vm10 = vcmp.gt.f32.partialorder %v2979_v38, 0.0 }
 0x562   :  { %vm3936_vm9 = vcmp.gt.f32.partialorder %v2643_v22, 0.0  ;;  %v4448_v5 = vmul.f32 0.01, %v2643_v22  ;;  %v10341_v11 = vsel %vm3929_vm10, %v2979_v38, %v4441_v41 }
 0x563   :  { %v2811_v52 = vpop.f32.mrf.mxu2  ;;  %13335 = vst [vmem:[#allocation338_spill] sm:$0xff] %v10341_v11 }
 0x564   :  { %v10331_v1 = vsel %vm3936_vm9, %v2643_v22, %v4448_v5  ;;  %v2812_v16 = vadd.f32 %v2811_v52, %v10118_v6 }
 0x565   :  { %13333 = vst [vmem:[#allocation337_spill] sm:$0xff] %v10331_v1  ;;  %v2980_v25 = vpop.f32.mrf.mxu3  ;;  %v2476_v45 = vpop.f32.mrf.mxu0  ;;  %v13345_v1 = vld [vmem:[#allocation68_spill] sm:$0xff] }
 0x566   :  { %v2477_v3 = vadd.f32 %v2476_v45, %v10105_v44  ;;  %v2981_v59 = vadd.f32 %v2980_v25, %v2812_v16 }
 0x567   :  { %v2645_v56 = vpop.f32.mrf.mxu1 }
 0x568   :  { %v2646_v60 = vadd.f32 %v2645_v56, %v2477_v3  ;;  %2515 = vmatmul.bf16.gmra.mxu0 %v8989_v35  ;;  %vm3937_vm11 = vcmp.gt.f32.partialorder %v2981_v59, 0.0  ;;  %v4449_v29 = vmul.f32 0.01, %v2981_v59  ;;  %2853 = vmatmul.bf16.gmra.mxu2 %v8989_v35 }
 0x56a   :  { %2684 = vmatmul.bf16.gmra.mxu1 %v13334_v4  ;;  %3022 = vmatmul.bf16.gmra.mxu3 %v13334_v4  ;;  %v10343_v22 = vsel %vm3937_vm11, %v2981_v59, %v4449_v29  ;;  %v4456_v3 = vmul.f32 0.01, %v2646_v60  ;;  %vm3944_vm12 = vcmp.gt.f32.partialorder %v2646_v60, 0.0 }
 0x56b   :  { %13336 = vst [vmem:[#allocation339_spill] sm:$0xff] %v10343_v22  ;;  %v2814_v42 = vpop.f32.mrf.mxu2  ;;  %v13339_v22 = vld [vmem:[#allocation62_spill] sm:$0xff] }
 0x56c   :  { %v2815_v7 = vadd.f32 %v2814_v42, %v10118_v6  ;;  %v10349_v59 = vsel %vm3944_vm12, %v2646_v60, %v4456_v3  ;;  %v13340_v3 = vld [vmem:[#allocation65_spill] sm:$0xff] }
 0x56d   :  { %v2983_v12 = vpop.f32.mrf.mxu3  ;;  %v2478_v52 = vpop.f32.mrf.mxu0  ;;  %13337 = vst [vmem:[#allocation340_spill] sm:$0xff] %v10349_v59 }
 0x56e   :  { %v2479_v16 = vadd.f32 %v2478_v52, %v10105_v44  ;;  %v2984_v45 = vadd.f32 %v2983_v12, %v2815_v7 }
 0x56f   :  { %v2647_v25 = vpop.f32.mrf.mxu1 }
 0x570   :  { %v2648_v56 = vadd.f32 %v2647_v25, %v2479_v16  ;;  %v4457_v12 = vmul.f32 0.01, %v2984_v45  ;;  %vm3945_vm14 = vcmp.gt.f32.partialorder %v2984_v45, 0.0 }
 0x572   :  { %vm3952_vm13 = vcmp.gt.f32.partialorder %v2648_v56, 0.0  ;;  %v4464_v38 = vmul.f32 0.01, %v2648_v56 }
 0x573   :  { %v2816_v41 = vpop.f32.mrf.mxu2 }
 0x574   :  { %v10351_v29 = vsel %vm3952_vm13, %v2648_v56, %v4464_v38  ;;  %v2817_v5 = vadd.f32 %v2816_v41, %v10118_v6  ;;  %v10361_v56 = vsel %vm3945_vm14, %v2984_v45, %v4457_v12 }
 0x575   :  { %13338 = vst [vmem:[#allocation341_spill] sm:$0xff] %v10351_v29  ;;  %v2985_v61 = vpop.f32.mrf.mxu3  ;;  %v2481_v42 = vpop.f32.mrf.mxu0 }
 0x576   :  { %v2482_v52 = vadd.f32 %v2481_v42, %v10105_v44  ;;  %v2986_v16 = vadd.f32 %v2985_v61, %v2817_v5  ;;  %13341 = vst [vmem:[#allocation342_spill] sm:$0xff] %v10361_v56 }
 0x577   :  { %v2650_v7 = vpop.f32.mrf.mxu1 }
 0x578   :  { %v2651_v25 = vadd.f32 %v2650_v7, %v2482_v52  ;;  %2520 = vmatmul.bf16.gmra.mxu0 %v13339_v22  ;;  %vm3953_vm15 = vcmp.gt.f32.partialorder %v2986_v16, 0.0  ;;  %v4465_v60 = vmul.f32 0.01, %v2986_v16  ;;  %2858 = vmatmul.bf16.gmra.mxu2 %v13339_v22 }
 0x57a   :  { %2689 = vmatmul.bf16.gmra.mxu1 %v13340_v3  ;;  %3027 = vmatmul.bf16.gmra.mxu3 %v13340_v3  ;;  %v10363_v38 = vsel %vm3953_vm15, %v2986_v16, %v4465_v60  ;;  %v4472_v29 = vmul.f32 0.01, %v2651_v25  ;;  %vm3960_vm0 = vcmp.gt.f32.partialorder %v2651_v25, 0.0 }
 0x57b   :  { %13342 = vst [vmem:[#allocation343_spill] sm:$0xff] %v10363_v38  ;;  %v2819_v41 = vpop.f32.mrf.mxu2 }
 0x57c   :  { %v2820_v5 = vadd.f32 %v2819_v41, %v10118_v6  ;;  %v10369_v16 = vsel %vm3960_vm0, %v2651_v25, %v4472_v29 }
 0x57d   :  { %v2988_v42 = vpop.f32.mrf.mxu3  ;;  %v2483_v52 = vpop.f32.mrf.mxu0  ;;  %13343 = vst [vmem:[#allocation344_spill] sm:$0xff] %v10369_v16 }
 0x57e   :  { %v2484_v7 = vadd.f32 %v2483_v52, %v10105_v44  ;;  %v2989_v59 = vadd.f32 %v2988_v42, %v2820_v5 }
 0x57f   :  { %v2652_v11 = vpop.f32.mrf.mxu1 }
 0x580   :  { %v2653_v39 = vadd.f32 %v2652_v11, %v2484_v7  ;;  %v4473_v42 = vmul.f32 0.01, %v2989_v59  ;;  %vm3961_vm2 = vcmp.gt.f32.partialorder %v2989_v59, 0.0 }
 0x582   :  { %vm3968_vm1 = vcmp.gt.f32.partialorder %v2653_v39, 0.0  ;;  %v4480_v45 = vmul.f32 0.01, %v2653_v39  ;;  %v10381_v25 = vsel %vm3961_vm2, %v2989_v59, %v4473_v42 }
 0x583   :  { %v2821_v12 = vpop.f32.mrf.mxu2  ;;  %13347 = vst [vmem:[#allocation346_spill] sm:$0xff] %v10381_v25 }
 0x584   :  { %v10371_v60 = vsel %vm3968_vm1, %v2653_v39, %v4480_v45  ;;  %v2822_v61 = vadd.f32 %v2821_v12, %v10118_v6  ;;  %v13346_v39 = vld [vmem:[#allocation71_spill] sm:$0xff] }
 0x585   :  { %13344 = vst [vmem:[#allocation345_spill] sm:$0xff] %v10371_v60  ;;  %v2990_v56 = vpop.f32.mrf.mxu3  ;;  %v2486_v41 = vpop.f32.mrf.mxu0 }
 0x586   :  { %v2487_v52 = vadd.f32 %v2486_v41, %v10105_v44  ;;  %v2991_v11 = vadd.f32 %v2990_v56, %v2822_v61 }
 0x587   :  { %v2655_v5 = vpop.f32.mrf.mxu1 }
 0x588   :  { %v2656_v7 = vadd.f32 %v2655_v5, %v2487_v52  ;;  %2525 = vmatmul.bf16.gmra.mxu0 %v13345_v1  ;;  %vm3969_vm3 = vcmp.gt.f32.partialorder %v2991_v11, 0.0  ;;  %v4481_v29 = vmul.f32 0.01, %v2991_v11  ;;  %2863 = vmatmul.bf16.gmra.mxu2 %v13345_v1 }
 0x58a   :  { %2694 = vmatmul.bf16.gmra.mxu1 %v13346_v39  ;;  %3032 = vmatmul.bf16.gmra.mxu3 %v13346_v39  ;;  %v10383_v45 = vsel %vm3969_vm3, %v2991_v11, %v4481_v29  ;;  %v4488_v60 = vmul.f32 0.01, %v2656_v7  ;;  %vm3976_vm4 = vcmp.gt.f32.partialorder %v2656_v7, 0.0 }
 0x58b   :  { %13348 = vst [vmem:[#allocation347_spill] sm:$0xff] %v10383_v45  ;;  %v2824_v12 = vpop.f32.mrf.mxu2  ;;  %v8292_v45 = vld [vmem:[#allocation5 + $0x74] sm:$0xf0] }
 0x58c   :  { %v2825_v61 = vadd.f32 %v2824_v12, %v10118_v6  ;;  %v10389_v11 = vsel %vm3976_vm4, %v2656_v7, %v4488_v60  ;;  %v8288_v7 = vld [vmem:[#allocation5 + $0x5c] sm:$0xf] }
 0x58d   :  { %v2993_v41 = vpop.f32.mrf.mxu3  ;;  %v2488_v52 = vpop.f32.mrf.mxu0  ;;  %13349 = vst [vmem:[#allocation348_spill] sm:$0xff] %v10389_v11 }
 0x58e   :  { %v2489_v5 = vadd.f32 %v2488_v52, %v10105_v44  ;;  %v2994_v16 = vadd.f32 %v2993_v41, %v2825_v61 }
 0x58f   :  { %v2657_v38 = vpop.f32.mrf.mxu1 }
 0x590   :  { %v2658_v23 = vadd.f32 %v2657_v38, %v2489_v5  ;;  %v4489_v41 = vmul.f32 0.01, %v2994_v16  ;;  %vm3977_vm6 = vcmp.gt.f32.partialorder %v2994_v16, 0.0 }
 0x592   :  { %vm3984_vm5 = vcmp.gt.f32.partialorder %v2658_v23, 0.0  ;;  %v4496_v59 = vmul.f32 0.01, %v2658_v23 }
 0x593   :  { %v2826_v42 = vpop.f32.mrf.mxu2 }
 0x594   :  { %v10391_v29 = vsel %vm3984_vm5, %v2658_v23, %v4496_v59  ;;  %v2827_v56 = vadd.f32 %v2826_v42, %v10118_v6  ;;  %v13352_v23 = vld [vmem:[#allocation77_spill] sm:$0xff] }
 0x595   :  { %13350 = vst [vmem:[#allocation349_spill] sm:$0xff] %v10391_v29  ;;  %v2995_v25 = vpop.f32.mrf.mxu3  ;;  %v2491_v12 = vpop.f32.mrf.mxu0  ;;  %v7569_v59 = vld [vmem:[#allocation5 + $0x78] sm:$0xf0]  ;;  %v7567_v42 = vld [vmem:[#allocation5 + $0x58] sm:$0xf] }
 0x596   :  { %v2492_v52 = vadd.f32 %v2491_v12, %v10105_v44  ;;  %v2996_v38 = vadd.f32 %v2995_v25, %v2827_v56  ;;  %v10401_v12 = vsel %vm3977_vm6, %v2994_v16, %v4489_v41  ;;  %v7572_v56 = vor.u32 %v8288_v7, %v7569_v59  ;;  %v7825_v29 = vld [vmem:[#allocation5 + $0x278] sm:$0xf0]  ;;  %v8356_v7 = vld [vmem:[#allocation5 + $0x274] sm:$0xf0] }
 0x597   :  { %v2660_v61 = vpop.f32.mrf.mxu1  ;;  %13353 = vst [vmem:[#allocation350_spill] sm:$0xff] %v10401_v12  ;;  %v13369_v12 = vld [vmem:[#allocation92_spill] sm:$0xff] }
 0x598   :  { %v2661_v5 = vadd.f32 %v2660_v61, %v2492_v52  ;;  %2530 = vmatmul.bf16.gmra.mxu0 %v13351_v24  ;;  %vm3985_vm7 = vcmp.gt.f32.partialorder %v2996_v38, 0.0  ;;  %v4497_v60 = vmul.f32 0.01, %v2996_v38  ;;  %2868 = vmatmul.bf16.gmra.mxu2 %v13351_v24  ;;  %v7568_v52 = vor.u32 %v8292_v45, %v7567_v42  ;;  %v8352_v61 = vld [vmem:[#allocation5 + $0x25c] sm:$0xf] }
 0x599   :  { %v7828_v3 = vor.u32 %v8352_v61, %v7825_v29  ;;  %3432 = vmatpush.bf16.msrb.mxu2 %v7572_v56  ;;  %v7823_v45 = vld [vmem:[#allocation5 + $0x258] sm:$0xf]  ;;  %v13357_v61 = vld [vmem:[#allocation80_spill] sm:$0xff] }
 0x59a   :  { %2699 = vmatmul.bf16.gmra.mxu1 %v13352_v23  ;;  %3037 = vmatmul.bf16.gmra.mxu3 %v13352_v23  ;;  %v10403_v11 = vsel %vm3985_vm7, %v2996_v38, %v4497_v60  ;;  %v4504_v41 = vmul.f32 0.01, %v2661_v5  ;;  %vm3992_vm8 = vcmp.gt.f32.partialorder %v2661_v5, 0.0  ;;  %v7824_v59 = vor.u32 %v8356_v7, %v7823_v45 }
 0x59b   :  { %13354 = vst [vmem:[#allocation351_spill] sm:$0xff] %v10403_v11  ;;  %v2829_v25 = vpop.f32.mrf.mxu2  ;;  %3094 = vmatpush.bf16.msrb.mxu0 %v7568_v52  ;;  %3601 = vmatpush.bf16.msrb.mxu3 %v7828_v3 }
 0x59c   :  { %v2830_v24 = vadd.f32 %v2829_v25, %v10118_v6  ;;  %v10409_v25 = vsel %vm3992_vm8, %v2661_v5, %v4504_v41  ;;  %3263 = vmatpush.bf16.msrb.mxu1 %v7824_v59  ;;  %v13358_v41 = vld [vmem:[#allocation83_spill] sm:$0xff] }
 0x59d   :  { %v2998_v1 = vpop.f32.mrf.mxu3  ;;  %v2493_v23 = vpop.f32.mrf.mxu0  ;;  %13355 = vst [vmem:[#allocation352_spill] sm:$0xff] %v10409_v25  ;;  %v13363_v25 = vld [vmem:[#allocation86_spill] sm:$0xff] }
 0x59e   :  { %v2494_v22 = vadd.f32 %v2493_v23, %v10105_v44  ;;  %v2999_v16 = vadd.f32 %v2998_v1, %v2830_v24 }
 0x59f   :  { %v2662_v4 = vpop.f32.mrf.mxu1 }
 0x5a0   :  { %v2663_v38 = vadd.f32 %v2662_v4, %v2494_v22  ;;  %v4505_v22 = vmul.f32 0.01, %v2999_v16  ;;  %vm3993_vm10 = vcmp.gt.f32.partialorder %v2999_v16, 0.0 }
 0x5a2   :  { %vm4000_vm9 = vcmp.gt.f32.partialorder %v2663_v38, 0.0  ;;  %v4512_v60 = vmul.f32 0.01, %v2663_v38 }
 0x5a3   :  { %v2831_v42 = vpop.f32.mrf.mxu2 }
 0x5a4   :  { %v10411_v39 = vsel %vm4000_vm9, %v2663_v38, %v4512_v60  ;;  %v2832_v29 = vadd.f32 %v2831_v42, %v10118_v6  ;;  %v10421_v38 = vsel %vm3993_vm10, %v2999_v16, %v4505_v22 }
 0x5a5   :  { %13356 = vst [vmem:[#allocation353_spill] sm:$0xff] %v10411_v39  ;;  %v3000_v23 = vpop.f32.mrf.mxu3  ;;  %v2496_v56 = vpop.f32.mrf.mxu0 }
 0x5a6   :  { %v2497_v1 = vadd.f32 %v2496_v56, %v10105_v44  ;;  %v3001_v3 = vadd.f32 %v3000_v23, %v2832_v29  ;;  %13359 = vst [vmem:[#allocation354_spill] sm:$0xff] %v10421_v38 }
 0x5a7   :  { %v2665_v4 = vpop.f32.mrf.mxu1 }
 0x5a8   :  { %v2666_v52 = vadd.f32 %v2665_v4, %v2497_v1  ;;  %2535 = vmatmul.bf16.gmra.mxu0 %v13357_v61  ;;  %vm4001_vm11 = vcmp.gt.f32.partialorder %v3001_v3, 0.0  ;;  %v4513_v5 = vmul.f32 0.01, %v3001_v3  ;;  %2873 = vmatmul.bf16.gmra.mxu2 %v13357_v61 }
 0x5aa   :  { %2704 = vmatmul.bf16.gmra.mxu1 %v13358_v41  ;;  %3042 = vmatmul.bf16.gmra.mxu3 %v13358_v41  ;;  %v10423_v45 = vsel %vm4001_vm11, %v3001_v3, %v4513_v5  ;;  %v4520_v4 = vmul.f32 0.01, %v2666_v52  ;;  %vm4008_vm12 = vcmp.gt.f32.partialorder %v2666_v52, 0.0 }
 0x5ab   :  { %13360 = vst [vmem:[#allocation355_spill] sm:$0xff] %v10423_v45  ;;  %v2834_v60 = vpop.f32.mrf.mxu2 }
 0x5ac   :  { %v2835_v59 = vadd.f32 %v2834_v60, %v10118_v6  ;;  %v10429_v3 = vsel %vm4008_vm12, %v2666_v52, %v4520_v4 }
 0x5ad   :  { %v3003_v42 = vpop.f32.mrf.mxu3  ;;  %v2498_v29 = vpop.f32.mrf.mxu0  ;;  %13361 = vst [vmem:[#allocation356_spill] sm:$0xff] %v10429_v3 }
 0x5ae   :  { %v2499_v23 = vadd.f32 %v2498_v29, %v10105_v44  ;;  %v3004_v1 = vadd.f32 %v3003_v42, %v2835_v59 }
 0x5af   :  { %v2667_v56 = vpop.f32.mrf.mxu1 }
 0x5b0   :  { %v2668_v24 = vadd.f32 %v2667_v56, %v2499_v23  ;;  %v4521_v42 = vmul.f32 0.01, %v3004_v1  ;;  %vm4009_vm14 = vcmp.gt.f32.partialorder %v3004_v1, 0.0 }
 0x5b2   :  { %vm4016_vm13 = vcmp.gt.f32.partialorder %v2668_v24, 0.0  ;;  %v4528_v16 = vmul.f32 0.01, %v2668_v24  ;;  %v10441_v4 = vsel %vm4009_vm14, %v3004_v1, %v4521_v42 }
 0x5b3   :  { %v2836_v22 = vpop.f32.mrf.mxu2  ;;  %13365 = vst [vmem:[#allocation358_spill] sm:$0xff] %v10441_v4 }
 0x5b4   :  { %v10431_v5 = vsel %vm4016_vm13, %v2668_v24, %v4528_v16  ;;  %v2837_v7 = vadd.f32 %v2836_v22, %v10118_v6  ;;  %v13364_v24 = vld [vmem:[#allocation89_spill] sm:$0xff] }
 0x5b5   :  { %13362 = vst [vmem:[#allocation357_spill] sm:$0xff] %v10431_v5  ;;  %v3005_v38 = vpop.f32.mrf.mxu3  ;;  %v2501_v60 = vpop.f32.mrf.mxu0 }
 0x5b6   :  { %v2502_v29 = vadd.f32 %v2501_v60, %v10105_v44  ;;  %v3006_v23 = vadd.f32 %v3005_v38, %v2837_v7 }
 0x5b7   :  { %v2670_v59 = vpop.f32.mrf.mxu1 }
 0x5b8   :  { %v2671_v56 = vadd.f32 %v2670_v59, %v2502_v29  ;;  %2540 = vmatmul.bf16.gmra.mxu0 %v13363_v25  ;;  %vm4017_vm15 = vcmp.gt.f32.partialorder %v3006_v23, 0.0  ;;  %v4529_v52 = vmul.f32 0.01, %v3006_v23  ;;  %2878 = vmatmul.bf16.gmra.mxu2 %v13363_v25 }
 0x5ba   :  { %2709 = vmatmul.bf16.gmra.mxu1 %v13364_v24  ;;  %3047 = vmatmul.bf16.gmra.mxu3 %v13364_v24  ;;  %v10443_v16 = vsel %vm4017_vm15, %v3006_v23, %v4529_v52  ;;  %v4536_v5 = vmul.f32 0.01, %v2671_v56  ;;  %vm4024_vm0 = vcmp.gt.f32.partialorder %v2671_v56, 0.0 }
 0x5bb   :  { %13366 = vst [vmem:[#allocation359_spill] sm:$0xff] %v10443_v16  ;;  %v2839_v22 = vpop.f32.mrf.mxu2 }
 0x5bc   :  { %v2840_v7 = vadd.f32 %v2839_v22, %v10118_v6  ;;  %v10449_v23 = vsel %vm4024_vm0, %v2671_v56, %v4536_v5 }
 0x5bd   :  { %v3008_v60 = vpop.f32.mrf.mxu3  ;;  %v2503_v29 = vpop.f32.mrf.mxu0  ;;  %13367 = vst [vmem:[#allocation360_spill] sm:$0xff] %v10449_v23 }
 0x5be   :  { %v2504_v59 = vadd.f32 %v2503_v29, %v10105_v44  ;;  %v3009_v3 = vadd.f32 %v3008_v60, %v2840_v7 }
 0x5bf   :  { %v2672_v45 = vpop.f32.mrf.mxu1 }
 0x5c0   :  { %v2673_v39 = vadd.f32 %v2672_v45, %v2504_v59  ;;  %v4537_v60 = vmul.f32 0.01, %v3009_v3  ;;  %vm4025_vm2 = vcmp.gt.f32.partialorder %v3009_v3, 0.0 }
 0x5c2   :  { %vm4032_vm1 = vcmp.gt.f32.partialorder %v2673_v39, 0.0  ;;  %v4544_v1 = vmul.f32 0.01, %v2673_v39  ;;  %v10461_v56 = vsel %vm4025_vm2, %v3009_v3, %v4537_v60 }
 0x5c3   :  { %v2841_v42 = vpop.f32.mrf.mxu2  ;;  %13371 = vst [vmem:[#allocation362_spill] sm:$0xff] %v10461_v56 }
 0x5c4   :  { %v10451_v52 = vsel %vm4032_vm1, %v2673_v39, %v4544_v1  ;;  %v2842_v38 = vadd.f32 %v2841_v42, %v10118_v6  ;;  %v13370_v39 = vld [vmem:[#allocation95_spill] sm:$0xff] }
 0x5c5   :  { %13368 = vst [vmem:[#allocation361_spill] sm:$0xff] %v10451_v52  ;;  %v3010_v4 = vpop.f32.mrf.mxu3  ;;  %v2506_v22 = vpop.f32.mrf.mxu0 }
 0x5c6   :  { %v2507_v29 = vadd.f32 %v2506_v22, %v10105_v44  ;;  %v3011_v45 = vadd.f32 %v3010_v4, %v2842_v38 }
 0x5c7   :  { %v2675_v7 = vpop.f32.mrf.mxu1 }
 0x5c8   :  { %v2676_v59 = vadd.f32 %v2675_v7, %v2507_v29  ;;  %2545 = vmatmul.bf16.gmra.mxu0 %v13369_v12  ;;  %vm4033_vm3 = vcmp.gt.f32.partialorder %v3011_v45, 0.0  ;;  %v4545_v5 = vmul.f32 0.01, %v3011_v45  ;;  %2883 = vmatmul.bf16.gmra.mxu2 %v13369_v12 }
 0x5ca   :  { %2714 = vmatmul.bf16.gmra.mxu1 %v13370_v39  ;;  %3052 = vmatmul.bf16.gmra.mxu3 %v13370_v39  ;;  %v10463_v1 = vsel %vm4033_vm3, %v3011_v45, %v4545_v5  ;;  %v4552_v52 = vmul.f32 0.01, %v2676_v59  ;;  %vm4040_vm4 = vcmp.gt.f32.partialorder %v2676_v59, 0.0  ;;  %v13375_v39 = vld [vmem:[#allocation98_spill] sm:$0xff] }
 0x5cb   :  { %13372 = vst [vmem:[#allocation363_spill] sm:$0xff] %v10463_v1  ;;  %v2844_v42 = vpop.f32.mrf.mxu2  ;;  %v8284_v1 = vld [vmem:[#allocation5 + $0x34] sm:$0xf0] }
 0x5cc   :  { %v2845_v38 = vadd.f32 %v2844_v42, %v10118_v6  ;;  %v10469_v45 = vsel %vm4040_vm4, %v2676_v59, %v4552_v52  ;;  %v8280_v59 = vld [vmem:[#allocation5 + $0x1c] sm:$0xf] }
 0x5cd   :  { %v3013_v22 = vpop.f32.mrf.mxu3  ;;  %v2508_v29 = vpop.f32.mrf.mxu0  ;;  %13373 = vst [vmem:[#allocation364_spill] sm:$0xff] %v10469_v45 }
 0x5ce   :  { %v2509_v7 = vadd.f32 %v2508_v29, %v10105_v44  ;;  %v3014_v23 = vadd.f32 %v3013_v22, %v2845_v38 }
 0x5cf   :  { %v2677_v16 = vpop.f32.mrf.mxu1 }
 0x5d0   :  { %v2678_v11 = vadd.f32 %v2677_v16, %v2509_v7  ;;  %v4553_v22 = vmul.f32 0.01, %v3014_v23  ;;  %vm4041_vm6 = vcmp.gt.f32.partialorder %v3014_v23, 0.0 }
 0x5d2   :  { %vm4048_vm5 = vcmp.gt.f32.partialorder %v2678_v11, 0.0  ;;  %v4560_v3 = vmul.f32 0.01, %v2678_v11 }
 0x5d3   :  { %v2846_v60 = vpop.f32.mrf.mxu2 }
 0x5d4   :  { %v10471_v5 = vsel %vm4048_vm5, %v2678_v11, %v4560_v3  ;;  %v2847_v4 = vadd.f32 %v2846_v60, %v10118_v6  ;;  %v13376_v11 = vld [vmem:[#allocation101_spill] sm:$0xff] }
 0x5d5   :  { %13374 = vst [vmem:[#allocation365_spill] sm:$0xff] %v10471_v5  ;;  %v3015_v56 = vpop.f32.mrf.mxu3  ;;  %v2511_v42 = vpop.f32.mrf.mxu0  ;;  %v7537_v3 = vld [vmem:[#allocation5 + $0x38] sm:$0xf0]  ;;  %v7535_v60 = vld [vmem:[#allocation5 + $0x18] sm:$0xf] }
 0x5d6   :  { %v2512_v29 = vadd.f32 %v2511_v42, %v10105_v44  ;;  %v3016_v16 = vadd.f32 %v3015_v56, %v2847_v4  ;;  %v10481_v42 = vsel %vm4041_vm6, %v3014_v23, %v4553_v22  ;;  %v7540_v4 = vor.u32 %v8280_v59, %v7537_v3  ;;  %v7793_v5 = vld [vmem:[#allocation5 + $0x238] sm:$0xf0]  ;;  %v8348_v59 = vld [vmem:[#allocation5 + $0x234] sm:$0xf0] }
 0x5d7   :  { %v2680_v38 = vpop.f32.mrf.mxu1  ;;  %13377 = vst [vmem:[#allocation366_spill] sm:$0xff] %v10481_v42  ;;  %v13393_v42 = vld [vmem:[#allocation116_spill] sm:$0xff] }
 0x5d8   :  { %v2681_v7 = vadd.f32 %v2680_v38, %v2512_v29  ;;  %2550 = vmatmul.bf16.gmra.mxu0 %v13375_v39  ;;  %vm4049_vm7 = vcmp.gt.f32.partialorder %v3016_v16, 0.0  ;;  %v4561_v52 = vmul.f32 0.01, %v3016_v16  ;;  %2888 = vmatmul.bf16.gmra.mxu2 %v13375_v39  ;;  %v7536_v29 = vor.u32 %v8284_v1, %v7535_v60  ;;  %v8344_v38 = vld [vmem:[#allocation5 + $0x21c] sm:$0xf] }
 0x5d9   :  { %v7796_v25 = vor.u32 %v8344_v38, %v7793_v5  ;;  %3433 = vmatpush.bf16.msrb.mxu2 %v7540_v4  ;;  %v7791_v1 = vld [vmem:[#allocation5 + $0x218] sm:$0xf]  ;;  %v13381_v38 = vld [vmem:[#allocation104_spill] sm:$0xff] }
 0x5da   :  { %2719 = vmatmul.bf16.gmra.mxu1 %v13376_v11  ;;  %3057 = vmatmul.bf16.gmra.mxu3 %v13376_v11  ;;  %v10483_v45 = vsel %vm4049_vm7, %v3016_v16, %v4561_v52  ;;  %v4568_v22 = vmul.f32 0.01, %v2681_v7  ;;  %vm4056_vm8 = vcmp.gt.f32.partialorder %v2681_v7, 0.0  ;;  %v7792_v3 = vor.u32 %v8348_v59, %v7791_v1 }
 0x5db   :  { %13378 = vst [vmem:[#allocation367_spill] sm:$0xff] %v10483_v45  ;;  %v2849_v56 = vpop.f32.mrf.mxu2  ;;  %3095 = vmatpush.bf16.msrb.mxu0 %v7536_v29  ;;  %3602 = vmatpush.bf16.msrb.mxu3 %v7796_v25 }
 0x5dc   :  { %v2850_v39 = vadd.f32 %v2849_v56, %v10118_v6  ;;  %v10489_v56 = vsel %vm4056_vm8, %v2681_v7, %v4568_v22  ;;  %3264 = vmatpush.bf16.msrb.mxu1 %v7792_v3  ;;  %v13382_v22 = vld [vmem:[#allocation107_spill] sm:$0xff] }
 0x5dd   :  { %v3018_v24 = vpop.f32.mrf.mxu3  ;;  %v2513_v11 = vpop.f32.mrf.mxu0  ;;  %13379 = vst [vmem:[#allocation368_spill] sm:$0xff] %v10489_v56  ;;  %v13387_v56 = vld [vmem:[#allocation110_spill] sm:$0xff] }
 0x5de   :  { %v2514_v41 = vadd.f32 %v2513_v11, %v10105_v44  ;;  %v3019_v23 = vadd.f32 %v3018_v24, %v2850_v39 }
 0x5df   :  { %v2682_v61 = vpop.f32.mrf.mxu1 }
 0x5e0   :  { %v2683_v16 = vadd.f32 %v2682_v61, %v2514_v41  ;;  %v4569_v24 = vmul.f32 0.01, %v3019_v23  ;;  %vm4057_vm10 = vcmp.gt.f32.partialorder %v3019_v23, 0.0 }
 0x5e2   :  { %vm4064_vm9 = vcmp.gt.f32.partialorder %v2683_v16, 0.0  ;;  %v4576_v52 = vmul.f32 0.01, %v2683_v16 }
 0x5e3   :  { %v2851_v60 = vpop.f32.mrf.mxu2 }
 0x5e4   :  { %v10491_v12 = vsel %vm4064_vm9, %v2683_v16, %v4576_v52  ;;  %v2852_v5 = vadd.f32 %v2851_v60, %v10118_v6  ;;  %v10501_v16 = vsel %vm4057_vm10, %v3019_v23, %v4569_v24 }
 0x5e5   :  { %13380 = vst [vmem:[#allocation369_spill] sm:$0xff] %v10491_v12  ;;  %v3020_v11 = vpop.f32.mrf.mxu3  ;;  %v2516_v4 = vpop.f32.mrf.mxu0 }
 0x5e6   :  { %v2517_v61 = vadd.f32 %v2516_v4, %v10105_v44  ;;  %v3021_v39 = vadd.f32 %v3020_v11, %v2852_v5  ;;  %13383 = vst [vmem:[#allocation104_spill] sm:$0xff] %v10501_v16 }
 0x5e7   :  { %v2685_v41 = vpop.f32.mrf.mxu1 }
 0x5e8   :  { %v2686_v29 = vadd.f32 %v2685_v41, %v2517_v61  ;;  %2555 = vmatmul.bf16.gmra.mxu0 %v13381_v38  ;;  %vm4065_vm11 = vcmp.gt.f32.partialorder %v3021_v39, 0.0  ;;  %v4577_v7 = vmul.f32 0.01, %v3021_v39  ;;  %2893 = vmatmul.bf16.gmra.mxu2 %v13381_v38 }
 0x5ea   :  { %2724 = vmatmul.bf16.gmra.mxu1 %v13382_v22  ;;  %3062 = vmatmul.bf16.gmra.mxu3 %v13382_v22  ;;  %v10503_v1 = vsel %vm4065_vm11, %v3021_v39, %v4577_v7  ;;  %v4584_v41 = vmul.f32 0.01, %v2686_v29  ;;  %vm4072_vm12 = vcmp.gt.f32.partialorder %v2686_v29, 0.0 }
 0x5eb   :  { %13384 = vst [vmem:[#allocation107_spill] sm:$0xff] %v10503_v1  ;;  %v2854_v52 = vpop.f32.mrf.mxu2 }
 0x5ec   :  { %v2855_v3 = vadd.f32 %v2854_v52, %v10118_v6  ;;  %v10509_v39 = vsel %vm4072_vm12, %v2686_v29, %v4584_v41 }
 0x5ed   :  { %v3023_v60 = vpop.f32.mrf.mxu3  ;;  %v2518_v5 = vpop.f32.mrf.mxu0  ;;  %13385 = vst [vmem:[#allocation370_spill] sm:$0xff] %v10509_v39 }
 0x5ee   :  { %v2519_v11 = vadd.f32 %v2518_v5, %v10105_v44  ;;  %v3024_v61 = vadd.f32 %v3023_v60, %v2855_v3 }
 0x5ef   :  { %v2687_v4 = vpop.f32.mrf.mxu1 }
 0x5f0   :  { %v2688_v25 = vadd.f32 %v2687_v4, %v2519_v11  ;;  %v4585_v60 = vmul.f32 0.01, %v3024_v61  ;;  %vm4073_vm14 = vcmp.gt.f32.partialorder %v3024_v61, 0.0 }
 0x5f2   :  { %vm4080_vm13 = vcmp.gt.f32.partialorder %v2688_v25, 0.0  ;;  %v4592_v23 = vmul.f32 0.01, %v2688_v25  ;;  %v10521_v41 = vsel %vm4073_vm14, %v3024_v61, %v4585_v60 }
 0x5f3   :  { %v2856_v24 = vpop.f32.mrf.mxu2  ;;  %13389 = vst [vmem:[#allocation110_spill] sm:$0xff] %v10521_v41 }
 0x5f4   :  { %v10511_v7 = vsel %vm4080_vm13, %v2688_v25, %v4592_v23  ;;  %v2857_v59 = vadd.f32 %v2856_v24, %v10118_v6  ;;  %v13388_v25 = vld [vmem:[#allocation113_spill] sm:$0xff] }
 0x5f5   :  { %13386 = vst [vmem:[#allocation371_spill] sm:$0xff] %v10511_v7  ;;  %v3025_v16 = vpop.f32.mrf.mxu3  ;;  %v2521_v52 = vpop.f32.mrf.mxu0 }
 0x5f6   :  { %v2522_v5 = vadd.f32 %v2521_v52, %v10105_v44  ;;  %v3026_v11 = vadd.f32 %v3025_v16, %v2857_v59 }
 0x5f7   :  { %v2690_v3 = vpop.f32.mrf.mxu1 }
 0x5f8   :  { %v2691_v4 = vadd.f32 %v2690_v3, %v2522_v5  ;;  %2560 = vmatmul.bf16.gmra.mxu0 %v13387_v56  ;;  %vm4081_vm15 = vcmp.gt.f32.partialorder %v3026_v11, 0.0  ;;  %v4593_v29 = vmul.f32 0.01, %v3026_v11  ;;  %2898 = vmatmul.bf16.gmra.mxu2 %v13387_v56 }
 0x5fa   :  { %2729 = vmatmul.bf16.gmra.mxu1 %v13388_v25  ;;  %3067 = vmatmul.bf16.gmra.mxu3 %v13388_v25  ;;  %v10523_v23 = vsel %vm4081_vm15, %v3026_v11, %v4593_v29  ;;  %v4600_v7 = vmul.f32 0.01, %v2691_v4  ;;  %vm4088_vm0 = vcmp.gt.f32.partialorder %v2691_v4, 0.0 }
 0x5fb   :  { %13390 = vst [vmem:[#allocation113_spill] sm:$0xff] %v10523_v23  ;;  %v2859_v24 = vpop.f32.mrf.mxu2 }
 0x5fc   :  { %v2860_v59 = vadd.f32 %v2859_v24, %v10118_v6  ;;  %v10529_v11 = vsel %vm4088_vm0, %v2691_v4, %v4600_v7 }
 0x5fd   :  { %v3028_v52 = vpop.f32.mrf.mxu3  ;;  %v2523_v5 = vpop.f32.mrf.mxu0  ;;  %13391 = vst [vmem:[#allocation372_spill] sm:$0xff] %v10529_v11 }
 0x5fe   :  { %v2524_v3 = vadd.f32 %v2523_v5, %v10105_v44  ;;  %v3029_v39 = vadd.f32 %v3028_v52, %v2860_v59 }
 0x5ff   :  { %v2692_v1 = vpop.f32.mrf.mxu1 }
 0x600   :  { %v2693_v12 = vadd.f32 %v2692_v1, %v2524_v3  ;;  %v4601_v52 = vmul.f32 0.01, %v3029_v39  ;;  %vm4089_vm2 = vcmp.gt.f32.partialorder %v3029_v39, 0.0 }
 0x602   :  { %vm4096_vm1 = vcmp.gt.f32.partialorder %v2693_v12, 0.0  ;;  %v4608_v61 = vmul.f32 0.01, %v2693_v12  ;;  %v10541_v4 = vsel %vm4089_vm2, %v3029_v39, %v4601_v52 }
 0x603   :  { %v2861_v60 = vpop.f32.mrf.mxu2  ;;  %13395 = vst [vmem:[#allocation374_spill] sm:$0xff] %v10541_v4 }
 0x604   :  { %v10531_v29 = vsel %vm4096_vm1, %v2693_v12, %v4608_v61  ;;  %v2862_v16 = vadd.f32 %v2861_v60, %v10118_v6  ;;  %v13394_v12 = vld [vmem:[#allocation119_spill] sm:$0xff] }
 0x605   :  { %13392 = vst [vmem:[#allocation373_spill] sm:$0xff] %v10531_v29  ;;  %v3030_v41 = vpop.f32.mrf.mxu3  ;;  %v2526_v24 = vpop.f32.mrf.mxu0 }
 0x606   :  { %v2527_v5 = vadd.f32 %v2526_v24, %v10105_v44  ;;  %v3031_v1 = vadd.f32 %v3030_v41, %v2862_v16 }
 0x607   :  { %v2695_v59 = vpop.f32.mrf.mxu1 }
 0x608   :  { %v2696_v3 = vadd.f32 %v2695_v59, %v2527_v5  ;;  %2565 = vmatmul.bf16.gmra.mxu0 %v13393_v42  ;;  %vm4097_vm3 = vcmp.gt.f32.partialorder %v3031_v1, 0.0  ;;  %v4609_v7 = vmul.f32 0.01, %v3031_v1  ;;  %2903 = vmatmul.bf16.gmra.mxu2 %v13393_v42 }
 0x60a   :  { %2734 = vmatmul.bf16.gmra.mxu1 %v13394_v12  ;;  %3072 = vmatmul.bf16.gmra.mxu3 %v13394_v12  ;;  %v10543_v61 = vsel %vm4097_vm3, %v3031_v1, %v4609_v7  ;;  %v4616_v29 = vmul.f32 0.01, %v2696_v3  ;;  %vm4104_vm4 = vcmp.gt.f32.partialorder %v2696_v3, 0.0  ;;  %v13399_v12 = vld [vmem:[#allocation122_spill] sm:$0xff] }
 0x60b   :  { %13396 = vst [vmem:[#allocation375_spill] sm:$0xff] %v10543_v61  ;;  %v2864_v60 = vpop.f32.mrf.mxu2 }
 0x60c   :  { %v2865_v16 = vadd.f32 %v2864_v60, %v10118_v6  ;;  %v10549_v1 = vsel %vm4104_vm4, %v2696_v3, %v4616_v29  ;;  %v8428_v3 = vld [vmem:[#allocation8 + $0xb8] sm:$0xff] }
 0x60d   :  { %v3033_v24 = vpop.f32.mrf.mxu3  ;;  %v2528_v5 = vpop.f32.mrf.mxu0  ;;  %13397 = vst [vmem:[#allocation376_spill] sm:$0xff] %v10549_v1  ;;  %6410 = vmatpush.bf16.msra.mxu2 %v8428_v3 }
 0x60e   :  { %v2529_v59 = vadd.f32 %v2528_v5, %v10105_v44  ;;  %v3034_v11 = vadd.f32 %v3033_v24, %v2865_v16 }
 0x60f   :  { %v2697_v23 = vpop.f32.mrf.mxu1 }
 0x610   :  { %v2698_v45 = vadd.f32 %v2697_v23, %v2529_v59  ;;  %v4617_v24 = vmul.f32 0.01, %v3034_v11  ;;  %vm4105_vm6 = vcmp.gt.f32.partialorder %v3034_v11, 0.0 }
 0x612   :  { %vm4112_vm5 = vcmp.gt.f32.partialorder %v2698_v45, 0.0  ;;  %v4624_v39 = vmul.f32 0.01, %v2698_v45  ;;  %v10561_v61 = vsel %vm4105_vm6, %v3034_v11, %v4617_v24  ;;  %v8420_v24 = vld [vmem:[#allocation8 + $0x78] sm:$0xff] }
 0x613   :  { %v2866_v52 = vpop.f32.mrf.mxu2  ;;  %13401 = vst [vmem:[#allocation378_spill] sm:$0xff] %v10561_v61  ;;  %6241 = vmatpush.bf16.msra.mxu1 %v8420_v24 }
 0x614   :  { %v10551_v7 = vsel %vm4112_vm5, %v2698_v45, %v4624_v39  ;;  %v2867_v41 = vadd.f32 %v2866_v52, %v10118_v6  ;;  %v13400_v45 = vld [vmem:[#allocation125_spill] sm:$0xff]  ;;  %v8412_v39 = vld [vmem:[#allocation8 + $0x38] sm:$0xff] }
 0x615   :  { %13398 = vst [vmem:[#allocation377_spill] sm:$0xff] %v10551_v7  ;;  %v3035_v4 = vpop.f32.mrf.mxu3  ;;  %v2531_v60 = vpop.f32.mrf.mxu0  ;;  %v8436_v52 = vld [vmem:[#allocation8 + $0xf8] sm:$0xff]  ;;  %6072 = vmatpush.bf16.msra.mxu0 %v8412_v39 }
 0x616   :  { %v2532_v5 = vadd.f32 %v2531_v60, %v10105_v44  ;;  %v3036_v23 = vadd.f32 %v3035_v4, %v2867_v41  ;;  %6579 = vmatpush.bf16.msra.mxu3 %v8436_v52 }
 0x617   :  { %v2700_v16 = vpop.f32.mrf.mxu1 }
 0x618   :  { %v2701_v59 = vadd.f32 %v2700_v16, %v2532_v5  ;;  %2570 = vmatmul.bf16.gmra.mxu0 %v13399_v12  ;;  %vm4113_vm7 = vcmp.gt.f32.partialorder %v3036_v23, 0.0  ;;  %v4625_v29 = vmul.f32 0.01, %v3036_v23  ;;  %2908 = vmatmul.bf16.gmra.mxu2 %v13399_v12 }
 0x61a   :  { %2739 = vmatmul.bf16.gmra.mxu1 %v13400_v45  ;;  %3077 = vmatmul.bf16.gmra.mxu3 %v13400_v45  ;;  %v10563_v60 = vsel %vm4113_vm7, %v3036_v23, %v4625_v29  ;;  %v4632_v42 = vmul.f32 0.01, %v2701_v59  ;;  %vm4120_vm8 = vcmp.gt.f32.partialorder %v2701_v59, 0.0 }
 0x61b   :  { %13402 = vst [vmem:[#allocation379_spill] sm:$0xff] %v10563_v60  ;;  %v2869_v4 = vpop.f32.mrf.mxu2 }
 0x61c   :  { %v2870_v5 = vadd.f32 %v2869_v4, %v10118_v6  ;;  %v10569_v3 = vsel %vm4120_vm8, %v2701_v59, %v4632_v42 }
 0x61d   :  { %v3038_v16 = vpop.f32.mrf.mxu3  ;;  %v2533_v1 = vpop.f32.mrf.mxu0  ;;  %13403 = vst [vmem:[#allocation380_spill] sm:$0xff] %v10569_v3 }
 0x61e   :  { %v2534_v7 = vadd.f32 %v2533_v1, %v10105_v44  ;;  %v3039_v12 = vadd.f32 %v3038_v16, %v2870_v5 }
 0x61f   :  { %v2702_v45 = vpop.f32.mrf.mxu1 }
 0x620   :  { %v2703_v11 = vadd.f32 %v2702_v45, %v2534_v7  ;;  %v4633_v45 = vmul.f32 0.01, %v3039_v12  ;;  %vm4121_vm10 = vcmp.gt.f32.partialorder %v3039_v12, 0.0 }
 0x622   :  { %vm4128_vm9 = vcmp.gt.f32.partialorder %v2703_v11, 0.0  ;;  %v4640_v23 = vmul.f32 0.01, %v2703_v11  ;;  %v10581_v59 = vsel %vm4121_vm10, %v3039_v12, %v4633_v45 }
 0x623   :  { %v2871_v29 = vpop.f32.mrf.mxu2  ;;  %13405 = vst [vmem:[#allocation382_spill] sm:$0xff] %v10581_v59 }
 0x624   :  { %v10571_v39 = vsel %vm4128_vm9, %v2703_v11, %v4640_v23  ;;  %v2872_v4 = vadd.f32 %v2871_v29, %v10118_v6 }
 0x625   :  { %13404 = vst [vmem:[#allocation381_spill] sm:$0xff] %v10571_v39  ;;  %v3040_v41 = vpop.f32.mrf.mxu3  ;;  %v2536_v52 = vpop.f32.mrf.mxu0 }
 0x626   :  { %v2537_v5 = vadd.f32 %v2536_v52, %v10105_v44  ;;  %v3041_v16 = vadd.f32 %v3040_v41, %v2872_v4 }
 0x627   :  { %v2705_v7 = vpop.f32.mrf.mxu1 }
 0x628   :  { %v2706_v61 = vadd.f32 %v2705_v7, %v2537_v5  ;;  %2575 = vmatmul.bf16.gmra.mxu0 %v9277_v46  ;;  %vm4129_vm11 = vcmp.gt.f32.partialorder %v3041_v16, 0.0  ;;  %v4641_v42 = vmul.f32 0.01, %v3041_v16  ;;  %2913 = vmatmul.bf16.gmra.mxu2 %v9277_v46 }
 0x62a   :  { %2744 = vmatmul.bf16.gmra.mxu1 %v9284_v28  ;;  %3082 = vmatmul.bf16.gmra.mxu3 %v9284_v28  ;;  %v10583_v11 = vsel %vm4129_vm11, %v3041_v16, %v4641_v42  ;;  %v4648_v1 = vmul.f32 0.01, %v2706_v61  ;;  %vm4136_vm12 = vcmp.gt.f32.partialorder %v2706_v61, 0.0 }
 0x62b   :  { %13406 = vst [vmem:[#allocation383_spill] sm:$0xff] %v10583_v11  ;;  %v2874_v24 = vpop.f32.mrf.mxu2 }
 0x62c   :  { %v2875_v23 = vadd.f32 %v2874_v24, %v10118_v6  ;;  %v10589_v16 = vsel %vm4136_vm12, %v2706_v61, %v4648_v1 }
 0x62d   :  { %v3043_v29 = vpop.f32.mrf.mxu3  ;;  %v2538_v4 = vpop.f32.mrf.mxu0  ;;  %13407 = vst [vmem:[#allocation384_spill] sm:$0xff] %v10589_v16 }
 0x62e   :  { %v2539_v52 = vadd.f32 %v2538_v4, %v10105_v44  ;;  %v3044_v7 = vadd.f32 %v3043_v29, %v2875_v23 }
 0x62f   :  { %v2707_v5 = vpop.f32.mrf.mxu1 }
 0x630   :  { %v2708_v3 = vadd.f32 %v2707_v5, %v2539_v52  ;;  %v4649_v29 = vmul.f32 0.01, %v3044_v7  ;;  %vm4137_vm14 = vcmp.gt.f32.partialorder %v3044_v7, 0.0 }
 0x632   :  { %vm4144_vm13 = vcmp.gt.f32.partialorder %v2708_v3, 0.0  ;;  %v4656_v12 = vmul.f32 0.01, %v2708_v3 }
 0x633   :  { %v2876_v45 = vpop.f32.mrf.mxu2 }
 0x634   :  { %v10591_v42 = vsel %vm4144_vm13, %v2708_v3, %v4656_v12  ;;  %v2877_v41 = vadd.f32 %v2876_v45, %v10118_v6  ;;  %v10601_v3 = vsel %vm4137_vm14, %v3044_v7, %v4649_v29 }
 0x635   :  { %13408 = vst [vmem:[#allocation385_spill] sm:$0xff] %v10591_v42  ;;  %v3045_v59 = vpop.f32.mrf.mxu3  ;;  %v2541_v24 = vpop.f32.mrf.mxu0 }
 0x636   :  { %v2542_v4 = vadd.f32 %v2541_v24, %v10105_v44  ;;  %v3046_v52 = vadd.f32 %v3045_v59, %v2877_v41  ;;  %13409 = vst [vmem:[#allocation386_spill] sm:$0xff] %v10601_v3 }
 0x637   :  { %v2710_v23 = vpop.f32.mrf.mxu1 }
 0x638   :  { %v2711_v5 = vadd.f32 %v2710_v23, %v2542_v4  ;;  %3096 = vmatmul.bf16.vlgmr.msrb.gmra.mxu0 %v8670_v43  ;;  %vm4145_vm15 = vcmp.gt.f32.partialorder %v3046_v52, 0.0  ;;  %v4657_v61 = vmul.f32 0.01, %v3046_v52  ;;  %3434 = vmatmul.bf16.vlgmr.msrb.gmra.mxu2 %v8670_v43 }
 0x63a   :  { %3265 = vmatmul.bf16.vlgmr.msrb.gmra.mxu1 %v8672_v47  ;;  %3603 = vmatmul.bf16.vlgmr.msrb.gmra.mxu3 %v8672_v47  ;;  %v10603_v1 = vsel %vm4145_vm15, %v3046_v52, %v4657_v61  ;;  %v4664_v16 = vmul.f32 0.01, %v2711_v5  ;;  %vm4152_vm0 = vcmp.gt.f32.partialorder %v2711_v5, 0.0 }
 0x63b   :  { %13410 = vst [vmem:[#allocation387_spill] sm:$0xff] %v10603_v1  ;;  %v2879_v12 = vpop.f32.mrf.mxu2 }
 0x63c   :  { %v2880_v41 = vadd.f32 %v2879_v12, %v10118_v6  ;;  %v10609_v29 = vsel %vm4152_vm0, %v2711_v5, %v4664_v16 }
 0x63d   :  { %v3048_v45 = vpop.f32.mrf.mxu3  ;;  %v2543_v24 = vpop.f32.mrf.mxu0  ;;  %13411 = vst [vmem:[#allocation388_spill] sm:$0xff] %v10609_v29 }
 0x63e   :  { %v2544_v4 = vadd.f32 %v2543_v24, %v10105_v44  ;;  %v3049_v11 = vadd.f32 %v3048_v45, %v2880_v41 }
 0x63f   :  { %v2712_v23 = vpop.f32.mrf.mxu1 }
 0x640   :  { %v2713_v43 = vadd.f32 %v2712_v23, %v2544_v4  ;;  %v4665_v45 = vmul.f32 0.01, %v3049_v11  ;;  %vm4153_vm2 = vcmp.gt.f32.partialorder %v3049_v11, 0.0 }
 0x642   :  { %vm4160_vm1 = vcmp.gt.f32.partialorder %v2713_v43, 0.0  ;;  %v4672_v47 = vmul.f32 0.01, %v2713_v43  ;;  %v10621_v5 = vsel %vm4153_vm2, %v3049_v11, %v4665_v45 }
 0x643   :  { %v2881_v7 = vpop.f32.mrf.mxu2  ;;  %13413 = vst [vmem:[#allocation390_spill] sm:$0xff] %v10621_v5 }
 0x644   :  { %v10611_v52 = vsel %vm4160_vm1, %v2713_v43, %v4672_v47  ;;  %v2882_v61 = vadd.f32 %v2881_v7, %v10118_v6 }
 0x645   :  { %13412 = vst [vmem:[#allocation389_spill] sm:$0xff] %v10611_v52  ;;  %v3050_v59 = vpop.f32.mrf.mxu3  ;;  %v2546_v12 = vpop.f32.mrf.mxu0 }
 0x646   :  { %v2547_v24 = vadd.f32 %v2546_v12, %v10105_v44  ;;  %v3051_v4 = vadd.f32 %v3050_v59, %v2882_v61 }
 0x647   :  { %v2715_v41 = vpop.f32.mrf.mxu1 }
 0x648   :  { %v2716_v23 = vadd.f32 %v2715_v41, %v2547_v24  ;;  %3101 = vmatmul.bf16.gmra.mxu0 %v8678_v54  ;;  %vm4161_vm3 = vcmp.gt.f32.partialorder %v3051_v4, 0.0  ;;  %v4673_v16 = vmul.f32 0.01, %v3051_v4  ;;  %3439 = vmatmul.bf16.gmra.mxu2 %v8678_v54 }
 0x64a   :  { %3270 = vmatmul.bf16.gmra.mxu1 %v8680_v55  ;;  %3608 = vmatmul.bf16.gmra.mxu3 %v8680_v55  ;;  %v10623_v43 = vsel %vm4161_vm3, %v3051_v4, %v4673_v16  ;;  %v4680_v29 = vmul.f32 0.01, %v2716_v23  ;;  %vm4168_vm4 = vcmp.gt.f32.partialorder %v2716_v23, 0.0 }
 0x64b   :  { %13414 = vst [vmem:[#allocation391_spill] sm:$0xff] %v10623_v43  ;;  %v2884_v47 = vpop.f32.mrf.mxu2  ;;  %v13417_v43 = vld [vmem:[#allocation15_spill] sm:$0xff] }
 0x64c   :  { %v2885_v7 = vadd.f32 %v2884_v47, %v10118_v6  ;;  %v10629_v45 = vsel %vm4168_vm4, %v2716_v23, %v4680_v29  ;;  %v13418_v23 = vld [vmem:[#allocation16_spill] sm:$0xff] }
 0x64d   :  { %v3053_v61 = vpop.f32.mrf.mxu3  ;;  %v2548_v12 = vpop.f32.mrf.mxu0  ;;  %13415 = vst [vmem:[#allocation392_spill] sm:$0xff] %v10629_v45 }
 0x64e   :  { %v2549_v24 = vadd.f32 %v2548_v12, %v10105_v44  ;;  %v3054_v3 = vadd.f32 %v3053_v61, %v2885_v7 }
 0x64f   :  { %v2717_v41 = vpop.f32.mrf.mxu1 }
 0x650   :  { %v2718_v54 = vadd.f32 %v2717_v41, %v2549_v24  ;;  %v4681_v61 = vmul.f32 0.01, %v3054_v3  ;;  %vm4169_vm6 = vcmp.gt.f32.partialorder %v3054_v3, 0.0 }
 0x652   :  { %vm4176_vm5 = vcmp.gt.f32.partialorder %v2718_v54, 0.0  ;;  %v4688_v55 = vmul.f32 0.01, %v2718_v54  ;;  %v10641_v5 = vsel %vm4169_vm6, %v3054_v3, %v4681_v61  ;;  %v8419_v61 = vld [vmem:[#allocation8 + $0x70] sm:$0xff] }
 0x653   :  { %v2886_v11 = vpop.f32.mrf.mxu2  ;;  %13419 = vst [vmem:[#allocation15_spill] sm:$0xff] %v10641_v5  ;;  %6242 = vmatpush.bf16.msra.mxu1 %v8419_v61 }
 0x654   :  { %v10631_v4 = vsel %vm4176_vm5, %v2718_v54, %v4688_v55  ;;  %v2887_v16 = vadd.f32 %v2886_v11, %v10118_v6  ;;  %v8427_v54 = vld [vmem:[#allocation8 + $0xb0] sm:$0xff] }
 0x655   :  { %13416 = vst [vmem:[#allocation393_spill] sm:$0xff] %v10631_v4  ;;  %v3055_v59 = vpop.f32.mrf.mxu3  ;;  %v2551_v47 = vpop.f32.mrf.mxu0  ;;  %v8411_v55 = vld [vmem:[#allocation8 + $0x30] sm:$0xff]  ;;  %6411 = vmatpush.bf16.msra.mxu2 %v8427_v54 }
 0x656   :  { %v2552_v12 = vadd.f32 %v2551_v47, %v10105_v44  ;;  %v3056_v24 = vadd.f32 %v3055_v59, %v2887_v16  ;;  %v8435_v11 = vld [vmem:[#allocation8 + $0xf0] sm:$0xff]  ;;  %6073 = vmatpush.bf16.msra.mxu0 %v8411_v55 }
 0x657   :  { %v2720_v7 = vpop.f32.mrf.mxu1  ;;  %6580 = vmatpush.bf16.msra.mxu3 %v8435_v11 }
 0x658   :  { %v2721_v41 = vadd.f32 %v2720_v7, %v2552_v12  ;;  %3106 = vmatmul.bf16.gmra.mxu0 %v13417_v43  ;;  %vm4177_vm7 = vcmp.gt.f32.partialorder %v3056_v24, 0.0  ;;  %v4689_v29 = vmul.f32 0.01, %v3056_v24  ;;  %3444 = vmatmul.bf16.gmra.mxu2 %v13417_v43 }
 0x65a   :  { %3275 = vmatmul.bf16.gmra.mxu1 %v13418_v23  ;;  %3613 = vmatmul.bf16.gmra.mxu3 %v13418_v23  ;;  %v10643_v47 = vsel %vm4177_vm7, %v3056_v24, %v4689_v29  ;;  %v4696_v52 = vmul.f32 0.01, %v2721_v41  ;;  %vm4184_vm8 = vcmp.gt.f32.partialorder %v2721_v41, 0.0 }
 0x65b   :  { %13420 = vst [vmem:[#allocation16_spill] sm:$0xff] %v10643_v47  ;;  %v2889_v59 = vpop.f32.mrf.mxu2 }
 0x65c   :  { %v2890_v12 = vadd.f32 %v2889_v59, %v10118_v6  ;;  %v10649_v54 = vsel %vm4184_vm8, %v2721_v41, %v4696_v52 }
 0x65d   :  { %v3058_v7 = vpop.f32.mrf.mxu3  ;;  %v2553_v45 = vpop.f32.mrf.mxu0  ;;  %13421 = vst [vmem:[#allocation394_spill] sm:$0xff] %v10649_v54 }
 0x65e   :  { %v2554_v43 = vadd.f32 %v2553_v45, %v10105_v44  ;;  %v3059_v4 = vadd.f32 %v3058_v7, %v2890_v12 }
 0x65f   :  { %v2722_v23 = vpop.f32.mrf.mxu1 }
 0x660   :  { %v2723_v3 = vadd.f32 %v2722_v23, %v2554_v43  ;;  %v4697_v43 = vmul.f32 0.01, %v3059_v4  ;;  %vm4185_vm10 = vcmp.gt.f32.partialorder %v3059_v4, 0.0 }
 0x662   :  { %vm4192_vm9 = vcmp.gt.f32.partialorder %v2723_v3, 0.0  ;;  %v4704_v24 = vmul.f32 0.01, %v2723_v3  ;;  %v10661_v41 = vsel %vm4185_vm10, %v3059_v4, %v4697_v43 }
 0x663   :  { %v2891_v29 = vpop.f32.mrf.mxu2  ;;  %13423 = vst [vmem:[#allocation396_spill] sm:$0xff] %v10661_v41 }
 0x664   :  { %v10651_v55 = vsel %vm4192_vm9, %v2723_v3, %v4704_v24  ;;  %v2892_v59 = vadd.f32 %v2891_v29, %v10118_v6 }
 0x665   :  { %13422 = vst [vmem:[#allocation395_spill] sm:$0xff] %v10651_v55  ;;  %v3060_v16 = vpop.f32.mrf.mxu3  ;;  %v2556_v11 = vpop.f32.mrf.mxu0 }
 0x666   :  { %v2557_v12 = vadd.f32 %v2556_v11, %v10105_v44  ;;  %v3061_v23 = vadd.f32 %v3060_v16, %v2892_v59 }
 0x667   :  { %v2725_v7 = vpop.f32.mrf.mxu1 }
 0x668   :  { %v2726_v5 = vadd.f32 %v2725_v7, %v2557_v12  ;;  %3111 = vmatmul.bf16.gmra.mxu0 %v8694_v14  ;;  %vm4193_vm11 = vcmp.gt.f32.partialorder %v3061_v23, 0.0  ;;  %v4705_v52 = vmul.f32 0.01, %v3061_v23  ;;  %3449 = vmatmul.bf16.gmra.mxu2 %v8694_v14 }
 0x66a   :  { %3280 = vmatmul.bf16.gmra.mxu1 %v8696_v15  ;;  %3618 = vmatmul.bf16.gmra.mxu3 %v8696_v15  ;;  %v10663_v3 = vsel %vm4193_vm11, %v3061_v23, %v4705_v52  ;;  %v4712_v45 = vmul.f32 0.01, %v2726_v5  ;;  %vm4200_vm12 = vcmp.gt.f32.partialorder %v2726_v5, 0.0 }
 0x66b   :  { %13424 = vst [vmem:[#allocation397_spill] sm:$0xff] %v10663_v3  ;;  %v2894_v61 = vpop.f32.mrf.mxu2 }
 0x66c   :  { %v2895_v24 = vadd.f32 %v2894_v61, %v10118_v6  ;;  %v10669_v43 = vsel %vm4200_vm12, %v2726_v5, %v4712_v45 }
 0x66d   :  { %v3063_v29 = vpop.f32.mrf.mxu3  ;;  %v2558_v59 = vpop.f32.mrf.mxu0  ;;  %13425 = vst [vmem:[#allocation398_spill] sm:$0xff] %v10669_v43 }
 0x66e   :  { %v2559_v11 = vadd.f32 %v2558_v59, %v10105_v44  ;;  %v3064_v7 = vadd.f32 %v3063_v29, %v2895_v24 }
 0x66f   :  { %v2727_v12 = vpop.f32.mrf.mxu1 }
 0x670   :  { %v2728_v14 = vadd.f32 %v2727_v12, %v2559_v11  ;;  %v4713_v29 = vmul.f32 0.01, %v3064_v7  ;;  %vm4201_vm14 = vcmp.gt.f32.partialorder %v3064_v7, 0.0 }
 0x672   :  { %vm4208_vm13 = vcmp.gt.f32.partialorder %v2728_v14, 0.0  ;;  %v4720_v15 = vmul.f32 0.01, %v2728_v14  ;;  %v10681_v45 = vsel %vm4201_vm14, %v3064_v7, %v4713_v29 }
 0x673   :  { %v2896_v4 = vpop.f32.mrf.mxu2  ;;  %13427 = vst [vmem:[#allocation400_spill] sm:$0xff] %v10681_v45 }
 0x674   :  { %v10671_v23 = vsel %vm4208_vm13, %v2728_v14, %v4720_v15  ;;  %v2897_v52 = vadd.f32 %v2896_v4, %v10118_v6 }
 0x675   :  { %13426 = vst [vmem:[#allocation399_spill] sm:$0xff] %v10671_v23  ;;  %v3065_v16 = vpop.f32.mrf.mxu3  ;;  %v2561_v61 = vpop.f32.mrf.mxu0 }
 0x676   :  { %v2562_v59 = vadd.f32 %v2561_v61, %v10105_v44  ;;  %v3066_v11 = vadd.f32 %v3065_v16, %v2897_v52 }
 0x677   :  { %v2730_v24 = vpop.f32.mrf.mxu1 }
 0x678   :  { %v2731_v12 = vadd.f32 %v2730_v24, %v2562_v59  ;;  %3116 = vmatmul.bf16.gmra.mxu0 %v8702_v20  ;;  %vm4209_vm15 = vcmp.gt.f32.partialorder %v3066_v11, 0.0  ;;  %v4721_v5 = vmul.f32 0.01, %v3066_v11  ;;  %3454 = vmatmul.bf16.gmra.mxu2 %v8702_v20 }
 0x67a   :  { %3285 = vmatmul.bf16.gmra.mxu1 %v8704_v21  ;;  %3623 = vmatmul.bf16.gmra.mxu3 %v8704_v21  ;;  %v10683_v14 = vsel %vm4209_vm15, %v3066_v11, %v4721_v5  ;;  %v4728_v43 = vmul.f32 0.01, %v2731_v12  ;;  %vm4216_vm0 = vcmp.gt.f32.partialorder %v2731_v12, 0.0 }
 0x67b   :  { %13428 = vst [vmem:[#allocation401_spill] sm:$0xff] %v10683_v14  ;;  %v2899_v15 = vpop.f32.mrf.mxu2 }
 0x67c   :  { %v2900_v4 = vadd.f32 %v2899_v15, %v10118_v6  ;;  %v10689_v29 = vsel %vm4216_vm0, %v2731_v12, %v4728_v43 }
 0x67d   :  { %v3068_v52 = vpop.f32.mrf.mxu3  ;;  %v2563_v61 = vpop.f32.mrf.mxu0  ;;  %13429 = vst [vmem:[#allocation402_spill] sm:$0xff] %v10689_v29 }
 0x67e   :  { %v2564_v59 = vadd.f32 %v2563_v61, %v10105_v44  ;;  %v3069_v41 = vadd.f32 %v3068_v52, %v2900_v4 }
 0x67f   :  { %v2732_v24 = vpop.f32.mrf.mxu1 }
 0x680   :  { %v2733_v20 = vadd.f32 %v2732_v24, %v2564_v59  ;;  %v4729_v52 = vmul.f32 0.01, %v3069_v41  ;;  %vm4217_vm2 = vcmp.gt.f32.partialorder %v3069_v41, 0.0 }
 0x682   :  { %vm4224_vm1 = vcmp.gt.f32.partialorder %v2733_v20, 0.0  ;;  %v4736_v21 = vmul.f32 0.01, %v2733_v20  ;;  %v10701_v12 = vsel %vm4217_vm2, %v3069_v41, %v4729_v52 }
 0x683   :  { %v2901_v7 = vpop.f32.mrf.mxu2  ;;  %13431 = vst [vmem:[#allocation404_spill] sm:$0xff] %v10701_v12 }
 0x684   :  { %v10691_v11 = vsel %vm4224_vm1, %v2733_v20, %v4736_v21  ;;  %v2902_v5 = vadd.f32 %v2901_v7, %v10118_v6 }
 0x685   :  { %13430 = vst [vmem:[#allocation403_spill] sm:$0xff] %v10691_v11  ;;  %v3070_v16 = vpop.f32.mrf.mxu3  ;;  %v2566_v15 = vpop.f32.mrf.mxu0 }
 0x686   :  { %v2567_v61 = vadd.f32 %v2566_v15, %v10105_v44  ;;  %v3071_v59 = vadd.f32 %v3070_v16, %v2902_v5 }
 0x687   :  { %v2735_v4 = vpop.f32.mrf.mxu1 }
 0x688   :  { %v2736_v24 = vadd.f32 %v2735_v4, %v2567_v61  ;;  %3121 = vmatmul.bf16.gmra.mxu0 %v8710_v26  ;;  %vm4225_vm3 = vcmp.gt.f32.partialorder %v3071_v59, 0.0  ;;  %v4737_v43 = vmul.f32 0.01, %v3071_v59  ;;  %3459 = vmatmul.bf16.gmra.mxu2 %v8710_v26 }
 0x68a   :  { %3290 = vmatmul.bf16.gmra.mxu1 %v8712_v27  ;;  %3628 = vmatmul.bf16.gmra.mxu3 %v8712_v27  ;;  %v10703_v20 = vsel %vm4225_vm3, %v3071_v59, %v4737_v43  ;;  %v4744_v29 = vmul.f32 0.01, %v2736_v24  ;;  %vm4232_vm4 = vcmp.gt.f32.partialorder %v2736_v24, 0.0 }
 0x68b   :  { %13432 = vst [vmem:[#allocation405_spill] sm:$0xff] %v10703_v20  ;;  %v2904_v21 = vpop.f32.mrf.mxu2 }
 0x68c   :  { %v2905_v7 = vadd.f32 %v2904_v21, %v10118_v6  ;;  %v10709_v52 = vsel %vm4232_vm4, %v2736_v24, %v4744_v29 }
 0x68d   :  { %v3073_v5 = vpop.f32.mrf.mxu3  ;;  %v2568_v15 = vpop.f32.mrf.mxu0  ;;  %13433 = vst [vmem:[#allocation406_spill] sm:$0xff] %v10709_v52 }
 0x68e   :  { %v2569_v61 = vadd.f32 %v2568_v15, %v10105_v44  ;;  %v3074_v45 = vadd.f32 %v3073_v5, %v2905_v7 }
 0x68f   :  { %v2737_v4 = vpop.f32.mrf.mxu1 }
 0x690   :  { %v2738_v26 = vadd.f32 %v2737_v4, %v2569_v61  ;;  %v4745_v5 = vmul.f32 0.01, %v3074_v45  ;;  %vm4233_vm6 = vcmp.gt.f32.partialorder %v3074_v45, 0.0 }
 0x692   :  { %vm4240_vm5 = vcmp.gt.f32.partialorder %v2738_v26, 0.0  ;;  %v4752_v27 = vmul.f32 0.01, %v2738_v26  ;;  %v10721_v24 = vsel %vm4233_vm6, %v3074_v45, %v4745_v5 }
 0x693   :  { %v2906_v41 = vpop.f32.mrf.mxu2  ;;  %13435 = vst [vmem:[#allocation408_spill] sm:$0xff] %v10721_v24 }
 0x694   :  { %v10711_v59 = vsel %vm4240_vm5, %v2738_v26, %v4752_v27  ;;  %v2907_v43 = vadd.f32 %v2906_v41, %v10118_v6  ;;  %v8426_v41 = vld [vmem:[#allocation8 + $0xa8] sm:$0xff] }
 0x695   :  { %13434 = vst [vmem:[#allocation407_spill] sm:$0xff] %v10711_v59  ;;  %v3075_v16 = vpop.f32.mrf.mxu3  ;;  %v2571_v21 = vpop.f32.mrf.mxu0  ;;  %6412 = vmatpush.bf16.msra.mxu2 %v8426_v41 }
 0x696   :  { %v2572_v15 = vadd.f32 %v2571_v21, %v10105_v44  ;;  %v3076_v61 = vadd.f32 %v3075_v16, %v2907_v43  ;;  %v8410_v21 = vld [vmem:[#allocation8 + $0x28] sm:$0xff] }
 0x697   :  { %v2740_v7 = vpop.f32.mrf.mxu1  ;;  %v8434_v16 = vld [vmem:[#allocation8 + $0xe8] sm:$0xff]  ;;  %6074 = vmatpush.bf16.msra.mxu0 %v8410_v21 }
 0x698   :  { %v2741_v4 = vadd.f32 %v2740_v7, %v2572_v15  ;;  %3126 = vmatmul.bf16.gmra.mxu0 %v8718_v32  ;;  %vm4241_vm7 = vcmp.gt.f32.partialorder %v3076_v61, 0.0  ;;  %v4753_v29 = vmul.f32 0.01, %v3076_v61  ;;  %3464 = vmatmul.bf16.gmra.mxu2 %v8718_v32 }
 0x699   :  { %6581 = vmatpush.bf16.msra.mxu3 %v8434_v16 }
 0x69a   :  { %3295 = vmatmul.bf16.gmra.mxu1 %v8720_v33  ;;  %3633 = vmatmul.bf16.gmra.mxu3 %v8720_v33  ;;  %v10723_v26 = vsel %vm4241_vm7, %v3076_v61, %v4753_v29  ;;  %v4760_v45 = vmul.f32 0.01, %v2741_v4  ;;  %vm4248_vm8 = vcmp.gt.f32.partialorder %v2741_v4, 0.0  ;;  %v8418_v29 = vld [vmem:[#allocation8 + $0x68] sm:$0xff] }
 0x69b   :  { %13436 = vst [vmem:[#allocation409_spill] sm:$0xff] %v10723_v26  ;;  %v2909_v27 = vpop.f32.mrf.mxu2  ;;  %6243 = vmatpush.bf16.msra.mxu1 %v8418_v29 }
 0x69c   :  { %v2910_v15 = vadd.f32 %v2909_v27, %v10118_v6  ;;  %v10729_v20 = vsel %vm4248_vm8, %v2741_v4, %v4760_v45 }
 0x69d   :  { %v3078_v7 = vpop.f32.mrf.mxu3  ;;  %v2573_v12 = vpop.f32.mrf.mxu0  ;;  %13437 = vst [vmem:[#allocation410_spill] sm:$0xff] %v10729_v20 }
 0x69e   :  { %v2574_v52 = vadd.f32 %v2573_v12, %v10105_v44  ;;  %v3079_v33 = vadd.f32 %v3078_v7, %v2910_v15 }
 0x69f   :  { %v2742_v32 = vpop.f32.mrf.mxu1 }
 0x6a0   :  { %v2743_v5 = vadd.f32 %v2742_v32, %v2574_v52  ;;  %v4761_v16 = vmul.f32 0.01, %v3079_v33  ;;  %vm4249_vm10 = vcmp.gt.f32.partialorder %v3079_v33, 0.0 }
 0x6a2   :  { %vm4256_vm9 = vcmp.gt.f32.partialorder %v2743_v5, 0.0  ;;  %v4768_v61 = vmul.f32 0.01, %v2743_v5 }
 0x6a3   :  { %v2911_v59 = vpop.f32.mrf.mxu2 }
 0x6a4   :  { %v10731_v43 = vsel %vm4256_vm9, %v2743_v5, %v4768_v61  ;;  %v2912_v27 = vadd.f32 %v2911_v59, %v10118_v6  ;;  %v10741_v59 = vsel %vm4249_vm10, %v3079_v33, %v4761_v16  ;;  %v8485_v33 = vld [vmem:[#allocation7] sm:$0xff] }
 0x6a5   :  { %13438 = vst [vmem:[#allocation411_spill] sm:$0xff] %v10731_v43  ;;  %v3080_v24 = vpop.f32.mrf.mxu3  ;;  %v2576_v12 = vpop.f32.mrf.mxu0  ;;  %v10749_v16 = vperm.slane %v8485_v33, 6 }
 0x6a6   :  { %v2577_v21 = vadd.f32 %v2576_v12, %v10105_v44  ;;  %v3081_v15 = vadd.f32 %v3080_v24, %v2912_v27  ;;  %13439 = vst [vmem:[#allocation412_spill] sm:$0xff] %v10741_v59 }
 0x6a7   :  { %v2745_v52 = vpop.f32.mrf.mxu1 }
 0x6a8   :  { %v2746_v7 = vadd.f32 %v2745_v52, %v2577_v21  ;;  %3131 = vmatmul.bf16.gmra.mxu0 %v8726_v51  ;;  %vm4257_vm11 = vcmp.gt.f32.partialorder %v3081_v15, 0.0  ;;  %v4769_v4 = vmul.f32 0.01, %v3081_v15  ;;  %3469 = vmatmul.bf16.gmra.mxu2 %v8726_v51 }
 0x6aa   :  { %3300 = vmatmul.bf16.gmra.mxu1 %v8728_v53  ;;  %3638 = vmatmul.bf16.gmra.mxu3 %v8728_v53  ;;  %v10743_v32 = vsel %vm4257_vm11, %v3081_v15, %v4769_v4  ;;  %v4776_v52 = vmul.f32 0.01, %v2746_v7  ;;  %vm4264_vm12 = vcmp.gt.f32.partialorder %v2746_v7, 0.0 }
 0x6ab   :  { %13440 = vst [vmem:[#allocation413_spill] sm:$0xff] %v10743_v32  ;;  %v2914_v45 = vpop.f32.mrf.mxu2 }
 0x6ac   :  { %v2915_v5 = vadd.f32 %v2914_v45, %v10118_v6  ;;  %v10751_v4 = vsel %vm4264_vm12, %v2746_v7, %v4776_v52 }
 0x6ad   :  { %v3083_v61 = vpop.f32.mrf.mxu3  ;;  %v2578_v29 = vpop.f32.mrf.mxu0  ;;  %13441 = vst [vmem:[#allocation414_spill] sm:$0xff] %v10751_v4 }
 0x6ae   :  { %v2579_v27 = vadd.f32 %v2578_v29, %v10105_v44  ;;  %v3084_v21 = vadd.f32 %v3083_v61, %v2915_v5 }
 0x6af   :  { %v2747_v12 = vpop.f32.mrf.mxu1 }
 0x6b0   :  { %v2748_v51 = vadd.f32 %v2747_v12, %v2579_v27  ;;  %v4777_v29 = vmul.f32 0.01, %v3084_v21  ;;  %vm4265_vm14 = vcmp.gt.f32.partialorder %v3084_v21, 0.0 }
 0x6b2   :  { %vm4272_vm13 = vcmp.gt.f32.partialorder %v2748_v51, 0.0  ;;  %v4784_v53 = vmul.f32 0.01, %v2748_v51  ;;  %v10765_v52 = vsel %vm4265_vm14, %v3084_v21, %v4777_v29 }
 0x6b3   :  { %v2916_v15 = vpop.f32.mrf.mxu2  ;;  %13443 = vst [vmem:[#allocation416_spill] sm:$0xff] %v10765_v52 }
 0x6b4   :  { %v10753_v24 = vsel %vm4272_vm13, %v2748_v51, %v4784_v53  ;;  %v2917_v45 = vadd.f32 %v2916_v15, %v10118_v6  ;;  %v10762_v6 = vperm.slane %v8485_v33, 7 }
 0x6b5   :  { %13442 = vst [vmem:[#allocation415_spill] sm:$0xff] %v10753_v24  ;;  %v3085_v41 = vpop.f32.mrf.mxu3  ;;  %v3097_v59 = vpop.f32.mrf.mxu0 }
 0x6b6   :  { %v3098_v5 = vadd.f32 %v3097_v59, %v10749_v16  ;;  %v3086_v27 = vadd.f32 %v3085_v41, %v2917_v45 }
 0x6b7   :  { %v3266_v61 = vpop.f32.mrf.mxu1 }
 0x6b8   :  { %v3267_v12 = vadd.f32 %v3266_v61, %v3098_v5  ;;  %3136 = vmatmul.bf16.gmra.mxu0 %v8736_v0  ;;  %vm4273_vm15 = vcmp.gt.f32.partialorder %v3086_v27, 0.0  ;;  %v4785_v7 = vmul.f32 0.01, %v3086_v27  ;;  %3474 = vmatmul.bf16.gmra.mxu2 %v8736_v0 }
 0x6ba   :  { %3305 = vmatmul.bf16.gmra.mxu1 %v8738_v2  ;;  %3643 = vmatmul.bf16.gmra.mxu3 %v8738_v2  ;;  %v10767_v59 = vsel %vm4273_vm15, %v3086_v27, %v4785_v7  ;;  %v4282_v33 = vmul.f32 0.01, %v3267_v12  ;;  %vm3770_vm0 = vcmp.gt.f32.partialorder %v3267_v12, 0.0 }
 0x6bb   :  { %13444 = vst [vmem:[#allocation417_spill] sm:$0xff] %v10767_v59  ;;  %v3435_v51 = vpop.f32.mrf.mxu2 }
 0x6bc   :  { %v3436_v53 = vadd.f32 %v3435_v51, %v10762_v6  ;;  %v10773_v21 = vsel %vm3770_vm0, %v3267_v12, %v4282_v33 }
 0x6bd   :  { %v3604_v15 = vpop.f32.mrf.mxu3  ;;  %v3099_v45 = vpop.f32.mrf.mxu0 }
 0x6be   :  { %v3100_v5 = vadd.f32 %v3099_v45, %v10749_v16  ;;  %v3605_v0 = vadd.f32 %v3604_v15, %v3436_v53 }
 0x6bf   :  { %v3268_v61 = vpop.f32.mrf.mxu1 }
 0x6c0   :  { %v3269_v44 = vadd.f32 %v3268_v61, %v3100_v5  ;;  %v4283_v15 = vmul.f32 0.01, %v3605_v0  ;;  %vm3771_vm2 = vcmp.gt.f32.partialorder %v3605_v0, 0.0 }
 0x6c2   :  { %vm3778_vm1 = vcmp.gt.f32.partialorder %v3269_v44, 0.0  ;;  %v4290_v2 = vmul.f32 0.01, %v3269_v44  ;;  %v10785_v12 = vsel %vm3771_vm2, %v3605_v0, %v4283_v15 }
 0x6c3   :  { %v3437_v27 = vpop.f32.mrf.mxu2 }
 0x6c4   :  { %v10775_v29 = vsel %vm3778_vm1, %v3269_v44, %v4290_v2  ;;  %v3438_v51 = vadd.f32 %v3437_v27, %v10762_v6 }
 0x6c5   :  { %v3606_v41 = vpop.f32.mrf.mxu3  ;;  %v3102_v52 = vpop.f32.mrf.mxu0 }
 0x6c6   :  { %v3103_v45 = vadd.f32 %v3102_v52, %v10749_v16  ;;  %v3607_v5 = vadd.f32 %v3606_v41, %v3438_v51 }
 0x6c7   :  { %v3271_v53 = vpop.f32.mrf.mxu1 }
 0x6c8   :  { %v3272_v61 = vadd.f32 %v3271_v53, %v3103_v45  ;;  %3141 = vmatmul.bf16.gmra.mxu0 %v8753_v30  ;;  %vm3779_vm3 = vcmp.gt.f32.partialorder %v3607_v5, 0.0  ;;  %v4291_v44 = vmul.f32 0.01, %v3607_v5  ;;  %3479 = vmatmul.bf16.gmra.mxu2 %v8753_v30 }
 0x6ca   :  { %3310 = vmatmul.bf16.gmra.mxu1 %v8758_v37  ;;  %3648 = vmatmul.bf16.gmra.mxu3 %v8758_v37  ;;  %v10787_v33 = vsel %vm3779_vm3, %v3607_v5, %v4291_v44  ;;  %v4298_v59 = vmul.f32 0.01, %v3272_v61  ;;  %vm3786_vm4 = vcmp.gt.f32.partialorder %v3272_v61, 0.0 }
 0x6cb   :  { %v3440_v41 = vpop.f32.mrf.mxu2 }
 0x6cc   :  { %v3441_v2 = vadd.f32 %v3440_v41, %v10762_v6  ;;  %v10793_v15 = vsel %vm3786_vm4, %v3272_v61, %v4298_v59  ;;  %v8425_v61 = vld [vmem:[#allocation8 + $0xa0] sm:$0xff] }
 0x6cd   :  { %v3609_v27 = vpop.f32.mrf.mxu3  ;;  %v3104_v51 = vpop.f32.mrf.mxu0  ;;  %6413 = vmatpush.bf16.msra.mxu2 %v8425_v61 }
 0x6ce   :  { %v3105_v45 = vadd.f32 %v3104_v51, %v10749_v16  ;;  %v3610_v7 = vadd.f32 %v3609_v27, %v3441_v2 }
 0x6cf   :  { %v3273_v53 = vpop.f32.mrf.mxu1 }
 0x6d0   :  { %v3274_v30 = vadd.f32 %v3273_v53, %v3105_v45  ;;  %v4299_v27 = vmul.f32 0.01, %v3610_v7  ;;  %vm3787_vm6 = vcmp.gt.f32.partialorder %v3610_v7, 0.0 }
 0x6d2   :  { %vm3794_vm5 = vcmp.gt.f32.partialorder %v3274_v30, 0.0  ;;  %v4306_v37 = vmul.f32 0.01, %v3274_v30 }
 0x6d3   :  { %v3442_v0 = vpop.f32.mrf.mxu2 }
 0x6d4   :  { %v10795_v5 = vsel %vm3794_vm5, %v3274_v30, %v4306_v37  ;;  %v3443_v44 = vadd.f32 %v3442_v0, %v10762_v6  ;;  %v8409_v30 = vld [vmem:[#allocation8 + $0x20] sm:$0xff]  ;;  %v10805_v0 = vsel %vm3787_vm6, %v3610_v7, %v4299_v27 }
 0x6d5   :  { %v3611_v52 = vpop.f32.mrf.mxu3  ;;  %v3107_v41 = vpop.f32.mrf.mxu0  ;;  %v8433_v37 = vld [vmem:[#allocation8 + $0xe0] sm:$0xff]  ;;  %6075 = vmatpush.bf16.msra.mxu0 %v8409_v30 }
 0x6d6   :  { %v3108_v51 = vadd.f32 %v3107_v41, %v10749_v16  ;;  %v3612_v45 = vadd.f32 %v3611_v52, %v3443_v44  ;;  %6582 = vmatpush.bf16.msra.mxu3 %v8433_v37  ;;  %v8417_v27 = vld [vmem:[#allocation8 + $0x60] sm:$0xff] }
 0x6d7   :  { %v3276_v2 = vpop.f32.mrf.mxu1  ;;  %6244 = vmatpush.bf16.msra.mxu1 %v8417_v27 }
 0x6d8   :  { %v3277_v53 = vadd.f32 %v3276_v2, %v3108_v51  ;;  %3146 = vmatmul.bf16.gmra.mxu0 %v8773_v10  ;;  %vm3795_vm7 = vcmp.gt.f32.partialorder %v3612_v45, 0.0  ;;  %v4307_v59 = vmul.f32 0.01, %v3612_v45  ;;  %3484 = vmatmul.bf16.gmra.mxu2 %v8773_v10 }
 0x6da   :  { %3315 = vmatmul.bf16.gmra.mxu1 %v8780_v18  ;;  %3653 = vmatmul.bf16.gmra.mxu3 %v8780_v18  ;;  %v10807_v41 = vsel %vm3795_vm7, %v3612_v45, %v4307_v59  ;;  %v4314_v32 = vmul.f32 0.01, %v3277_v53  ;;  %vm3802_vm8 = vcmp.gt.f32.partialorder %v3277_v53, 0.0 }
 0x6db   :  { %v3445_v52 = vpop.f32.mrf.mxu2 }
 0x6dc   :  { %v3446_v51 = vadd.f32 %v3445_v52, %v10762_v6  ;;  %v10813_v61 = vsel %vm3802_vm8, %v3277_v53, %v4314_v32 }
 0x6dd   :  { %v3614_v2 = vpop.f32.mrf.mxu3  ;;  %v3109_v4 = vpop.f32.mrf.mxu0 }
 0x6de   :  { %v3110_v10 = vadd.f32 %v3109_v4, %v10749_v16  ;;  %v3615_v24 = vadd.f32 %v3614_v2, %v3446_v51 }
 0x6df   :  { %v3278_v18 = vpop.f32.mrf.mxu1 }
 0x6e0   :  { %v3279_v7 = vadd.f32 %v3278_v18, %v3110_v10  ;;  %v4315_v10 = vmul.f32 0.01, %v3615_v24  ;;  %vm3803_vm10 = vcmp.gt.f32.partialorder %v3615_v24, 0.0 }
 0x6e2   :  { %vm3810_vm9 = vcmp.gt.f32.partialorder %v3279_v7, 0.0  ;;  %v4322_v45 = vmul.f32 0.01, %v3279_v7  ;;  %v10825_v53 = vsel %vm3803_vm10, %v3615_v24, %v4315_v10 }
 0x6e3   :  { %v3447_v59 = vpop.f32.mrf.mxu2 }
 0x6e4   :  { %v10815_v30 = vsel %vm3810_vm9, %v3279_v7, %v4322_v45  ;;  %v3448_v52 = vadd.f32 %v3447_v59, %v10762_v6 }
 0x6e5   :  { %v3616_v44 = vpop.f32.mrf.mxu3  ;;  %v3112_v37 = vpop.f32.mrf.mxu0 }
 0x6e6   :  { %v3113_v51 = vadd.f32 %v3112_v37, %v10749_v16  ;;  %v3617_v18 = vadd.f32 %v3616_v44, %v3448_v52 }
 0x6e7   :  { %v3281_v2 = vpop.f32.mrf.mxu1 }
 0x6e8   :  { %v3282_v20 = vadd.f32 %v3281_v2, %v3113_v51  ;;  %3151 = vmatmul.bf16.gmra.mxu0 %v8797_v36  ;;  %vm3811_vm11 = vcmp.gt.f32.partialorder %v3617_v18, 0.0  ;;  %v4323_v32 = vmul.f32 0.01, %v3617_v18  ;;  %3489 = vmatmul.bf16.gmra.mxu2 %v8797_v36 }
 0x6ea   :  { %3320 = vmatmul.bf16.gmra.mxu1 %v8804_v50  ;;  %3658 = vmatmul.bf16.gmra.mxu3 %v8804_v50  ;;  %v10827_v7 = vsel %vm3811_vm11, %v3617_v18, %v4323_v32  ;;  %v4330_v4 = vmul.f32 0.01, %v3282_v20  ;;  %vm3818_vm12 = vcmp.gt.f32.partialorder %v3282_v20, 0.0 }
 0x6eb   :  { %v3450_v27 = vpop.f32.mrf.mxu2 }
 0x6ec   :  { %v3451_v45 = vadd.f32 %v3450_v27, %v10762_v6  ;;  %v10833_v10 = vsel %vm3818_vm12, %v3282_v20, %v4330_v4 }
 0x6ed   :  { %v3619_v59 = vpop.f32.mrf.mxu3  ;;  %v3114_v52 = vpop.f32.mrf.mxu0 }
 0x6ee   :  { %v3115_v37 = vadd.f32 %v3114_v52, %v10749_v16  ;;  %v3620_v2 = vadd.f32 %v3619_v59, %v3451_v45 }
 0x6ef   :  { %v3283_v51 = vpop.f32.mrf.mxu1 }
 0x6f0   :  { %v3284_v36 = vadd.f32 %v3283_v51, %v3115_v37  ;;  %v4331_v59 = vmul.f32 0.01, %v3620_v2  ;;  %vm3819_vm14 = vcmp.gt.f32.partialorder %v3620_v2, 0.0 }
 0x6f2   :  { %vm3826_vm13 = vcmp.gt.f32.partialorder %v3284_v36, 0.0  ;;  %v4338_v50 = vmul.f32 0.01, %v3284_v36  ;;  %v10845_v4 = vsel %vm3819_vm14, %v3620_v2, %v4331_v59 }
 0x6f3   :  { %v3452_v24 = vpop.f32.mrf.mxu2 }
 0x6f4   :  { %v10835_v18 = vsel %vm3826_vm13, %v3284_v36, %v4338_v50  ;;  %v3453_v32 = vadd.f32 %v3452_v24, %v10762_v6 }
 0x6f5   :  { %v3621_v44 = vpop.f32.mrf.mxu3  ;;  %v3117_v27 = vpop.f32.mrf.mxu0 }
 0x6f6   :  { %v3118_v52 = vadd.f32 %v3117_v27, %v10749_v16  ;;  %v3622_v37 = vadd.f32 %v3621_v44, %v3453_v32 }
 0x6f7   :  { %v3286_v45 = vpop.f32.mrf.mxu1 }
 0x6f8   :  { %v3287_v51 = vadd.f32 %v3286_v45, %v3118_v52  ;;  %3156 = vmatmul.bf16.gmra.mxu0 %v8821_v58  ;;  %vm3827_vm15 = vcmp.gt.f32.partialorder %v3622_v37, 0.0  ;;  %v4339_v20 = vmul.f32 0.01, %v3622_v37  ;;  %3494 = vmatmul.bf16.gmra.mxu2 %v8821_v58 }
 0x6fa   :  { %3325 = vmatmul.bf16.gmra.mxu1 %v8828_v13  ;;  %3663 = vmatmul.bf16.gmra.mxu3 %v8828_v13  ;;  %v10847_v36 = vsel %vm3827_vm15, %v3622_v37, %v4339_v20  ;;  %v4346_v26 = vmul.f32 0.01, %v3287_v51  ;;  %vm3834_vm0 = vcmp.gt.f32.partialorder %v3287_v51, 0.0 }
 0x6fb   :  { %v3455_v50 = vpop.f32.mrf.mxu2 }
 0x6fc   :  { %v3456_v24 = vadd.f32 %v3455_v50, %v10762_v6  ;;  %v10853_v59 = vsel %vm3834_vm0, %v3287_v51, %v4346_v26 }
 0x6fd   :  { %v3624_v32 = vpop.f32.mrf.mxu3  ;;  %v3119_v27 = vpop.f32.mrf.mxu0 }
 0x6fe   :  { %v3120_v52 = vadd.f32 %v3119_v27, %v10749_v16  ;;  %v3625_v43 = vadd.f32 %v3624_v32, %v3456_v24 }
 0x6ff   :  { %v3288_v45 = vpop.f32.mrf.mxu1 }
 0x700   :  { %v3289_v58 = vadd.f32 %v3288_v45, %v3120_v52  ;;  %v4347_v32 = vmul.f32 0.01, %v3625_v43  ;;  %vm3835_vm2 = vcmp.gt.f32.partialorder %v3625_v43, 0.0 }
 0x702   :  { %vm3842_vm1 = vcmp.gt.f32.partialorder %v3289_v58, 0.0  ;;  %v4354_v13 = vmul.f32 0.01, %v3289_v58  ;;  %v10865_v51 = vsel %vm3835_vm2, %v3625_v43, %v4347_v32 }
 0x703   :  { %v3457_v2 = vpop.f32.mrf.mxu2 }
 0x704   :  { %v10855_v37 = vsel %vm3842_vm1, %v3289_v58, %v4354_v13  ;;  %v3458_v20 = vadd.f32 %v3457_v2, %v10762_v6 }
 0x705   :  { %v3626_v44 = vpop.f32.mrf.mxu3  ;;  %v3122_v50 = vpop.f32.mrf.mxu0 }
 0x706   :  { %v3123_v27 = vadd.f32 %v3122_v50, %v10749_v16  ;;  %v3627_v52 = vadd.f32 %v3626_v44, %v3458_v20 }
 0x707   :  { %v3291_v24 = vpop.f32.mrf.mxu1 }
 0x708   :  { %v3292_v45 = vadd.f32 %v3291_v24, %v3123_v27  ;;  %3161 = vmatmul.bf16.gmra.mxu0 %v8845_v19  ;;  %vm3843_vm3 = vcmp.gt.f32.partialorder %v3627_v52, 0.0  ;;  %v4355_v26 = vmul.f32 0.01, %v3627_v52  ;;  %3499 = vmatmul.bf16.gmra.mxu2 %v8845_v19 }
 0x70a   :  { %3330 = vmatmul.bf16.gmra.mxu1 %v8852_v49  ;;  %3668 = vmatmul.bf16.gmra.mxu3 %v8852_v49  ;;  %v10867_v58 = vsel %vm3843_vm3, %v3627_v52, %v4355_v26  ;;  %v4362_v14 = vmul.f32 0.01, %v3292_v45  ;;  %vm3850_vm4 = vcmp.gt.f32.partialorder %v3292_v45, 0.0 }
 0x70b   :  { %v3460_v13 = vpop.f32.mrf.mxu2 }
 0x70c   :  { %v3461_v2 = vadd.f32 %v3460_v13, %v10762_v6  ;;  %v10873_v32 = vsel %vm3850_vm4, %v3292_v45, %v4362_v14  ;;  %v8424_v45 = vld [vmem:[#allocation8 + $0x98] sm:$0xff] }
 0x70d   :  { %v3629_v20 = vpop.f32.mrf.mxu3  ;;  %v3124_v50 = vpop.f32.mrf.mxu0  ;;  %6414 = vmatpush.bf16.msra.mxu2 %v8424_v45 }
 0x70e   :  { %v3125_v27 = vadd.f32 %v3124_v50, %v10749_v16  ;;  %v3630_v11 = vadd.f32 %v3629_v20, %v3461_v2 }
 0x70f   :  { %v3293_v24 = vpop.f32.mrf.mxu1 }
 0x710   :  { %v3294_v19 = vadd.f32 %v3293_v24, %v3125_v27  ;;  %v4363_v20 = vmul.f32 0.01, %v3630_v11  ;;  %vm3851_vm6 = vcmp.gt.f32.partialorder %v3630_v11, 0.0 }
 0x712   :  { %vm3858_vm5 = vcmp.gt.f32.partialorder %v3294_v19, 0.0  ;;  %v4370_v49 = vmul.f32 0.01, %v3294_v19 }
 0x713   :  { %v3462_v43 = vpop.f32.mrf.mxu2 }
 0x714   :  { %v10875_v52 = vsel %vm3858_vm5, %v3294_v19, %v4370_v49  ;;  %v3463_v26 = vadd.f32 %v3462_v43, %v10762_v6  ;;  %v8408_v19 = vld [vmem:[#allocation8 + $0x18] sm:$0xff]  ;;  %v10885_v43 = vsel %vm3851_vm6, %v3630_v11, %v4363_v20 }
 0x715   :  { %v3631_v44 = vpop.f32.mrf.mxu3  ;;  %v3127_v13 = vpop.f32.mrf.mxu0  ;;  %v8432_v49 = vld [vmem:[#allocation8 + $0xd8] sm:$0xff]  ;;  %6076 = vmatpush.bf16.msra.mxu0 %v8408_v19 }
 0x716   :  { %v3128_v50 = vadd.f32 %v3127_v13, %v10749_v16  ;;  %v3632_v27 = vadd.f32 %v3631_v44, %v3463_v26  ;;  %6583 = vmatpush.bf16.msra.mxu3 %v8432_v49  ;;  %v8416_v20 = vld [vmem:[#allocation8 + $0x58] sm:$0xff] }
 0x717   :  { %v3296_v2 = vpop.f32.mrf.mxu1  ;;  %6245 = vmatpush.bf16.msra.mxu1 %v8416_v20 }
 0x718   :  { %v3297_v24 = vadd.f32 %v3296_v2, %v3128_v50  ;;  %3166 = vmatmul.bf16.gmra.mxu0 %v8869_v62  ;;  %vm3859_vm7 = vcmp.gt.f32.partialorder %v3632_v27, 0.0  ;;  %v4371_v14 = vmul.f32 0.01, %v3632_v27  ;;  %3504 = vmatmul.bf16.gmra.mxu2 %v8869_v62 }
 0x71a   :  { %3335 = vmatmul.bf16.gmra.mxu1 %v8876_v8  ;;  %3673 = vmatmul.bf16.gmra.mxu3 %v8876_v8  ;;  %v10887_v13 = vsel %vm3859_vm7, %v3632_v27, %v4371_v14  ;;  %v4378_v54 = vmul.f32 0.01, %v3297_v24  ;;  %vm3866_vm8 = vcmp.gt.f32.partialorder %v3297_v24, 0.0 }
 0x71b   :  { %v3465_v44 = vpop.f32.mrf.mxu2 }
 0x71c   :  { %v3466_v50 = vadd.f32 %v3465_v44, %v10762_v6  ;;  %v10893_v45 = vsel %vm3866_vm8, %v3297_v24, %v4378_v54 }
 0x71d   :  { %v3634_v2 = vpop.f32.mrf.mxu3  ;;  %v3129_v23 = vpop.f32.mrf.mxu0 }
 0x71e   :  { %v3130_v62 = vadd.f32 %v3129_v23, %v10749_v16  ;;  %v3635_v3 = vadd.f32 %v3634_v2, %v3466_v50 }
 0x71f   :  { %v3298_v8 = vpop.f32.mrf.mxu1 }
 0x720   :  { %v3299_v11 = vadd.f32 %v3298_v8, %v3130_v62  ;;  %v4379_v62 = vmul.f32 0.01, %v3635_v3  ;;  %vm3867_vm10 = vcmp.gt.f32.partialorder %v3635_v3, 0.0 }
 0x722   :  { %vm3874_vm9 = vcmp.gt.f32.partialorder %v3299_v11, 0.0  ;;  %v4386_v27 = vmul.f32 0.01, %v3299_v11  ;;  %v10905_v24 = vsel %vm3867_vm10, %v3635_v3, %v4379_v62 }
 0x723   :  { %v3467_v14 = vpop.f32.mrf.mxu2 }
 0x724   :  { %v10895_v19 = vsel %vm3874_vm9, %v3299_v11, %v4386_v27  ;;  %v3468_v44 = vadd.f32 %v3467_v14, %v10762_v6 }
 0x725   :  { %v3636_v26 = vpop.f32.mrf.mxu3  ;;  %v3132_v49 = vpop.f32.mrf.mxu0 }
 0x726   :  { %v3133_v50 = vadd.f32 %v3132_v49, %v10749_v16  ;;  %v3637_v8 = vadd.f32 %v3636_v26, %v3468_v44 }
 0x727   :  { %v3301_v2 = vpop.f32.mrf.mxu1 }
 0x728   :  { %v3302_v55 = vadd.f32 %v3301_v2, %v3133_v50  ;;  %3171 = vmatmul.bf16.gmra.mxu0 %v8893_v31  ;;  %vm3875_vm11 = vcmp.gt.f32.partialorder %v3637_v8, 0.0  ;;  %v4387_v54 = vmul.f32 0.01, %v3637_v8  ;;  %3509 = vmatmul.bf16.gmra.mxu2 %v8893_v31 }
 0x72a   :  { %3340 = vmatmul.bf16.gmra.mxu1 %v8900_v48  ;;  %3678 = vmatmul.bf16.gmra.mxu3 %v8900_v48  ;;  %v10907_v11 = vsel %vm3875_vm11, %v3637_v8, %v4387_v54  ;;  %v4394_v23 = vmul.f32 0.01, %v3302_v55  ;;  %vm3882_vm12 = vcmp.gt.f32.partialorder %v3302_v55, 0.0 }
 0x72b   :  { %v3470_v20 = vpop.f32.mrf.mxu2 }
 0x72c   :  { %v3471_v27 = vadd.f32 %v3470_v20, %v10762_v6  ;;  %v10913_v62 = vsel %vm3882_vm12, %v3302_v55, %v4394_v23 }
 0x72d   :  { %v3639_v14 = vpop.f32.mrf.mxu3  ;;  %v3134_v44 = vpop.f32.mrf.mxu0 }
 0x72e   :  { %v3135_v49 = vadd.f32 %v3134_v44, %v10749_v16  ;;  %v3640_v2 = vadd.f32 %v3639_v14, %v3471_v27 }
 0x72f   :  { %v3303_v50 = vpop.f32.mrf.mxu1 }
 0x730   :  { %v3304_v31 = vadd.f32 %v3303_v50, %v3135_v49  ;;  %v4395_v14 = vmul.f32 0.01, %v3640_v2  ;;  %vm3883_vm14 = vcmp.gt.f32.partialorder %v3640_v2, 0.0 }
 0x732   :  { %vm3890_vm13 = vcmp.gt.f32.partialorder %v3304_v31, 0.0  ;;  %v4402_v48 = vmul.f32 0.01, %v3304_v31  ;;  %v10925_v23 = vsel %vm3883_vm14, %v3640_v2, %v4395_v14 }
 0x733   :  { %v3472_v3 = vpop.f32.mrf.mxu2 }
 0x734   :  { %v10915_v8 = vsel %vm3890_vm13, %v3304_v31, %v4402_v48  ;;  %v3473_v54 = vadd.f32 %v3472_v3, %v10762_v6 }
 0x735   :  { %v3641_v26 = vpop.f32.mrf.mxu3  ;;  %v3137_v20 = vpop.f32.mrf.mxu0 }
 0x736   :  { %v3138_v44 = vadd.f32 %v3137_v20, %v10749_v16  ;;  %v3642_v49 = vadd.f32 %v3641_v26, %v3473_v54 }
 0x737   :  { %v3306_v27 = vpop.f32.mrf.mxu1 }
 0x738   :  { %v3307_v50 = vadd.f32 %v3306_v27, %v3138_v44  ;;  %3176 = vmatmul.bf16.gmra.mxu0 %v8917_v17  ;;  %vm3891_vm15 = vcmp.gt.f32.partialorder %v3642_v49, 0.0  ;;  %v4403_v55 = vmul.f32 0.01, %v3642_v49  ;;  %3514 = vmatmul.bf16.gmra.mxu2 %v8917_v17 }
 0x73a   :  { %3345 = vmatmul.bf16.gmra.mxu1 %v8924_v57  ;;  %3683 = vmatmul.bf16.gmra.mxu3 %v8924_v57  ;;  %v10927_v31 = vsel %vm3891_vm15, %v3642_v49, %v4403_v55  ;;  %v4410_v1 = vmul.f32 0.01, %v3307_v50  ;;  %vm3898_vm0 = vcmp.gt.f32.partialorder %v3307_v50, 0.0 }
 0x73b   :  { %v3475_v48 = vpop.f32.mrf.mxu2 }
 0x73c   :  { %v3476_v3 = vadd.f32 %v3475_v48, %v10762_v6  ;;  %v10933_v14 = vsel %vm3898_vm0, %v3307_v50, %v4410_v1 }
 0x73d   :  { %v3644_v54 = vpop.f32.mrf.mxu3  ;;  %v3139_v20 = vpop.f32.mrf.mxu0 }
 0x73e   :  { %v3140_v44 = vadd.f32 %v3139_v20, %v10749_v16  ;;  %v3645_v47 = vadd.f32 %v3644_v54, %v3476_v3 }
 0x73f   :  { %v3308_v27 = vpop.f32.mrf.mxu1 }
 0x740   :  { %v3309_v17 = vadd.f32 %v3308_v27, %v3140_v44  ;;  %v4411_v54 = vmul.f32 0.01, %v3645_v47  ;;  %vm3899_vm2 = vcmp.gt.f32.partialorder %v3645_v47, 0.0 }
 0x742   :  { %vm3906_vm1 = vcmp.gt.f32.partialorder %v3309_v17, 0.0  ;;  %v4418_v57 = vmul.f32 0.01, %v3309_v17  ;;  %v10945_v50 = vsel %vm3899_vm2, %v3645_v47, %v4411_v54 }
 0x743   :  { %v3477_v2 = vpop.f32.mrf.mxu2 }
 0x744   :  { %v10935_v49 = vsel %vm3906_vm1, %v3309_v17, %v4418_v57  ;;  %v3478_v55 = vadd.f32 %v3477_v2, %v10762_v6 }
 0x745   :  { %v3646_v26 = vpop.f32.mrf.mxu3  ;;  %v3142_v48 = vpop.f32.mrf.mxu0 }
 0x746   :  { %v3143_v20 = vadd.f32 %v3142_v48, %v10749_v16  ;;  %v3647_v44 = vadd.f32 %v3646_v26, %v3478_v55 }
 0x747   :  { %v3311_v3 = vpop.f32.mrf.mxu1 }
 0x748   :  { %v3312_v27 = vadd.f32 %v3311_v3, %v3143_v20  ;;  %3181 = vmatmul.bf16.gmra.mxu0 %v8941_v40  ;;  %vm3907_vm3 = vcmp.gt.f32.partialorder %v3647_v44, 0.0  ;;  %v4419_v1 = vmul.f32 0.01, %v3647_v44  ;;  %3519 = vmatmul.bf16.gmra.mxu2 %v8941_v40 }
 0x74a   :  { %3350 = vmatmul.bf16.gmra.mxu1 %v8948_v63  ;;  %3688 = vmatmul.bf16.gmra.mxu3 %v8948_v63  ;;  %v10947_v17 = vsel %vm3907_vm3, %v3647_v44, %v4419_v1  ;;  %v4426_v39 = vmul.f32 0.01, %v3312_v27  ;;  %vm3914_vm4 = vcmp.gt.f32.partialorder %v3312_v27, 0.0 }
 0x74b   :  { %v3480_v57 = vpop.f32.mrf.mxu2 }
 0x74c   :  { %v3481_v2 = vadd.f32 %v3480_v57, %v10762_v6  ;;  %v10953_v54 = vsel %vm3914_vm4, %v3312_v27, %v4426_v39  ;;  %v8423_v27 = vld [vmem:[#allocation8 + $0x90] sm:$0xff] }
 0x74d   :  { %v3649_v55 = vpop.f32.mrf.mxu3  ;;  %v3144_v48 = vpop.f32.mrf.mxu0  ;;  %13445 = vst [vmem:[#allocation418_spill] sm:$0xff] %v10953_v54  ;;  %6415 = vmatpush.bf16.msra.mxu2 %v8423_v27 }
 0x74e   :  { %v3145_v20 = vadd.f32 %v3144_v48, %v10749_v16  ;;  %v3650_v42 = vadd.f32 %v3649_v55, %v3481_v2 }
 0x74f   :  { %v3313_v3 = vpop.f32.mrf.mxu1 }
 0x750   :  { %v3314_v40 = vadd.f32 %v3313_v3, %v3145_v20  ;;  %v4427_v55 = vmul.f32 0.01, %v3650_v42  ;;  %vm3915_vm6 = vcmp.gt.f32.partialorder %v3650_v42, 0.0 }
 0x752   :  { %vm3922_vm5 = vcmp.gt.f32.partialorder %v3314_v40, 0.0  ;;  %v4434_v63 = vmul.f32 0.01, %v3314_v40 }
 0x753   :  { %v3482_v47 = vpop.f32.mrf.mxu2 }
 0x754   :  { %v10955_v44 = vsel %vm3922_vm5, %v3314_v40, %v4434_v63  ;;  %v3483_v1 = vadd.f32 %v3482_v47, %v10762_v6  ;;  %v8407_v40 = vld [vmem:[#allocation8 + $0x10] sm:$0xff]  ;;  %v10965_v47 = vsel %vm3915_vm6, %v3650_v42, %v4427_v55 }
 0x755   :  { %13446 = vst [vmem:[#allocation419_spill] sm:$0xff] %v10955_v44  ;;  %v3651_v26 = vpop.f32.mrf.mxu3  ;;  %v3147_v57 = vpop.f32.mrf.mxu0  ;;  %v8431_v63 = vld [vmem:[#allocation8 + $0xd0] sm:$0xff]  ;;  %6077 = vmatpush.bf16.msra.mxu0 %v8407_v40 }
 0x756   :  { %v3148_v48 = vadd.f32 %v3147_v57, %v10749_v16  ;;  %v3652_v20 = vadd.f32 %v3651_v26, %v3483_v1  ;;  %13447 = vst [vmem:[#allocation420_spill] sm:$0xff] %v10965_v47  ;;  %6584 = vmatpush.bf16.msra.mxu3 %v8431_v63  ;;  %v8415_v55 = vld [vmem:[#allocation8 + $0x50] sm:$0xff] }
 0x757   :  { %v3316_v2 = vpop.f32.mrf.mxu1  ;;  %6246 = vmatpush.bf16.msra.mxu1 %v8415_v55 }
 0x758   :  { %v3317_v3 = vadd.f32 %v3316_v2, %v3148_v48  ;;  %3186 = vmatmul.bf16.gmra.mxu0 %v8965_v34  ;;  %vm3923_vm7 = vcmp.gt.f32.partialorder %v3652_v20, 0.0  ;;  %v4435_v39 = vmul.f32 0.01, %v3652_v20  ;;  %3524 = vmatmul.bf16.gmra.mxu2 %v8965_v34 }
 0x75a   :  { %3355 = vmatmul.bf16.gmra.mxu1 %v8972_v9  ;;  %3693 = vmatmul.bf16.gmra.mxu3 %v8972_v9  ;;  %v10967_v57 = vsel %vm3923_vm7, %v3652_v20, %v4435_v39  ;;  %v4442_v44 = vmul.f32 0.01, %v3317_v3  ;;  %vm3930_vm8 = vcmp.gt.f32.partialorder %v3317_v3, 0.0 }
 0x75b   :  { %v3485_v26 = vpop.f32.mrf.mxu2 }
 0x75c   :  { %v3486_v48 = vadd.f32 %v3485_v26, %v10762_v6  ;;  %v10973_v27 = vsel %vm3930_vm8, %v3317_v3, %v4442_v44  ;;  %v13450_v3 = vld [vmem:[#allocation59_spill] sm:$0xff] }
 0x75d   :  { %v3654_v2 = vpop.f32.mrf.mxu3  ;;  %v3149_v60 = vpop.f32.mrf.mxu0  ;;  %13448 = vst [vmem:[#allocation421_spill] sm:$0xff] %v10973_v27 }
 0x75e   :  { %v3150_v34 = vadd.f32 %v3149_v60, %v10749_v16  ;;  %v3655_v54 = vadd.f32 %v3654_v2, %v3486_v48 }
 0x75f   :  { %v3318_v9 = vpop.f32.mrf.mxu1 }
 0x760   :  { %v3319_v42 = vadd.f32 %v3318_v9, %v3150_v34  ;;  %v4443_v34 = vmul.f32 0.01, %v3655_v54  ;;  %vm3931_vm10 = vcmp.gt.f32.partialorder %v3655_v54, 0.0 }
 0x762   :  { %vm3938_vm9 = vcmp.gt.f32.partialorder %v3319_v42, 0.0  ;;  %v4450_v20 = vmul.f32 0.01, %v3319_v42 }
 0x763   :  { %v3487_v39 = vpop.f32.mrf.mxu2 }
 0x764   :  { %v10975_v40 = vsel %vm3938_vm9, %v3319_v42, %v4450_v20  ;;  %v3488_v26 = vadd.f32 %v3487_v39, %v10762_v6  ;;  %v10985_v42 = vsel %vm3931_vm10, %v3655_v54, %v4443_v34 }
 0x765   :  { %13449 = vst [vmem:[#allocation422_spill] sm:$0xff] %v10975_v40  ;;  %v3656_v1 = vpop.f32.mrf.mxu3  ;;  %v3152_v63 = vpop.f32.mrf.mxu0 }
 0x766   :  { %v3153_v48 = vadd.f32 %v3152_v63, %v10749_v16  ;;  %v3657_v9 = vadd.f32 %v3656_v1, %v3488_v26  ;;  %13451 = vst [vmem:[#allocation59_spill] sm:$0xff] %v10985_v42 }
 0x767   :  { %v3321_v2 = vpop.f32.mrf.mxu1 }
 0x768   :  { %v3322_v47 = vadd.f32 %v3321_v2, %v3153_v48  ;;  %3191 = vmatmul.bf16.gmra.mxu0 %v8989_v35  ;;  %vm3939_vm11 = vcmp.gt.f32.partialorder %v3657_v9, 0.0  ;;  %v4451_v44 = vmul.f32 0.01, %v3657_v9  ;;  %3529 = vmatmul.bf16.gmra.mxu2 %v8989_v35 }
 0x76a   :  { %3360 = vmatmul.bf16.gmra.mxu1 %v13450_v3  ;;  %3698 = vmatmul.bf16.gmra.mxu3 %v13450_v3  ;;  %v10987_v55 = vsel %vm3939_vm11, %v3657_v9, %v4451_v44  ;;  %v4458_v27 = vmul.f32 0.01, %v3322_v47  ;;  %vm3946_vm12 = vcmp.gt.f32.partialorder %v3322_v47, 0.0 }
 0x76b   :  { %13452 = vst [vmem:[#allocation423_spill] sm:$0xff] %v10987_v55  ;;  %v3490_v20 = vpop.f32.mrf.mxu2  ;;  %v13455_v55 = vld [vmem:[#allocation62_spill] sm:$0xff] }
 0x76c   :  { %v3491_v39 = vadd.f32 %v3490_v20, %v10762_v6  ;;  %v10993_v9 = vsel %vm3946_vm12, %v3322_v47, %v4458_v27  ;;  %v13456_v27 = vld [vmem:[#allocation65_spill] sm:$0xff] }
 0x76d   :  { %v3659_v26 = vpop.f32.mrf.mxu3  ;;  %v3154_v63 = vpop.f32.mrf.mxu0  ;;  %13453 = vst [vmem:[#allocation424_spill] sm:$0xff] %v10993_v9 }
 0x76e   :  { %v3155_v48 = vadd.f32 %v3154_v63, %v10749_v16  ;;  %v3660_v60 = vadd.f32 %v3659_v26, %v3491_v39 }
 0x76f   :  { %v3323_v2 = vpop.f32.mrf.mxu1 }
 0x770   :  { %v3324_v35 = vadd.f32 %v3323_v2, %v3155_v48  ;;  %v4459_v26 = vmul.f32 0.01, %v3660_v60  ;;  %vm3947_vm14 = vcmp.gt.f32.partialorder %v3660_v60, 0.0 }
 0x772   :  { %vm3954_vm13 = vcmp.gt.f32.partialorder %v3324_v35, 0.0  ;;  %v4466_v54 = vmul.f32 0.01, %v3324_v35 }
 0x773   :  { %v3492_v34 = vpop.f32.mrf.mxu2 }
 0x774   :  { %v10995_v44 = vsel %vm3954_vm13, %v3324_v35, %v4466_v54  ;;  %v3493_v3 = vadd.f32 %v3492_v34, %v10762_v6  ;;  %v11005_v35 = vsel %vm3947_vm14, %v3660_v60, %v4459_v26 }
 0x775   :  { %13454 = vst [vmem:[#allocation425_spill] sm:$0xff] %v10995_v44  ;;  %v3661_v1 = vpop.f32.mrf.mxu3  ;;  %v3157_v20 = vpop.f32.mrf.mxu0 }
 0x776   :  { %v3158_v63 = vadd.f32 %v3157_v20, %v10749_v16  ;;  %v3662_v48 = vadd.f32 %v3661_v1, %v3493_v3  ;;  %13457 = vst [vmem:[#allocation62_spill] sm:$0xff] %v11005_v35 }
 0x777   :  { %v3326_v39 = vpop.f32.mrf.mxu1 }
 0x778   :  { %v3327_v2 = vadd.f32 %v3326_v39, %v3158_v63  ;;  %3196 = vmatmul.bf16.gmra.mxu0 %v13455_v55  ;;  %vm3955_vm15 = vcmp.gt.f32.partialorder %v3662_v48, 0.0  ;;  %v4467_v47 = vmul.f32 0.01, %v3662_v48  ;;  %3534 = vmatmul.bf16.gmra.mxu2 %v13455_v55 }
 0x77a   :  { %3365 = vmatmul.bf16.gmra.mxu1 %v13456_v27  ;;  %3703 = vmatmul.bf16.gmra.mxu3 %v13456_v27  ;;  %v11007_v54 = vsel %vm3955_vm15, %v3662_v48, %v4467_v47  ;;  %v4474_v44 = vmul.f32 0.01, %v3327_v2  ;;  %vm3962_vm0 = vcmp.gt.f32.partialorder %v3327_v2, 0.0 }
 0x77b   :  { %13458 = vst [vmem:[#allocation65_spill] sm:$0xff] %v11007_v54  ;;  %v3495_v34 = vpop.f32.mrf.mxu2  ;;  %v13461_v54 = vld [vmem:[#allocation68_spill] sm:$0xff] }
 0x77c   :  { %v3496_v3 = vadd.f32 %v3495_v34, %v10762_v6  ;;  %v11013_v48 = vsel %vm3962_vm0, %v3327_v2, %v4474_v44  ;;  %v13462_v2 = vld [vmem:[#allocation71_spill] sm:$0xff] }
 0x77d   :  { %v3664_v20 = vpop.f32.mrf.mxu3  ;;  %v3159_v63 = vpop.f32.mrf.mxu0  ;;  %13459 = vst [vmem:[#allocation426_spill] sm:$0xff] %v11013_v48 }
 0x77e   :  { %v3160_v39 = vadd.f32 %v3159_v63, %v10749_v16  ;;  %v3665_v9 = vadd.f32 %v3664_v20, %v3496_v3 }
 0x77f   :  { %v3328_v42 = vpop.f32.mrf.mxu1 }
 0x780   :  { %v3329_v55 = vadd.f32 %v3328_v42, %v3160_v39  ;;  %v4475_v20 = vmul.f32 0.01, %v3665_v9  ;;  %vm3963_vm2 = vcmp.gt.f32.partialorder %v3665_v9, 0.0 }
 0x782   :  { %vm3970_vm1 = vcmp.gt.f32.partialorder %v3329_v55, 0.0  ;;  %v4482_v60 = vmul.f32 0.01, %v3329_v55 }
 0x783   :  { %v3497_v26 = vpop.f32.mrf.mxu2 }
 0x784   :  { %v11015_v47 = vsel %vm3970_vm1, %v3329_v55, %v4482_v60  ;;  %v3498_v27 = vadd.f32 %v3497_v26, %v10762_v6  ;;  %v11025_v55 = vsel %vm3963_vm2, %v3665_v9, %v4475_v20 }
 0x785   :  { %13460 = vst [vmem:[#allocation427_spill] sm:$0xff] %v11015_v47  ;;  %v3666_v1 = vpop.f32.mrf.mxu3  ;;  %v3162_v34 = vpop.f32.mrf.mxu0 }
 0x786   :  { %v3163_v63 = vadd.f32 %v3162_v34, %v10749_v16  ;;  %v3667_v42 = vadd.f32 %v3666_v1, %v3498_v27  ;;  %13463 = vst [vmem:[#allocation68_spill] sm:$0xff] %v11025_v55 }
 0x787   :  { %v3331_v3 = vpop.f32.mrf.mxu1 }
 0x788   :  { %v3332_v39 = vadd.f32 %v3331_v3, %v3163_v63  ;;  %3201 = vmatmul.bf16.gmra.mxu0 %v13461_v54  ;;  %vm3971_vm3 = vcmp.gt.f32.partialorder %v3667_v42, 0.0  ;;  %v4483_v44 = vmul.f32 0.01, %v3667_v42  ;;  %3539 = vmatmul.bf16.gmra.mxu2 %v13461_v54 }
 0x78a   :  { %3370 = vmatmul.bf16.gmra.mxu1 %v13462_v2  ;;  %3708 = vmatmul.bf16.gmra.mxu3 %v13462_v2  ;;  %v11027_v60 = vsel %vm3971_vm3, %v3667_v42, %v4483_v44  ;;  %v4490_v47 = vmul.f32 0.01, %v3332_v39  ;;  %vm3978_vm4 = vcmp.gt.f32.partialorder %v3332_v39, 0.0 }
 0x78b   :  { %13464 = vst [vmem:[#allocation71_spill] sm:$0xff] %v11027_v60  ;;  %v3500_v26 = vpop.f32.mrf.mxu2  ;;  %v13467_v60 = vld [vmem:[#allocation74_spill] sm:$0xff] }
 0x78c   :  { %v3501_v27 = vadd.f32 %v3500_v26, %v10762_v6  ;;  %v11033_v42 = vsel %vm3978_vm4, %v3332_v39, %v4490_v47  ;;  %v13468_v39 = vld [vmem:[#allocation77_spill] sm:$0xff] }
 0x78d   :  { %v3669_v34 = vpop.f32.mrf.mxu3  ;;  %v3164_v63 = vpop.f32.mrf.mxu0  ;;  %13465 = vst [vmem:[#allocation428_spill] sm:$0xff] %v11033_v42 }
 0x78e   :  { %v3165_v3 = vadd.f32 %v3164_v63, %v10749_v16  ;;  %v3670_v48 = vadd.f32 %v3669_v34, %v3501_v27 }
 0x78f   :  { %v3333_v35 = vpop.f32.mrf.mxu1 }
 0x790   :  { %v3334_v54 = vadd.f32 %v3333_v35, %v3165_v3  ;;  %v4491_v34 = vmul.f32 0.01, %v3670_v48  ;;  %vm3979_vm6 = vcmp.gt.f32.partialorder %v3670_v48, 0.0 }
 0x792   :  { %vm3986_vm5 = vcmp.gt.f32.partialorder %v3334_v54, 0.0  ;;  %v4498_v9 = vmul.f32 0.01, %v3334_v54  ;;  %v11045_v55 = vsel %vm3979_vm6, %v3670_v48, %v4491_v34  ;;  %v8414_v34 = vld [vmem:[#allocation8 + $0x48] sm:$0xff] }
 0x793   :  { %v3502_v20 = vpop.f32.mrf.mxu2  ;;  %13469 = vst [vmem:[#allocation74_spill] sm:$0xff] %v11045_v55  ;;  %6247 = vmatpush.bf16.msra.mxu1 %v8414_v34  ;;  %v13473_v34 = vld [vmem:[#allocation80_spill] sm:$0xff] }
 0x794   :  { %v11035_v44 = vsel %vm3986_vm5, %v3334_v54, %v4498_v9  ;;  %v3503_v2 = vadd.f32 %v3502_v20, %v10762_v6  ;;  %v8422_v54 = vld [vmem:[#allocation8 + $0x88] sm:$0xff] }
 0x795   :  { %13466 = vst [vmem:[#allocation429_spill] sm:$0xff] %v11035_v44  ;;  %v3671_v1 = vpop.f32.mrf.mxu3  ;;  %v3167_v26 = vpop.f32.mrf.mxu0  ;;  %v8406_v9 = vld [vmem:[#allocation8 + $0x8] sm:$0xff]  ;;  %6416 = vmatpush.bf16.msra.mxu2 %v8422_v54 }
 0x796   :  { %v3168_v63 = vadd.f32 %v3167_v26, %v10749_v16  ;;  %v3672_v35 = vadd.f32 %v3671_v1, %v3503_v2  ;;  %v8430_v20 = vld [vmem:[#allocation8 + $0xc8] sm:$0xff]  ;;  %6078 = vmatpush.bf16.msra.mxu0 %v8406_v9 }
 0x797   :  { %v3336_v27 = vpop.f32.mrf.mxu1  ;;  %6585 = vmatpush.bf16.msra.mxu3 %v8430_v20 }
 0x798   :  { %v3337_v3 = vadd.f32 %v3336_v27, %v3168_v63  ;;  %3206 = vmatmul.bf16.gmra.mxu0 %v13467_v60  ;;  %vm3987_vm7 = vcmp.gt.f32.partialorder %v3672_v35, 0.0  ;;  %v4499_v47 = vmul.f32 0.01, %v3672_v35  ;;  %3544 = vmatmul.bf16.gmra.mxu2 %v13467_v60 }
 0x79a   :  { %3375 = vmatmul.bf16.gmra.mxu1 %v13468_v39  ;;  %3713 = vmatmul.bf16.gmra.mxu3 %v13468_v39  ;;  %v11047_v26 = vsel %vm3987_vm7, %v3672_v35, %v4499_v47  ;;  %v4506_v40 = vmul.f32 0.01, %v3337_v3  ;;  %vm3994_vm8 = vcmp.gt.f32.partialorder %v3337_v3, 0.0 }
 0x79b   :  { %13470 = vst [vmem:[#allocation77_spill] sm:$0xff] %v11047_v26  ;;  %v3505_v1 = vpop.f32.mrf.mxu2 }
 0x79c   :  { %v3506_v63 = vadd.f32 %v3505_v1, %v10762_v6  ;;  %v11053_v54 = vsel %vm3994_vm8, %v3337_v3, %v4506_v40  ;;  %v13474_v3 = vld [vmem:[#allocation83_spill] sm:$0xff] }
 0x79d   :  { %v3674_v27 = vpop.f32.mrf.mxu3  ;;  %v3169_v42 = vpop.f32.mrf.mxu0  ;;  %13471 = vst [vmem:[#allocation430_spill] sm:$0xff] %v11053_v54 }
 0x79e   :  { %v3170_v60 = vadd.f32 %v3169_v42, %v10749_v16  ;;  %v3675_v44 = vadd.f32 %v3674_v27, %v3506_v63 }
 0x79f   :  { %v3338_v39 = vpop.f32.mrf.mxu1 }
 0x7a0   :  { %v3339_v48 = vadd.f32 %v3338_v39, %v3170_v60  ;;  %v4507_v60 = vmul.f32 0.01, %v3675_v44  ;;  %vm3995_vm10 = vcmp.gt.f32.partialorder %v3675_v44, 0.0 }
 0x7a2   :  { %vm4002_vm9 = vcmp.gt.f32.partialorder %v3339_v48, 0.0  ;;  %v4514_v35 = vmul.f32 0.01, %v3339_v48 }
 0x7a3   :  { %v3507_v47 = vpop.f32.mrf.mxu2 }
 0x7a4   :  { %v11055_v9 = vsel %vm4002_vm9, %v3339_v48, %v4514_v35  ;;  %v3508_v1 = vadd.f32 %v3507_v47, %v10762_v6  ;;  %v11065_v48 = vsel %vm3995_vm10, %v3675_v44, %v4507_v60 }
 0x7a5   :  { %13472 = vst [vmem:[#allocation431_spill] sm:$0xff] %v11055_v9  ;;  %v3676_v2 = vpop.f32.mrf.mxu3  ;;  %v3172_v20 = vpop.f32.mrf.mxu0 }
 0x7a6   :  { %v3173_v63 = vadd.f32 %v3172_v20, %v10749_v16  ;;  %v3677_v39 = vadd.f32 %v3676_v2, %v3508_v1  ;;  %13475 = vst [vmem:[#allocation80_spill] sm:$0xff] %v11065_v48 }
 0x7a7   :  { %v3341_v27 = vpop.f32.mrf.mxu1 }
 0x7a8   :  { %v3342_v55 = vadd.f32 %v3341_v27, %v3173_v63  ;;  %3211 = vmatmul.bf16.gmra.mxu0 %v13473_v34  ;;  %vm4003_vm11 = vcmp.gt.f32.partialorder %v3677_v39, 0.0  ;;  %v4515_v40 = vmul.f32 0.01, %v3677_v39  ;;  %3549 = vmatmul.bf16.gmra.mxu2 %v13473_v34 }
 0x7aa   :  { %3380 = vmatmul.bf16.gmra.mxu1 %v13474_v3  ;;  %3718 = vmatmul.bf16.gmra.mxu3 %v13474_v3  ;;  %v11067_v35 = vsel %vm4003_vm11, %v3677_v39, %v4515_v40  ;;  %v4522_v9 = vmul.f32 0.01, %v3342_v55  ;;  %vm4010_vm12 = vcmp.gt.f32.partialorder %v3342_v55, 0.0 }
 0x7ab   :  { %13476 = vst [vmem:[#allocation83_spill] sm:$0xff] %v11067_v35  ;;  %v3510_v47 = vpop.f32.mrf.mxu2  ;;  %v13479_v35 = vld [vmem:[#allocation86_spill] sm:$0xff] }
 0x7ac   :  { %v3511_v1 = vadd.f32 %v3510_v47, %v10762_v6  ;;  %v11073_v39 = vsel %vm4010_vm12, %v3342_v55, %v4522_v9  ;;  %v13480_v9 = vld [vmem:[#allocation89_spill] sm:$0xff] }
 0x7ad   :  { %v3679_v20 = vpop.f32.mrf.mxu3  ;;  %v3174_v63 = vpop.f32.mrf.mxu0  ;;  %13477 = vst [vmem:[#allocation432_spill] sm:$0xff] %v11073_v39 }
 0x7ae   :  { %v3175_v27 = vadd.f32 %v3174_v63, %v10749_v16  ;;  %v3680_v54 = vadd.f32 %v3679_v20, %v3511_v1 }
 0x7af   :  { %v3343_v42 = vpop.f32.mrf.mxu1 }
 0x7b0   :  { %v3344_v34 = vadd.f32 %v3343_v42, %v3175_v27  ;;  %v4523_v20 = vmul.f32 0.01, %v3680_v54  ;;  %vm4011_vm14 = vcmp.gt.f32.partialorder %v3680_v54, 0.0 }
 0x7b2   :  { %vm4018_vm13 = vcmp.gt.f32.partialorder %v3344_v34, 0.0  ;;  %v4530_v44 = vmul.f32 0.01, %v3344_v34 }
 0x7b3   :  { %v3512_v60 = vpop.f32.mrf.mxu2 }
 0x7b4   :  { %v11075_v40 = vsel %vm4018_vm13, %v3344_v34, %v4530_v44  ;;  %v3513_v3 = vadd.f32 %v3512_v60, %v10762_v6  ;;  %v11085_v34 = vsel %vm4011_vm14, %v3680_v54, %v4523_v20 }
 0x7b5   :  { %13478 = vst [vmem:[#allocation433_spill] sm:$0xff] %v11075_v40  ;;  %v3681_v2 = vpop.f32.mrf.mxu3  ;;  %v3177_v47 = vpop.f32.mrf.mxu0 }
 0x7b6   :  { %v3178_v63 = vadd.f32 %v3177_v47, %v10749_v16  ;;  %v3682_v42 = vadd.f32 %v3681_v2, %v3513_v3  ;;  %13481 = vst [vmem:[#allocation86_spill] sm:$0xff] %v11085_v34 }
 0x7b7   :  { %v3346_v1 = vpop.f32.mrf.mxu1 }
 0x7b8   :  { %v3347_v27 = vadd.f32 %v3346_v1, %v3178_v63  ;;  %3216 = vmatmul.bf16.gmra.mxu0 %v13479_v35  ;;  %vm4019_vm15 = vcmp.gt.f32.partialorder %v3682_v42, 0.0  ;;  %v4531_v55 = vmul.f32 0.01, %v3682_v42  ;;  %3554 = vmatmul.bf16.gmra.mxu2 %v13479_v35 }
 0x7ba   :  { %3385 = vmatmul.bf16.gmra.mxu1 %v13480_v9  ;;  %3723 = vmatmul.bf16.gmra.mxu3 %v13480_v9  ;;  %v11087_v44 = vsel %vm4019_vm15, %v3682_v42, %v4531_v55  ;;  %v4538_v40 = vmul.f32 0.01, %v3347_v27  ;;  %vm4026_vm0 = vcmp.gt.f32.partialorder %v3347_v27, 0.0 }
 0x7bb   :  { %13482 = vst [vmem:[#allocation89_spill] sm:$0xff] %v11087_v44  ;;  %v3515_v60 = vpop.f32.mrf.mxu2  ;;  %v13485_v44 = vld [vmem:[#allocation92_spill] sm:$0xff] }
 0x7bc   :  { %v3516_v3 = vadd.f32 %v3515_v60, %v10762_v6  ;;  %v11093_v42 = vsel %vm4026_vm0, %v3347_v27, %v4538_v40  ;;  %v13486_v27 = vld [vmem:[#allocation95_spill] sm:$0xff] }
 0x7bd   :  { %v3684_v47 = vpop.f32.mrf.mxu3  ;;  %v3179_v63 = vpop.f32.mrf.mxu0  ;;  %13483 = vst [vmem:[#allocation434_spill] sm:$0xff] %v11093_v42 }
 0x7be   :  { %v3180_v1 = vadd.f32 %v3179_v63, %v10749_v16  ;;  %v3685_v39 = vadd.f32 %v3684_v47, %v3516_v3 }
 0x7bf   :  { %v3348_v48 = vpop.f32.mrf.mxu1 }
 0x7c0   :  { %v3349_v35 = vadd.f32 %v3348_v48, %v3180_v1  ;;  %v4539_v47 = vmul.f32 0.01, %v3685_v39  ;;  %vm4027_vm2 = vcmp.gt.f32.partialorder %v3685_v39, 0.0 }
 0x7c2   :  { %vm4034_vm1 = vcmp.gt.f32.partialorder %v3349_v35, 0.0  ;;  %v4546_v54 = vmul.f32 0.01, %v3349_v35 }
 0x7c3   :  { %v3517_v20 = vpop.f32.mrf.mxu2 }
 0x7c4   :  { %v11095_v55 = vsel %vm4034_vm1, %v3349_v35, %v4546_v54  ;;  %v3518_v9 = vadd.f32 %v3517_v20, %v10762_v6  ;;  %v11105_v35 = vsel %vm4027_vm2, %v3685_v39, %v4539_v47 }
 0x7c5   :  { %13484 = vst [vmem:[#allocation435_spill] sm:$0xff] %v11095_v55  ;;  %v3686_v2 = vpop.f32.mrf.mxu3  ;;  %v3182_v60 = vpop.f32.mrf.mxu0 }
 0x7c6   :  { %v3183_v63 = vadd.f32 %v3182_v60, %v10749_v16  ;;  %v3687_v48 = vadd.f32 %v3686_v2, %v3518_v9  ;;  %13487 = vst [vmem:[#allocation92_spill] sm:$0xff] %v11105_v35 }
 0x7c7   :  { %v3351_v3 = vpop.f32.mrf.mxu1 }
 0x7c8   :  { %v3352_v1 = vadd.f32 %v3351_v3, %v3183_v63  ;;  %3221 = vmatmul.bf16.gmra.mxu0 %v13485_v44  ;;  %vm4035_vm3 = vcmp.gt.f32.partialorder %v3687_v48, 0.0  ;;  %v4547_v40 = vmul.f32 0.01, %v3687_v48  ;;  %3559 = vmatmul.bf16.gmra.mxu2 %v13485_v44 }
 0x7ca   :  { %3390 = vmatmul.bf16.gmra.mxu1 %v13486_v27  ;;  %3728 = vmatmul.bf16.gmra.mxu3 %v13486_v27  ;;  %v11107_v54 = vsel %vm4035_vm3, %v3687_v48, %v4547_v40  ;;  %v4554_v55 = vmul.f32 0.01, %v3352_v1  ;;  %vm4042_vm4 = vcmp.gt.f32.partialorder %v3352_v1, 0.0 }
 0x7cb   :  { %13488 = vst [vmem:[#allocation95_spill] sm:$0xff] %v11107_v54  ;;  %v3520_v20 = vpop.f32.mrf.mxu2  ;;  %v13491_v54 = vld [vmem:[#allocation98_spill] sm:$0xff] }
 0x7cc   :  { %v3521_v9 = vadd.f32 %v3520_v20, %v10762_v6  ;;  %v11113_v48 = vsel %vm4042_vm4, %v3352_v1, %v4554_v55  ;;  %v13492_v1 = vld [vmem:[#allocation101_spill] sm:$0xff] }
 0x7cd   :  { %v3689_v60 = vpop.f32.mrf.mxu3  ;;  %v3184_v63 = vpop.f32.mrf.mxu0  ;;  %13489 = vst [vmem:[#allocation436_spill] sm:$0xff] %v11113_v48 }
 0x7ce   :  { %v3185_v3 = vadd.f32 %v3184_v63, %v10749_v16  ;;  %v3690_v42 = vadd.f32 %v3689_v60, %v3521_v9 }
 0x7cf   :  { %v3353_v34 = vpop.f32.mrf.mxu1 }
 0x7d0   :  { %v3354_v44 = vadd.f32 %v3353_v34, %v3185_v3  ;;  %v4555_v60 = vmul.f32 0.01, %v3690_v42  ;;  %vm4043_vm6 = vcmp.gt.f32.partialorder %v3690_v42, 0.0 }
 0x7d2   :  { %vm4050_vm5 = vcmp.gt.f32.partialorder %v3354_v44, 0.0  ;;  %v4562_v39 = vmul.f32 0.01, %v3354_v44  ;;  %v11125_v35 = vsel %vm4043_vm6, %v3690_v42, %v4555_v60  ;;  %v8413_v60 = vld [vmem:[#allocation8 + $0x40] sm:$0xff] }
 0x7d3   :  { %v3522_v47 = vpop.f32.mrf.mxu2  ;;  %13493 = vst [vmem:[#allocation98_spill] sm:$0xff] %v11125_v35  ;;  %6248 = vmatpush.bf16.msra.mxu1 %v8413_v60 }
 0x7d4   :  { %v11115_v40 = vsel %vm4050_vm5, %v3354_v44, %v4562_v39  ;;  %v3523_v27 = vadd.f32 %v3522_v47, %v10762_v6  ;;  %v8421_v44 = vld [vmem:[#allocation8 + $0x80] sm:$0xff] }
 0x7d5   :  { %13490 = vst [vmem:[#allocation437_spill] sm:$0xff] %v11115_v40  ;;  %v3691_v2 = vpop.f32.mrf.mxu3  ;;  %v3187_v20 = vpop.f32.mrf.mxu0  ;;  %v8405_v39 = vld [vmem:[#allocation8] sm:$0xff]  ;;  %6417 = vmatpush.bf16.msra.mxu2 %v8421_v44 }
 0x7d6   :  { %v3188_v63 = vadd.f32 %v3187_v20, %v10749_v16  ;;  %v3692_v34 = vadd.f32 %v3691_v2, %v3523_v27  ;;  %v8429_v47 = vld [vmem:[#allocation8 + $0xc0] sm:$0xff]  ;;  %6079 = vmatpush.bf16.msra.mxu0 %v8405_v39 }
 0x7d7   :  { %v3356_v9 = vpop.f32.mrf.mxu1  ;;  %6586 = vmatpush.bf16.msra.mxu3 %v8429_v47 }
 0x7d8   :  { %v3357_v3 = vadd.f32 %v3356_v9, %v3188_v63  ;;  %3226 = vmatmul.bf16.gmra.mxu0 %v13491_v54  ;;  %vm4051_vm7 = vcmp.gt.f32.partialorder %v3692_v34, 0.0  ;;  %v4563_v55 = vmul.f32 0.01, %v3692_v34  ;;  %3564 = vmatmul.bf16.gmra.mxu2 %v13491_v54 }
 0x7da   :  { %3395 = vmatmul.bf16.gmra.mxu1 %v13492_v1  ;;  %3733 = vmatmul.bf16.gmra.mxu3 %v13492_v1  ;;  %v11127_v20 = vsel %vm4051_vm7, %v3692_v34, %v4563_v55  ;;  %v4570_v26 = vmul.f32 0.01, %v3357_v3  ;;  %vm4058_vm8 = vcmp.gt.f32.partialorder %v3357_v3, 0.0 }
 0x7db   :  { %13494 = vst [vmem:[#allocation101_spill] sm:$0xff] %v11127_v20  ;;  %v3525_v2 = vpop.f32.mrf.mxu2 }
 0x7dc   :  { %v3526_v63 = vadd.f32 %v3525_v2, %v10762_v6  ;;  %v11133_v44 = vsel %vm4058_vm8, %v3357_v3, %v4570_v26 }
 0x7dd   :  { %v3694_v9 = vpop.f32.mrf.mxu3  ;;  %v3189_v48 = vpop.f32.mrf.mxu0  ;;  %13495 = vst [vmem:[#allocation438_spill] sm:$0xff] %v11133_v44 }
 0x7de   :  { %v3190_v54 = vadd.f32 %v3189_v48, %v10749_v16  ;;  %v3695_v40 = vadd.f32 %v3694_v9, %v3526_v63 }
 0x7df   :  { %v3358_v1 = vpop.f32.mrf.mxu1 }
 0x7e0   :  { %v3359_v42 = vadd.f32 %v3358_v1, %v3190_v54  ;;  %v4571_v54 = vmul.f32 0.01, %v3695_v40  ;;  %vm4059_vm10 = vcmp.gt.f32.partialorder %v3695_v40, 0.0 }
 0x7e2   :  { %vm4066_vm9 = vcmp.gt.f32.partialorder %v3359_v42, 0.0  ;;  %v4578_v34 = vmul.f32 0.01, %v3359_v42  ;;  %v11145_v3 = vsel %vm4059_vm10, %v3695_v40, %v4571_v54 }
 0x7e3   :  { %v3527_v55 = vpop.f32.mrf.mxu2  ;;  %13497 = vst [vmem:[#allocation440_spill] sm:$0xff] %v11145_v3 }
 0x7e4   :  { %v11135_v39 = vsel %vm4066_vm9, %v3359_v42, %v4578_v34  ;;  %v3528_v2 = vadd.f32 %v3527_v55, %v10762_v6 }
 0x7e5   :  { %13496 = vst [vmem:[#allocation439_spill] sm:$0xff] %v11135_v39  ;;  %v3696_v27 = vpop.f32.mrf.mxu3  ;;  %v3192_v47 = vpop.f32.mrf.mxu0 }
 0x7e6   :  { %v3193_v63 = vadd.f32 %v3192_v47, %v10749_v16  ;;  %v3697_v1 = vadd.f32 %v3696_v27, %v3528_v2 }
 0x7e7   :  { %v3361_v9 = vpop.f32.mrf.mxu1 }
 0x7e8   :  { %v3362_v35 = vadd.f32 %v3361_v9, %v3193_v63  ;;  %3231 = vmatmul.bf16.gmra.mxu0 %v13381_v38  ;;  %vm4067_vm11 = vcmp.gt.f32.partialorder %v3697_v1, 0.0  ;;  %v4579_v26 = vmul.f32 0.01, %v3697_v1  ;;  %3569 = vmatmul.bf16.gmra.mxu2 %v13381_v38 }
 0x7ea   :  { %3400 = vmatmul.bf16.gmra.mxu1 %v13382_v22  ;;  %3738 = vmatmul.bf16.gmra.mxu3 %v13382_v22  ;;  %v11147_v42 = vsel %vm4067_vm11, %v3697_v1, %v4579_v26  ;;  %v4586_v48 = vmul.f32 0.01, %v3362_v35  ;;  %vm4074_vm12 = vcmp.gt.f32.partialorder %v3362_v35, 0.0 }
 0x7eb   :  { %13498 = vst [vmem:[#allocation441_spill] sm:$0xff] %v11147_v42  ;;  %v3530_v60 = vpop.f32.mrf.mxu2 }
 0x7ec   :  { %v3531_v34 = vadd.f32 %v3530_v60, %v10762_v6  ;;  %v11153_v54 = vsel %vm4074_vm12, %v3362_v35, %v4586_v48 }
 0x7ed   :  { %v3699_v55 = vpop.f32.mrf.mxu3  ;;  %v3194_v2 = vpop.f32.mrf.mxu0  ;;  %13499 = vst [vmem:[#allocation442_spill] sm:$0xff] %v11153_v54 }
 0x7ee   :  { %v3195_v47 = vadd.f32 %v3194_v2, %v10749_v16  ;;  %v3700_v9 = vadd.f32 %v3699_v55, %v3531_v34 }
 0x7ef   :  { %v3363_v63 = vpop.f32.mrf.mxu1 }
 0x7f0   :  { %v3364_v38 = vadd.f32 %v3363_v63, %v3195_v47  ;;  %v4587_v55 = vmul.f32 0.01, %v3700_v9  ;;  %vm4075_vm14 = vcmp.gt.f32.partialorder %v3700_v9, 0.0 }
 0x7f2   :  { %vm4082_vm13 = vcmp.gt.f32.partialorder %v3364_v38, 0.0  ;;  %v4594_v22 = vmul.f32 0.01, %v3364_v38  ;;  %v11165_v48 = vsel %vm4075_vm14, %v3700_v9, %v4587_v55 }
 0x7f3   :  { %v3532_v40 = vpop.f32.mrf.mxu2  ;;  %13501 = vst [vmem:[#allocation444_spill] sm:$0xff] %v11165_v48 }
 0x7f4   :  { %v11155_v1 = vsel %vm4082_vm13, %v3364_v38, %v4594_v22  ;;  %v3533_v26 = vadd.f32 %v3532_v40, %v10762_v6 }
 0x7f5   :  { %13500 = vst [vmem:[#allocation443_spill] sm:$0xff] %v11155_v1  ;;  %v3701_v27 = vpop.f32.mrf.mxu3  ;;  %v3197_v60 = vpop.f32.mrf.mxu0 }
 0x7f6   :  { %v3198_v2 = vadd.f32 %v3197_v60, %v10749_v16  ;;  %v3702_v47 = vadd.f32 %v3701_v27, %v3533_v26 }
 0x7f7   :  { %v3366_v34 = vpop.f32.mrf.mxu1 }
 0x7f8   :  { %v3367_v63 = vadd.f32 %v3366_v34, %v3198_v2  ;;  %3236 = vmatmul.bf16.gmra.mxu0 %v13387_v56  ;;  %vm4083_vm15 = vcmp.gt.f32.partialorder %v3702_v47, 0.0  ;;  %v4595_v35 = vmul.f32 0.01, %v3702_v47  ;;  %3574 = vmatmul.bf16.gmra.mxu2 %v13387_v56 }
 0x7fa   :  { %3405 = vmatmul.bf16.gmra.mxu1 %v13388_v25  ;;  %3743 = vmatmul.bf16.gmra.mxu3 %v13388_v25  ;;  %v11167_v38 = vsel %vm4083_vm15, %v3702_v47, %v4595_v35  ;;  %v4602_v54 = vmul.f32 0.01, %v3367_v63  ;;  %vm4090_vm0 = vcmp.gt.f32.partialorder %v3367_v63, 0.0 }
 0x7fb   :  { %13502 = vst [vmem:[#allocation445_spill] sm:$0xff] %v11167_v38  ;;  %v3535_v22 = vpop.f32.mrf.mxu2  ;;  %v13505_v38 = vld [vmem:[#allocation116_spill] sm:$0xff] }
 0x7fc   :  { %v3536_v40 = vadd.f32 %v3535_v22, %v10762_v6  ;;  %v11173_v55 = vsel %vm4090_vm0, %v3367_v63, %v4602_v54  ;;  %v13506_v63 = vld [vmem:[#allocation119_spill] sm:$0xff] }
 0x7fd   :  { %v3704_v26 = vpop.f32.mrf.mxu3  ;;  %v3199_v60 = vpop.f32.mrf.mxu0  ;;  %13503 = vst [vmem:[#allocation446_spill] sm:$0xff] %v11173_v55 }
 0x7fe   :  { %v3200_v2 = vadd.f32 %v3199_v60, %v10749_v16  ;;  %v3705_v3 = vadd.f32 %v3704_v26, %v3536_v40 }
 0x7ff   :  { %v3368_v34 = vpop.f32.mrf.mxu1 }
 0x800   :  { %v3369_v56 = vadd.f32 %v3368_v34, %v3200_v2  ;;  %v4603_v26 = vmul.f32 0.01, %v3705_v3  ;;  %vm4091_vm2 = vcmp.gt.f32.partialorder %v3705_v3, 0.0 }
 0x802   :  { %vm4098_vm1 = vcmp.gt.f32.partialorder %v3369_v56, 0.0  ;;  %v4610_v25 = vmul.f32 0.01, %v3369_v56 }
 0x803   :  { %v3537_v9 = vpop.f32.mrf.mxu2 }
 0x804   :  { %v11175_v47 = vsel %vm4098_vm1, %v3369_v56, %v4610_v25  ;;  %v3538_v35 = vadd.f32 %v3537_v9, %v10762_v6  ;;  %v11185_v56 = vsel %vm4091_vm2, %v3705_v3, %v4603_v26 }
 0x805   :  { %13504 = vst [vmem:[#allocation447_spill] sm:$0xff] %v11175_v47  ;;  %v3706_v27 = vpop.f32.mrf.mxu3  ;;  %v3202_v22 = vpop.f32.mrf.mxu0 }
 0x806   :  { %v3203_v60 = vadd.f32 %v3202_v22, %v10749_v16  ;;  %v3707_v2 = vadd.f32 %v3706_v27, %v3538_v35  ;;  %13507 = vst [vmem:[#allocation116_spill] sm:$0xff] %v11185_v56 }
 0x807   :  { %v3371_v40 = vpop.f32.mrf.mxu1 }
 0x808   :  { %v3372_v34 = vadd.f32 %v3371_v40, %v3203_v60  ;;  %3241 = vmatmul.bf16.gmra.mxu0 %v13505_v38  ;;  %vm4099_vm3 = vcmp.gt.f32.partialorder %v3707_v2, 0.0  ;;  %v4611_v54 = vmul.f32 0.01, %v3707_v2  ;;  %3579 = vmatmul.bf16.gmra.mxu2 %v13505_v38 }
 0x80a   :  { %3410 = vmatmul.bf16.gmra.mxu1 %v13506_v63  ;;  %3748 = vmatmul.bf16.gmra.mxu3 %v13506_v63  ;;  %v11187_v25 = vsel %vm4099_vm3, %v3707_v2, %v4611_v54  ;;  %v4618_v47 = vmul.f32 0.01, %v3372_v34  ;;  %vm4106_vm4 = vcmp.gt.f32.partialorder %v3372_v34, 0.0 }
 0x80b   :  { %13508 = vst [vmem:[#allocation119_spill] sm:$0xff] %v11187_v25  ;;  %v3540_v9 = vpop.f32.mrf.mxu2  ;;  %v13511_v25 = vld [vmem:[#allocation122_spill] sm:$0xff] }
 0x80c   :  { %v3541_v35 = vadd.f32 %v3540_v9, %v10762_v6  ;;  %v11193_v2 = vsel %vm4106_vm4, %v3372_v34, %v4618_v47  ;;  %v13512_v34 = vld [vmem:[#allocation125_spill] sm:$0xff] }
 0x80d   :  { %v3709_v22 = vpop.f32.mrf.mxu3  ;;  %v3204_v60 = vpop.f32.mrf.mxu0  ;;  %13509 = vst [vmem:[#allocation448_spill] sm:$0xff] %v11193_v2 }
 0x80e   :  { %v3205_v40 = vadd.f32 %v3204_v60, %v10749_v16  ;;  %v3710_v55 = vadd.f32 %v3709_v22, %v3541_v35 }
 0x80f   :  { %v3373_v48 = vpop.f32.mrf.mxu1 }
 0x810   :  { %v3374_v38 = vadd.f32 %v3373_v48, %v3205_v40  ;;  %v4619_v22 = vmul.f32 0.01, %v3710_v55  ;;  %vm4107_vm6 = vcmp.gt.f32.partialorder %v3710_v55, 0.0 }
 0x812   :  { %vm4114_vm5 = vcmp.gt.f32.partialorder %v3374_v38, 0.0  ;;  %v4626_v3 = vmul.f32 0.01, %v3374_v38  ;;  %v11205_v56 = vsel %vm4107_vm6, %v3710_v55, %v4619_v22  ;;  %v8452_v22 = vld [vmem:[#allocation8 + $0x178] sm:$0xff] }
 0x813   :  { %v3542_v26 = vpop.f32.mrf.mxu2  ;;  %13513 = vst [vmem:[#allocation122_spill] sm:$0xff] %v11205_v56  ;;  %6917 = vmatpush.bf16.msrb.mxu1 %v8452_v22 }
 0x814   :  { %v11195_v54 = vsel %vm4114_vm5, %v3374_v38, %v4626_v3  ;;  %v3543_v63 = vadd.f32 %v3542_v26, %v10762_v6  ;;  %v8460_v38 = vld [vmem:[#allocation8 + $0x1b8] sm:$0xff] }
 0x815   :  { %13510 = vst [vmem:[#allocation449_spill] sm:$0xff] %v11195_v54  ;;  %v3711_v27 = vpop.f32.mrf.mxu3  ;;  %v3207_v9 = vpop.f32.mrf.mxu0  ;;  %v8444_v3 = vld [vmem:[#allocation8 + $0x138] sm:$0xff]  ;;  %7086 = vmatpush.bf16.msrb.mxu2 %v8460_v38 }
 0x816   :  { %v3208_v60 = vadd.f32 %v3207_v9, %v10749_v16  ;;  %v3712_v48 = vadd.f32 %v3711_v27, %v3543_v63  ;;  %v8468_v26 = vld [vmem:[#allocation8 + $0x1f8] sm:$0xff]  ;;  %6748 = vmatpush.bf16.msrb.mxu0 %v8444_v3 }
 0x817   :  { %v3376_v35 = vpop.f32.mrf.mxu1  ;;  %7255 = vmatpush.bf16.msrb.mxu3 %v8468_v26 }
 0x818   :  { %v3377_v40 = vadd.f32 %v3376_v35, %v3208_v60  ;;  %3246 = vmatmul.bf16.gmra.mxu0 %v13511_v25  ;;  %vm4115_vm7 = vcmp.gt.f32.partialorder %v3712_v48, 0.0  ;;  %v4627_v47 = vmul.f32 0.01, %v3712_v48  ;;  %3584 = vmatmul.bf16.gmra.mxu2 %v13511_v25 }
 0x81a   :  { %3415 = vmatmul.bf16.gmra.mxu1 %v13512_v34  ;;  %3753 = vmatmul.bf16.gmra.mxu3 %v13512_v34  ;;  %v11207_v9 = vsel %vm4115_vm7, %v3712_v48, %v4627_v47  ;;  %v4634_v1 = vmul.f32 0.01, %v3377_v40  ;;  %vm4122_vm8 = vcmp.gt.f32.partialorder %v3377_v40, 0.0 }
 0x81b   :  { %13514 = vst [vmem:[#allocation125_spill] sm:$0xff] %v11207_v9  ;;  %v3545_v27 = vpop.f32.mrf.mxu2  ;;  %v13528_v9 = vld [vmem:[#allocation168_spill] sm:$0xff] }
 0x81c   :  { %v3546_v60 = vadd.f32 %v3545_v27, %v10762_v6  ;;  %v11213_v38 = vsel %vm4122_vm8, %v3377_v40, %v4634_v1 }
 0x81d   :  { %v3714_v35 = vpop.f32.mrf.mxu3  ;;  %v3209_v2 = vpop.f32.mrf.mxu0  ;;  %13515 = vst [vmem:[#allocation450_spill] sm:$0xff] %v11213_v38  ;;  %v13522_v38 = vld [vmem:[#allocation17_spill] sm:$0xff] }
 0x81e   :  { %v3210_v25 = vadd.f32 %v3209_v2, %v10749_v16  ;;  %v3715_v54 = vadd.f32 %v3714_v35, %v3546_v60 }
 0x81f   :  { %v3378_v34 = vpop.f32.mrf.mxu1 }
 0x820   :  { %v3379_v55 = vadd.f32 %v3378_v34, %v3210_v25  ;;  %v4635_v25 = vmul.f32 0.01, %v3715_v54  ;;  %vm4123_vm10 = vcmp.gt.f32.partialorder %v3715_v54, 0.0 }
 0x822   :  { %vm4130_vm9 = vcmp.gt.f32.partialorder %v3379_v55, 0.0  ;;  %v4642_v48 = vmul.f32 0.01, %v3379_v55  ;;  %v11225_v40 = vsel %vm4123_vm10, %v3715_v54, %v4635_v25 }
 0x823   :  { %v3547_v47 = vpop.f32.mrf.mxu2  ;;  %13517 = vst [vmem:[#allocation452_spill] sm:$0xff] %v11225_v40 }
 0x824   :  { %v11215_v3 = vsel %vm4130_vm9, %v3379_v55, %v4642_v48  ;;  %v3548_v27 = vadd.f32 %v3547_v47, %v10762_v6 }
 0x825   :  { %13516 = vst [vmem:[#allocation451_spill] sm:$0xff] %v11215_v3  ;;  %v3716_v63 = vpop.f32.mrf.mxu3  ;;  %v3212_v26 = vpop.f32.mrf.mxu0  ;;  %v13527_v3 = vld [vmem:[#allocation169_spill] sm:$0xff] }
 0x826   :  { %v3213_v60 = vadd.f32 %v3212_v26, %v10749_v16  ;;  %v3717_v34 = vadd.f32 %v3716_v63, %v3548_v27  ;;  %v13529_v40 = vpack.c.bf16 %v13527_v3, %v13528_v9 }
 0x827   :  { %v3381_v35 = vpop.f32.mrf.mxu1 }
 0x828   :  { %v3382_v56 = vadd.f32 %v3381_v35, %v3213_v60  ;;  %3251 = vmatmul.bf16.gmra.mxu0 %v9277_v46  ;;  %vm4131_vm11 = vcmp.gt.f32.partialorder %v3717_v34, 0.0  ;;  %v4643_v1 = vmul.f32 0.01, %v3717_v34  ;;  %3589 = vmatmul.bf16.gmra.mxu2 %v9277_v46 }
 0x82a   :  { %3420 = vmatmul.bf16.gmra.mxu1 %v9284_v28  ;;  %3758 = vmatmul.bf16.gmra.mxu3 %v9284_v28  ;;  %v11227_v55 = vsel %vm4131_vm11, %v3717_v34, %v4643_v1  ;;  %v4650_v2 = vmul.f32 0.01, %v3382_v56  ;;  %vm4138_vm12 = vcmp.gt.f32.partialorder %v3382_v56, 0.0 }
 0x82b   :  { %13518 = vst [vmem:[#allocation453_spill] sm:$0xff] %v11227_v55  ;;  %v3550_v22 = vpop.f32.mrf.mxu2  ;;  %v13521_v55 = vld [vmem:[#allocation18_spill] sm:$0xff] }
 0x82c   :  { %v3551_v48 = vadd.f32 %v3550_v22, %v10762_v6  ;;  %v11233_v25 = vsel %vm4138_vm12, %v3382_v56, %v4650_v2  ;;  %v13523_v56 = vpack.c.bf16 %v13521_v55, %v13522_v38  ;;  %v13538_v55 = vld [vmem:[#allocation21_spill] sm:$0xff] }
 0x82d   :  { %v3719_v47 = vpop.f32.mrf.mxu3  ;;  %v3214_v27 = vpop.f32.mrf.mxu0  ;;  %13519 = vst [vmem:[#allocation454_spill] sm:$0xff] %v11233_v25  ;;  %v13531_v25 = vld [vmem:[#allocation170_spill] sm:$0xff] }
 0x82e   :  { %v3215_v26 = vadd.f32 %v3214_v27, %v10749_v16  ;;  %v3720_v35 = vadd.f32 %v3719_v47, %v3551_v48 }
 0x82f   :  { %v3383_v60 = vpop.f32.mrf.mxu1 }
 0x830   :  { %v3384_v46 = vadd.f32 %v3383_v60, %v3215_v26  ;;  %v4651_v47 = vmul.f32 0.01, %v3720_v35  ;;  %vm4139_vm14 = vcmp.gt.f32.partialorder %v3720_v35, 0.0 }
 0x832   :  { %vm4146_vm13 = vcmp.gt.f32.partialorder %v3384_v46, 0.0  ;;  %v4658_v28 = vmul.f32 0.01, %v3384_v46 }
 0x833   :  { %v3552_v54 = vpop.f32.mrf.mxu2 }
 0x834   :  { %v11235_v34 = vsel %vm4146_vm13, %v3384_v46, %v4658_v28  ;;  %v3553_v1 = vadd.f32 %v3552_v54, %v10762_v6  ;;  %v13524_v46 = vld [vmem:[#allocation20_spill] sm:$0xff]  ;;  %v13525_v28 = vld [vmem:[#allocation19_spill] sm:$0xff] }
 0x835   :  { %13520 = vst [vmem:[#allocation455_spill] sm:$0xff] %v11235_v34  ;;  %v3721_v63 = vpop.f32.mrf.mxu3  ;;  %v3217_v22 = vpop.f32.mrf.mxu0  ;;  %v13526_v54 = vpack.c.bf16 %v13524_v46, %v13525_v28 }
 0x836   :  { %v3218_v27 = vadd.f32 %v3217_v22, %v10749_v16  ;;  %v3722_v26 = vadd.f32 %v3721_v63, %v3553_v1  ;;  %v13530_v22 = vld [vmem:[#allocation171_spill] sm:$0xff]  ;;  %v11253_v63 = vsel %vm4139_vm14, %v3720_v35, %v4651_v47 }
 0x837   :  { %v3386_v48 = vpop.f32.mrf.mxu1  ;;  %v13532_v34 = vpack.c.bf16 %v13530_v22, %v13531_v25  ;;  %13533 = vst [vmem:[#allocation18_spill] sm:$0xff] %v11253_v63  ;;  %v13543_v63 = vld [vmem:[#allocation173_spill] sm:$0xff] }
 0x838   :  { %v3387_v60 = vadd.f32 %v3386_v48, %v3218_v27  ;;  %6080 = vmatmul.bf16.vlgmr.msra.gmra.mxu0 %v13523_v56  ;;  %vm4147_vm15 = vcmp.gt.f32.partialorder %v3722_v26, 0.0  ;;  %v4659_v2 = vmul.f32 0.01, %v3722_v26  ;;  %6418 = vmatmul.bf16.vlgmr.msra.gmra.mxu2 %v13529_v40 }
 0x83a   :  { %6249 = vmatmul.bf16.vlgmr.msra.gmra.mxu1 %v13526_v54  ;;  %6587 = vmatmul.bf16.vlgmr.msra.gmra.mxu3 %v13532_v34  ;;  %v11255_v1 = vsel %vm4147_vm15, %v3722_v26, %v4659_v2  ;;  %v4666_v40 = vmul.f32 0.01, %v3387_v60  ;;  %vm4154_vm0 = vcmp.gt.f32.partialorder %v3387_v60, 0.0 }
 0x83b   :  { %13534 = vst [vmem:[#allocation17_spill] sm:$0xff] %v11255_v1  ;;  %v3555_v38 = vpop.f32.mrf.mxu2  ;;  %v13544_v1 = vld [vmem:[#allocation172_spill] sm:$0xff] }
 0x83c   :  { %v3556_v27 = vadd.f32 %v3555_v38, %v10762_v6  ;;  %v11261_v34 = vsel %vm4154_vm0, %v3387_v60, %v4666_v40  ;;  %v13545_v22 = vpack.c.bf16 %v13543_v63, %v13544_v1 }
 0x83d   :  { %v3724_v48 = vpop.f32.mrf.mxu3  ;;  %v3219_v56 = vpop.f32.mrf.mxu0  ;;  %13535 = vst [vmem:[#allocation20_spill] sm:$0xff] %v11261_v34  ;;  %v13547_v34 = vld [vmem:[#allocation174_spill] sm:$0xff] }
 0x83e   :  { %v3220_v46 = vadd.f32 %v3219_v56, %v10749_v16  ;;  %v3725_v3 = vadd.f32 %v3724_v48, %v3556_v27 }
 0x83f   :  { %v3388_v9 = vpop.f32.mrf.mxu1 }
 0x840   :  { %v3389_v28 = vadd.f32 %v3388_v9, %v3220_v46  ;;  %v4667_v48 = vmul.f32 0.01, %v3725_v3  ;;  %vm4155_vm2 = vcmp.gt.f32.partialorder %v3725_v3, 0.0  ;;  %v13537_v9 = vld [vmem:[#allocation22_spill] sm:$0xff] }
 0x841   :  { %v13539_v60 = vpack.c.bf16 %v13537_v9, %v13538_v55 }
 0x842   :  { %vm4162_vm1 = vcmp.gt.f32.partialorder %v3389_v28, 0.0  ;;  %v4674_v35 = vmul.f32 0.01, %v3389_v28 }
 0x843   :  { %v3557_v25 = vpop.f32.mrf.mxu2 }
 0x844   :  { %v11263_v47 = vsel %vm4162_vm1, %v3389_v28, %v4674_v35  ;;  %v3558_v26 = vadd.f32 %v3557_v25, %v10762_v6  ;;  %v13540_v28 = vld [vmem:[#allocation24_spill] sm:$0xff]  ;;  %v13541_v35 = vld [vmem:[#allocation23_spill] sm:$0xff] }
 0x845   :  { %13536 = vst [vmem:[#allocation19_spill] sm:$0xff] %v11263_v47  ;;  %v3726_v2 = vpop.f32.mrf.mxu3  ;;  %v3222_v54 = vpop.f32.mrf.mxu0  ;;  %v13542_v25 = vpack.c.bf16 %v13540_v28, %v13541_v35 }
 0x846   :  { %v3223_v38 = vadd.f32 %v3222_v54, %v10749_v16  ;;  %v3727_v56 = vadd.f32 %v3726_v2, %v3558_v26  ;;  %v13546_v54 = vld [vmem:[#allocation175_spill] sm:$0xff]  ;;  %v11281_v26 = vsel %vm4155_vm2, %v3725_v3, %v4667_v48 }
 0x847   :  { %v3391_v27 = vpop.f32.mrf.mxu1  ;;  %v13548_v47 = vpack.c.bf16 %v13546_v54, %v13547_v34  ;;  %13549 = vst [vmem:[#allocation169_spill] sm:$0xff] %v11281_v26  ;;  %v13559_v26 = vld [vmem:[#allocation177_spill] sm:$0xff] }
 0x848   :  { %v3392_v46 = vadd.f32 %v3391_v27, %v3223_v38  ;;  %6085 = vmatmul.bf16.gmra.mxu0 %v13539_v60  ;;  %vm4163_vm3 = vcmp.gt.f32.partialorder %v3727_v56, 0.0  ;;  %v4675_v40 = vmul.f32 0.01, %v3727_v56  ;;  %6423 = vmatmul.bf16.gmra.mxu2 %v13545_v22  ;;  %v13554_v38 = vld [vmem:[#allocation25_spill] sm:$0xff] }
 0x84a   :  { %6254 = vmatmul.bf16.gmra.mxu1 %v13542_v25  ;;  %6592 = vmatmul.bf16.gmra.mxu3 %v13548_v47  ;;  %v11283_v2 = vsel %vm4163_vm3, %v3727_v56, %v4675_v40  ;;  %v4682_v22 = vmul.f32 0.01, %v3392_v46  ;;  %vm4170_vm4 = vcmp.gt.f32.partialorder %v3392_v46, 0.0 }
 0x84b   :  { %13550 = vst [vmem:[#allocation168_spill] sm:$0xff] %v11283_v2  ;;  %v3560_v55 = vpop.f32.mrf.mxu2  ;;  %v13560_v2 = vld [vmem:[#allocation176_spill] sm:$0xff] }
 0x84c   :  { %v3561_v27 = vadd.f32 %v3560_v55, %v10762_v6  ;;  %v11289_v47 = vsel %vm4170_vm4, %v3392_v46, %v4682_v22  ;;  %v13561_v54 = vpack.c.bf16 %v13559_v26, %v13560_v2 }
 0x84d   :  { %v3729_v9 = vpop.f32.mrf.mxu3  ;;  %v3224_v60 = vpop.f32.mrf.mxu0  ;;  %13551 = vst [vmem:[#allocation171_spill] sm:$0xff] %v11289_v47  ;;  %v13563_v47 = vld [vmem:[#allocation178_spill] sm:$0xff] }
 0x84e   :  { %v3225_v28 = vadd.f32 %v3224_v60, %v10749_v16  ;;  %v3730_v1 = vadd.f32 %v3729_v9, %v3561_v27 }
 0x84f   :  { %v3393_v63 = vpop.f32.mrf.mxu1 }
 0x850   :  { %v3394_v35 = vadd.f32 %v3393_v63, %v3225_v28  ;;  %v4683_v9 = vmul.f32 0.01, %v3730_v1  ;;  %vm4171_vm6 = vcmp.gt.f32.partialorder %v3730_v1, 0.0  ;;  %v13553_v63 = vld [vmem:[#allocation26_spill] sm:$0xff] }
 0x851   :  { %v13555_v46 = vpack.c.bf16 %v13553_v63, %v13554_v38 }
 0x852   :  { %vm4178_vm5 = vcmp.gt.f32.partialorder %v3394_v35, 0.0  ;;  %v4690_v3 = vmul.f32 0.01, %v3394_v35 }
 0x853   :  { %v3562_v34 = vpop.f32.mrf.mxu2 }
 0x854   :  { %v11291_v48 = vsel %vm4178_vm5, %v3394_v35, %v4690_v3  ;;  %v3563_v56 = vadd.f32 %v3562_v34, %v10762_v6  ;;  %v13556_v35 = vld [vmem:[#allocation28_spill] sm:$0xff]  ;;  %v13557_v3 = vld [vmem:[#allocation27_spill] sm:$0xff] }
 0x855   :  { %13552 = vst [vmem:[#allocation170_spill] sm:$0xff] %v11291_v48  ;;  %v3731_v40 = vpop.f32.mrf.mxu3  ;;  %v3227_v25 = vpop.f32.mrf.mxu0  ;;  %v13558_v34 = vpack.c.bf16 %v13556_v35, %v13557_v3 }
 0x856   :  { %v3228_v55 = vadd.f32 %v3227_v25, %v10749_v16  ;;  %v3732_v60 = vadd.f32 %v3731_v40, %v3563_v56  ;;  %v13562_v25 = vld [vmem:[#allocation179_spill] sm:$0xff]  ;;  %v8459_v56 = vld [vmem:[#allocation8 + $0x1b0] sm:$0xff] }
 0x857   :  { %v3396_v27 = vpop.f32.mrf.mxu1  ;;  %v13564_v48 = vpack.c.bf16 %v13562_v25, %v13563_v47  ;;  %v8443_v40 = vld [vmem:[#allocation8 + $0x130] sm:$0xff]  ;;  %7087 = vmatpush.bf16.msrb.mxu2 %v8459_v56 }
 0x858   :  { %v3397_v28 = vadd.f32 %v3396_v27, %v3228_v55  ;;  %6090 = vmatmul.bf16.gmra.mxu0 %v13555_v46  ;;  %vm4179_vm7 = vcmp.gt.f32.partialorder %v3732_v60, 0.0  ;;  %v4691_v22 = vmul.f32 0.01, %v3732_v60  ;;  %6428 = vmatmul.bf16.gmra.mxu2 %v13561_v54  ;;  %v8467_v55 = vld [vmem:[#allocation8 + $0x1f0] sm:$0xff]  ;;  %v11309_v27 = vsel %vm4171_vm6, %v3730_v1, %v4683_v9 }
 0x859   :  { %13565 = vst [vmem:[#allocation22_spill] sm:$0xff] %v11309_v27  ;;  %6749 = vmatpush.bf16.msrb.mxu0 %v8443_v40  ;;  %7256 = vmatpush.bf16.msrb.mxu3 %v8467_v55  ;;  %v8451_v9 = vld [vmem:[#allocation8 + $0x170] sm:$0xff] }
 0x85a   :  { %6259 = vmatmul.bf16.gmra.mxu1 %v13558_v34  ;;  %6597 = vmatmul.bf16.gmra.mxu3 %v13564_v48  ;;  %v11311_v38 = vsel %vm4179_vm7, %v3732_v60, %v4691_v22  ;;  %v4698_v3 = vmul.f32 0.01, %v3397_v28  ;;  %vm4186_vm8 = vcmp.gt.f32.partialorder %v3397_v28, 0.0  ;;  %v13570_v46 = vld [vmem:[#allocation29_spill] sm:$0xff] }
 0x85b   :  { %13566 = vst [vmem:[#allocation21_spill] sm:$0xff] %v11311_v38  ;;  %v3565_v63 = vpop.f32.mrf.mxu2  ;;  %6918 = vmatpush.bf16.msrb.mxu1 %v8451_v9  ;;  %v13569_v9 = vld [vmem:[#allocation30_spill] sm:$0xff]  ;;  %v13575_v27 = vld [vmem:[#allocation181_spill] sm:$0xff]  ;;  %v13576_v38 = vld [vmem:[#allocation180_spill] sm:$0xff] }
 0x85c   :  { %v3566_v26 = vadd.f32 %v3565_v63, %v10762_v6  ;;  %v11317_v34 = vsel %vm4186_vm8, %v3397_v28, %v4698_v3  ;;  %v13571_v28 = vpack.c.bf16 %v13569_v9, %v13570_v46  ;;  %v13577_v63 = vpack.c.bf16 %v13575_v27, %v13576_v38 }
 0x85d   :  { %v3734_v2 = vpop.f32.mrf.mxu3  ;;  %v3229_v54 = vpop.f32.mrf.mxu0  ;;  %13567 = vst [vmem:[#allocation24_spill] sm:$0xff] %v11317_v34  ;;  %v13579_v34 = vld [vmem:[#allocation182_spill] sm:$0xff] }
 0x85e   :  { %v3230_v47 = vadd.f32 %v3229_v54, %v10749_v16  ;;  %v3735_v35 = vadd.f32 %v3734_v2, %v3566_v26 }
 0x85f   :  { %v3398_v48 = vpop.f32.mrf.mxu1 }
 0x860   :  { %v3399_v1 = vadd.f32 %v3398_v48, %v3230_v47  ;;  %v4699_v54 = vmul.f32 0.01, %v3735_v35  ;;  %vm4187_vm10 = vcmp.gt.f32.partialorder %v3735_v35, 0.0 }
 0x862   :  { %vm4194_vm9 = vcmp.gt.f32.partialorder %v3399_v1, 0.0  ;;  %v4706_v60 = vmul.f32 0.01, %v3399_v1 }
 0x863   :  { %v3567_v22 = vpop.f32.mrf.mxu2 }
 0x864   :  { %v11319_v25 = vsel %vm4194_vm9, %v3399_v1, %v4706_v60  ;;  %v3568_v56 = vadd.f32 %v3567_v22, %v10762_v6  ;;  %v13572_v1 = vld [vmem:[#allocation32_spill] sm:$0xff]  ;;  %v13573_v60 = vld [vmem:[#allocation31_spill] sm:$0xff] }
 0x865   :  { %13568 = vst [vmem:[#allocation23_spill] sm:$0xff] %v11319_v25  ;;  %v3736_v40 = vpop.f32.mrf.mxu3  ;;  %v3232_v55 = vpop.f32.mrf.mxu0  ;;  %v13574_v22 = vpack.c.bf16 %v13572_v1, %v13573_v60 }
 0x866   :  { %v3233_v26 = vadd.f32 %v3232_v55, %v10749_v16  ;;  %v3737_v47 = vadd.f32 %v3736_v40, %v3568_v56  ;;  %v13578_v55 = vld [vmem:[#allocation183_spill] sm:$0xff]  ;;  %v11337_v56 = vsel %vm4187_vm10, %v3735_v35, %v4699_v54 }
 0x867   :  { %v3401_v2 = vpop.f32.mrf.mxu1  ;;  %v13580_v25 = vpack.c.bf16 %v13578_v55, %v13579_v34  ;;  %13581 = vst [vmem:[#allocation173_spill] sm:$0xff] %v11337_v56  ;;  %v13591_v56 = vld [vmem:[#allocation185_spill] sm:$0xff] }
 0x868   :  { %v3402_v48 = vadd.f32 %v3401_v2, %v3233_v26  ;;  %6095 = vmatmul.bf16.gmra.mxu0 %v13571_v28  ;;  %vm4195_vm11 = vcmp.gt.f32.partialorder %v3737_v47, 0.0  ;;  %v4707_v3 = vmul.f32 0.01, %v3737_v47  ;;  %6433 = vmatmul.bf16.gmra.mxu2 %v13577_v63  ;;  %v13586_v26 = vld [vmem:[#allocation33_spill] sm:$0xff] }
 0x86a   :  { %6264 = vmatmul.bf16.gmra.mxu1 %v13574_v22  ;;  %6602 = vmatmul.bf16.gmra.mxu3 %v13580_v25  ;;  %v11339_v40 = vsel %vm4195_vm11, %v3737_v47, %v4707_v3  ;;  %v4714_v63 = vmul.f32 0.01, %v3402_v48  ;;  %vm4202_vm12 = vcmp.gt.f32.partialorder %v3402_v48, 0.0 }
 0x86b   :  { %13582 = vst [vmem:[#allocation172_spill] sm:$0xff] %v11339_v40  ;;  %v3570_v46 = vpop.f32.mrf.mxu2  ;;  %v13592_v40 = vld [vmem:[#allocation184_spill] sm:$0xff] }
 0x86c   :  { %v3571_v2 = vadd.f32 %v3570_v46, %v10762_v6  ;;  %v11345_v25 = vsel %vm4202_vm12, %v3402_v48, %v4714_v63  ;;  %v13593_v55 = vpack.c.bf16 %v13591_v56, %v13592_v40 }
 0x86d   :  { %v3739_v9 = vpop.f32.mrf.mxu3  ;;  %v3234_v28 = vpop.f32.mrf.mxu0  ;;  %13583 = vst [vmem:[#allocation175_spill] sm:$0xff] %v11345_v25  ;;  %v13595_v25 = vld [vmem:[#allocation186_spill] sm:$0xff] }
 0x86e   :  { %v3235_v1 = vadd.f32 %v3234_v28, %v10749_v16  ;;  %v3740_v38 = vadd.f32 %v3739_v9, %v3571_v2 }
 0x86f   :  { %v3403_v27 = vpop.f32.mrf.mxu1 }
 0x870   :  { %v3404_v60 = vadd.f32 %v3403_v27, %v3235_v1  ;;  %v4715_v9 = vmul.f32 0.01, %v3740_v38  ;;  %vm4203_vm14 = vcmp.gt.f32.partialorder %v3740_v38, 0.0  ;;  %v13585_v27 = vld [vmem:[#allocation34_spill] sm:$0xff] }
 0x871   :  { %v13587_v48 = vpack.c.bf16 %v13585_v27, %v13586_v26 }
 0x872   :  { %vm4210_vm13 = vcmp.gt.f32.partialorder %v3404_v60, 0.0  ;;  %v4722_v35 = vmul.f32 0.01, %v3404_v60 }
 0x873   :  { %v3572_v34 = vpop.f32.mrf.mxu2 }
 0x874   :  { %v11347_v54 = vsel %vm4210_vm13, %v3404_v60, %v4722_v35  ;;  %v3573_v47 = vadd.f32 %v3572_v34, %v10762_v6  ;;  %v13588_v60 = vld [vmem:[#allocation36_spill] sm:$0xff]  ;;  %v13589_v35 = vld [vmem:[#allocation35_spill] sm:$0xff] }
 0x875   :  { %13584 = vst [vmem:[#allocation174_spill] sm:$0xff] %v11347_v54  ;;  %v3741_v3 = vpop.f32.mrf.mxu3  ;;  %v3237_v22 = vpop.f32.mrf.mxu0  ;;  %v13590_v34 = vpack.c.bf16 %v13588_v60, %v13589_v35 }
 0x876   :  { %v3238_v46 = vadd.f32 %v3237_v22, %v10749_v16  ;;  %v3742_v28 = vadd.f32 %v3741_v3, %v3573_v47  ;;  %v13594_v22 = vld [vmem:[#allocation187_spill] sm:$0xff]  ;;  %v11365_v47 = vsel %vm4203_vm14, %v3740_v38, %v4715_v9 }
 0x877   :  { %v3406_v2 = vpop.f32.mrf.mxu1  ;;  %v13596_v54 = vpack.c.bf16 %v13594_v22, %v13595_v25  ;;  %13597 = vst [vmem:[#allocation26_spill] sm:$0xff] %v11365_v47  ;;  %v13607_v47 = vld [vmem:[#allocation189_spill] sm:$0xff] }
 0x878   :  { %v3407_v1 = vadd.f32 %v3406_v2, %v3238_v46  ;;  %6100 = vmatmul.bf16.gmra.mxu0 %v13587_v48  ;;  %vm4211_vm15 = vcmp.gt.f32.partialorder %v3742_v28, 0.0  ;;  %v4723_v63 = vmul.f32 0.01, %v3742_v28  ;;  %6438 = vmatmul.bf16.gmra.mxu2 %v13593_v55  ;;  %v13602_v46 = vld [vmem:[#allocation37_spill] sm:$0xff] }
 0x87a   :  { %6269 = vmatmul.bf16.gmra.mxu1 %v13590_v34  ;;  %6607 = vmatmul.bf16.gmra.mxu3 %v13596_v54  ;;  %v11367_v3 = vsel %vm4211_vm15, %v3742_v28, %v4723_v63  ;;  %v4730_v55 = vmul.f32 0.01, %v3407_v1  ;;  %vm4218_vm0 = vcmp.gt.f32.partialorder %v3407_v1, 0.0 }
 0x87b   :  { %13598 = vst [vmem:[#allocation25_spill] sm:$0xff] %v11367_v3  ;;  %v3575_v26 = vpop.f32.mrf.mxu2  ;;  %v13608_v3 = vld [vmem:[#allocation188_spill] sm:$0xff] }
 0x87c   :  { %v3576_v2 = vadd.f32 %v3575_v26, %v10762_v6  ;;  %v11373_v54 = vsel %vm4218_vm0, %v3407_v1, %v4730_v55  ;;  %v13609_v22 = vpack.c.bf16 %v13607_v47, %v13608_v3 }
 0x87d   :  { %v3744_v27 = vpop.f32.mrf.mxu3  ;;  %v3239_v48 = vpop.f32.mrf.mxu0  ;;  %13599 = vst [vmem:[#allocation28_spill] sm:$0xff] %v11373_v54  ;;  %v13611_v54 = vld [vmem:[#allocation190_spill] sm:$0xff] }
 0x87e   :  { %v3240_v60 = vadd.f32 %v3239_v48, %v10749_v16  ;;  %v3745_v40 = vadd.f32 %v3744_v27, %v3576_v2 }
 0x87f   :  { %v3408_v56 = vpop.f32.mrf.mxu1 }
 0x880   :  { %v3409_v35 = vadd.f32 %v3408_v56, %v3240_v60  ;;  %v4731_v27 = vmul.f32 0.01, %v3745_v40  ;;  %vm4219_vm2 = vcmp.gt.f32.partialorder %v3745_v40, 0.0  ;;  %v13601_v56 = vld [vmem:[#allocation38_spill] sm:$0xff] }
 0x881   :  { %v13603_v1 = vpack.c.bf16 %v13601_v56, %v13602_v46 }
 0x882   :  { %vm4226_vm1 = vcmp.gt.f32.partialorder %v3409_v35, 0.0  ;;  %v4738_v38 = vmul.f32 0.01, %v3409_v35 }
 0x883   :  { %v3577_v25 = vpop.f32.mrf.mxu2 }
 0x884   :  { %v11375_v9 = vsel %vm4226_vm1, %v3409_v35, %v4738_v38  ;;  %v3578_v28 = vadd.f32 %v3577_v25, %v10762_v6  ;;  %v13604_v35 = vld [vmem:[#allocation40_spill] sm:$0xff]  ;;  %v13605_v38 = vld [vmem:[#allocation39_spill] sm:$0xff] }
 0x885   :  { %13600 = vst [vmem:[#allocation27_spill] sm:$0xff] %v11375_v9  ;;  %v3746_v63 = vpop.f32.mrf.mxu3  ;;  %v3242_v34 = vpop.f32.mrf.mxu0  ;;  %v13606_v25 = vpack.c.bf16 %v13604_v35, %v13605_v38 }
 0x886   :  { %v3243_v26 = vadd.f32 %v3242_v34, %v10749_v16  ;;  %v3747_v48 = vadd.f32 %v3746_v63, %v3578_v28  ;;  %v13610_v34 = vld [vmem:[#allocation191_spill] sm:$0xff]  ;;  %v11393_v28 = vsel %vm4219_vm2, %v3745_v40, %v4731_v27 }
 0x887   :  { %v3411_v2 = vpop.f32.mrf.mxu1  ;;  %v13612_v9 = vpack.c.bf16 %v13610_v34, %v13611_v54  ;;  %13613 = vst [vmem:[#allocation177_spill] sm:$0xff] %v11393_v28  ;;  %v13623_v28 = vld [vmem:[#allocation193_spill] sm:$0xff] }
 0x888   :  { %v3412_v60 = vadd.f32 %v3411_v2, %v3243_v26  ;;  %6105 = vmatmul.bf16.gmra.mxu0 %v13603_v1  ;;  %vm4227_vm3 = vcmp.gt.f32.partialorder %v3747_v48, 0.0  ;;  %v4739_v55 = vmul.f32 0.01, %v3747_v48  ;;  %6443 = vmatmul.bf16.gmra.mxu2 %v13609_v22  ;;  %v13618_v26 = vld [vmem:[#allocation41_spill] sm:$0xff] }
 0x88a   :  { %6274 = vmatmul.bf16.gmra.mxu1 %v13606_v25  ;;  %6612 = vmatmul.bf16.gmra.mxu3 %v13612_v9  ;;  %v11395_v63 = vsel %vm4227_vm3, %v3747_v48, %v4739_v55  ;;  %v4746_v22 = vmul.f32 0.01, %v3412_v60  ;;  %vm4234_vm4 = vcmp.gt.f32.partialorder %v3412_v60, 0.0 }
 0x88b   :  { %13614 = vst [vmem:[#allocation176_spill] sm:$0xff] %v11395_v63  ;;  %v3580_v46 = vpop.f32.mrf.mxu2  ;;  %v13624_v63 = vld [vmem:[#allocation192_spill] sm:$0xff] }
 0x88c   :  { %v3581_v2 = vadd.f32 %v3580_v46, %v10762_v6  ;;  %v11401_v9 = vsel %vm4234_vm4, %v3412_v60, %v4746_v22  ;;  %v13625_v34 = vpack.c.bf16 %v13623_v28, %v13624_v63 }
 0x88d   :  { %v3749_v56 = vpop.f32.mrf.mxu3  ;;  %v3244_v1 = vpop.f32.mrf.mxu0  ;;  %13615 = vst [vmem:[#allocation179_spill] sm:$0xff] %v11401_v9  ;;  %v13627_v9 = vld [vmem:[#allocation194_spill] sm:$0xff] }
 0x88e   :  { %v3245_v35 = vadd.f32 %v3244_v1, %v10749_v16  ;;  %v3750_v3 = vadd.f32 %v3749_v56, %v3581_v2 }
 0x88f   :  { %v3413_v47 = vpop.f32.mrf.mxu1 }
 0x890   :  { %v3414_v38 = vadd.f32 %v3413_v47, %v3245_v35  ;;  %v4747_v56 = vmul.f32 0.01, %v3750_v3  ;;  %vm4235_vm6 = vcmp.gt.f32.partialorder %v3750_v3, 0.0  ;;  %v13617_v47 = vld [vmem:[#allocation42_spill] sm:$0xff] }
 0x891   :  { %v13619_v60 = vpack.c.bf16 %v13617_v47, %v13618_v26 }
 0x892   :  { %vm4242_vm5 = vcmp.gt.f32.partialorder %v3414_v38, 0.0  ;;  %v4754_v40 = vmul.f32 0.01, %v3414_v38 }
 0x893   :  { %v3582_v54 = vpop.f32.mrf.mxu2 }
 0x894   :  { %v11403_v27 = vsel %vm4242_vm5, %v3414_v38, %v4754_v40  ;;  %v3583_v48 = vadd.f32 %v3582_v54, %v10762_v6  ;;  %v13620_v38 = vld [vmem:[#allocation44_spill] sm:$0xff]  ;;  %v13621_v40 = vld [vmem:[#allocation43_spill] sm:$0xff] }
 0x895   :  { %13616 = vst [vmem:[#allocation178_spill] sm:$0xff] %v11403_v27  ;;  %v3751_v55 = vpop.f32.mrf.mxu3  ;;  %v3247_v25 = vpop.f32.mrf.mxu0  ;;  %v13622_v54 = vpack.c.bf16 %v13620_v38, %v13621_v40  ;;  %v8450_v40 = vld [vmem:[#allocation8 + $0x168] sm:$0xff] }
 0x896   :  { %v3248_v46 = vadd.f32 %v3247_v25, %v10749_v16  ;;  %v3752_v1 = vadd.f32 %v3751_v55, %v3583_v48  ;;  %v13626_v25 = vld [vmem:[#allocation195_spill] sm:$0xff]  ;;  %v8458_v48 = vld [vmem:[#allocation8 + $0x1a8] sm:$0xff]  ;;  %6919 = vmatpush.bf16.msrb.mxu1 %v8450_v40  ;;  %v13633_v40 = vld [vmem:[#allocation46_spill] sm:$0xff] }
 0x897   :  { %v3416_v2 = vpop.f32.mrf.mxu1  ;;  %v13628_v27 = vpack.c.bf16 %v13626_v25, %v13627_v9  ;;  %v8442_v55 = vld [vmem:[#allocation8 + $0x128] sm:$0xff]  ;;  %7088 = vmatpush.bf16.msrb.mxu2 %v8458_v48 }
 0x898   :  { %v3417_v35 = vadd.f32 %v3416_v2, %v3248_v46  ;;  %6110 = vmatmul.bf16.gmra.mxu0 %v13619_v60  ;;  %vm4243_vm7 = vcmp.gt.f32.partialorder %v3752_v1, 0.0  ;;  %v4755_v22 = vmul.f32 0.01, %v3752_v1  ;;  %6448 = vmatmul.bf16.gmra.mxu2 %v13625_v34  ;;  %v8466_v46 = vld [vmem:[#allocation8 + $0x1e8] sm:$0xff]  ;;  %v11421_v2 = vsel %vm4235_vm6, %v3750_v3, %v4747_v56  ;;  %v13634_v60 = vld [vmem:[#allocation45_spill] sm:$0xff] }
 0x899   :  { %13629 = vst [vmem:[#allocation30_spill] sm:$0xff] %v11421_v2  ;;  %6750 = vmatpush.bf16.msrb.mxu0 %v8442_v55  ;;  %7257 = vmatpush.bf16.msrb.mxu3 %v8466_v46  ;;  %v13639_v2 = vld [vmem:[#allocation197_spill] sm:$0xff] }
 0x89a   :  { %6279 = vmatmul.bf16.gmra.mxu1 %v13622_v54  ;;  %6617 = vmatmul.bf16.gmra.mxu3 %v13628_v27  ;;  %v11423_v26 = vsel %vm4243_vm7, %v3752_v1, %v4755_v22  ;;  %v4762_v3 = vmul.f32 0.01, %v3417_v35  ;;  %vm4250_vm8 = vcmp.gt.f32.partialorder %v3417_v35, 0.0 }
 0x89b   :  { %13630 = vst [vmem:[#allocation29_spill] sm:$0xff] %v11423_v26  ;;  %v3585_v47 = vpop.f32.mrf.mxu2  ;;  %v13640_v26 = vld [vmem:[#allocation196_spill] sm:$0xff] }
 0x89c   :  { %v3586_v28 = vadd.f32 %v3585_v47, %v10762_v6  ;;  %v11429_v54 = vsel %vm4250_vm8, %v3417_v35, %v4762_v3  ;;  %v13635_v35 = vpack.c.bf16 %v13633_v40, %v13634_v60  ;;  %v13641_v47 = vpack.c.bf16 %v13639_v2, %v13640_v26 }
 0x89d   :  { %v3754_v63 = vpop.f32.mrf.mxu3  ;;  %v3249_v34 = vpop.f32.mrf.mxu0  ;;  %13631 = vst [vmem:[#allocation32_spill] sm:$0xff] %v11429_v54  ;;  %v13643_v54 = vld [vmem:[#allocation198_spill] sm:$0xff] }
 0x89e   :  { %v3250_v9 = vadd.f32 %v3249_v34, %v10749_v16  ;;  %v3755_v38 = vadd.f32 %v3754_v63, %v3586_v28 }
 0x89f   :  { %v3418_v27 = vpop.f32.mrf.mxu1 }
 0x8a0   :  { %v3419_v56 = vadd.f32 %v3418_v27, %v3250_v9  ;;  %v4763_v34 = vmul.f32 0.01, %v3755_v38  ;;  %vm4251_vm10 = vcmp.gt.f32.partialorder %v3755_v38, 0.0 }
 0x8a2   :  { %vm4258_vm9 = vcmp.gt.f32.partialorder %v3419_v56, 0.0  ;;  %v4770_v1 = vmul.f32 0.01, %v3419_v56 }
 0x8a3   :  { %v3587_v22 = vpop.f32.mrf.mxu2 }
 0x8a4   :  { %v11431_v25 = vsel %vm4258_vm9, %v3419_v56, %v4770_v1  ;;  %v3588_v48 = vadd.f32 %v3587_v22, %v10762_v6  ;;  %v13636_v56 = vld [vmem:[#allocation48_spill] sm:$0xff]  ;;  %v13637_v1 = vld [vmem:[#allocation47_spill] sm:$0xff] }
 0x8a5   :  { %13632 = vst [vmem:[#allocation31_spill] sm:$0xff] %v11431_v25  ;;  %v3756_v55 = vpop.f32.mrf.mxu3  ;;  %v3252_v46 = vpop.f32.mrf.mxu0  ;;  %v13638_v22 = vpack.c.bf16 %v13636_v56, %v13637_v1 }
 0x8a6   :  { %v3253_v28 = vadd.f32 %v3252_v46, %v10749_v16  ;;  %v3757_v9 = vadd.f32 %v3756_v55, %v3588_v48  ;;  %v13642_v46 = vld [vmem:[#allocation199_spill] sm:$0xff]  ;;  %v11449_v48 = vsel %vm4251_vm10, %v3755_v38, %v4763_v34 }
 0x8a7   :  { %v3421_v63 = vpop.f32.mrf.mxu1  ;;  %v13644_v25 = vpack.c.bf16 %v13642_v46, %v13643_v54  ;;  %13645 = vst [vmem:[#allocation181_spill] sm:$0xff] %v11449_v48  ;;  %v11460_v54 = vld [vmem:[%s12415_s4] ss:$0 sm:$0xff]  ;;  %v13656_v48 = vld [vmem:[#allocation200_spill] sm:$0xff] }
 0x8a8   :  { %v3422_v27 = vadd.f32 %v3421_v63, %v3253_v28  ;;  %6115 = vmatmul.bf16.gmra.mxu0 %v13635_v35  ;;  %vm4259_vm11 = vcmp.gt.f32.partialorder %v3757_v9, 0.0  ;;  %v4771_v3 = vmul.f32 0.01, %v3757_v9  ;;  %6453 = vmatmul.bf16.gmra.mxu2 %v13641_v47  ;;  %v13650_v28 = vld [vmem:[#allocation49_spill] sm:$0xff] }
 0x8aa   :  { %6284 = vmatmul.bf16.gmra.mxu1 %v13638_v22  ;;  %6622 = vmatmul.bf16.gmra.mxu3 %v13644_v25  ;;  %v11451_v55 = vsel %vm4259_vm11, %v3757_v9, %v4771_v3  ;;  %v4778_v47 = vmul.f32 0.01, %v3422_v27  ;;  %vm4266_vm12 = vcmp.gt.f32.partialorder %v3422_v27, 0.0 }
 0x8ab   :  { %13646 = vst [vmem:[#allocation180_spill] sm:$0xff] %v11451_v55  ;;  %v3590_v60 = vpop.f32.mrf.mxu2 }
 0x8ac   :  { %v3591_v63 = vadd.f32 %v3590_v60, %v10762_v6  ;;  %v11462_v34 = vsel %vm4266_vm12, %v3422_v27, %v4778_v47 }
 0x8ad   :  { %v3759_v40 = vpop.f32.mrf.mxu3  ;;  %v3254_v35 = vpop.f32.mrf.mxu0  ;;  %13647 = vst [vmem:[#allocation183_spill] sm:$0xff] %v11462_v34  ;;  %v13659_v34 = vld [vmem:[#allocation202_spill] sm:$0xff] }
 0x8ae   :  { %v3255_v56 = vadd.f32 %v3254_v35, %v10749_v16  ;;  %v3760_v26 = vadd.f32 %v3759_v40, %v3591_v63 }
 0x8af   :  { %v3423_v2 = vpop.f32.mrf.mxu1 }
 0x8b0   :  { %v3424_v1 = vadd.f32 %v3423_v2, %v3255_v56  ;;  %v4779_v40 = vmul.f32 0.01, %v3760_v26  ;;  %vm4267_vm14 = vcmp.gt.f32.partialorder %v3760_v26, 0.0  ;;  %v13649_v2 = vld [vmem:[#allocation50_spill] sm:$0xff] }
 0x8b1   :  { %v13651_v27 = vpack.c.bf16 %v13649_v2, %v13650_v28 }
 0x8b2   :  { %vm4274_vm13 = vcmp.gt.f32.partialorder %v3424_v1, 0.0  ;;  %v4786_v38 = vmul.f32 0.01, %v3424_v1 }
 0x8b3   :  { %v3592_v25 = vpop.f32.mrf.mxu2 }
 0x8b4   :  { %v11464_v9 = vsel %vm4274_vm13, %v3424_v1, %v4786_v38  ;;  %v3593_v3 = vadd.f32 %v3592_v25, %v10762_v6  ;;  %v13652_v1 = vld [vmem:[#allocation52_spill] sm:$0xff]  ;;  %v13653_v6 = vld [vmem:[#allocation51_spill] sm:$0xff]  ;;  %v13655_v25 = vld [vmem:[#allocation201_spill] sm:$0xff] }
 0x8b5   :  { %13648 = vst [vmem:[#allocation182_spill] sm:$0xff] %v11464_v9  ;;  %v3761_v16 = vpop.f32.mrf.mxu3  ;;  %v6081_v22 = vpop.f32.mrf.mxu0  ;;  %v13654_v38 = vpack.c.bf16 %v13652_v1, %v13653_v6  ;;  %v13657_v46 = vpack.c.bf16 %v13655_v25, %v13656_v48 }
 0x8b6   :  { %v6082_v60 = vadd.f32 %v11460_v54, %v6081_v22  ;;  %v3762_v35 = vadd.f32 %v3761_v16, %v3593_v3  ;;  %v13658_v22 = vld [vmem:[#allocation203_spill] sm:$0xff]  ;;  %v11482_v3 = vsel %vm4267_vm14, %v3760_v26, %v4779_v40 }
 0x8b7   :  { %v6250_v63 = vpop.f32.mrf.mxu1  ;;  %v13660_v9 = vpack.c.bf16 %v13658_v22, %v13659_v34  ;;  %13661 = vst [vmem:[#allocation34_spill] sm:$0xff] %v11482_v3  ;;  %v13663_v22 = vld [vmem:[#allocation54_spill] sm:$0xff] }
 0x8b8   :  { %v6251_v56 = vadd.f32 %v6250_v63, %v6082_v60  ;;  %6120 = vmatmul.bf16.gmra.mxu0 %v13651_v27  ;;  %vm4275_vm15 = vcmp.gt.f32.partialorder %v3762_v35, 0.0  ;;  %v4787_v47 = vmul.f32 0.01, %v3762_v35  ;;  %6458 = vmatmul.bf16.gmra.mxu2 %v13657_v46  ;;  %v13666_v60 = vld [vmem:[#allocation56_spill] sm:$0xff] }
 0x8ba   :  { %6289 = vmatmul.bf16.gmra.mxu1 %v13654_v38  ;;  %6627 = vmatmul.bf16.gmra.mxu3 %v13660_v9  ;;  %v11484_v16 = vsel %vm4275_vm15, %v3762_v35, %v4787_v47 }
 0x8bb   :  { %13662 = vst [vmem:[#allocation33_spill] sm:$0xff] %v11484_v16  ;;  %v6419_v28 = vpop.f32.mrf.mxu2 }
 0x8bc   :  { %v6420_v63 = vadd.f32 %v6419_v28, %v6251_v56  ;;  %v13664_v56 = vld [vmem:[#allocation53_spill] sm:$0xff] }
 0x8bd   :  { %v6588_v2 = vpop.f32.mrf.mxu3  ;;  %v6083_v27 = vpop.f32.mrf.mxu0  ;;  %v13665_v28 = vpack.c.bf16 %v13663_v22, %v13664_v56 }
 0x8be   :  { %v6084_v1 = vadd.f32 %v11460_v54, %v6083_v27  ;;  %v11489_v48 = vadd.f32 %v6588_v2, %v6420_v63  ;;  %v13667_v27 = vld [vmem:[#allocation55_spill] sm:$0xff]  ;;  %v13669_v63 = vld [vmem:[#allocation205_spill] sm:$0xff]  ;;  %v13670_v2 = vld [vmem:[#allocation204_spill] sm:$0xff] }
 0x8bf   :  { %v6252_v6 = vpop.f32.mrf.mxu1  ;;  %v13668_v3 = vpack.c.bf16 %v13666_v60, %v13667_v27 }
 0x8c0   :  { %v6253_v46 = vadd.f32 %v6252_v6, %v6084_v1  ;;  %v13671_v1 = vpack.c.bf16 %v13669_v63, %v13670_v2  ;;  %v13672_v6 = vld [vmem:[#allocation207_spill] sm:$0xff] }
 0x8c3   :  { %v6421_v38 = vpop.f32.mrf.mxu2 }
 0x8c4   :  { %v6422_v34 = vadd.f32 %v6421_v38, %v6253_v46  ;;  %v13673_v46 = vld [vmem:[#allocation206_spill] sm:$0xff] }
 0x8c5   :  { %v6590_v9 = vpop.f32.mrf.mxu3  ;;  %v6086_v26 = vpop.f32.mrf.mxu0  ;;  %v13674_v38 = vpack.c.bf16 %v13672_v6, %v13673_v46  ;;  %v13675_v46 = vld [vmem:[#allocation58_spill] sm:$0xff] }
 0x8c6   :  { %v6087_v40 = vadd.f32 %v11460_v54, %v6086_v26  ;;  %v11492_v47 = vadd.f32 %v6590_v9, %v6422_v34 }
 0x8c7   :  { %v6255_v35 = vpop.f32.mrf.mxu1 }
 0x8c8   :  { %v6256_v25 = vadd.f32 %v6255_v35, %v6087_v40  ;;  %6125 = vmatmul.bf16.gmra.mxu0 %v13665_v28  ;;  %6463 = vmatmul.bf16.gmra.mxu2 %v13671_v1 }
 0x8ca   :  { %6294 = vmatmul.bf16.gmra.mxu1 %v13668_v3  ;;  %6632 = vmatmul.bf16.gmra.mxu3 %v13674_v38 }
 0x8cb   :  { %v6424_v26 = vpop.f32.mrf.mxu2 }
 0x8cc   :  { %v6425_v34 = vadd.f32 %v6424_v26, %v6256_v25  ;;  %v13676_v25 = vld [vmem:[#allocation57_spill] sm:$0xff] }
 0x8cd   :  { %v6593_v9 = vpop.f32.mrf.mxu3  ;;  %v6088_v40 = vpop.f32.mrf.mxu0  ;;  %v13677_v38 = vpack.c.bf16 %v13675_v46, %v13676_v25  ;;  %v13678_v26 = vld [vmem:[#allocation61_spill] sm:$0xff] }
 0x8ce   :  { %v6089_v35 = vadd.f32 %v11460_v54, %v6088_v40  ;;  %v11507_v56 = vadd.f32 %v6593_v9, %v6425_v34  ;;  %v13679_v40 = vld [vmem:[#allocation60_spill] sm:$0xff]  ;;  %v13681_v34 = vld [vmem:[#allocation209_spill] sm:$0xff] }
 0x8cf   :  { %v6257_v22 = vpop.f32.mrf.mxu1  ;;  %v13680_v55 = vpack.c.bf16 %v13678_v26, %v13679_v40  ;;  %v13682_v9 = vld [vmem:[#allocation208_spill] sm:$0xff]  ;;  %v8449_v40 = vld [vmem:[#allocation8 + $0x160] sm:$0xff] }
 0x8d0   :  { %v6258_v28 = vadd.f32 %v6257_v22, %v6089_v35  ;;  %v13683_v35 = vpack.c.bf16 %v13681_v34, %v13682_v9  ;;  %v13684_v22 = vld [vmem:[#allocation211_spill] sm:$0xff]  ;;  %6920 = vmatpush.bf16.msrb.mxu1 %v8449_v40 }
 0x8d3   :  { %v6426_v60 = vpop.f32.mrf.mxu2 }
 0x8d4   :  { %v6427_v3 = vadd.f32 %v6426_v60, %v6258_v28  ;;  %v13685_v28 = vld [vmem:[#allocation210_spill] sm:$0xff] }
 0x8d5   :  { %v6595_v27 = vpop.f32.mrf.mxu3  ;;  %v6091_v16 = vpop.f32.mrf.mxu0  ;;  %v13686_v60 = vpack.c.bf16 %v13684_v22, %v13685_v28 }
 0x8d6   :  { %v6092_v63 = vadd.f32 %v11460_v54, %v6091_v16  ;;  %v11510_v1 = vadd.f32 %v6595_v27, %v6427_v3  ;;  %v8457_v16 = vld [vmem:[#allocation8 + $0x1a0] sm:$0xff] }
 0x8d7   :  { %v6260_v2 = vpop.f32.mrf.mxu1  ;;  %v8441_v3 = vld [vmem:[#allocation8 + $0x120] sm:$0xff]  ;;  %7089 = vmatpush.bf16.msrb.mxu2 %v8457_v16 }
 0x8d8   :  { %v6261_v6 = vadd.f32 %v6260_v2, %v6092_v63  ;;  %6130 = vmatmul.bf16.gmra.mxu0 %v13677_v38  ;;  %6468 = vmatmul.bf16.gmra.mxu2 %v13683_v35  ;;  %v8465_v27 = vld [vmem:[#allocation8 + $0x1e0] sm:$0xff] }
 0x8d9   :  { %6751 = vmatpush.bf16.msrb.mxu0 %v8441_v3  ;;  %7258 = vmatpush.bf16.msrb.mxu3 %v8465_v27  ;;  %v13688_v27 = vld [vmem:[#allocation63_spill] sm:$0xff] }
 0x8da   :  { %6299 = vmatmul.bf16.gmra.mxu1 %v13680_v55  ;;  %6637 = vmatmul.bf16.gmra.mxu3 %v13686_v60 }
 0x8db   :  { %v6429_v63 = vpop.f32.mrf.mxu2 }
 0x8dc   :  { %v6430_v2 = vadd.f32 %v6429_v63, %v6261_v6  ;;  %v13687_v63 = vld [vmem:[#allocation64_spill] sm:$0xff] }
 0x8dd   :  { %v6598_v46 = vpop.f32.mrf.mxu3  ;;  %v6093_v25 = vpop.f32.mrf.mxu0  ;;  %v13689_v42 = vpack.c.bf16 %v13687_v63, %v13688_v27 }
 0x8de   :  { %v6094_v55 = vadd.f32 %v11460_v54, %v6093_v25  ;;  %v11525_v26 = vadd.f32 %v6598_v46, %v6430_v2  ;;  %v13690_v25 = vld [vmem:[#allocation67_spill] sm:$0xff]  ;;  %v13691_v2 = vld [vmem:[#allocation66_spill] sm:$0xff] }
 0x8df   :  { %v6262_v38 = vpop.f32.mrf.mxu1  ;;  %v13692_v46 = vpack.c.bf16 %v13690_v25, %v13691_v2 }
 0x8e0   :  { %v6263_v34 = vadd.f32 %v6262_v38, %v6094_v55  ;;  %v13693_v55 = vld [vmem:[#allocation213_spill] sm:$0xff]  ;;  %v13694_v38 = vld [vmem:[#allocation212_spill] sm:$0xff] }
 0x8e1   :  { %v13695_v40 = vpack.c.bf16 %v13693_v55, %v13694_v38 }
 0x8e3   :  { %v6431_v9 = vpop.f32.mrf.mxu2 }
 0x8e4   :  { %v6432_v35 = vadd.f32 %v6431_v9, %v6263_v34  ;;  %v13696_v34 = vld [vmem:[#allocation215_spill] sm:$0xff]  ;;  %v13697_v9 = vld [vmem:[#allocation214_spill] sm:$0xff] }
 0x8e5   :  { %v6600_v22 = vpop.f32.mrf.mxu3  ;;  %v6096_v28 = vpop.f32.mrf.mxu0  ;;  %v13698_v44 = vpack.c.bf16 %v13696_v34, %v13697_v9  ;;  %v13701_v34 = vld [vmem:[#allocation70_spill] sm:$0xff] }
 0x8e6   :  { %v6097_v60 = vadd.f32 %v11460_v54, %v6096_v28  ;;  %v11528_v3 = vadd.f32 %v6600_v22, %v6432_v35 }
 0x8e7   :  { %v6265_v16 = vpop.f32.mrf.mxu1 }
 0x8e8   :  { %v6266_v6 = vadd.f32 %v6265_v16, %v6097_v60  ;;  %6135 = vmatmul.bf16.gmra.mxu0 %v13689_v42  ;;  %6473 = vmatmul.bf16.gmra.mxu2 %v13695_v40 }
 0x8ea   :  { %6304 = vmatmul.bf16.gmra.mxu1 %v13692_v46  ;;  %6642 = vmatmul.bf16.gmra.mxu3 %v13698_v44 }
 0x8eb   :  { %v6434_v28 = vpop.f32.mrf.mxu2 }
 0x8ec   :  { %v6435_v35 = vadd.f32 %v6434_v28, %v6266_v6  ;;  %v13702_v6 = vld [vmem:[#allocation69_spill] sm:$0xff] }
 0x8ed   :  { %v6603_v22 = vpop.f32.mrf.mxu3  ;;  %v6098_v60 = vpop.f32.mrf.mxu0  ;;  %v13703_v9 = vpack.c.bf16 %v13701_v34, %v13702_v6  ;;  %v13704_v28 = vld [vmem:[#allocation73_spill] sm:$0xff] }
 0x8ee   :  { %v6099_v16 = vadd.f32 %v11460_v54, %v6098_v60  ;;  %v11543_v42 = vadd.f32 %v6603_v22, %v6435_v35  ;;  %v13705_v60 = vld [vmem:[#allocation72_spill] sm:$0xff]  ;;  %v13707_v35 = vld [vmem:[#allocation217_spill] sm:$0xff] }
 0x8ef   :  { %v6267_v63 = vpop.f32.mrf.mxu1  ;;  %v13706_v20 = vpack.c.bf16 %v13704_v28, %v13705_v60  ;;  %v13708_v22 = vld [vmem:[#allocation216_spill] sm:$0xff] }
 0x8f0   :  { %13699 = vst [vmem:[#allocation36_spill] sm:$0xff] %v11543_v42  ;;  %v6268_v27 = vadd.f32 %v6267_v63, %v6099_v16  ;;  %v13709_v16 = vpack.c.bf16 %v13707_v35, %v13708_v22  ;;  %v13710_v63 = vld [vmem:[#allocation219_spill] sm:$0xff] }
 0x8f3   :  { %v6436_v25 = vpop.f32.mrf.mxu2 }
 0x8f4   :  { %v6437_v2 = vadd.f32 %v6436_v25, %v6268_v27  ;;  %v13711_v27 = vld [vmem:[#allocation218_spill] sm:$0xff] }
 0x8f5   :  { %v6605_v46 = vpop.f32.mrf.mxu3  ;;  %v6101_v39 = vpop.f32.mrf.mxu0  ;;  %v13712_v25 = vpack.c.bf16 %v13710_v63, %v13711_v27  ;;  %v13715_v27 = vld [vmem:[#allocation76_spill] sm:$0xff] }
 0x8f6   :  { %v6102_v55 = vadd.f32 %v11460_v54, %v6101_v39  ;;  %v11546_v40 = vadd.f32 %v6605_v46, %v6437_v2 }
 0x8f7   :  { %v6270_v38 = vpop.f32.mrf.mxu1 }
 0x8f8   :  { %13700 = vst [vmem:[#allocation35_spill] sm:$0xff] %v11546_v40  ;;  %v6271_v44 = vadd.f32 %v6270_v38, %v6102_v55  ;;  %6140 = vmatmul.bf16.gmra.mxu0 %v13703_v9  ;;  %6478 = vmatmul.bf16.gmra.mxu2 %v13709_v16 }
 0x8fa   :  { %6309 = vmatmul.bf16.gmra.mxu1 %v13706_v20  ;;  %6647 = vmatmul.bf16.gmra.mxu3 %v13712_v25 }
 0x8fb   :  { %v6439_v39 = vpop.f32.mrf.mxu2 }
 0x8fc   :  { %v6440_v2 = vadd.f32 %v6439_v39, %v6271_v44  ;;  %v13716_v44 = vld [vmem:[#allocation75_spill] sm:$0xff] }
 0x8fd   :  { %v6608_v46 = vpop.f32.mrf.mxu3  ;;  %v6103_v55 = vpop.f32.mrf.mxu0  ;;  %v13717_v25 = vpack.c.bf16 %v13715_v27, %v13716_v44  ;;  %v13718_v39 = vld [vmem:[#allocation79_spill] sm:$0xff] }
 0x8fe   :  { %v6104_v38 = vadd.f32 %v11460_v54, %v6103_v55  ;;  %v11561_v6 = vadd.f32 %v6608_v46, %v6440_v2  ;;  %v13719_v55 = vld [vmem:[#allocation78_spill] sm:$0xff]  ;;  %v13721_v2 = vld [vmem:[#allocation221_spill] sm:$0xff]  ;;  %v13722_v46 = vld [vmem:[#allocation220_spill] sm:$0xff] }
 0x8ff   :  { %v6272_v34 = vpop.f32.mrf.mxu1  ;;  %v13720_v42 = vpack.c.bf16 %v13718_v39, %v13719_v55 }
 0x900   :  { %13713 = vst [vmem:[#allocation185_spill] sm:$0xff] %v11561_v6  ;;  %v6273_v9 = vadd.f32 %v6272_v34, %v6104_v38  ;;  %v13723_v38 = vpack.c.bf16 %v13721_v2, %v13722_v46  ;;  %v13724_v34 = vld [vmem:[#allocation223_spill] sm:$0xff] }
 0x903   :  { %v6441_v28 = vpop.f32.mrf.mxu2 }
 0x904   :  { %v6442_v20 = vadd.f32 %v6441_v28, %v6273_v9  ;;  %v13725_v9 = vld [vmem:[#allocation222_spill] sm:$0xff] }
 0x905   :  { %v6610_v60 = vpop.f32.mrf.mxu3  ;;  %v6106_v40 = vpop.f32.mrf.mxu0  ;;  %v13726_v28 = vpack.c.bf16 %v13724_v34, %v13725_v9  ;;  %v13729_v9 = vld [vmem:[#allocation82_spill] sm:$0xff] }
 0x906   :  { %v6107_v35 = vadd.f32 %v11460_v54, %v6106_v40  ;;  %v11564_v16 = vadd.f32 %v6610_v60, %v6442_v20 }
 0x907   :  { %v6275_v22 = vpop.f32.mrf.mxu1 }
 0x908   :  { %13714 = vst [vmem:[#allocation184_spill] sm:$0xff] %v11564_v16  ;;  %v6276_v63 = vadd.f32 %v6275_v22, %v6107_v35  ;;  %6145 = vmatmul.bf16.gmra.mxu0 %v13717_v25  ;;  %6483 = vmatmul.bf16.gmra.mxu2 %v13723_v38 }
 0x90a   :  { %6314 = vmatmul.bf16.gmra.mxu1 %v13720_v42  ;;  %6652 = vmatmul.bf16.gmra.mxu3 %v13726_v28 }
 0x90b   :  { %v6444_v40 = vpop.f32.mrf.mxu2 }
 0x90c   :  { %v6445_v20 = vadd.f32 %v6444_v40, %v6276_v63  ;;  %v13730_v63 = vld [vmem:[#allocation81_spill] sm:$0xff] }
 0x90d   :  { %v6613_v60 = vpop.f32.mrf.mxu3  ;;  %v6108_v35 = vpop.f32.mrf.mxu0  ;;  %v13731_v28 = vpack.c.bf16 %v13729_v9, %v13730_v63  ;;  %v13732_v40 = vld [vmem:[#allocation85_spill] sm:$0xff] }
 0x90e   :  { %v6109_v22 = vadd.f32 %v11460_v54, %v6108_v35  ;;  %v11579_v44 = vadd.f32 %v6613_v60, %v6445_v20  ;;  %v13733_v35 = vld [vmem:[#allocation84_spill] sm:$0xff]  ;;  %v13735_v20 = vld [vmem:[#allocation225_spill] sm:$0xff] }
 0x90f   :  { %v6277_v27 = vpop.f32.mrf.mxu1  ;;  %v13734_v6 = vpack.c.bf16 %v13732_v40, %v13733_v35  ;;  %v13736_v60 = vld [vmem:[#allocation224_spill] sm:$0xff]  ;;  %v8448_v35 = vld [vmem:[#allocation8 + $0x158] sm:$0xff] }
 0x910   :  { %13727 = vst [vmem:[#allocation187_spill] sm:$0xff] %v11579_v44  ;;  %v6278_v25 = vadd.f32 %v6277_v27, %v6109_v22  ;;  %v13737_v22 = vpack.c.bf16 %v13735_v20, %v13736_v60  ;;  %v13738_v27 = vld [vmem:[#allocation227_spill] sm:$0xff]  ;;  %6921 = vmatpush.bf16.msrb.mxu1 %v8448_v35 }
 0x913   :  { %v6446_v39 = vpop.f32.mrf.mxu2 }
 0x914   :  { %v6447_v42 = vadd.f32 %v6446_v39, %v6278_v25  ;;  %v13739_v25 = vld [vmem:[#allocation226_spill] sm:$0xff] }
 0x915   :  { %v6615_v55 = vpop.f32.mrf.mxu3  ;;  %v6111_v16 = vpop.f32.mrf.mxu0  ;;  %v13740_v39 = vpack.c.bf16 %v13738_v27, %v13739_v25 }
 0x916   :  { %v6112_v2 = vadd.f32 %v11460_v54, %v6111_v16  ;;  %v11582_v38 = vadd.f32 %v6615_v55, %v6447_v42  ;;  %v8456_v16 = vld [vmem:[#allocation8 + $0x198] sm:$0xff] }
 0x917   :  { %v6280_v46 = vpop.f32.mrf.mxu1  ;;  %v8440_v42 = vld [vmem:[#allocation8 + $0x118] sm:$0xff]  ;;  %7090 = vmatpush.bf16.msrb.mxu2 %v8456_v16 }
 0x918   :  { %13728 = vst [vmem:[#allocation186_spill] sm:$0xff] %v11582_v38  ;;  %v6281_v34 = vadd.f32 %v6280_v46, %v6112_v2  ;;  %6150 = vmatmul.bf16.gmra.mxu0 %v13731_v28  ;;  %6488 = vmatmul.bf16.gmra.mxu2 %v13737_v22  ;;  %v8464_v55 = vld [vmem:[#allocation8 + $0x1d8] sm:$0xff] }
 0x919   :  { %6752 = vmatpush.bf16.msrb.mxu0 %v8440_v42  ;;  %7259 = vmatpush.bf16.msrb.mxu3 %v8464_v55  ;;  %v13744_v55 = vld [vmem:[#allocation87_spill] sm:$0xff] }
 0x91a   :  { %6319 = vmatmul.bf16.gmra.mxu1 %v13734_v6  ;;  %6657 = vmatmul.bf16.gmra.mxu3 %v13740_v39 }
 0x91b   :  { %v6449_v2 = vpop.f32.mrf.mxu2 }
 0x91c   :  { %v6450_v46 = vadd.f32 %v6449_v2, %v6281_v34  ;;  %v13743_v2 = vld [vmem:[#allocation88_spill] sm:$0xff] }
 0x91d   :  { %v6618_v9 = vpop.f32.mrf.mxu3  ;;  %v6113_v63 = vpop.f32.mrf.mxu0  ;;  %v13745_v38 = vpack.c.bf16 %v13743_v2, %v13744_v55 }
 0x91e   :  { %v6114_v6 = vadd.f32 %v11460_v54, %v6113_v63  ;;  %v11597_v40 = vadd.f32 %v6618_v9, %v6450_v46  ;;  %v13746_v63 = vld [vmem:[#allocation91_spill] sm:$0xff]  ;;  %v13747_v46 = vld [vmem:[#allocation90_spill] sm:$0xff] }
 0x91f   :  { %v6282_v28 = vpop.f32.mrf.mxu1  ;;  %v13748_v9 = vpack.c.bf16 %v13746_v63, %v13747_v46 }
 0x920   :  { %13741 = vst [vmem:[#allocation38_spill] sm:$0xff] %v11597_v40  ;;  %v6283_v20 = vadd.f32 %v6282_v28, %v6114_v6  ;;  %v13749_v6 = vld [vmem:[#allocation229_spill] sm:$0xff]  ;;  %v13750_v28 = vld [vmem:[#allocation228_spill] sm:$0xff] }
 0x921   :  { %v13751_v35 = vpack.c.bf16 %v13749_v6, %v13750_v28 }
 0x923   :  { %v6451_v60 = vpop.f32.mrf.mxu2 }
 0x924   :  { %v6452_v22 = vadd.f32 %v6451_v60, %v6283_v20  ;;  %v13752_v20 = vld [vmem:[#allocation231_spill] sm:$0xff]  ;;  %v13753_v60 = vld [vmem:[#allocation230_spill] sm:$0xff] }
 0x925   :  { %v6620_v27 = vpop.f32.mrf.mxu3  ;;  %v6116_v25 = vpop.f32.mrf.mxu0  ;;  %v13754_v40 = vpack.c.bf16 %v13752_v20, %v13753_v60  ;;  %v13757_v20 = vld [vmem:[#allocation94_spill] sm:$0xff] }
 0x926   :  { %v6117_v39 = vadd.f32 %v11460_v54, %v6116_v25  ;;  %v11600_v42 = vadd.f32 %v6620_v27, %v6452_v22 }
 0x927   :  { %v6285_v16 = vpop.f32.mrf.mxu1 }
 0x928   :  { %13742 = vst [vmem:[#allocation37_spill] sm:$0xff] %v11600_v42  ;;  %v6286_v34 = vadd.f32 %v6285_v16, %v6117_v39  ;;  %6155 = vmatmul.bf16.gmra.mxu0 %v13745_v38  ;;  %6493 = vmatmul.bf16.gmra.mxu2 %v13751_v35 }
 0x92a   :  { %6324 = vmatmul.bf16.gmra.mxu1 %v13748_v9  ;;  %6662 = vmatmul.bf16.gmra.mxu3 %v13754_v40 }
 0x92b   :  { %v6454_v25 = vpop.f32.mrf.mxu2 }
 0x92c   :  { %v6455_v22 = vadd.f32 %v6454_v25, %v6286_v34  ;;  %v13758_v34 = vld [vmem:[#allocation93_spill] sm:$0xff] }
 0x92d   :  { %v6623_v27 = vpop.f32.mrf.mxu3  ;;  %v6118_v39 = vpop.f32.mrf.mxu0  ;;  %v13759_v60 = vpack.c.bf16 %v13757_v20, %v13758_v34  ;;  %v13760_v25 = vld [vmem:[#allocation97_spill] sm:$0xff] }
 0x92e   :  { %v6119_v16 = vadd.f32 %v11460_v54, %v6118_v39  ;;  %v11615_v38 = vadd.f32 %v6623_v27, %v6455_v22  ;;  %v13761_v39 = vld [vmem:[#allocation96_spill] sm:$0xff]  ;;  %v13763_v22 = vld [vmem:[#allocation233_spill] sm:$0xff] }
 0x92f   :  { %v6287_v2 = vpop.f32.mrf.mxu1  ;;  %v13762_v44 = vpack.c.bf16 %v13760_v25, %v13761_v39  ;;  %v13764_v27 = vld [vmem:[#allocation232_spill] sm:$0xff] }
 0x930   :  { %13755 = vst [vmem:[#allocation40_spill] sm:$0xff] %v11615_v38  ;;  %v6288_v55 = vadd.f32 %v6287_v2, %v6119_v16  ;;  %v13765_v16 = vpack.c.bf16 %v13763_v22, %v13764_v27  ;;  %v13766_v2 = vld [vmem:[#allocation235_spill] sm:$0xff] }
 0x933   :  { %v6456_v63 = vpop.f32.mrf.mxu2 }
 0x934   :  { %v6457_v46 = vadd.f32 %v6456_v63, %v6288_v55  ;;  %v13767_v55 = vld [vmem:[#allocation234_spill] sm:$0xff] }
 0x935   :  { %v6625_v9 = vpop.f32.mrf.mxu3  ;;  %v6121_v42 = vpop.f32.mrf.mxu0  ;;  %v13768_v63 = vpack.c.bf16 %v13766_v2, %v13767_v55  ;;  %v13771_v55 = vld [vmem:[#allocation100_spill] sm:$0xff] }
 0x936   :  { %v6122_v6 = vadd.f32 %v11460_v54, %v6121_v42  ;;  %v11618_v35 = vadd.f32 %v6625_v9, %v6457_v46 }
 0x937   :  { %v6290_v28 = vpop.f32.mrf.mxu1 }
 0x938   :  { %13756 = vst [vmem:[#allocation39_spill] sm:$0xff] %v11618_v35  ;;  %v6291_v40 = vadd.f32 %v6290_v28, %v6122_v6  ;;  %6160 = vmatmul.bf16.gmra.mxu0 %v13759_v60  ;;  %6498 = vmatmul.bf16.gmra.mxu2 %v13765_v16 }
 0x93a   :  { %6329 = vmatmul.bf16.gmra.mxu1 %v13762_v44  ;;  %6667 = vmatmul.bf16.gmra.mxu3 %v13768_v63 }
 0x93b   :  { %v6459_v42 = vpop.f32.mrf.mxu2 }
 0x93c   :  { %v6460_v46 = vadd.f32 %v6459_v42, %v6291_v40  ;;  %v13772_v40 = vld [vmem:[#allocation99_spill] sm:$0xff] }
 0x93d   :  { %v6628_v9 = vpop.f32.mrf.mxu3  ;;  %v6123_v6 = vpop.f32.mrf.mxu0  ;;  %v13773_v63 = vpack.c.bf16 %v13771_v55, %v13772_v40  ;;  %v13774_v42 = vld [vmem:[#allocation103_spill] sm:$0xff] }
 0x93e   :  { %v6124_v28 = vadd.f32 %v11460_v54, %v6123_v6  ;;  %v11633_v34 = vadd.f32 %v6628_v9, %v6460_v46  ;;  %v13775_v6 = vld [vmem:[#allocation102_spill] sm:$0xff]  ;;  %v13777_v46 = vld [vmem:[#allocation237_spill] sm:$0xff]  ;;  %v13778_v9 = vld [vmem:[#allocation236_spill] sm:$0xff] }
 0x93f   :  { %v6292_v20 = vpop.f32.mrf.mxu1  ;;  %v13776_v38 = vpack.c.bf16 %v13774_v42, %v13775_v6 }
 0x940   :  { %13769 = vst [vmem:[#allocation189_spill] sm:$0xff] %v11633_v34  ;;  %v6293_v60 = vadd.f32 %v6292_v20, %v6124_v28  ;;  %v13779_v28 = vpack.c.bf16 %v13777_v46, %v13778_v9  ;;  %v13780_v20 = vld [vmem:[#allocation239_spill] sm:$0xff] }
 0x943   :  { %v6461_v25 = vpop.f32.mrf.mxu2 }
 0x944   :  { %v6462_v44 = vadd.f32 %v6461_v25, %v6293_v60  ;;  %v13781_v60 = vld [vmem:[#allocation238_spill] sm:$0xff] }
 0x945   :  { %v6630_v39 = vpop.f32.mrf.mxu3  ;;  %v6126_v35 = vpop.f32.mrf.mxu0  ;;  %v13782_v25 = vpack.c.bf16 %v13780_v20, %v13781_v60  ;;  %v13785_v60 = vld [vmem:[#allocation106_spill] sm:$0xff] }
 0x946   :  { %v6127_v22 = vadd.f32 %v11460_v54, %v6126_v35  ;;  %v11636_v16 = vadd.f32 %v6630_v39, %v6462_v44 }
 0x947   :  { %v6295_v27 = vpop.f32.mrf.mxu1 }
 0x948   :  { %13770 = vst [vmem:[#allocation188_spill] sm:$0xff] %v11636_v16  ;;  %v6296_v2 = vadd.f32 %v6295_v27, %v6127_v22  ;;  %6165 = vmatmul.bf16.gmra.mxu0 %v13773_v63  ;;  %6503 = vmatmul.bf16.gmra.mxu2 %v13779_v28 }
 0x94a   :  { %6334 = vmatmul.bf16.gmra.mxu1 %v13776_v38  ;;  %6672 = vmatmul.bf16.gmra.mxu3 %v13782_v25 }
 0x94b   :  { %v6464_v35 = vpop.f32.mrf.mxu2 }
 0x94c   :  { %v6465_v44 = vadd.f32 %v6464_v35, %v6296_v2  ;;  %v13786_v2 = vld [vmem:[#allocation105_spill] sm:$0xff] }
 0x94d   :  { %v6633_v39 = vpop.f32.mrf.mxu3  ;;  %v6128_v22 = vpop.f32.mrf.mxu0  ;;  %v13787_v25 = vpack.c.bf16 %v13785_v60, %v13786_v2  ;;  %v13788_v35 = vld [vmem:[#allocation109_spill] sm:$0xff] }
 0x94e   :  { %v6129_v27 = vadd.f32 %v11460_v54, %v6128_v22  ;;  %v11651_v40 = vadd.f32 %v6633_v39, %v6465_v44  ;;  %v13789_v22 = vld [vmem:[#allocation108_spill] sm:$0xff]  ;;  %v13791_v44 = vld [vmem:[#allocation241_spill] sm:$0xff] }
 0x94f   :  { %v6297_v55 = vpop.f32.mrf.mxu1  ;;  %v13790_v34 = vpack.c.bf16 %v13788_v35, %v13789_v22  ;;  %v13792_v39 = vld [vmem:[#allocation240_spill] sm:$0xff]  ;;  %v8447_v22 = vld [vmem:[#allocation8 + $0x150] sm:$0xff] }
 0x950   :  { %13783 = vst [vmem:[#allocation191_spill] sm:$0xff] %v11651_v40  ;;  %v6298_v63 = vadd.f32 %v6297_v55, %v6129_v27  ;;  %v13793_v27 = vpack.c.bf16 %v13791_v44, %v13792_v39  ;;  %v13794_v55 = vld [vmem:[#allocation243_spill] sm:$0xff]  ;;  %6922 = vmatpush.bf16.msrb.mxu1 %v8447_v22 }
 0x953   :  { %v6466_v42 = vpop.f32.mrf.mxu2 }
 0x954   :  { %v6467_v38 = vadd.f32 %v6466_v42, %v6298_v63  ;;  %v13795_v63 = vld [vmem:[#allocation242_spill] sm:$0xff] }
 0x955   :  { %v6635_v6 = vpop.f32.mrf.mxu3  ;;  %v6131_v16 = vpop.f32.mrf.mxu0  ;;  %v13796_v42 = vpack.c.bf16 %v13794_v55, %v13795_v63 }
 0x956   :  { %v6132_v46 = vadd.f32 %v11460_v54, %v6131_v16  ;;  %v11654_v28 = vadd.f32 %v6635_v6, %v6467_v38  ;;  %v8455_v16 = vld [vmem:[#allocation8 + $0x190] sm:$0xff] }
 0x957   :  { %v6300_v9 = vpop.f32.mrf.mxu1  ;;  %v8439_v38 = vld [vmem:[#allocation8 + $0x110] sm:$0xff]  ;;  %7091 = vmatpush.bf16.msrb.mxu2 %v8455_v16 }
 0x958   :  { %13784 = vst [vmem:[#allocation190_spill] sm:$0xff] %v11654_v28  ;;  %v6301_v20 = vadd.f32 %v6300_v9, %v6132_v46  ;;  %6170 = vmatmul.bf16.gmra.mxu0 %v13787_v25  ;;  %6508 = vmatmul.bf16.gmra.mxu2 %v13793_v27  ;;  %v8463_v6 = vld [vmem:[#allocation8 + $0x1d0] sm:$0xff] }
 0x959   :  { %6753 = vmatpush.bf16.msrb.mxu0 %v8439_v38  ;;  %7260 = vmatpush.bf16.msrb.mxu3 %v8463_v6  ;;  %v13800_v6 = vld [vmem:[#allocation111_spill] sm:$0xff] }
 0x95a   :  { %6339 = vmatmul.bf16.gmra.mxu1 %v13790_v34  ;;  %6677 = vmatmul.bf16.gmra.mxu3 %v13796_v42 }
 0x95b   :  { %v6469_v46 = vpop.f32.mrf.mxu2 }
 0x95c   :  { %v6470_v9 = vadd.f32 %v6469_v46, %v6301_v20  ;;  %v13799_v46 = vld [vmem:[#allocation112_spill] sm:$0xff] }
 0x95d   :  { %v6638_v60 = vpop.f32.mrf.mxu3  ;;  %v6133_v2 = vpop.f32.mrf.mxu0  ;;  %v13801_v28 = vpack.c.bf16 %v13799_v46, %v13800_v6 }
 0x95e   :  { %v6134_v34 = vadd.f32 %v11460_v54, %v6133_v2  ;;  %v11669_v35 = vadd.f32 %v6638_v60, %v6470_v9  ;;  %v13802_v2 = vld [vmem:[#allocation115_spill] sm:$0xff]  ;;  %v13803_v9 = vld [vmem:[#allocation114_spill] sm:$0xff] }
 0x95f   :  { %v6302_v25 = vpop.f32.mrf.mxu1  ;;  %v13804_v60 = vpack.c.bf16 %v13802_v2, %v13803_v9 }
 0x960   :  { %13797 = vst [vmem:[#allocation42_spill] sm:$0xff] %v11669_v35  ;;  %v6303_v44 = vadd.f32 %v6302_v25, %v6134_v34  ;;  %v13805_v34 = vld [vmem:[#allocation245_spill] sm:$0xff]  ;;  %v13806_v25 = vld [vmem:[#allocation244_spill] sm:$0xff] }
 0x961   :  { %v13807_v22 = vpack.c.bf16 %v13805_v34, %v13806_v25 }
 0x963   :  { %v6471_v39 = vpop.f32.mrf.mxu2 }
 0x964   :  { %v6472_v27 = vadd.f32 %v6471_v39, %v6303_v44  ;;  %v13808_v44 = vld [vmem:[#allocation247_spill] sm:$0xff]  ;;  %v13809_v39 = vld [vmem:[#allocation246_spill] sm:$0xff] }
 0x965   :  { %v6640_v55 = vpop.f32.mrf.mxu3  ;;  %v6136_v63 = vpop.f32.mrf.mxu0  ;;  %v13810_v35 = vpack.c.bf16 %v13808_v44, %v13809_v39  ;;  %v13813_v44 = vld [vmem:[#allocation118_spill] sm:$0xff] }
 0x966   :  { %v6137_v42 = vadd.f32 %v11460_v54, %v6136_v63  ;;  %v11672_v38 = vadd.f32 %v6640_v55, %v6472_v27 }
 0x967   :  { %v6305_v16 = vpop.f32.mrf.mxu1 }
 0x968   :  { %13798 = vst [vmem:[#allocation41_spill] sm:$0xff] %v11672_v38  ;;  %v6306_v20 = vadd.f32 %v6305_v16, %v6137_v42  ;;  %6175 = vmatmul.bf16.gmra.mxu0 %v13801_v28  ;;  %6513 = vmatmul.bf16.gmra.mxu2 %v13807_v22 }
 0x96a   :  { %6344 = vmatmul.bf16.gmra.mxu1 %v13804_v60  ;;  %6682 = vmatmul.bf16.gmra.mxu3 %v13810_v35 }
 0x96b   :  { %v6474_v63 = vpop.f32.mrf.mxu2 }
 0x96c   :  { %v6475_v27 = vadd.f32 %v6474_v63, %v6306_v20  ;;  %v13814_v20 = vld [vmem:[#allocation117_spill] sm:$0xff] }
 0x96d   :  { %v6643_v55 = vpop.f32.mrf.mxu3  ;;  %v6138_v42 = vpop.f32.mrf.mxu0  ;;  %v13815_v39 = vpack.c.bf16 %v13813_v44, %v13814_v20  ;;  %v13816_v63 = vld [vmem:[#allocation121_spill] sm:$0xff] }
 0x96e   :  { %v6139_v16 = vadd.f32 %v11460_v54, %v6138_v42  ;;  %v11687_v28 = vadd.f32 %v6643_v55, %v6475_v27  ;;  %v13817_v42 = vld [vmem:[#allocation120_spill] sm:$0xff]  ;;  %v13819_v27 = vld [vmem:[#allocation249_spill] sm:$0xff] }
 0x96f   :  { %v6307_v46 = vpop.f32.mrf.mxu1  ;;  %v13818_v40 = vpack.c.bf16 %v13816_v63, %v13817_v42  ;;  %v13820_v55 = vld [vmem:[#allocation248_spill] sm:$0xff] }
 0x970   :  { %13811 = vst [vmem:[#allocation44_spill] sm:$0xff] %v11687_v28  ;;  %v6308_v6 = vadd.f32 %v6307_v46, %v6139_v16  ;;  %v13821_v16 = vpack.c.bf16 %v13819_v27, %v13820_v55  ;;  %v13822_v46 = vld [vmem:[#allocation251_spill] sm:$0xff] }
 0x973   :  { %v6476_v2 = vpop.f32.mrf.mxu2 }
 0x974   :  { %v6477_v9 = vadd.f32 %v6476_v2, %v6308_v6  ;;  %v13823_v6 = vld [vmem:[#allocation250_spill] sm:$0xff] }
 0x975   :  { %v6645_v60 = vpop.f32.mrf.mxu3  ;;  %v6141_v38 = vpop.f32.mrf.mxu0  ;;  %v13824_v2 = vpack.c.bf16 %v13822_v46, %v13823_v6  ;;  %v13827_v6 = vld [vmem:[#allocation124_spill] sm:$0xff] }
 0x976   :  { %v6142_v34 = vadd.f32 %v11460_v54, %v6141_v38  ;;  %v11690_v22 = vadd.f32 %v6645_v60, %v6477_v9 }
 0x977   :  { %v6310_v25 = vpop.f32.mrf.mxu1 }
 0x978   :  { %13812 = vst [vmem:[#allocation43_spill] sm:$0xff] %v11690_v22  ;;  %v6311_v35 = vadd.f32 %v6310_v25, %v6142_v34  ;;  %6180 = vmatmul.bf16.gmra.mxu0 %v13815_v39  ;;  %6518 = vmatmul.bf16.gmra.mxu2 %v13821_v16 }
 0x97a   :  { %6349 = vmatmul.bf16.gmra.mxu1 %v13818_v40  ;;  %6687 = vmatmul.bf16.gmra.mxu3 %v13824_v2 }
 0x97b   :  { %v6479_v38 = vpop.f32.mrf.mxu2 }
 0x97c   :  { %v6480_v9 = vadd.f32 %v6479_v38, %v6311_v35  ;;  %v13828_v35 = vld [vmem:[#allocation123_spill] sm:$0xff] }
 0x97d   :  { %v6648_v60 = vpop.f32.mrf.mxu3  ;;  %v6143_v34 = vpop.f32.mrf.mxu0  ;;  %v13829_v2 = vpack.c.bf16 %v13827_v6, %v13828_v35  ;;  %v13830_v38 = vld [vmem:[#allocation127_spill] sm:$0xff] }
 0x97e   :  { %v6144_v25 = vadd.f32 %v11460_v54, %v6143_v34  ;;  %v11705_v20 = vadd.f32 %v6648_v60, %v6480_v9  ;;  %v13831_v34 = vld [vmem:[#allocation126_spill] sm:$0xff]  ;;  %v13833_v9 = vld [vmem:[#allocation253_spill] sm:$0xff]  ;;  %v13834_v60 = vld [vmem:[#allocation252_spill] sm:$0xff] }
 0x97f   :  { %v6312_v44 = vpop.f32.mrf.mxu1  ;;  %v13832_v28 = vpack.c.bf16 %v13830_v38, %v13831_v34 }
 0x980   :  { %13825 = vst [vmem:[#allocation193_spill] sm:$0xff] %v11705_v20  ;;  %v6313_v39 = vadd.f32 %v6312_v44, %v6144_v25  ;;  %v13835_v25 = vpack.c.bf16 %v13833_v9, %v13834_v60  ;;  %v13836_v44 = vld [vmem:[#allocation255_spill] sm:$0xff] }
 0x983   :  { %v6481_v63 = vpop.f32.mrf.mxu2 }
 0x984   :  { %v6482_v40 = vadd.f32 %v6481_v63, %v6313_v39  ;;  %v13837_v39 = vld [vmem:[#allocation254_spill] sm:$0xff] }
 0x985   :  { %v6650_v42 = vpop.f32.mrf.mxu3  ;;  %v6146_v22 = vpop.f32.mrf.mxu0  ;;  %v13838_v63 = vpack.c.bf16 %v13836_v44, %v13837_v39  ;;  %v13841_v39 = vld [vmem:[#allocation129_spill] sm:$0xff] }
 0x986   :  { %v6147_v27 = vadd.f32 %v11460_v54, %v6146_v22  ;;  %v11708_v16 = vadd.f32 %v6650_v42, %v6482_v40 }
 0x987   :  { %v6315_v55 = vpop.f32.mrf.mxu1 }
 0x988   :  { %13826 = vst [vmem:[#allocation192_spill] sm:$0xff] %v11708_v16  ;;  %v6316_v46 = vadd.f32 %v6315_v55, %v6147_v27  ;;  %6185 = vmatmul.bf16.gmra.mxu0 %v13829_v2  ;;  %6523 = vmatmul.bf16.gmra.mxu2 %v13835_v25 }
 0x98a   :  { %6354 = vmatmul.bf16.gmra.mxu1 %v13832_v28  ;;  %6692 = vmatmul.bf16.gmra.mxu3 %v13838_v63 }
 0x98b   :  { %v6484_v22 = vpop.f32.mrf.mxu2 }
 0x98c   :  { %v6485_v40 = vadd.f32 %v6484_v22, %v6316_v46  ;;  %v13842_v46 = vld [vmem:[#allocation128_spill] sm:$0xff]  ;;  %v13844_v22 = vld [vmem:[#allocation131_spill] sm:$0xff] }
 0x98d   :  { %v6653_v42 = vpop.f32.mrf.mxu3  ;;  %v6148_v27 = vpop.f32.mrf.mxu0  ;;  %v13843_v63 = vpack.c.bf16 %v13841_v39, %v13842_v46 }
 0x98e   :  { %v6149_v55 = vadd.f32 %v11460_v54, %v6148_v27  ;;  %v11723_v35 = vadd.f32 %v6653_v42, %v6485_v40  ;;  %v13845_v27 = vld [vmem:[#allocation130_spill] sm:$0xff]  ;;  %v13847_v40 = vld [vmem:[#allocation257_spill] sm:$0xff]  ;;  %v13848_v42 = vld [vmem:[#allocation256_spill] sm:$0xff] }
 0x98f   :  { %v6317_v6 = vpop.f32.mrf.mxu1  ;;  %v13846_v20 = vpack.c.bf16 %v13844_v22, %v13845_v27  ;;  %v8446_v27 = vld [vmem:[#allocation8 + $0x148] sm:$0xff] }
 0x990   :  { %13839 = vst [vmem:[#allocation195_spill] sm:$0xff] %v11723_v35  ;;  %v6318_v2 = vadd.f32 %v6317_v6, %v6149_v55  ;;  %v13849_v55 = vpack.c.bf16 %v13847_v40, %v13848_v42  ;;  %v13850_v6 = vld [vmem:[#allocation259_spill] sm:$0xff]  ;;  %6923 = vmatpush.bf16.msrb.mxu1 %v8446_v27 }
 0x993   :  { %v6486_v38 = vpop.f32.mrf.mxu2 }
 0x994   :  { %v6487_v28 = vadd.f32 %v6486_v38, %v6318_v2  ;;  %v13851_v2 = vld [vmem:[#allocation258_spill] sm:$0xff] }
 0x995   :  { %v6655_v34 = vpop.f32.mrf.mxu3  ;;  %v6151_v16 = vpop.f32.mrf.mxu0  ;;  %v13852_v38 = vpack.c.bf16 %v13850_v6, %v13851_v2 }
 0x996   :  { %v6152_v9 = vadd.f32 %v11460_v54, %v6151_v16  ;;  %v11726_v25 = vadd.f32 %v6655_v34, %v6487_v28  ;;  %v8454_v16 = vld [vmem:[#allocation8 + $0x188] sm:$0xff] }
 0x997   :  { %v6320_v60 = vpop.f32.mrf.mxu1  ;;  %v8438_v28 = vld [vmem:[#allocation8 + $0x108] sm:$0xff]  ;;  %7092 = vmatpush.bf16.msrb.mxu2 %v8454_v16 }
 0x998   :  { %13840 = vst [vmem:[#allocation194_spill] sm:$0xff] %v11726_v25  ;;  %v6321_v44 = vadd.f32 %v6320_v60, %v6152_v9  ;;  %6190 = vmatmul.bf16.gmra.mxu0 %v13843_v63  ;;  %6528 = vmatmul.bf16.gmra.mxu2 %v13849_v55  ;;  %v8462_v34 = vld [vmem:[#allocation8 + $0x1c8] sm:$0xff] }
 0x999   :  { %6754 = vmatpush.bf16.msrb.mxu0 %v8438_v28  ;;  %7261 = vmatpush.bf16.msrb.mxu3 %v8462_v34  ;;  %v13856_v34 = vld [vmem:[#allocation132_spill] sm:$0xff] }
 0x99a   :  { %6359 = vmatmul.bf16.gmra.mxu1 %v13846_v20  ;;  %6697 = vmatmul.bf16.gmra.mxu3 %v13852_v38 }
 0x99b   :  { %v6489_v9 = vpop.f32.mrf.mxu2 }
 0x99c   :  { %v6490_v60 = vadd.f32 %v6489_v9, %v6321_v44  ;;  %v13855_v9 = vld [vmem:[#allocation133_spill] sm:$0xff] }
 0x99d   :  { %v6658_v39 = vpop.f32.mrf.mxu3  ;;  %v6153_v46 = vpop.f32.mrf.mxu0  ;;  %v13857_v25 = vpack.c.bf16 %v13855_v9, %v13856_v34 }
 0x99e   :  { %v6154_v20 = vadd.f32 %v11460_v54, %v6153_v46  ;;  %v11741_v22 = vadd.f32 %v6658_v39, %v6490_v60  ;;  %v13858_v46 = vld [vmem:[#allocation135_spill] sm:$0xff]  ;;  %v13859_v60 = vld [vmem:[#allocation134_spill] sm:$0xff] }
 0x99f   :  { %v6322_v63 = vpop.f32.mrf.mxu1  ;;  %v13860_v39 = vpack.c.bf16 %v13858_v46, %v13859_v60 }
 0x9a0   :  { %13853 = vst [vmem:[#allocation46_spill] sm:$0xff] %v11741_v22  ;;  %v6323_v40 = vadd.f32 %v6322_v63, %v6154_v20  ;;  %v13861_v20 = vld [vmem:[#allocation261_spill] sm:$0xff]  ;;  %v13862_v63 = vld [vmem:[#allocation260_spill] sm:$0xff] }
 0x9a1   :  { %v13863_v27 = vpack.c.bf16 %v13861_v20, %v13862_v63 }
 0x9a3   :  { %v6491_v42 = vpop.f32.mrf.mxu2 }
 0x9a4   :  { %v6492_v55 = vadd.f32 %v6491_v42, %v6323_v40  ;;  %v13864_v40 = vld [vmem:[#allocation263_spill] sm:$0xff]  ;;  %v13865_v42 = vld [vmem:[#allocation262_spill] sm:$0xff] }
 0x9a5   :  { %v6660_v6 = vpop.f32.mrf.mxu3  ;;  %v6156_v2 = vpop.f32.mrf.mxu0  ;;  %v13866_v22 = vpack.c.bf16 %v13864_v40, %v13865_v42  ;;  %v13869_v40 = vld [vmem:[#allocation137_spill] sm:$0xff] }
 0x9a6   :  { %v6157_v38 = vadd.f32 %v11460_v54, %v6156_v2  ;;  %v11744_v28 = vadd.f32 %v6660_v6, %v6492_v55 }
 0x9a7   :  { %v6325_v16 = vpop.f32.mrf.mxu1 }
 0x9a8   :  { %13854 = vst [vmem:[#allocation45_spill] sm:$0xff] %v11744_v28  ;;  %v6326_v44 = vadd.f32 %v6325_v16, %v6157_v38  ;;  %6195 = vmatmul.bf16.gmra.mxu0 %v13857_v25  ;;  %6533 = vmatmul.bf16.gmra.mxu2 %v13863_v27 }
 0x9aa   :  { %6364 = vmatmul.bf16.gmra.mxu1 %v13860_v39  ;;  %6702 = vmatmul.bf16.gmra.mxu3 %v13866_v22 }
 0x9ab   :  { %v6494_v2 = vpop.f32.mrf.mxu2 }
 0x9ac   :  { %v6495_v55 = vadd.f32 %v6494_v2, %v6326_v44  ;;  %v13870_v44 = vld [vmem:[#allocation136_spill] sm:$0xff]  ;;  %v13872_v2 = vld [vmem:[#allocation139_spill] sm:$0xff] }
 0x9ad   :  { %v6663_v6 = vpop.f32.mrf.mxu3  ;;  %v6158_v38 = vpop.f32.mrf.mxu0  ;;  %v13871_v42 = vpack.c.bf16 %v13869_v40, %v13870_v44 }
 0x9ae   :  { %v6159_v16 = vadd.f32 %v11460_v54, %v6158_v38  ;;  %v11759_v25 = vadd.f32 %v6663_v6, %v6495_v55  ;;  %v13873_v38 = vld [vmem:[#allocation138_spill] sm:$0xff]  ;;  %v13875_v55 = vld [vmem:[#allocation265_spill] sm:$0xff]  ;;  %v13876_v6 = vld [vmem:[#allocation264_spill] sm:$0xff] }
 0x9af   :  { %v6327_v9 = vpop.f32.mrf.mxu1  ;;  %v13874_v35 = vpack.c.bf16 %v13872_v2, %v13873_v38 }
 0x9b0   :  { %13867 = vst [vmem:[#allocation48_spill] sm:$0xff] %v11759_v25  ;;  %v6328_v34 = vadd.f32 %v6327_v9, %v6159_v16  ;;  %v13877_v16 = vpack.c.bf16 %v13875_v55, %v13876_v6  ;;  %v13878_v9 = vld [vmem:[#allocation267_spill] sm:$0xff] }
 0x9b3   :  { %v6496_v46 = vpop.f32.mrf.mxu2 }
 0x9b4   :  { %v6497_v60 = vadd.f32 %v6496_v46, %v6328_v34  ;;  %v13879_v34 = vld [vmem:[#allocation266_spill] sm:$0xff] }
 0x9b5   :  { %v6665_v39 = vpop.f32.mrf.mxu3  ;;  %v6161_v28 = vpop.f32.mrf.mxu0  ;;  %v13880_v46 = vpack.c.bf16 %v13878_v9, %v13879_v34  ;;  %v13883_v34 = vld [vmem:[#allocation141_spill] sm:$0xff] }
 0x9b6   :  { %v6162_v20 = vadd.f32 %v11460_v54, %v6161_v28  ;;  %v11762_v27 = vadd.f32 %v6665_v39, %v6497_v60 }
 0x9b7   :  { %v6330_v63 = vpop.f32.mrf.mxu1 }
 0x9b8   :  { %13868 = vst [vmem:[#allocation47_spill] sm:$0xff] %v11762_v27  ;;  %v6331_v22 = vadd.f32 %v6330_v63, %v6162_v20  ;;  %6200 = vmatmul.bf16.gmra.mxu0 %v13871_v42  ;;  %6538 = vmatmul.bf16.gmra.mxu2 %v13877_v16 }
 0x9ba   :  { %6369 = vmatmul.bf16.gmra.mxu1 %v13874_v35  ;;  %6707 = vmatmul.bf16.gmra.mxu3 %v13880_v46 }
 0x9bb   :  { %v6499_v28 = vpop.f32.mrf.mxu2 }
 0x9bc   :  { %v6500_v60 = vadd.f32 %v6499_v28, %v6331_v22  ;;  %v13884_v22 = vld [vmem:[#allocation140_spill] sm:$0xff]  ;;  %v13886_v28 = vld [vmem:[#allocation143_spill] sm:$0xff] }
 0x9bd   :  { %v6668_v39 = vpop.f32.mrf.mxu3  ;;  %v6163_v20 = vpop.f32.mrf.mxu0  ;;  %v13885_v46 = vpack.c.bf16 %v13883_v34, %v13884_v22 }
 0x9be   :  { %v6164_v63 = vadd.f32 %v11460_v54, %v6163_v20  ;;  %v11777_v44 = vadd.f32 %v6668_v39, %v6500_v60  ;;  %v13887_v20 = vld [vmem:[#allocation142_spill] sm:$0xff]  ;;  %v13889_v60 = vld [vmem:[#allocation269_spill] sm:$0xff]  ;;  %v13890_v39 = vld [vmem:[#allocation268_spill] sm:$0xff] }
 0x9bf   :  { %v6332_v40 = vpop.f32.mrf.mxu1  ;;  %v13888_v25 = vpack.c.bf16 %v13886_v28, %v13887_v20 }
 0x9c0   :  { %13881 = vst [vmem:[#allocation197_spill] sm:$0xff] %v11777_v44  ;;  %v6333_v42 = vadd.f32 %v6332_v40, %v6164_v63  ;;  %v13891_v63 = vpack.c.bf16 %v13889_v60, %v13890_v39  ;;  %v13892_v40 = vld [vmem:[#allocation271_spill] sm:$0xff] }
 0x9c3   :  { %v6501_v2 = vpop.f32.mrf.mxu2 }
 0x9c4   :  { %v6502_v35 = vadd.f32 %v6501_v2, %v6333_v42  ;;  %v13893_v42 = vld [vmem:[#allocation270_spill] sm:$0xff] }
 0x9c5   :  { %v6670_v38 = vpop.f32.mrf.mxu3  ;;  %v6166_v27 = vpop.f32.mrf.mxu0  ;;  %v13894_v2 = vpack.c.bf16 %v13892_v40, %v13893_v42  ;;  %v13897_v42 = vld [vmem:[#allocation145_spill] sm:$0xff] }
 0x9c6   :  { %v6167_v55 = vadd.f32 %v11460_v54, %v6166_v27  ;;  %v11780_v16 = vadd.f32 %v6670_v38, %v6502_v35 }
 0x9c7   :  { %v6335_v6 = vpop.f32.mrf.mxu1 }
 0x9c8   :  { %13882 = vst [vmem:[#allocation196_spill] sm:$0xff] %v11780_v16  ;;  %v6336_v9 = vadd.f32 %v6335_v6, %v6167_v55  ;;  %6205 = vmatmul.bf16.gmra.mxu0 %v13885_v46  ;;  %6543 = vmatmul.bf16.gmra.mxu2 %v13891_v63 }
 0x9ca   :  { %6374 = vmatmul.bf16.gmra.mxu1 %v13888_v25  ;;  %6712 = vmatmul.bf16.gmra.mxu3 %v13894_v2 }
 0x9cb   :  { %v6504_v27 = vpop.f32.mrf.mxu2 }
 0x9cc   :  { %v6505_v35 = vadd.f32 %v6504_v27, %v6336_v9  ;;  %v13898_v9 = vld [vmem:[#allocation144_spill] sm:$0xff]  ;;  %v13900_v27 = vld [vmem:[#allocation147_spill] sm:$0xff] }
 0x9cd   :  { %v6673_v38 = vpop.f32.mrf.mxu3  ;;  %v6168_v55 = vpop.f32.mrf.mxu0  ;;  %v13899_v2 = vpack.c.bf16 %v13897_v42, %v13898_v9 }
 0x9ce   :  { %v6169_v6 = vadd.f32 %v11460_v54, %v6168_v55  ;;  %v11795_v22 = vadd.f32 %v6673_v38, %v6505_v35  ;;  %v13901_v55 = vld [vmem:[#allocation146_spill] sm:$0xff]  ;;  %v13903_v35 = vld [vmem:[#allocation273_spill] sm:$0xff]  ;;  %v13904_v38 = vld [vmem:[#allocation272_spill] sm:$0xff] }
 0x9cf   :  { %v6337_v34 = vpop.f32.mrf.mxu1  ;;  %v13902_v44 = vpack.c.bf16 %v13900_v27, %v13901_v55  ;;  %v8445_v55 = vld [vmem:[#allocation8 + $0x140] sm:$0xff] }
 0x9d0   :  { %13895 = vst [vmem:[#allocation199_spill] sm:$0xff] %v11795_v22  ;;  %v6338_v46 = vadd.f32 %v6337_v34, %v6169_v6  ;;  %v13905_v6 = vpack.c.bf16 %v13903_v35, %v13904_v38  ;;  %v13906_v34 = vld [vmem:[#allocation275_spill] sm:$0xff]  ;;  %6924 = vmatpush.bf16.msrb.mxu1 %v8445_v55 }
 0x9d3   :  { %v6506_v28 = vpop.f32.mrf.mxu2 }
 0x9d4   :  { %v6507_v25 = vadd.f32 %v6506_v28, %v6338_v46  ;;  %v13907_v46 = vld [vmem:[#allocation274_spill] sm:$0xff] }
 0x9d5   :  { %v6675_v20 = vpop.f32.mrf.mxu3  ;;  %v6171_v16 = vpop.f32.mrf.mxu0  ;;  %v13908_v28 = vpack.c.bf16 %v13906_v34, %v13907_v46 }
 0x9d6   :  { %v6172_v60 = vadd.f32 %v11460_v54, %v6171_v16  ;;  %v11798_v63 = vadd.f32 %v6675_v20, %v6507_v25  ;;  %v8453_v16 = vld [vmem:[#allocation8 + $0x180] sm:$0xff] }
 0x9d7   :  { %v6340_v39 = vpop.f32.mrf.mxu1  ;;  %v8437_v25 = vld [vmem:[#allocation8 + $0x100] sm:$0xff]  ;;  %7093 = vmatpush.bf16.msrb.mxu2 %v8453_v16 }
 0x9d8   :  { %13896 = vst [vmem:[#allocation198_spill] sm:$0xff] %v11798_v63  ;;  %v6341_v40 = vadd.f32 %v6340_v39, %v6172_v60  ;;  %6210 = vmatmul.bf16.gmra.mxu0 %v13899_v2  ;;  %6548 = vmatmul.bf16.gmra.mxu2 %v13905_v6  ;;  %v8461_v20 = vld [vmem:[#allocation8 + $0x1c0] sm:$0xff] }
 0x9d9   :  { %6755 = vmatpush.bf16.msrb.mxu0 %v8437_v25  ;;  %7262 = vmatpush.bf16.msrb.mxu3 %v8461_v20  ;;  %v13912_v20 = vld [vmem:[#allocation148_spill] sm:$0xff] }
 0x9da   :  { %6379 = vmatmul.bf16.gmra.mxu1 %v13902_v44  ;;  %6717 = vmatmul.bf16.gmra.mxu3 %v13908_v28 }
 0x9db   :  { %v6509_v60 = vpop.f32.mrf.mxu2 }
 0x9dc   :  { %v6510_v39 = vadd.f32 %v6509_v60, %v6341_v40  ;;  %v13911_v60 = vld [vmem:[#allocation149_spill] sm:$0xff] }
 0x9dd   :  { %v6678_v42 = vpop.f32.mrf.mxu3  ;;  %v6173_v9 = vpop.f32.mrf.mxu0  ;;  %v13913_v63 = vpack.c.bf16 %v13911_v60, %v13912_v20 }
 0x9de   :  { %v6174_v44 = vadd.f32 %v11460_v54, %v6173_v9  ;;  %v11813_v27 = vadd.f32 %v6678_v42, %v6510_v39  ;;  %v13914_v9 = vld [vmem:[#allocation151_spill] sm:$0xff]  ;;  %v13915_v39 = vld [vmem:[#allocation150_spill] sm:$0xff] }
 0x9df   :  { %v6342_v2 = vpop.f32.mrf.mxu1  ;;  %v13916_v42 = vpack.c.bf16 %v13914_v9, %v13915_v39 }
 0x9e0   :  { %13909 = vst [vmem:[#allocation50_spill] sm:$0xff] %v11813_v27  ;;  %v6343_v35 = vadd.f32 %v6342_v2, %v6174_v44  ;;  %v13917_v44 = vld [vmem:[#allocation277_spill] sm:$0xff]  ;;  %v13918_v2 = vld [vmem:[#allocation276_spill] sm:$0xff] }
 0x9e1   :  { %v13919_v55 = vpack.c.bf16 %v13917_v44, %v13918_v2 }
 0x9e3   :  { %v6511_v38 = vpop.f32.mrf.mxu2 }
 0x9e4   :  { %v6512_v6 = vadd.f32 %v6511_v38, %v6343_v35  ;;  %v13920_v35 = vld [vmem:[#allocation279_spill] sm:$0xff]  ;;  %v13921_v38 = vld [vmem:[#allocation278_spill] sm:$0xff] }
 0x9e5   :  { %v6680_v34 = vpop.f32.mrf.mxu3  ;;  %v6176_v46 = vpop.f32.mrf.mxu0  ;;  %v13922_v27 = vpack.c.bf16 %v13920_v35, %v13921_v38  ;;  %v13925_v35 = vld [vmem:[#allocation153_spill] sm:$0xff] }
 0x9e6   :  { %v6177_v28 = vadd.f32 %v11460_v54, %v6176_v46  ;;  %v11816_v25 = vadd.f32 %v6680_v34, %v6512_v6 }
 0x9e7   :  { %v6345_v16 = vpop.f32.mrf.mxu1 }
 0x9e8   :  { %13910 = vst [vmem:[#allocation49_spill] sm:$0xff] %v11816_v25  ;;  %v6346_v40 = vadd.f32 %v6345_v16, %v6177_v28  ;;  %6215 = vmatmul.bf16.gmra.mxu0 %v13913_v63  ;;  %6553 = vmatmul.bf16.gmra.mxu2 %v13919_v55 }
 0x9ea   :  { %6384 = vmatmul.bf16.gmra.mxu1 %v13916_v42  ;;  %6722 = vmatmul.bf16.gmra.mxu3 %v13922_v27 }
 0x9eb   :  { %v6514_v46 = vpop.f32.mrf.mxu2 }
 0x9ec   :  { %v6515_v6 = vadd.f32 %v6514_v46, %v6346_v40  ;;  %v13926_v40 = vld [vmem:[#allocation152_spill] sm:$0xff]  ;;  %v13928_v46 = vld [vmem:[#allocation155_spill] sm:$0xff] }
 0x9ed   :  { %v6683_v34 = vpop.f32.mrf.mxu3  ;;  %v6178_v28 = vpop.f32.mrf.mxu0  ;;  %v13927_v38 = vpack.c.bf16 %v13925_v35, %v13926_v40 }
 0x9ee   :  { %v6179_v16 = vadd.f32 %v11460_v54, %v6178_v28  ;;  %v11831_v63 = vadd.f32 %v6683_v34, %v6515_v6  ;;  %v13929_v28 = vld [vmem:[#allocation154_spill] sm:$0xff]  ;;  %v13931_v6 = vld [vmem:[#allocation281_spill] sm:$0xff]  ;;  %v13932_v34 = vld [vmem:[#allocation280_spill] sm:$0xff] }
 0x9ef   :  { %v6347_v60 = vpop.f32.mrf.mxu1  ;;  %v13930_v22 = vpack.c.bf16 %v13928_v46, %v13929_v28 }
 0x9f0   :  { %13923 = vst [vmem:[#allocation52_spill] sm:$0xff] %v11831_v63  ;;  %v6348_v20 = vadd.f32 %v6347_v60, %v6179_v16  ;;  %v13933_v16 = vpack.c.bf16 %v13931_v6, %v13932_v34  ;;  %v13934_v60 = vld [vmem:[#allocation283_spill] sm:$0xff] }
 0x9f3   :  { %v6516_v9 = vpop.f32.mrf.mxu2 }
 0x9f4   :  { %v6517_v39 = vadd.f32 %v6516_v9, %v6348_v20  ;;  %v13935_v20 = vld [vmem:[#allocation282_spill] sm:$0xff] }
 0x9f5   :  { %v6685_v42 = vpop.f32.mrf.mxu3  ;;  %v6181_v25 = vpop.f32.mrf.mxu0  ;;  %v13936_v9 = vpack.c.bf16 %v13934_v60, %v13935_v20  ;;  %v13939_v20 = vld [vmem:[#allocation157_spill] sm:$0xff] }
 0x9f6   :  { %v6182_v44 = vadd.f32 %v11460_v54, %v6181_v25  ;;  %v11834_v55 = vadd.f32 %v6685_v42, %v6517_v39 }
 0x9f7   :  { %v6350_v2 = vpop.f32.mrf.mxu1 }
 0x9f8   :  { %13924 = vst [vmem:[#allocation51_spill] sm:$0xff] %v11834_v55  ;;  %v6351_v27 = vadd.f32 %v6350_v2, %v6182_v44  ;;  %6220 = vmatmul.bf16.gmra.mxu0 %v13927_v38  ;;  %6558 = vmatmul.bf16.gmra.mxu2 %v13933_v16 }
 0x9fa   :  { %6389 = vmatmul.bf16.gmra.mxu1 %v13930_v22  ;;  %6727 = vmatmul.bf16.gmra.mxu3 %v13936_v9 }
 0x9fb   :  { %v6519_v25 = vpop.f32.mrf.mxu2 }
 0x9fc   :  { %v6520_v39 = vadd.f32 %v6519_v25, %v6351_v27  ;;  %v13940_v27 = vld [vmem:[#allocation156_spill] sm:$0xff]  ;;  %v13942_v25 = vld [vmem:[#allocation159_spill] sm:$0xff] }
 0x9fd   :  { %v6688_v42 = vpop.f32.mrf.mxu3  ;;  %v6183_v44 = vpop.f32.mrf.mxu0  ;;  %v13941_v9 = vpack.c.bf16 %v13939_v20, %v13940_v27 }
 0x9fe   :  { %v6184_v2 = vadd.f32 %v11460_v54, %v6183_v44  ;;  %v11849_v40 = vadd.f32 %v6688_v42, %v6520_v39  ;;  %v13943_v44 = vld [vmem:[#allocation158_spill] sm:$0xff]  ;;  %v13945_v39 = vld [vmem:[#allocation285_spill] sm:$0xff]  ;;  %v13946_v42 = vld [vmem:[#allocation284_spill] sm:$0xff] }
 0x9ff   :  { %v6352_v35 = vpop.f32.mrf.mxu1  ;;  %v13944_v63 = vpack.c.bf16 %v13942_v25, %v13943_v44 }
 0xa00   :  { %13937 = vst [vmem:[#allocation201_spill] sm:$0xff] %v11849_v40  ;;  %v6353_v38 = vadd.f32 %v6352_v35, %v6184_v2  ;;  %v13947_v2 = vpack.c.bf16 %v13945_v39, %v13946_v42  ;;  %v13948_v35 = vld [vmem:[#allocation287_spill] sm:$0xff] }
 0xa03   :  { %v6521_v46 = vpop.f32.mrf.mxu2 }
 0xa04   :  { %v6522_v22 = vadd.f32 %v6521_v46, %v6353_v38  ;;  %v13949_v38 = vld [vmem:[#allocation286_spill] sm:$0xff] }
 0xa05   :  { %v6690_v28 = vpop.f32.mrf.mxu3  ;;  %v6186_v55 = vpop.f32.mrf.mxu0  ;;  %v13950_v46 = vpack.c.bf16 %v13948_v35, %v13949_v38  ;;  %v13953_v38 = vld [vmem:[#allocation161_spill] sm:$0xff] }
 0xa06   :  { %v6187_v6 = vadd.f32 %v11460_v54, %v6186_v55  ;;  %v11852_v16 = vadd.f32 %v6690_v28, %v6522_v22 }
 0xa07   :  { %v6355_v34 = vpop.f32.mrf.mxu1 }
 0xa08   :  { %13938 = vst [vmem:[#allocation200_spill] sm:$0xff] %v11852_v16  ;;  %v6356_v60 = vadd.f32 %v6355_v34, %v6187_v6  ;;  %6225 = vmatmul.bf16.gmra.mxu0 %v13941_v9  ;;  %6563 = vmatmul.bf16.gmra.mxu2 %v13947_v2 }
 0xa0a   :  { %6394 = vmatmul.bf16.gmra.mxu1 %v13944_v63  ;;  %6732 = vmatmul.bf16.gmra.mxu3 %v13950_v46 }
 0xa0b   :  { %v6524_v55 = vpop.f32.mrf.mxu2 }
 0xa0c   :  { %v6525_v22 = vadd.f32 %v6524_v55, %v6356_v60  ;;  %v13954_v60 = vld [vmem:[#allocation160_spill] sm:$0xff]  ;;  %v13956_v55 = vld [vmem:[#allocation163_spill] sm:$0xff] }
 0xa0d   :  { %v6693_v28 = vpop.f32.mrf.mxu3  ;;  %v6188_v6 = vpop.f32.mrf.mxu0  ;;  %v13955_v46 = vpack.c.bf16 %v13953_v38, %v13954_v60 }
 0xa0e   :  { %v6189_v34 = vadd.f32 %v11460_v54, %v6188_v6  ;;  %v11867_v27 = vadd.f32 %v6693_v28, %v6525_v22  ;;  %v13957_v6 = vld [vmem:[#allocation162_spill] sm:$0xff]  ;;  %v13959_v22 = vld [vmem:[#allocation289_spill] sm:$0xff]  ;;  %v13960_v28 = vld [vmem:[#allocation288_spill] sm:$0xff] }
 0xa0f   :  { %v6357_v20 = vpop.f32.mrf.mxu1  ;;  %v13958_v40 = vpack.c.bf16 %v13956_v55, %v13957_v6 }
 0xa10   :  { %13951 = vst [vmem:[#allocation203_spill] sm:$0xff] %v11867_v27  ;;  %v6358_v9 = vadd.f32 %v6357_v20, %v6189_v34  ;;  %v13961_v34 = vpack.c.bf16 %v13959_v22, %v13960_v28  ;;  %v13962_v20 = vld [vmem:[#allocation291_spill] sm:$0xff]  ;;  %v11890_v22 = vld [vmem:[%s12415_s4] ss:$0 sm:$0xff]  ;;  %s8625_s4 = smov [#allocation10]  }
 0xa11   :  { %s7492_s19 = sshll.u32 %s8625_s4, 4  ;;  %s7493_s19 = int_to_ptr.vmem [resolvable:$true] %s7492_s19 }
 0xa13   :  { %v6526_v25 = vpop.f32.mrf.mxu2 }
 0xa14   :  { %v6527_v63 = vadd.f32 %v6526_v25, %v6358_v9  ;;  %v13963_v9 = vld [vmem:[#allocation290_spill] sm:$0xff] }
 0xa15   :  { %v6695_v44 = vpop.f32.mrf.mxu3  ;;  %v6191_v16 = vpop.f32.mrf.mxu0  ;;  %v13964_v25 = vpack.c.bf16 %v13962_v20, %v13963_v9  ;;  %v13968_v9 = vld [vmem:[#allocation164_spill] sm:$0xff] }
 0xa16   :  { %v6192_v39 = vadd.f32 %v11460_v54, %v6191_v16  ;;  %v11870_v2 = vadd.f32 %v6695_v44, %v6527_v63 }
 0xa17   :  { %v6360_v42 = vpop.f32.mrf.mxu1 }
 0xa18   :  { %13952 = vst [vmem:[#allocation202_spill] sm:$0xff] %v11870_v2  ;;  %v6361_v35 = vadd.f32 %v6360_v42, %v6192_v39  ;;  %6230 = vmatmul.bf16.gmra.mxu0 %v13955_v46  ;;  %6568 = vmatmul.bf16.gmra.mxu2 %v13961_v34 }
 0xa1a   :  { %6399 = vmatmul.bf16.gmra.mxu1 %v13958_v40  ;;  %6737 = vmatmul.bf16.gmra.mxu3 %v13964_v25 }
 0xa1b   :  { %v6529_v16 = vpop.f32.mrf.mxu2 }
 0xa1c   :  { %v6530_v63 = vadd.f32 %v6529_v16, %v6361_v35  ;;  %v13970_v16 = vld [vmem:[#allocation167_spill] sm:$0xff] }
 0xa1d   :  { %v6698_v44 = vpop.f32.mrf.mxu3  ;;  %v6193_v39 = vpop.f32.mrf.mxu0 }
 0xa1e   :  { %v6194_v42 = vadd.f32 %v11460_v54, %v6193_v39  ;;  %v11885_v60 = vadd.f32 %v6698_v44, %v6530_v63  ;;  %v13967_v54 = vld [vmem:[#allocation165_spill] sm:$0xff]  ;;  %v13971_v63 = vld [vmem:[#allocation166_spill] sm:$0xff] }
 0xa1f   :  { %v6362_v38 = vpop.f32.mrf.mxu1  ;;  %v13969_v25 = vpack.c.bf16 %v13967_v54, %v13968_v9  ;;  %v13972_v44 = vpack.c.bf16 %v13970_v16, %v13971_v63  ;;  %v13973_v39 = vld [vmem:[#allocation293_spill] sm:$0xff] }
 0xa20   :  { %13965 = vst [vmem:[#allocation54_spill] sm:$0xff] %v11885_v60  ;;  %v6363_v46 = vadd.f32 %v6362_v38, %v6194_v42  ;;  %v13974_v42 = vld [vmem:[#allocation292_spill] sm:$0xff] }
 0xa21   :  { %v13975_v38 = vpack.c.bf16 %v13973_v39, %v13974_v42 }
 0xa23   :  { %v6531_v55 = vpop.f32.mrf.mxu2 }
 0xa24   :  { %v6532_v40 = vadd.f32 %v6531_v55, %v6363_v46  ;;  %v13976_v46 = vld [vmem:[#allocation295_spill] sm:$0xff]  ;;  %v13977_v55 = vld [vmem:[#allocation294_spill] sm:$0xff] }
 0xa25   :  { %v6700_v6 = vpop.f32.mrf.mxu3  ;;  %v6196_v2 = vpop.f32.mrf.mxu0  ;;  %v13978_v60 = vpack.c.bf16 %v13976_v46, %v13977_v55  ;;  %v13979_v46 = vld [vmem:[#allocation297_spill] sm:$0xff] }
 0xa26   :  { %v6197_v28 = vadd.f32 %v11890_v22, %v6196_v2  ;;  %v11893_v34 = vadd.f32 %v6700_v6, %v6532_v40 }
 0xa27   :  { %v6365_v35 = vpop.f32.mrf.mxu1 }
 0xa28   :  { %13966 = vst [vmem:[#allocation53_spill] sm:$0xff] %v11893_v34  ;;  %v6366_v20 = vadd.f32 %v6365_v35, %v6197_v28  ;;  %6235 = vmatmul.bf16.gmra.mxu0 %v13969_v25  ;;  %6573 = vmatmul.bf16.gmra.mxu2 %v13975_v38 }
 0xa2a   :  { %6404 = vmatmul.bf16.gmra.mxu1 %v13972_v44  ;;  %6742 = vmatmul.bf16.gmra.mxu3 %v13978_v60 }
 0xa2b   :  { %v6534_v2 = vpop.f32.mrf.mxu2 }
 0xa2c   :  { %v6535_v40 = vadd.f32 %v6534_v2, %v6366_v20  ;;  %v13980_v20 = vld [vmem:[#allocation296_spill] sm:$0xff]  ;;  %v13982_v2 = vld [vmem:[#allocation299_spill] sm:$0xff] }
 0xa2d   :  { %v6703_v6 = vpop.f32.mrf.mxu3  ;;  %v6198_v28 = vpop.f32.mrf.mxu0  ;;  %v13981_v55 = vpack.c.bf16 %v13979_v46, %v13980_v20 }
 0xa2e   :  { %v6199_v35 = vadd.f32 %v11890_v22, %v6198_v28  ;;  %v11908_v9 = vadd.f32 %v6703_v6, %v6535_v40  ;;  %v13983_v28 = vld [vmem:[#allocation298_spill] sm:$0xff]  ;;  %v13985_v40 = vpack.c.bf16 %v10775_v29, %v10773_v21  ;;  %v13986_v6 = vpack.c.bf16 %v10787_v33, %v10785_v12  ;;  %v13987_v33 = vld [vmem:[#allocation301_spill] sm:$0xff] }
 0xa2f   :  { %v6367_v54 = vpop.f32.mrf.mxu1  ;;  %v13984_v27 = vpack.c.bf16 %v13982_v2, %v13983_v28  ;;  %v13990_v28 = vld [vmem:[#allocation303_spill] sm:$0xff] }
 0xa30   :  { %v6368_v25 = vadd.f32 %v6367_v54, %v6199_v35 }
 0xa33   :  { %v6536_v16 = vpop.f32.mrf.mxu2 }
 0xa34   :  { %v6537_v63 = vadd.f32 %v6536_v16, %v6368_v25 }
 0xa35   :  { %v6705_v44 = vpop.f32.mrf.mxu3  ;;  %v6201_v34 = vpop.f32.mrf.mxu0 }
 0xa36   :  { %v6202_v39 = vadd.f32 %v11890_v22, %v6201_v34  ;;  %v11911_v38 = vadd.f32 %v6705_v44, %v6537_v63 }
 0xa37   :  { %v6370_v42 = vpop.f32.mrf.mxu1 }
 0xa38   :  { %v6371_v60 = vadd.f32 %v6370_v42, %v6202_v39  ;;  %6756 = vmatmul.bf16.vlgmr.msrb.gmra.mxu0 %v13981_v55  ;;  %7094 = vmatmul.bf16.vlgmr.msrb.gmra.mxu2 %v13985_v40  ;;  %v13991_v40 = vld [vmem:[#allocation302_spill] sm:$0xff] }
 0xa3a   :  { %6925 = vmatmul.bf16.vlgmr.msrb.gmra.mxu1 %v13984_v27  ;;  %7263 = vmatmul.bf16.vlgmr.msrb.gmra.mxu3 %v13986_v6  ;;  %v13992_v6 = vpack.c.bf16 %v13990_v28, %v13991_v40  ;;  %v13998_v28 = vld [vmem:[#allocation307_spill] sm:$0xff]  ;;  %v13999_v40 = vld [vmem:[#allocation306_spill] sm:$0xff] }
 0xa3b   :  { %v6539_v34 = vpop.f32.mrf.mxu2 }
 0xa3c   :  { %v6540_v35 = vadd.f32 %v6539_v34, %v6371_v60  ;;  %v13988_v60 = vld [vmem:[#allocation300_spill] sm:$0xff]  ;;  %v13993_v34 = vpack.c.bf16 %v10795_v5, %v10793_v15 }
 0xa3d   :  { %v6708_v54 = vpop.f32.mrf.mxu3  ;;  %v6203_v25 = vpop.f32.mrf.mxu0  ;;  %v13989_v2 = vpack.c.bf16 %v13987_v33, %v13988_v60 }
 0xa3e   :  { %v6204_v16 = vadd.f32 %v11890_v22, %v6203_v25  ;;  %v11926_v44 = vadd.f32 %v6708_v54, %v6540_v35  ;;  %v13994_v35 = vpack.c.bf16 %v10807_v41, %v10805_v0  ;;  %v13995_v41 = vld [vmem:[#allocation305_spill] sm:$0xff] }
 0xa3f   :  { %v6372_v63 = vpop.f32.mrf.mxu1 }
 0xa40   :  { %v6373_v39 = vadd.f32 %v6372_v63, %v6204_v16 }
 0xa43   :  { %v6541_v42 = vpop.f32.mrf.mxu2 }
 0xa44   :  { %v6542_v27 = vadd.f32 %v6541_v42, %v6373_v39 }
 0xa45   :  { %v6710_v46 = vpop.f32.mrf.mxu3  ;;  %v6206_v20 = vpop.f32.mrf.mxu0 }
 0xa46   :  { %v6207_v21 = vadd.f32 %v11890_v22, %v6206_v20  ;;  %v11929_v55 = vadd.f32 %v6710_v46, %v6542_v27 }
 0xa47   :  { %v6375_v29 = vpop.f32.mrf.mxu1 }
 0xa48   :  { %v6376_v12 = vadd.f32 %v6375_v29, %v6207_v21  ;;  %6761 = vmatmul.bf16.gmra.mxu0 %v13989_v2  ;;  %7099 = vmatmul.bf16.gmra.mxu2 %v13993_v34  ;;  %v14001_v34 = vpack.c.bf16 %v10815_v30, %v10813_v61 }
 0xa4a   :  { %6930 = vmatmul.bf16.gmra.mxu1 %v13992_v6  ;;  %7268 = vmatmul.bf16.gmra.mxu3 %v13994_v35  ;;  %v14000_v6 = vpack.c.bf16 %v13998_v28, %v13999_v40  ;;  %v14002_v35 = vpack.c.bf16 %v10827_v7, %v10825_v53  ;;  %v14003_v7 = vld [vmem:[#allocation309_spill] sm:$0xff]  ;;  %v14009_v40 = vpack.c.bf16 %v10835_v18, %v10833_v10 }
 0xa4b   :  { %v6544_v54 = vpop.f32.mrf.mxu2 }
 0xa4c   :  { %v6545_v25 = vadd.f32 %v6544_v54, %v6376_v12  ;;  %v13996_v12 = vld [vmem:[#allocation304_spill] sm:$0xff] }
 0xa4d   :  { %v6713_v16 = vpop.f32.mrf.mxu3  ;;  %v6208_v63 = vpop.f32.mrf.mxu0  ;;  %v13997_v2 = vpack.c.bf16 %v13995_v41, %v13996_v12  ;;  %v14006_v12 = vld [vmem:[#allocation311_spill] sm:$0xff] }
 0xa4e   :  { %v6209_v39 = vadd.f32 %v11890_v22, %v6208_v63  ;;  %v11944_v27 = vadd.f32 %v6713_v16, %v6545_v25 }
 0xa4f   :  { %v6377_v42 = vpop.f32.mrf.mxu1 }
 0xa50   :  { %v6378_v46 = vadd.f32 %v6377_v42, %v6209_v39 }
 0xa53   :  { %v6546_v20 = vpop.f32.mrf.mxu2 }
 0xa54   :  { %v6547_v21 = vadd.f32 %v6546_v20, %v6378_v46 }
 0xa55   :  { %v6715_v29 = vpop.f32.mrf.mxu3  ;;  %v6211_v33 = vpop.f32.mrf.mxu0 }
 0xa56   :  { %v6212_v15 = vadd.f32 %v11890_v22, %v6211_v33  ;;  %v11947_v60 = vadd.f32 %v6715_v29, %v6547_v21 }
 0xa57   :  { %v6380_v5 = vpop.f32.mrf.mxu1 }
 0xa58   :  { %v6381_v0 = vadd.f32 %v6380_v5, %v6212_v15  ;;  %6766 = vmatmul.bf16.gmra.mxu0 %v13997_v2  ;;  %7104 = vmatmul.bf16.gmra.mxu2 %v14001_v34  ;;  %v14007_v2 = vld [vmem:[#allocation310_spill] sm:$0xff] }
 0xa59   :  { %v14008_v28 = vpack.c.bf16 %v14006_v12, %v14007_v2  ;;  %v14018_v12 = vpack.c.bf16 %v10867_v58, %v10865_v51  ;;  %v14019_v58 = vld [vmem:[#allocation317_spill] sm:$0xff] }
 0xa5a   :  { %6935 = vmatmul.bf16.gmra.mxu1 %v14000_v6  ;;  %7273 = vmatmul.bf16.gmra.mxu3 %v14002_v35  ;;  %v14010_v6 = vpack.c.bf16 %v10847_v36, %v10845_v4  ;;  %v14011_v36 = vld [vmem:[#allocation313_spill] sm:$0xff] }
 0xa5b   :  { %v6549_v54 = vpop.f32.mrf.mxu2 }
 0xa5c   :  { %v6550_v25 = vadd.f32 %v6549_v54, %v6381_v0  ;;  %v14004_v0 = vld [vmem:[#allocation308_spill] sm:$0xff] }
 0xa5d   :  { %v6718_v16 = vpop.f32.mrf.mxu3  ;;  %v6213_v63 = vpop.f32.mrf.mxu0  ;;  %v14005_v41 = vpack.c.bf16 %v14003_v7, %v14004_v0  ;;  %v14015_v7 = vld [vmem:[#allocation314_spill] sm:$0xff] }
 0xa5e   :  { %v6214_v39 = vadd.f32 %v11890_v22, %v6213_v63  ;;  %v11962_v46 = vadd.f32 %v6718_v16, %v6550_v25 }
 0xa5f   :  { %v6382_v42 = vpop.f32.mrf.mxu1 }
 0xa60   :  { %v6383_v20 = vadd.f32 %v6382_v42, %v6214_v39 }
 0xa63   :  { %v6551_v21 = vpop.f32.mrf.mxu2 }
 0xa64   :  { %v6552_v29 = vadd.f32 %v6551_v21, %v6383_v20 }
 0xa65   :  { %v6720_v33 = vpop.f32.mrf.mxu3  ;;  %v6216_v15 = vpop.f32.mrf.mxu0 }
 0xa66   :  { %v6217_v61 = vadd.f32 %v11890_v22, %v6216_v15  ;;  %v11965_v5 = vadd.f32 %v6720_v33, %v6552_v29 }
 0xa67   :  { %v6385_v30 = vpop.f32.mrf.mxu1 }
 0xa68   :  { %v6386_v53 = vadd.f32 %v6385_v30, %v6217_v61  ;;  %6771 = vmatmul.bf16.gmra.mxu0 %v14005_v41  ;;  %7109 = vmatmul.bf16.gmra.mxu2 %v14009_v40  ;;  %v14012_v61 = vld [vmem:[#allocation312_spill] sm:$0xff]  ;;  %v14017_v41 = vpack.c.bf16 %v10855_v37, %v10853_v59 }
 0xa69   :  { %v14013_v30 = vpack.c.bf16 %v14011_v36, %v14012_v61  ;;  %v14025_v36 = vpack.c.bf16 %v10875_v52, %v10873_v32  ;;  %v14026_v61 = vpack.c.bf16 %v10887_v13, %v10885_v43  ;;  %v14027_v13 = vld [vmem:[#allocation321_spill] sm:$0xff] }
 0xa6a   :  { %6940 = vmatmul.bf16.gmra.mxu1 %v14008_v28  ;;  %7278 = vmatmul.bf16.gmra.mxu3 %v14010_v6 }
 0xa6b   :  { %v6554_v34 = vpop.f32.mrf.mxu2 }
 0xa6c   :  { %v6555_v35 = vadd.f32 %v6554_v34, %v6386_v53  ;;  %v14014_v53 = vld [vmem:[#allocation315_spill] sm:$0xff] }
 0xa6d   :  { %v6723_v54 = vpop.f32.mrf.mxu3  ;;  %v6218_v25 = vpop.f32.mrf.mxu0  ;;  %v14016_v0 = vpack.c.bf16 %v14014_v53, %v14015_v7 }
 0xa6e   :  { %v6219_v16 = vadd.f32 %v11890_v22, %v6218_v25  ;;  %v11980_v39 = vadd.f32 %v6723_v54, %v6555_v35 }
 0xa6f   :  { %v6387_v63 = vpop.f32.mrf.mxu1 }
 0xa70   :  { %v6388_v42 = vadd.f32 %v6387_v63, %v6219_v16 }
 0xa73   :  { %v6556_v20 = vpop.f32.mrf.mxu2 }
 0xa74   :  { %v6557_v21 = vadd.f32 %v6556_v20, %v6388_v42 }
 0xa75   :  { %v6725_v29 = vpop.f32.mrf.mxu3  ;;  %v6221_v33 = vpop.f32.mrf.mxu0 }
 0xa76   :  { %v6222_v10 = vadd.f32 %v11890_v22, %v6221_v33  ;;  %v11983_v15 = vadd.f32 %v6725_v29, %v6557_v21  ;;  %v14020_v29 = vld [vmem:[#allocation316_spill] sm:$0xff] }
 0xa77   :  { %v6390_v18 = vpop.f32.mrf.mxu1  ;;  %v14021_v33 = vpack.c.bf16 %v14019_v58, %v14020_v29 }
 0xa78   :  { %v6391_v4 = vadd.f32 %v6390_v18, %v6222_v10  ;;  %6776 = vmatmul.bf16.gmra.mxu0 %v14013_v30  ;;  %7114 = vmatmul.bf16.gmra.mxu2 %v14017_v41  ;;  %v14022_v10 = vld [vmem:[#allocation319_spill] sm:$0xff]  ;;  %v14023_v18 = vld [vmem:[#allocation318_spill] sm:$0xff] }
 0xa7a   :  { %6945 = vmatmul.bf16.gmra.mxu1 %v14016_v0  ;;  %7283 = vmatmul.bf16.gmra.mxu3 %v14018_v12 }
 0xa7b   :  { %v6559_v2 = vpop.f32.mrf.mxu2 }
 0xa7c   :  { %v6560_v28 = vadd.f32 %v6559_v2, %v6391_v4  ;;  %v14024_v4 = vpack.c.bf16 %v14022_v10, %v14023_v18 }
 0xa7d   :  { %v6728_v40 = vpop.f32.mrf.mxu3  ;;  %v6223_v6 = vpop.f32.mrf.mxu0 }
 0xa7e   :  { %v6224_v34 = vadd.f32 %v11890_v22, %v6223_v6  ;;  %v11998_v54 = vadd.f32 %v6728_v40, %v6560_v28 }
 0xa7f   :  { %v6392_v35 = vpop.f32.mrf.mxu1 }
 0xa80   :  { %v6393_v25 = vadd.f32 %v6392_v35, %v6224_v34 }
 0xa83   :  { %v6561_v16 = vpop.f32.mrf.mxu2 }
 0xa84   :  { %v6562_v63 = vadd.f32 %v6561_v16, %v6393_v25  ;;  %v14028_v16 = vld [vmem:[#allocation320_spill] sm:$0xff] }
 0xa85   :  { %v6730_v42 = vpop.f32.mrf.mxu3  ;;  %v6226_v20 = vpop.f32.mrf.mxu0 }
 0xa86   :  { %v6227_v59 = vadd.f32 %v11890_v22, %v6226_v20  ;;  %v12001_v21 = vadd.f32 %v6730_v42, %v6562_v63  ;;  %v14029_v63 = vpack.c.bf16 %v14027_v13, %v14028_v16  ;;  %v14030_v42 = vld [vmem:[#allocation323_spill] sm:$0xff]  ;;  %v14031_v20 = vld [vmem:[#allocation322_spill] sm:$0xff] }
 0xa87   :  { %v6395_v37 = vpop.f32.mrf.mxu1 }
 0xa88   :  { %v6396_v51 = vadd.f32 %v6395_v37, %v6227_v59  ;;  %6781 = vmatmul.bf16.gmra.mxu0 %v14021_v33  ;;  %7119 = vmatmul.bf16.gmra.mxu2 %v14025_v36  ;;  %v14032_v59 = vpack.c.bf16 %v14030_v42, %v14031_v20  ;;  %v14033_v37 = vpack.c.bf16 %v10895_v19, %v10893_v45 }
 0xa8a   :  { %6950 = vmatmul.bf16.gmra.mxu1 %v14024_v4  ;;  %7288 = vmatmul.bf16.gmra.mxu3 %v14026_v61 }
 0xa8b   :  { %v6564_v30 = vpop.f32.mrf.mxu2 }
 0xa8c   :  { %v6565_v53 = vadd.f32 %v6564_v30, %v6396_v51  ;;  %v14034_v51 = vpack.c.bf16 %v10907_v11, %v10905_v24  ;;  %v14035_v11 = vld [vmem:[#allocation325_spill] sm:$0xff] }
 0xa8d   :  { %v6733_v7 = vpop.f32.mrf.mxu3  ;;  %v6228_v0 = vpop.f32.mrf.mxu0 }
 0xa8e   :  { %v6229_v41 = vadd.f32 %v11890_v22, %v6228_v0  ;;  %v12016_v2 = vadd.f32 %v6733_v7, %v6565_v53 }
 0xa8f   :  { %v6397_v12 = vpop.f32.mrf.mxu1 }
 0xa90   :  { %v6398_v28 = vadd.f32 %v6397_v12, %v6229_v41  ;;  %v14036_v12 = vld [vmem:[#allocation324_spill] sm:$0xff] }
 0xa93   :  { %v6566_v40 = vpop.f32.mrf.mxu2 }
 0xa94   :  { %v6567_v6 = vadd.f32 %v6566_v40, %v6398_v28  ;;  %v14037_v28 = vpack.c.bf16 %v14035_v11, %v14036_v12  ;;  %v14038_v40 = vld [vmem:[#allocation327_spill] sm:$0xff] }
 0xa95   :  { %v6735_v34 = vpop.f32.mrf.mxu3  ;;  %v6231_v35 = vpop.f32.mrf.mxu0 }
 0xa96   :  { %v6232_v32 = vadd.f32 %v11890_v22, %v6231_v35  ;;  %v12019_v25 = vadd.f32 %v6735_v34, %v6567_v6  ;;  %v14039_v6 = vld [vmem:[#allocation326_spill] sm:$0xff]  ;;  %v14041_v35 = vpack.c.bf16 %v10915_v8, %v10913_v62 }
 0xa97   :  { %v6400_v52 = vpop.f32.mrf.mxu1  ;;  %v14040_v34 = vpack.c.bf16 %v14038_v40, %v14039_v6 }
 0xa98   :  { %v6401_v43 = vadd.f32 %v6400_v52, %v6232_v32  ;;  %6786 = vmatmul.bf16.gmra.mxu0 %v14029_v63  ;;  %7124 = vmatmul.bf16.gmra.mxu2 %v14033_v37  ;;  %v14042_v32 = vpack.c.bf16 %v10927_v31, %v10925_v23  ;;  %v14043_v31 = vld [vmem:[#allocation329_spill] sm:$0xff] }
 0xa9a   :  { %6955 = vmatmul.bf16.gmra.mxu1 %v14032_v59  ;;  %7293 = vmatmul.bf16.gmra.mxu3 %v14034_v51 }
 0xa9b   :  { %v6569_v58 = vpop.f32.mrf.mxu2 }
 0xa9c   :  { %v6570_v29 = vadd.f32 %v6569_v58, %v6401_v43 }
 0xa9d   :  { %v6738_v33 = vpop.f32.mrf.mxu3  ;;  %v6233_v10 = vpop.f32.mrf.mxu0 }
 0xa9e   :  { %v6234_v18 = vadd.f32 %v11890_v22, %v6233_v10  ;;  %v12034_v36 = vadd.f32 %v6738_v33, %v6570_v29  ;;  %v14044_v33 = vld [vmem:[#allocation328_spill] sm:$0xff] }
 0xa9f   :  { %v6402_v4 = vpop.f32.mrf.mxu1  ;;  %v14045_v10 = vpack.c.bf16 %v14043_v31, %v14044_v33 }
 0xaa0   :  { %v6403_v61 = vadd.f32 %v6402_v4, %v6234_v18  ;;  %v14046_v18 = vld [vmem:[#allocation331_spill] sm:$0xff]  ;;  %v14047_v4 = vld [vmem:[#allocation330_spill] sm:$0xff] }
 0xaa3   :  { %v6571_v30 = vpop.f32.mrf.mxu2 }
 0xaa4   :  { %v6572_v53 = vadd.f32 %v6571_v30, %v6403_v61  ;;  %v14049_v61 = vpack.c.bf16 %v10935_v49, %v10933_v14  ;;  %v14050_v30 = vpack.c.bf16 %v10947_v17, %v10945_v50  ;;  %v14051_v17 = vld [vmem:[#allocation333_spill] sm:$0xff] }
 0xaa5   :  { %v6740_v7 = vpop.f32.mrf.mxu3  ;;  %v6236_v0 = vpop.f32.mrf.mxu0 }
 0xaa6   :  { %v6237_v45 = vadd.f32 %v11890_v22, %v6236_v0  ;;  %v12037_v41 = vadd.f32 %v6740_v7, %v6572_v53 }
 0xaa7   :  { %v6405_v19 = vpop.f32.mrf.mxu1 }
 0xaa8   :  { %v6406_v24 = vadd.f32 %v6405_v19, %v6237_v45  ;;  %6791 = vmatmul.bf16.gmra.mxu0 %v14037_v28  ;;  %7129 = vmatmul.bf16.gmra.mxu2 %v14041_v35  ;;  %v14052_v35 = vld [vmem:[#allocation332_spill] sm:$0xff] }
 0xaaa   :  { %6960 = vmatmul.bf16.gmra.mxu1 %v14040_v34  ;;  %7298 = vmatmul.bf16.gmra.mxu3 %v14042_v32  ;;  %v14053_v32 = vpack.c.bf16 %v14051_v17, %v14052_v35 }
 0xaab   :  { %v6574_v52 = vpop.f32.mrf.mxu2 }
 0xaac   :  { %v6575_v43 = vadd.f32 %v6574_v52, %v6406_v24  ;;  %v14054_v52 = vld [vmem:[#allocation335_spill] sm:$0xff] }
 0xaad   :  { %v6743_v13 = vpop.f32.mrf.mxu3  ;;  %v6238_v16 = vpop.f32.mrf.mxu0 }
 0xaae   :  { %v6239_v63 = vadd.f32 %v11890_v22, %v6238_v16  ;;  %v12052_v20 = vadd.f32 %v6743_v13, %v6575_v43  ;;  %v14048_v22 = vpack.c.bf16 %v14046_v18, %v14047_v4  ;;  %v14055_v43 = vld [vmem:[#allocation334_spill] sm:$0xff] }
 0xaaf   :  { %v6407_v42 = vpop.f32.mrf.mxu1  ;;  %v14056_v13 = vpack.c.bf16 %v14054_v52, %v14055_v43  ;;  %v14058_v16 = vld [vmem:[#allocation418_spill] sm:$0xff] }
 0xab0   :  { %v6408_v59 = vadd.f32 %v6407_v42, %v6239_v63  ;;  %v14060_v42 = vld [vmem:[#allocation420_spill] sm:$0xff] }
 0xab3   :  { %v6576_v37 = vpop.f32.mrf.mxu2 }
 0xab4   :  { %v6577_v51 = vadd.f32 %v6576_v37, %v6408_v59  ;;  %v14061_v59 = vpack.c.bf16 %v10967_v57, %v14060_v42  ;;  %v14074_v42 = vld [vmem:[#allocation36_spill] sm:$0xff] }
 0xab5   :  { %v6745_v58 = vpop.f32.mrf.mxu3  ;;  %v6757_v29 = vpop.f32.mrf.mxu0 }
 0xab6   :  { %v12054_v8 = vadd.f32 %v6745_v58, %v6577_v51  ;;  %v6758_v23 = vadd.f32 %v6757_v29, %v11489_v48 }
 0xab7   :  { %v6926_v62 = vpop.f32.mrf.mxu1 }
 0xab8   :  { %6796 = vmatmul.bf16.gmra.mxu0 %v14045_v10  ;;  %7134 = vmatmul.bf16.gmra.mxu2 %v14049_v61  ;;  %v6927_v53 = vadd.f32 %v6926_v62, %v6758_v23 }
 0xaba   :  { %6965 = vmatmul.bf16.gmra.mxu1 %v14048_v22  ;;  %7303 = vmatmul.bf16.gmra.mxu3 %v14050_v30 }
 0xabb   :  { %v7095_v7 = vpop.f32.mrf.mxu2 }
 0xabc   :  { %v7096_v0 = vadd.f32 %v7095_v7, %v6927_v53  ;;  %v14062_v53 = vld [vmem:[#allocation337_spill] sm:$0xff]  ;;  %v14063_v7 = vld [vmem:[#allocation336_spill] sm:$0xff] }
 0xabd   :  { %v7264_v48 = vpop.f32.mrf.mxu3  ;;  %v6759_v45 = vpop.f32.mrf.mxu0 }
 0xabe   :  { %v7265_v24 = vadd.f32 %v7264_v48, %v7096_v0  ;;  %v6760_v11 = vadd.f32 %v6759_v45, %v11492_v47  ;;  %v14057_v47 = vld [vmem:[#allocation419_spill] sm:$0xff]  ;;  %v14064_v0 = vpack.c.bf16 %v14062_v53, %v14063_v7  ;;  %v14066_v45 = vld [vmem:[#allocation338_spill] sm:$0xff] }
 0xabf   :  { %v6928_v19 = vpop.f32.mrf.mxu1  ;;  %v14059_v63 = vpack.c.bf16 %v14057_v47, %v14058_v16  ;;  %v14065_v48 = vld [vmem:[#allocation339_spill] sm:$0xff] }
 0xac0   :  { %7424 = vst [vmem:[#allocation10] sm:$0xff] %v7265_v24  ;;  %v6929_v12 = vadd.f32 %v6928_v19, %v6760_v11  ;;  %v14067_v19 = vpack.c.bf16 %v14065_v48, %v14066_v45  ;;  %v14069_v24 = vld [vmem:[#allocation421_spill] sm:$0xff] }
 0xac3   :  { %v7097_v28 = vpop.f32.mrf.mxu2 }
 0xac4   :  { %v7098_v40 = vadd.f32 %v7097_v28, %v6929_v12  ;;  %v14071_v12 = vld [vmem:[#allocation423_spill] sm:$0xff] }
 0xac5   :  { %v7266_v6 = vpop.f32.mrf.mxu3  ;;  %v6762_v14 = vpop.f32.mrf.mxu0  ;;  %v14072_v28 = vld [vmem:[#allocation59_spill] sm:$0xff] }
 0xac6   :  { %v7267_v34 = vadd.f32 %v7266_v6, %v7098_v40  ;;  %v6763_v50 = vadd.f32 %v6762_v14, %v11507_v56  ;;  %v14073_v40 = vpack.c.bf16 %v14071_v12, %v14072_v28 }
 0xac7   :  { %v6931_v49 = vpop.f32.mrf.mxu1 }
 0xac8   :  { %6801 = vmatmul.bf16.gmra.mxu0 %v14053_v32  ;;  %7425 = vst [vmem:[#allocation10 + $0x8] sm:$0xff] %v7267_v34  ;;  %7139 = vmatmul.bf16.gmra.mxu2 %v14059_v63  ;;  %v6932_v37 = vadd.f32 %v6931_v49, %v6763_v50 }
 0xaca   :  { %6970 = vmatmul.bf16.gmra.mxu1 %v14056_v13  ;;  %7308 = vmatmul.bf16.gmra.mxu3 %v14061_v59 }
 0xacb   :  { %v7100_v51 = vpop.f32.mrf.mxu2 }
 0xacc   :  { %v7101_v56 = vadd.f32 %v7100_v51, %v6932_v37  ;;  %v14075_v37 = vld [vmem:[#allocation341_spill] sm:$0xff]  ;;  %v14076_v51 = vld [vmem:[#allocation340_spill] sm:$0xff] }
 0xacd   :  { %v7269_v58 = vpop.f32.mrf.mxu3  ;;  %v6764_v29 = vpop.f32.mrf.mxu0 }
 0xace   :  { %v7270_v23 = vadd.f32 %v7269_v58, %v7101_v56  ;;  %v6765_v31 = vadd.f32 %v6764_v29, %v11510_v1  ;;  %v14068_v1 = vld [vmem:[#allocation422_spill] sm:$0xff]  ;;  %v14077_v56 = vpack.c.bf16 %v14075_v37, %v14076_v51  ;;  %v14078_v58 = vld [vmem:[#allocation343_spill] sm:$0xff] }
 0xacf   :  { %v6933_v62 = vpop.f32.mrf.mxu1  ;;  %v14070_v11 = vpack.c.bf16 %v14068_v1, %v14069_v24  ;;  %v14079_v29 = vld [vmem:[#allocation342_spill] sm:$0xff] }
 0xad0   :  { %7426 = vst [vmem:[#allocation10 + $0x10] sm:$0xff] %v7270_v23  ;;  %v6934_v33 = vadd.f32 %v6933_v62, %v6765_v31  ;;  %v14080_v62 = vpack.c.bf16 %v14078_v58, %v14079_v29  ;;  %v14082_v23 = vld [vmem:[#allocation424_spill] sm:$0xff] }
 0xad1   :  { %v14101_v58 = vld [vmem:[#allocation184_spill] sm:$0xff] }
 0xad3   :  { %v7102_v10 = vpop.f32.mrf.mxu2 }
 0xad4   :  { %v7103_v18 = vadd.f32 %v7102_v10, %v6934_v33  ;;  %v14084_v33 = vld [vmem:[#allocation65_spill] sm:$0xff]  ;;  %v14085_v10 = vld [vmem:[#allocation62_spill] sm:$0xff] }
 0xad5   :  { %v7271_v4 = vpop.f32.mrf.mxu3  ;;  %v6767_v22 = vpop.f32.mrf.mxu0 }
 0xad6   :  { %v7272_v30 = vadd.f32 %v7271_v4, %v7103_v18  ;;  %v6768_v57 = vadd.f32 %v6767_v22, %v11525_v26  ;;  %v14086_v18 = vpack.c.bf16 %v14084_v33, %v14085_v10 }
 0xad7   :  { %v6936_v61 = vpop.f32.mrf.mxu1 }
 0xad8   :  { %6806 = vmatmul.bf16.gmra.mxu0 %v14064_v0  ;;  %7427 = vst [vmem:[#allocation10 + $0x18] sm:$0xff] %v7272_v30  ;;  %7144 = vmatmul.bf16.gmra.mxu2 %v14070_v11  ;;  %v6937_v6 = vadd.f32 %v6936_v61, %v6768_v57  ;;  %v14087_v0 = vld [vmem:[#allocation35_spill] sm:$0xff] }
 0xada   :  { %6975 = vmatmul.bf16.gmra.mxu1 %v14067_v19  ;;  %7313 = vmatmul.bf16.gmra.mxu3 %v14073_v40  ;;  %v14088_v40 = vld [vmem:[#allocation185_spill] sm:$0xff] }
 0xadb   :  { %v7105_v14 = vpop.f32.mrf.mxu2 }
 0xadc   :  { %v7106_v26 = vadd.f32 %v7105_v14, %v6937_v6  ;;  %v14089_v14 = vld [vmem:[#allocation345_spill] sm:$0xff] }
 0xadd   :  { %v7274_v49 = vpop.f32.mrf.mxu3  ;;  %v6769_v34 = vpop.f32.mrf.mxu0 }
 0xade   :  { %v7275_v17 = vadd.f32 %v7274_v49, %v7106_v26  ;;  %v6770_v35 = vadd.f32 %v6769_v34, %v11528_v3  ;;  %v14081_v3 = vld [vmem:[#allocation425_spill] sm:$0xff]  ;;  %v14090_v26 = vld [vmem:[#allocation344_spill] sm:$0xff]  ;;  %v14092_v34 = vld [vmem:[#allocation347_spill] sm:$0xff] }
 0xadf   :  { %v6938_v50 = vpop.f32.mrf.mxu1  ;;  %v14083_v31 = vpack.c.bf16 %v14081_v3, %v14082_v23  ;;  %v14091_v49 = vpack.c.bf16 %v14089_v14, %v14090_v26 }
 0xae0   :  { %7428 = vst [vmem:[#allocation10 + $0x20] sm:$0xff] %v7275_v17  ;;  %v6939_v32 = vadd.f32 %v6938_v50, %v6770_v35  ;;  %v14093_v50 = vld [vmem:[#allocation346_spill] sm:$0xff]  ;;  %v14095_v35 = vld [vmem:[#allocation427_spill] sm:$0xff] }
 0xae1   :  { %v14094_v17 = vpack.c.bf16 %v14092_v34, %v14093_v50  ;;  %v14115_v34 = vld [vmem:[#allocation186_spill] sm:$0xff] }
 0xae3   :  { %v7107_v52 = vpop.f32.mrf.mxu2 }
 0xae4   :  { %v7108_v43 = vadd.f32 %v7107_v52, %v6939_v32  ;;  %v14096_v32 = vld [vmem:[#allocation426_spill] sm:$0xff] }
 0xae5   :  { %v7276_v13 = vpop.f32.mrf.mxu3  ;;  %v6772_v47 = vpop.f32.mrf.mxu0  ;;  %v14097_v52 = vpack.c.bf16 %v14095_v35, %v14096_v32 }
 0xae6   :  { %v7277_v63 = vadd.f32 %v7276_v13, %v7108_v43  ;;  %v6773_v59 = vadd.f32 %v6772_v47, %v14074_v42  ;;  %v14098_v43 = vld [vmem:[#allocation71_spill] sm:$0xff]  ;;  %v14099_v13 = vld [vmem:[#allocation68_spill] sm:$0xff] }
 0xae7   :  { %v6941_v16 = vpop.f32.mrf.mxu1  ;;  %v14100_v47 = vpack.c.bf16 %v14098_v43, %v14099_v13 }
 0xae8   :  { %6811 = vmatmul.bf16.gmra.mxu0 %v14077_v56  ;;  %7429 = vst [vmem:[#allocation10 + $0x28] sm:$0xff] %v7277_v63  ;;  %7149 = vmatmul.bf16.gmra.mxu2 %v14083_v31  ;;  %v6942_v4 = vadd.f32 %v6941_v16, %v6773_v59 }
 0xaea   :  { %6980 = vmatmul.bf16.gmra.mxu1 %v14080_v62  ;;  %7318 = vmatmul.bf16.gmra.mxu3 %v14086_v18 }
 0xaeb   :  { %v7110_v22 = vpop.f32.mrf.mxu2 }
 0xaec   :  { %v7111_v61 = vadd.f32 %v7110_v22, %v6942_v4  ;;  %v14102_v4 = vld [vmem:[#allocation187_spill] sm:$0xff] }
 0xaed   :  { %v7279_v30 = vpop.f32.mrf.mxu3  ;;  %v6774_v57 = vpop.f32.mrf.mxu0 }
 0xaee   :  { %v7280_v7 = vadd.f32 %v7279_v30, %v7111_v61  ;;  %v6775_v48 = vadd.f32 %v6774_v57, %v14087_v0  ;;  %v14103_v61 = vld [vmem:[#allocation349_spill] sm:$0xff]  ;;  %v14104_v30 = vld [vmem:[#allocation348_spill] sm:$0xff] }
 0xaef   :  { %v6943_v53 = vpop.f32.mrf.mxu1  ;;  %v14105_v57 = vpack.c.bf16 %v14103_v61, %v14104_v30 }
 0xaf0   :  { %7430 = vst [vmem:[#allocation10 + $0x30] sm:$0xff] %v7280_v7  ;;  %v6944_v45 = vadd.f32 %v6943_v53, %v6775_v48  ;;  %v14106_v53 = vld [vmem:[#allocation351_spill] sm:$0xff]  ;;  %v14107_v7 = vld [vmem:[#allocation350_spill] sm:$0xff]  ;;  %v14109_v48 = vld [vmem:[#allocation429_spill] sm:$0xff] }
 0xaf1   :  { %v14108_v0 = vpack.c.bf16 %v14106_v53, %v14107_v7  ;;  %v14129_v53 = vld [vmem:[#allocation37_spill] sm:$0xff] }
 0xaf3   :  { %v7112_v19 = vpop.f32.mrf.mxu2 }
 0xaf4   :  { %v7113_v1 = vadd.f32 %v7112_v19, %v6944_v45  ;;  %v14110_v45 = vld [vmem:[#allocation428_spill] sm:$0xff] }
 0xaf5   :  { %v7281_v24 = vpop.f32.mrf.mxu3  ;;  %v6777_v11 = vpop.f32.mrf.mxu0  ;;  %v14111_v19 = vpack.c.bf16 %v14109_v48, %v14110_v45 }
 0xaf6   :  { %v7282_v28 = vadd.f32 %v7281_v24, %v7113_v1  ;;  %v6778_v6 = vadd.f32 %v6777_v11, %v14088_v40  ;;  %v14112_v1 = vld [vmem:[#allocation77_spill] sm:$0xff]  ;;  %v14113_v24 = vld [vmem:[#allocation74_spill] sm:$0xff] }
 0xaf7   :  { %v6946_v12 = vpop.f32.mrf.mxu1  ;;  %v14114_v11 = vpack.c.bf16 %v14112_v1, %v14113_v24 }
 0xaf8   :  { %6816 = vmatmul.bf16.gmra.mxu0 %v14091_v49  ;;  %7431 = vst [vmem:[#allocation10 + $0x38] sm:$0xff] %v7282_v28  ;;  %7154 = vmatmul.bf16.gmra.mxu2 %v14097_v52  ;;  %v6947_v16 = vadd.f32 %v6946_v12, %v6778_v6 }
 0xafa   :  { %6985 = vmatmul.bf16.gmra.mxu1 %v14094_v17  ;;  %7323 = vmatmul.bf16.gmra.mxu3 %v14100_v47 }
 0xafb   :  { %v7115_v63 = vpop.f32.mrf.mxu2 }
 0xafc   :  { %v7116_v42 = vadd.f32 %v7115_v63, %v6947_v16  ;;  %v14116_v16 = vld [vmem:[#allocation38_spill] sm:$0xff] }
 0xafd   :  { %v7284_v59 = vpop.f32.mrf.mxu3  ;;  %v6779_v37 = vpop.f32.mrf.mxu0 }
 0xafe   :  { %v7285_v56 = vadd.f32 %v7284_v59, %v7116_v42  ;;  %v6780_v29 = vadd.f32 %v6779_v37, %v14101_v58  ;;  %v14117_v42 = vld [vmem:[#allocation353_spill] sm:$0xff]  ;;  %v14118_v59 = vld [vmem:[#allocation352_spill] sm:$0xff] }
 0xaff   :  { %v6948_v51 = vpop.f32.mrf.mxu1  ;;  %v14119_v37 = vpack.c.bf16 %v14117_v42, %v14118_v59 }
 0xb00   :  { %7432 = vst [vmem:[#allocation10 + $0x40] sm:$0xff] %v7285_v56  ;;  %v6949_v62 = vadd.f32 %v6948_v51, %v6780_v29  ;;  %v14120_v51 = vld [vmem:[#allocation355_spill] sm:$0xff]  ;;  %v14121_v56 = vld [vmem:[#allocation354_spill] sm:$0xff] }
 0xb01   :  { %v14122_v58 = vpack.c.bf16 %v14120_v51, %v14121_v56  ;;  %v14123_v29 = vld [vmem:[#allocation431_spill] sm:$0xff] }
 0xb02   :  { %v14143_v51 = vld [vmem:[#allocation39_spill] sm:$0xff] }
 0xb03   :  { %v7117_v3 = vpop.f32.mrf.mxu2 }
 0xb04   :  { %v7118_v23 = vadd.f32 %v7117_v3, %v6949_v62  ;;  %v14124_v62 = vld [vmem:[#allocation430_spill] sm:$0xff] }
 0xb05   :  { %v7286_v31 = vpop.f32.mrf.mxu3  ;;  %v6782_v33 = vpop.f32.mrf.mxu0  ;;  %v14125_v3 = vpack.c.bf16 %v14123_v29, %v14124_v62 }
 0xb06   :  { %v7287_v18 = vadd.f32 %v7286_v31, %v7118_v23  ;;  %v6783_v22 = vadd.f32 %v6782_v33, %v14102_v4  ;;  %v14126_v23 = vld [vmem:[#allocation83_spill] sm:$0xff]  ;;  %v14127_v31 = vld [vmem:[#allocation80_spill] sm:$0xff] }
 0xb07   :  { %v6951_v10 = vpop.f32.mrf.mxu1  ;;  %v14128_v33 = vpack.c.bf16 %v14126_v23, %v14127_v31 }
 0xb08   :  { %6821 = vmatmul.bf16.gmra.mxu0 %v14105_v57  ;;  %7433 = vst [vmem:[#allocation10 + $0x48] sm:$0xff] %v7287_v18  ;;  %7159 = vmatmul.bf16.gmra.mxu2 %v14111_v19  ;;  %v6952_v12 = vadd.f32 %v6951_v10, %v6783_v22 }
 0xb0a   :  { %6990 = vmatmul.bf16.gmra.mxu1 %v14108_v0  ;;  %7328 = vmatmul.bf16.gmra.mxu3 %v14114_v11 }
 0xb0b   :  { %v7120_v28 = vpop.f32.mrf.mxu2 }
 0xb0c   :  { %v7121_v40 = vadd.f32 %v7120_v28, %v6952_v12  ;;  %v14130_v12 = vld [vmem:[#allocation40_spill] sm:$0xff] }
 0xb0d   :  { %v7289_v6 = vpop.f32.mrf.mxu3  ;;  %v6784_v14 = vpop.f32.mrf.mxu0 }
 0xb0e   :  { %v7290_v49 = vadd.f32 %v7289_v6, %v7121_v40  ;;  %v6785_v50 = vadd.f32 %v6784_v14, %v14115_v34  ;;  %v14131_v40 = vld [vmem:[#allocation357_spill] sm:$0xff]  ;;  %v14132_v6 = vld [vmem:[#allocation356_spill] sm:$0xff] }
 0xb0f   :  { %v6953_v26 = vpop.f32.mrf.mxu1  ;;  %v14133_v14 = vpack.c.bf16 %v14131_v40, %v14132_v6 }
 0xb10   :  { %7434 = vst [vmem:[#allocation10 + $0x50] sm:$0xff] %v7290_v49  ;;  %v6954_v17 = vadd.f32 %v6953_v26, %v6785_v50  ;;  %v14134_v26 = vld [vmem:[#allocation359_spill] sm:$0xff]  ;;  %v14135_v49 = vld [vmem:[#allocation358_spill] sm:$0xff]  ;;  %v14137_v50 = vld [vmem:[#allocation433_spill] sm:$0xff] }
 0xb11   :  { %v14136_v34 = vpack.c.bf16 %v14134_v26, %v14135_v49  ;;  %v14157_v26 = vld [vmem:[#allocation188_spill] sm:$0xff] }
 0xb13   :  { %v7122_v35 = vpop.f32.mrf.mxu2 }
 0xb14   :  { %v7123_v32 = vadd.f32 %v7122_v35, %v6954_v17  ;;  %v14138_v17 = vld [vmem:[#allocation432_spill] sm:$0xff] }
 0xb15   :  { %v7291_v52 = vpop.f32.mrf.mxu3  ;;  %v6787_v43 = vpop.f32.mrf.mxu0  ;;  %v14139_v35 = vpack.c.bf16 %v14137_v50, %v14138_v17 }
 0xb16   :  { %v7292_v47 = vadd.f32 %v7291_v52, %v7123_v32  ;;  %v6788_v63 = vadd.f32 %v6787_v43, %v14116_v16  ;;  %v14140_v32 = vld [vmem:[#allocation89_spill] sm:$0xff]  ;;  %v14141_v52 = vld [vmem:[#allocation86_spill] sm:$0xff] }
 0xb17   :  { %v6956_v13 = vpop.f32.mrf.mxu1  ;;  %v14142_v43 = vpack.c.bf16 %v14140_v32, %v14141_v52 }
 0xb18   :  { %6826 = vmatmul.bf16.gmra.mxu0 %v14119_v37  ;;  %7435 = vst [vmem:[#allocation10 + $0x58] sm:$0xff] %v7292_v47  ;;  %7164 = vmatmul.bf16.gmra.mxu2 %v14125_v3  ;;  %v6957_v10 = vadd.f32 %v6956_v13, %v6788_v63 }
 0xb1a   :  { %6995 = vmatmul.bf16.gmra.mxu1 %v14122_v58  ;;  %7333 = vmatmul.bf16.gmra.mxu3 %v14128_v33 }
 0xb1b   :  { %v7125_v18 = vpop.f32.mrf.mxu2 }
 0xb1c   :  { %v7126_v4 = vadd.f32 %v7125_v18, %v6957_v10  ;;  %v14144_v10 = vld [vmem:[#allocation189_spill] sm:$0xff] }
 0xb1d   :  { %v7294_v22 = vpop.f32.mrf.mxu3  ;;  %v6789_v61 = vpop.f32.mrf.mxu0 }
 0xb1e   :  { %v7295_v57 = vadd.f32 %v7294_v22, %v7126_v4  ;;  %v6790_v7 = vadd.f32 %v6789_v61, %v14129_v53  ;;  %v14145_v4 = vld [vmem:[#allocation361_spill] sm:$0xff]  ;;  %v14146_v22 = vld [vmem:[#allocation360_spill] sm:$0xff] }
 0xb1f   :  { %v6958_v30 = vpop.f32.mrf.mxu1  ;;  %v14147_v61 = vpack.c.bf16 %v14145_v4, %v14146_v22 }
 0xb20   :  { %7436 = vst [vmem:[#allocation10 + $0x60] sm:$0xff] %v7295_v57  ;;  %v6959_v0 = vadd.f32 %v6958_v30, %v6790_v7  ;;  %v14148_v30 = vld [vmem:[#allocation363_spill] sm:$0xff]  ;;  %v14149_v57 = vld [vmem:[#allocation362_spill] sm:$0xff] }
 0xb21   :  { %v14150_v53 = vpack.c.bf16 %v14148_v30, %v14149_v57  ;;  %v14151_v7 = vld [vmem:[#allocation435_spill] sm:$0xff]  ;;  %v14171_v30 = vld [vmem:[#allocation190_spill] sm:$0xff] }
 0xb23   :  { %v7127_v48 = vpop.f32.mrf.mxu2 }
 0xb24   :  { %v7128_v45 = vadd.f32 %v7127_v48, %v6959_v0  ;;  %v14152_v0 = vld [vmem:[#allocation434_spill] sm:$0xff] }
 0xb25   :  { %v7296_v19 = vpop.f32.mrf.mxu3  ;;  %v6792_v1 = vpop.f32.mrf.mxu0  ;;  %v14153_v48 = vpack.c.bf16 %v14151_v7, %v14152_v0 }
 0xb26   :  { %v7297_v11 = vadd.f32 %v7296_v19, %v7128_v45  ;;  %v6793_v28 = vadd.f32 %v6792_v1, %v14130_v12  ;;  %v14154_v45 = vld [vmem:[#allocation95_spill] sm:$0xff]  ;;  %v14155_v19 = vld [vmem:[#allocation92_spill] sm:$0xff] }
 0xb27   :  { %v6961_v24 = vpop.f32.mrf.mxu1  ;;  %v14156_v1 = vpack.c.bf16 %v14154_v45, %v14155_v19 }
 0xb28   :  { %6831 = vmatmul.bf16.gmra.mxu0 %v14133_v14  ;;  %7437 = vst [vmem:[#allocation10 + $0x68] sm:$0xff] %v7297_v11  ;;  %7169 = vmatmul.bf16.gmra.mxu2 %v14139_v35  ;;  %v6962_v13 = vadd.f32 %v6961_v24, %v6793_v28 }
 0xb2a   :  { %7000 = vmatmul.bf16.gmra.mxu1 %v14136_v34  ;;  %7338 = vmatmul.bf16.gmra.mxu3 %v14142_v43 }
 0xb2b   :  { %v7130_v47 = vpop.f32.mrf.mxu2 }
 0xb2c   :  { %v7131_v16 = vadd.f32 %v7130_v47, %v6962_v13  ;;  %v14158_v13 = vld [vmem:[#allocation191_spill] sm:$0xff] }
 0xb2d   :  { %v7299_v63 = vpop.f32.mrf.mxu3  ;;  %v6794_v42 = vpop.f32.mrf.mxu0 }
 0xb2e   :  { %v7300_v37 = vadd.f32 %v7299_v63, %v7131_v16  ;;  %v6795_v56 = vadd.f32 %v6794_v42, %v14143_v51  ;;  %v14159_v16 = vld [vmem:[#allocation365_spill] sm:$0xff]  ;;  %v14160_v63 = vld [vmem:[#allocation364_spill] sm:$0xff] }
 0xb2f   :  { %v6963_v59 = vpop.f32.mrf.mxu1  ;;  %v14161_v42 = vpack.c.bf16 %v14159_v16, %v14160_v63 }
 0xb30   :  { %7438 = vst [vmem:[#allocation10 + $0x70] sm:$0xff] %v7300_v37  ;;  %v6964_v58 = vadd.f32 %v6963_v59, %v6795_v56  ;;  %v14162_v59 = vld [vmem:[#allocation367_spill] sm:$0xff]  ;;  %v14163_v37 = vld [vmem:[#allocation366_spill] sm:$0xff]  ;;  %v14165_v56 = vld [vmem:[#allocation437_spill] sm:$0xff] }
 0xb31   :  { %v14164_v51 = vpack.c.bf16 %v14162_v59, %v14163_v37  ;;  %v14185_v59 = vld [vmem:[#allocation41_spill] sm:$0xff] }
 0xb33   :  { %v7132_v29 = vpop.f32.mrf.mxu2 }
 0xb34   :  { %v7133_v62 = vadd.f32 %v7132_v29, %v6964_v58  ;;  %v14166_v58 = vld [vmem:[#allocation436_spill] sm:$0xff] }
 0xb35   :  { %v7301_v3 = vpop.f32.mrf.mxu3  ;;  %v6797_v23 = vpop.f32.mrf.mxu0  ;;  %v14167_v29 = vpack.c.bf16 %v14165_v56, %v14166_v58 }
 0xb36   :  { %v7302_v33 = vadd.f32 %v7301_v3, %v7133_v62  ;;  %v6798_v18 = vadd.f32 %v6797_v23, %v14144_v10  ;;  %v14168_v62 = vld [vmem:[#allocation101_spill] sm:$0xff]  ;;  %v14169_v3 = vld [vmem:[#allocation98_spill] sm:$0xff] }
 0xb37   :  { %v6966_v31 = vpop.f32.mrf.mxu1  ;;  %v14170_v23 = vpack.c.bf16 %v14168_v62, %v14169_v3 }
 0xb38   :  { %6836 = vmatmul.bf16.gmra.mxu0 %v14147_v61  ;;  %7439 = vst [vmem:[#allocation10 + $0x78] sm:$0xff] %v7302_v33  ;;  %7174 = vmatmul.bf16.gmra.mxu2 %v14153_v48  ;;  %v6967_v24 = vadd.f32 %v6966_v31, %v6798_v18 }
 0xb3a   :  { %7005 = vmatmul.bf16.gmra.mxu1 %v14150_v53  ;;  %7343 = vmatmul.bf16.gmra.mxu3 %v14156_v1 }
 0xb3b   :  { %v7135_v11 = vpop.f32.mrf.mxu2 }
 0xb3c   :  { %v7136_v12 = vadd.f32 %v7135_v11, %v6967_v24  ;;  %v14172_v24 = vld [vmem:[#allocation42_spill] sm:$0xff] }
 0xb3d   :  { %v7304_v28 = vpop.f32.mrf.mxu3  ;;  %v6799_v40 = vpop.f32.mrf.mxu0 }
 0xb3e   :  { %v7305_v14 = vadd.f32 %v7304_v28, %v7136_v12  ;;  %v6800_v49 = vadd.f32 %v6799_v40, %v14157_v26  ;;  %v14173_v12 = vld [vmem:[#allocation369_spill] sm:$0xff]  ;;  %v14174_v28 = vld [vmem:[#allocation368_spill] sm:$0xff] }
 0xb3f   :  { %v6968_v6 = vpop.f32.mrf.mxu1  ;;  %v14175_v40 = vpack.c.bf16 %v14173_v12, %v14174_v28 }
 0xb40   :  { %7440 = vst [vmem:[#allocation10 + $0x80] sm:$0xff] %v7305_v14  ;;  %v6969_v34 = vadd.f32 %v6968_v6, %v6800_v49  ;;  %v14176_v6 = vld [vmem:[#allocation107_spill] sm:$0xff]  ;;  %v14177_v14 = vld [vmem:[#allocation104_spill] sm:$0xff] }
 0xb41   :  { %v14178_v26 = vpack.c.bf16 %v14176_v6, %v14177_v14  ;;  %v14179_v49 = vld [vmem:[#allocation439_spill] sm:$0xff] }
 0xb42   :  { %v14199_v6 = vld [vmem:[#allocation43_spill] sm:$0xff] }
 0xb43   :  { %v7137_v50 = vpop.f32.mrf.mxu2 }
 0xb44   :  { %v7138_v17 = vadd.f32 %v7137_v50, %v6969_v34  ;;  %v14180_v34 = vld [vmem:[#allocation438_spill] sm:$0xff] }
 0xb45   :  { %v7306_v35 = vpop.f32.mrf.mxu3  ;;  %v6802_v32 = vpop.f32.mrf.mxu0  ;;  %v14181_v50 = vpack.c.bf16 %v14179_v49, %v14180_v34 }
 0xb46   :  { %v7307_v43 = vadd.f32 %v7306_v35, %v7138_v17  ;;  %v6803_v47 = vadd.f32 %v6802_v32, %v14158_v13  ;;  %v14182_v17 = vld [vmem:[#allocation441_spill] sm:$0xff]  ;;  %v14183_v35 = vld [vmem:[#allocation440_spill] sm:$0xff] }
 0xb47   :  { %v6971_v52 = vpop.f32.mrf.mxu1  ;;  %v14184_v32 = vpack.c.bf16 %v14182_v17, %v14183_v35 }
 0xb48   :  { %6841 = vmatmul.bf16.gmra.mxu0 %v14161_v42  ;;  %7441 = vst [vmem:[#allocation10 + $0x88] sm:$0xff] %v7307_v43  ;;  %7179 = vmatmul.bf16.gmra.mxu2 %v14167_v29  ;;  %v6972_v31 = vadd.f32 %v6971_v52, %v6803_v47 }
 0xb4a   :  { %7010 = vmatmul.bf16.gmra.mxu1 %v14164_v51  ;;  %7348 = vmatmul.bf16.gmra.mxu3 %v14170_v23 }
 0xb4b   :  { %v7140_v33 = vpop.f32.mrf.mxu2 }
 0xb4c   :  { %v7141_v10 = vadd.f32 %v7140_v33, %v6972_v31  ;;  %v14186_v31 = vld [vmem:[#allocation44_spill] sm:$0xff] }
 0xb4d   :  { %v7309_v18 = vpop.f32.mrf.mxu3  ;;  %v6804_v4 = vpop.f32.mrf.mxu0 }
 0xb4e   :  { %v7310_v61 = vadd.f32 %v7309_v18, %v7141_v10  ;;  %v6805_v57 = vadd.f32 %v6804_v4, %v14171_v30  ;;  %v14187_v10 = vld [vmem:[#allocation371_spill] sm:$0xff]  ;;  %v14188_v18 = vld [vmem:[#allocation370_spill] sm:$0xff] }
 0xb4f   :  { %v6973_v22 = vpop.f32.mrf.mxu1  ;;  %v14189_v4 = vpack.c.bf16 %v14187_v10, %v14188_v18 }
 0xb50   :  { %7442 = vst [vmem:[#allocation10 + $0x90] sm:$0xff] %v7310_v61  ;;  %v6974_v53 = vadd.f32 %v6973_v22, %v6805_v57  ;;  %v14190_v22 = vld [vmem:[#allocation113_spill] sm:$0xff]  ;;  %v14191_v61 = vld [vmem:[#allocation110_spill] sm:$0xff]  ;;  %v14193_v57 = vld [vmem:[#allocation443_spill] sm:$0xff] }
 0xb51   :  { %v14192_v30 = vpack.c.bf16 %v14190_v22, %v14191_v61  ;;  %v14213_v22 = vld [vmem:[#allocation192_spill] sm:$0xff] }
 0xb53   :  { %v7142_v7 = vpop.f32.mrf.mxu2 }
 0xb54   :  { %v7143_v0 = vadd.f32 %v7142_v7, %v6974_v53  ;;  %v14194_v53 = vld [vmem:[#allocation442_spill] sm:$0xff] }
 0xb55   :  { %v7311_v48 = vpop.f32.mrf.mxu3  ;;  %v6807_v45 = vpop.f32.mrf.mxu0  ;;  %v14195_v7 = vpack.c.bf16 %v14193_v57, %v14194_v53 }
 0xb56   :  { %v7312_v1 = vadd.f32 %v7311_v48, %v7143_v0  ;;  %v6808_v11 = vadd.f32 %v6807_v45, %v14172_v24  ;;  %v14196_v0 = vld [vmem:[#allocation445_spill] sm:$0xff]  ;;  %v14197_v48 = vld [vmem:[#allocation444_spill] sm:$0xff] }
 0xb57   :  { %v6976_v19 = vpop.f32.mrf.mxu1  ;;  %v14198_v45 = vpack.c.bf16 %v14196_v0, %v14197_v48 }
 0xb58   :  { %6846 = vmatmul.bf16.gmra.mxu0 %v14175_v40  ;;  %7443 = vst [vmem:[#allocation10 + $0x98] sm:$0xff] %v7312_v1  ;;  %7184 = vmatmul.bf16.gmra.mxu2 %v14181_v50  ;;  %v6977_v52 = vadd.f32 %v6976_v19, %v6808_v11 }
 0xb5a   :  { %7015 = vmatmul.bf16.gmra.mxu1 %v14178_v26  ;;  %7353 = vmatmul.bf16.gmra.mxu3 %v14184_v32 }
 0xb5b   :  { %v7145_v43 = vpop.f32.mrf.mxu2 }
 0xb5c   :  { %v7146_v13 = vadd.f32 %v7145_v43, %v6977_v52  ;;  %v14200_v52 = vld [vmem:[#allocation193_spill] sm:$0xff] }
 0xb5d   :  { %v7314_v47 = vpop.f32.mrf.mxu3  ;;  %v6809_v16 = vpop.f32.mrf.mxu0 }
 0xb5e   :  { %v7315_v42 = vadd.f32 %v7314_v47, %v7146_v13  ;;  %v6810_v37 = vadd.f32 %v6809_v16, %v14185_v59  ;;  %v14201_v13 = vld [vmem:[#allocation373_spill] sm:$0xff]  ;;  %v14202_v47 = vld [vmem:[#allocation372_spill] sm:$0xff] }
 0xb5f   :  { %v6978_v63 = vpop.f32.mrf.mxu1  ;;  %v14203_v16 = vpack.c.bf16 %v14201_v13, %v14202_v47 }
 0xb60   :  { %7444 = vst [vmem:[#allocation10 + $0xa0] sm:$0xff] %v7315_v42  ;;  %v6979_v51 = vadd.f32 %v6978_v63, %v6810_v37  ;;  %v14204_v63 = vld [vmem:[#allocation375_spill] sm:$0xff]  ;;  %v14205_v42 = vld [vmem:[#allocation374_spill] sm:$0xff] }
 0xb61   :  { %v14206_v59 = vpack.c.bf16 %v14204_v63, %v14205_v42  ;;  %v14207_v37 = vld [vmem:[#allocation447_spill] sm:$0xff]  ;;  %v14227_v63 = vld [vmem:[#allocation194_spill] sm:$0xff] }
 0xb63   :  { %v7147_v56 = vpop.f32.mrf.mxu2 }
 0xb64   :  { %v7148_v58 = vadd.f32 %v7147_v56, %v6979_v51  ;;  %v14208_v51 = vld [vmem:[#allocation446_spill] sm:$0xff] }
 0xb65   :  { %v7316_v29 = vpop.f32.mrf.mxu3  ;;  %v6812_v62 = vpop.f32.mrf.mxu0  ;;  %v14209_v56 = vpack.c.bf16 %v14207_v37, %v14208_v51 }
 0xb66   :  { %v7317_v23 = vadd.f32 %v7316_v29, %v7148_v58  ;;  %v6813_v33 = vadd.f32 %v6812_v62, %v14186_v31  ;;  %v14210_v58 = vld [vmem:[#allocation119_spill] sm:$0xff]  ;;  %v14211_v29 = vld [vmem:[#allocation116_spill] sm:$0xff] }
 0xb67   :  { %v6981_v3 = vpop.f32.mrf.mxu1  ;;  %v14212_v62 = vpack.c.bf16 %v14210_v58, %v14211_v29 }
 0xb68   :  { %6851 = vmatmul.bf16.gmra.mxu0 %v14189_v4  ;;  %7445 = vst [vmem:[#allocation10 + $0xa8] sm:$0xff] %v7317_v23  ;;  %7189 = vmatmul.bf16.gmra.mxu2 %v14195_v7  ;;  %v6982_v19 = vadd.f32 %v6981_v3, %v6813_v33 }
 0xb6a   :  { %7020 = vmatmul.bf16.gmra.mxu1 %v14192_v30  ;;  %7358 = vmatmul.bf16.gmra.mxu3 %v14198_v45 }
 0xb6b   :  { %v7150_v1 = vpop.f32.mrf.mxu2 }
 0xb6c   :  { %v7151_v24 = vadd.f32 %v7150_v1, %v6982_v19  ;;  %v14214_v19 = vld [vmem:[#allocation195_spill] sm:$0xff] }
 0xb6d   :  { %v7319_v11 = vpop.f32.mrf.mxu3  ;;  %v6814_v12 = vpop.f32.mrf.mxu0 }
 0xb6e   :  { %v7320_v40 = vadd.f32 %v7319_v11, %v7151_v24  ;;  %v6815_v14 = vadd.f32 %v6814_v12, %v14199_v6  ;;  %v14215_v24 = vld [vmem:[#allocation377_spill] sm:$0xff]  ;;  %v14216_v11 = vld [vmem:[#allocation376_spill] sm:$0xff] }
 0xb6f   :  { %v6983_v28 = vpop.f32.mrf.mxu1  ;;  %v14217_v12 = vpack.c.bf16 %v14215_v24, %v14216_v11 }
 0xb70   :  { %7446 = vst [vmem:[#allocation10 + $0xb0] sm:$0xff] %v7320_v40  ;;  %v6984_v26 = vadd.f32 %v6983_v28, %v6815_v14  ;;  %v14218_v28 = vld [vmem:[#allocation379_spill] sm:$0xff]  ;;  %v14219_v40 = vld [vmem:[#allocation378_spill] sm:$0xff]  ;;  %v14221_v14 = vld [vmem:[#allocation449_spill] sm:$0xff] }
 0xb71   :  { %v14220_v6 = vpack.c.bf16 %v14218_v28, %v14219_v40  ;;  %v14241_v28 = vld [vmem:[#allocation45_spill] sm:$0xff] }
 0xb73   :  { %v7152_v49 = vpop.f32.mrf.mxu2 }
 0xb74   :  { %v7153_v34 = vadd.f32 %v7152_v49, %v6984_v26  ;;  %v14222_v26 = vld [vmem:[#allocation448_spill] sm:$0xff] }
 0xb75   :  { %v7321_v50 = vpop.f32.mrf.mxu3  ;;  %v6817_v17 = vpop.f32.mrf.mxu0  ;;  %v14223_v49 = vpack.c.bf16 %v14221_v14, %v14222_v26 }
 0xb76   :  { %v7322_v32 = vadd.f32 %v7321_v50, %v7153_v34  ;;  %v6818_v43 = vadd.f32 %v6817_v17, %v14200_v52  ;;  %v14224_v34 = vld [vmem:[#allocation125_spill] sm:$0xff]  ;;  %v14225_v50 = vld [vmem:[#allocation122_spill] sm:$0xff] }
 0xb77   :  { %v6986_v35 = vpop.f32.mrf.mxu1  ;;  %v14226_v17 = vpack.c.bf16 %v14224_v34, %v14225_v50 }
 0xb78   :  { %6856 = vmatmul.bf16.gmra.mxu0 %v14203_v16  ;;  %7447 = vst [vmem:[#allocation10 + $0xb8] sm:$0xff] %v7322_v32  ;;  %7194 = vmatmul.bf16.gmra.mxu2 %v14209_v56  ;;  %v6987_v3 = vadd.f32 %v6986_v35, %v6818_v43 }
 0xb7a   :  { %7025 = vmatmul.bf16.gmra.mxu1 %v14206_v59  ;;  %7363 = vmatmul.bf16.gmra.mxu3 %v14212_v62 }
 0xb7b   :  { %v7155_v23 = vpop.f32.mrf.mxu2 }
 0xb7c   :  { %v7156_v31 = vadd.f32 %v7155_v23, %v6987_v3  ;;  %v14228_v3 = vld [vmem:[#allocation46_spill] sm:$0xff] }
 0xb7d   :  { %v7324_v33 = vpop.f32.mrf.mxu3  ;;  %v6819_v10 = vpop.f32.mrf.mxu0 }
 0xb7e   :  { %v7325_v4 = vadd.f32 %v7324_v33, %v7156_v31  ;;  %v6820_v61 = vadd.f32 %v6819_v10, %v14213_v22  ;;  %v14229_v31 = vld [vmem:[#allocation381_spill] sm:$0xff]  ;;  %v14230_v33 = vld [vmem:[#allocation380_spill] sm:$0xff] }
 0xb7f   :  { %v6988_v18 = vpop.f32.mrf.mxu1  ;;  %v14231_v10 = vpack.c.bf16 %v14229_v31, %v14230_v33 }
 0xb80   :  { %7448 = vst [vmem:[#allocation10 + $0xc0] sm:$0xff] %v7325_v4  ;;  %v6989_v30 = vadd.f32 %v6988_v18, %v6820_v61  ;;  %v14232_v18 = vld [vmem:[#allocation383_spill] sm:$0xff]  ;;  %v14233_v4 = vld [vmem:[#allocation382_spill] sm:$0xff] }
 0xb81   :  { %v14234_v22 = vpack.c.bf16 %v14232_v18, %v14233_v4  ;;  %v14235_v61 = vld [vmem:[#allocation451_spill] sm:$0xff] }
 0xb82   :  { %v14255_v18 = vld [vmem:[#allocation47_spill] sm:$0xff] }
 0xb83   :  { %v7157_v57 = vpop.f32.mrf.mxu2 }
 0xb84   :  { %v7158_v53 = vadd.f32 %v7157_v57, %v6989_v30  ;;  %v14236_v30 = vld [vmem:[#allocation450_spill] sm:$0xff] }
 0xb85   :  { %v7326_v7 = vpop.f32.mrf.mxu3  ;;  %v6822_v0 = vpop.f32.mrf.mxu0  ;;  %v14237_v57 = vpack.c.bf16 %v14235_v61, %v14236_v30 }
 0xb86   :  { %v7327_v45 = vadd.f32 %v7326_v7, %v7158_v53  ;;  %v6823_v1 = vadd.f32 %v6822_v0, %v14214_v19  ;;  %v14238_v53 = vld [vmem:[#allocation453_spill] sm:$0xff]  ;;  %v14239_v7 = vld [vmem:[#allocation452_spill] sm:$0xff] }
 0xb87   :  { %v6991_v48 = vpop.f32.mrf.mxu1  ;;  %v14240_v0 = vpack.c.bf16 %v14238_v53, %v14239_v7 }
 0xb88   :  { %6861 = vmatmul.bf16.gmra.mxu0 %v14217_v12  ;;  %7449 = vst [vmem:[#allocation10 + $0xc8] sm:$0xff] %v7327_v45  ;;  %7199 = vmatmul.bf16.gmra.mxu2 %v14223_v49  ;;  %v6992_v35 = vadd.f32 %v6991_v48, %v6823_v1 }
 0xb8a   :  { %7030 = vmatmul.bf16.gmra.mxu1 %v14220_v6  ;;  %7368 = vmatmul.bf16.gmra.mxu3 %v14226_v17 }
 0xb8b   :  { %v7160_v32 = vpop.f32.mrf.mxu2 }
 0xb8c   :  { %v7161_v52 = vadd.f32 %v7160_v32, %v6992_v35  ;;  %v14242_v35 = vld [vmem:[#allocation48_spill] sm:$0xff] }
 0xb8d   :  { %v7329_v43 = vpop.f32.mrf.mxu3  ;;  %v6824_v13 = vpop.f32.mrf.mxu0 }
 0xb8e   :  { %v7330_v16 = vadd.f32 %v7329_v43, %v7161_v52  ;;  %v6825_v42 = vadd.f32 %v6824_v13, %v14227_v63  ;;  %v14243_v52 = vld [vmem:[#allocation385_spill] sm:$0xff]  ;;  %v14244_v43 = vld [vmem:[#allocation384_spill] sm:$0xff] }
 0xb8f   :  { %v6993_v47 = vpop.f32.mrf.mxu1  ;;  %v14245_v13 = vpack.c.bf16 %v14243_v52, %v14244_v43 }
 0xb90   :  { %7450 = vst [vmem:[#allocation10 + $0xd0] sm:$0xff] %v7330_v16  ;;  %v6994_v59 = vadd.f32 %v6993_v47, %v6825_v42  ;;  %v14246_v47 = vld [vmem:[#allocation387_spill] sm:$0xff]  ;;  %v14247_v16 = vld [vmem:[#allocation386_spill] sm:$0xff] }
 0xb91   :  { %v14248_v63 = vpack.c.bf16 %v14246_v47, %v14247_v16  ;;  %v14249_v42 = vld [vmem:[#allocation455_spill] sm:$0xff]  ;;  %v14269_v47 = vld [vmem:[#allocation196_spill] sm:$0xff] }
 0xb93   :  { %v7162_v37 = vpop.f32.mrf.mxu2 }
 0xb94   :  { %v7163_v51 = vadd.f32 %v7162_v37, %v6994_v59  ;;  %v14250_v59 = vld [vmem:[#allocation454_spill] sm:$0xff] }
 0xb95   :  { %v7331_v56 = vpop.f32.mrf.mxu3  ;;  %v6827_v58 = vpop.f32.mrf.mxu0  ;;  %v14251_v37 = vpack.c.bf16 %v14249_v42, %v14250_v59 }
 0xb96   :  { %v7332_v62 = vadd.f32 %v7331_v56, %v7163_v51  ;;  %v6828_v23 = vadd.f32 %v6827_v58, %v14228_v3  ;;  %v14252_v51 = vld [vmem:[#allocation17_spill] sm:$0xff]  ;;  %v14253_v56 = vld [vmem:[#allocation18_spill] sm:$0xff] }
 0xb97   :  { %v6996_v29 = vpop.f32.mrf.mxu1  ;;  %v14254_v58 = vpack.c.bf16 %v14252_v51, %v14253_v56 }
 0xb98   :  { %6866 = vmatmul.bf16.gmra.mxu0 %v14231_v10  ;;  %7451 = vst [vmem:[#allocation10 + $0xd8] sm:$0xff] %v7332_v62  ;;  %7204 = vmatmul.bf16.gmra.mxu2 %v14237_v57  ;;  %v6997_v48 = vadd.f32 %v6996_v29, %v6828_v23 }
 0xb9a   :  { %7035 = vmatmul.bf16.gmra.mxu1 %v14234_v22  ;;  %7373 = vmatmul.bf16.gmra.mxu3 %v14240_v0 }
 0xb9b   :  { %v7165_v45 = vpop.f32.mrf.mxu2 }
 0xb9c   :  { %v7166_v19 = vadd.f32 %v7165_v45, %v6997_v48  ;;  %v14256_v48 = vld [vmem:[#allocation197_spill] sm:$0xff] }
 0xb9d   :  { %v7334_v1 = vpop.f32.mrf.mxu3  ;;  %v6829_v24 = vpop.f32.mrf.mxu0 }
 0xb9e   :  { %v7335_v12 = vadd.f32 %v7334_v1, %v7166_v19  ;;  %v6830_v40 = vadd.f32 %v6829_v24, %v14241_v28  ;;  %v14257_v19 = vld [vmem:[#allocation389_spill] sm:$0xff]  ;;  %v14258_v1 = vld [vmem:[#allocation388_spill] sm:$0xff] }
 0xb9f   :  { %v6998_v11 = vpop.f32.mrf.mxu1  ;;  %v14259_v24 = vpack.c.bf16 %v14257_v19, %v14258_v1 }
 0xba0   :  { %7452 = vst [vmem:[#allocation10 + $0xe0] sm:$0xff] %v7335_v12  ;;  %v6999_v6 = vadd.f32 %v6998_v11, %v6830_v40  ;;  %v14260_v11 = vld [vmem:[#allocation391_spill] sm:$0xff]  ;;  %v14261_v12 = vld [vmem:[#allocation390_spill] sm:$0xff] }
 0xba1   :  { %v14262_v28 = vpack.c.bf16 %v14260_v11, %v14261_v12  ;;  %v14263_v40 = vld [vmem:[#allocation19_spill] sm:$0xff]  ;;  %v14283_v11 = vld [vmem:[#allocation198_spill] sm:$0xff] }
 0xba3   :  { %v7167_v14 = vpop.f32.mrf.mxu2 }
 0xba4   :  { %v7168_v26 = vadd.f32 %v7167_v14, %v6999_v6  ;;  %v14264_v6 = vld [vmem:[#allocation20_spill] sm:$0xff] }
 0xba5   :  { %v7336_v49 = vpop.f32.mrf.mxu3  ;;  %v6832_v34 = vpop.f32.mrf.mxu0  ;;  %v14265_v14 = vpack.c.bf16 %v14263_v40, %v14264_v6 }
 0xba6   :  { %v7337_v17 = vadd.f32 %v7336_v49, %v7168_v26  ;;  %v6833_v32 = vadd.f32 %v6832_v34, %v14242_v35  ;;  %v14266_v26 = vld [vmem:[#allocation168_spill] sm:$0xff]  ;;  %v14267_v49 = vld [vmem:[#allocation169_spill] sm:$0xff] }
 0xba7   :  { %v7001_v50 = vpop.f32.mrf.mxu1  ;;  %v14268_v34 = vpack.c.bf16 %v14266_v26, %v14267_v49 }
 0xba8   :  { %6871 = vmatmul.bf16.gmra.mxu0 %v14245_v13  ;;  %7453 = vst [vmem:[#allocation10 + $0xe8] sm:$0xff] %v7337_v17  ;;  %7209 = vmatmul.bf16.gmra.mxu2 %v14251_v37  ;;  %v7002_v29 = vadd.f32 %v7001_v50, %v6833_v32 }
 0xbaa   :  { %7040 = vmatmul.bf16.gmra.mxu1 %v14248_v63  ;;  %7378 = vmatmul.bf16.gmra.mxu3 %v14254_v58 }
 0xbab   :  { %v7170_v62 = vpop.f32.mrf.mxu2 }
 0xbac   :  { %v7171_v3 = vadd.f32 %v7170_v62, %v7002_v29  ;;  %v14270_v29 = vld [vmem:[#allocation199_spill] sm:$0xff] }
 0xbad   :  { %v7339_v23 = vpop.f32.mrf.mxu3  ;;  %v6834_v31 = vpop.f32.mrf.mxu0 }
 0xbae   :  { %v7340_v10 = vadd.f32 %v7339_v23, %v7171_v3  ;;  %v6835_v4 = vadd.f32 %v6834_v31, %v14255_v18  ;;  %v14271_v3 = vld [vmem:[#allocation393_spill] sm:$0xff]  ;;  %v14272_v23 = vld [vmem:[#allocation392_spill] sm:$0xff] }
 0xbaf   :  { %v7003_v33 = vpop.f32.mrf.mxu1  ;;  %v14273_v31 = vpack.c.bf16 %v14271_v3, %v14272_v23 }
 0xbb0   :  { %7454 = vst [vmem:[#allocation10 + $0xf0] sm:$0xff] %v7340_v10  ;;  %v7004_v22 = vadd.f32 %v7003_v33, %v6835_v4  ;;  %v14274_v33 = vld [vmem:[#allocation16_spill] sm:$0xff]  ;;  %v14275_v10 = vld [vmem:[#allocation15_spill] sm:$0xff]  ;;  %v14277_v4 = vld [vmem:[#allocation170_spill] sm:$0xff] }
 0xbb1   :  { %v14276_v18 = vpack.c.bf16 %v14274_v33, %v14275_v10  ;;  %v14297_v33 = vld [vmem:[#allocation49_spill] sm:$0xff] }
 0xbb3   :  { %v7172_v61 = vpop.f32.mrf.mxu2 }
 0xbb4   :  { %v7173_v30 = vadd.f32 %v7172_v61, %v7004_v22  ;;  %v14278_v22 = vld [vmem:[#allocation171_spill] sm:$0xff] }
 0xbb5   :  { %v7341_v57 = vpop.f32.mrf.mxu3  ;;  %v6837_v53 = vpop.f32.mrf.mxu0  ;;  %v14279_v61 = vpack.c.bf16 %v14277_v4, %v14278_v22 }
 0xbb6   :  { %v7342_v0 = vadd.f32 %v7341_v57, %v7173_v30  ;;  %v6838_v45 = vadd.f32 %v6837_v53, %v14256_v48  ;;  %v14280_v30 = vld [vmem:[#allocation21_spill] sm:$0xff]  ;;  %v14281_v57 = vld [vmem:[#allocation22_spill] sm:$0xff] }
 0xbb7   :  { %v7006_v7 = vpop.f32.mrf.mxu1  ;;  %v14282_v53 = vpack.c.bf16 %v14280_v30, %v14281_v57 }
 0xbb8   :  { %6876 = vmatmul.bf16.gmra.mxu0 %v14259_v24  ;;  %7455 = vst [vmem:[#allocation10 + $0xf8] sm:$0xff] %v7342_v0  ;;  %7214 = vmatmul.bf16.gmra.mxu2 %v14265_v14  ;;  %v7007_v50 = vadd.f32 %v7006_v7, %v6838_v45 }
 0xbba   :  { %7045 = vmatmul.bf16.gmra.mxu1 %v14262_v28  ;;  %7383 = vmatmul.bf16.gmra.mxu3 %v14268_v34 }
 0xbbb   :  { %v7175_v17 = vpop.f32.mrf.mxu2 }
 0xbbc   :  { %v7176_v35 = vadd.f32 %v7175_v17, %v7007_v50  ;;  %v14284_v50 = vld [vmem:[#allocation50_spill] sm:$0xff] }
 0xbbd   :  { %v7344_v32 = vpop.f32.mrf.mxu3  ;;  %v6839_v52 = vpop.f32.mrf.mxu0 }
 0xbbe   :  { %v7345_v13 = vadd.f32 %v7344_v32, %v7176_v35  ;;  %v6840_v16 = vadd.f32 %v6839_v52, %v14269_v47  ;;  %v14285_v35 = vld [vmem:[#allocation395_spill] sm:$0xff]  ;;  %v14286_v32 = vld [vmem:[#allocation394_spill] sm:$0xff] }
 0xbbf   :  { %v7008_v43 = vpop.f32.mrf.mxu1  ;;  %v14287_v52 = vpack.c.bf16 %v14285_v35, %v14286_v32 }
 0xbc0   :  { %7456 = vst [vmem:[#allocation10 + $0x100] sm:$0xff] %v7345_v13  ;;  %v7009_v63 = vadd.f32 %v7008_v43, %v6840_v16  ;;  %v14288_v43 = vld [vmem:[#allocation397_spill] sm:$0xff]  ;;  %v14289_v13 = vld [vmem:[#allocation396_spill] sm:$0xff]  ;;  %v14291_v16 = vld [vmem:[#allocation23_spill] sm:$0xff] }
 0xbc1   :  { %v14290_v47 = vpack.c.bf16 %v14288_v43, %v14289_v13  ;;  %v14311_v43 = vld [vmem:[#allocation51_spill] sm:$0xff] }
 0xbc3   :  { %v7177_v42 = vpop.f32.mrf.mxu2 }
 0xbc4   :  { %v7178_v59 = vadd.f32 %v7177_v42, %v7009_v63  ;;  %v14292_v63 = vld [vmem:[#allocation24_spill] sm:$0xff] }
 0xbc5   :  { %v7346_v37 = vpop.f32.mrf.mxu3  ;;  %v6842_v51 = vpop.f32.mrf.mxu0  ;;  %v14293_v42 = vpack.c.bf16 %v14291_v16, %v14292_v63 }
 0xbc6   :  { %v7347_v58 = vadd.f32 %v7346_v37, %v7178_v59  ;;  %v6843_v62 = vadd.f32 %v6842_v51, %v14270_v29  ;;  %v14294_v59 = vld [vmem:[#allocation172_spill] sm:$0xff]  ;;  %v14295_v37 = vld [vmem:[#allocation173_spill] sm:$0xff] }
 0xbc7   :  { %v7011_v56 = vpop.f32.mrf.mxu1  ;;  %v14296_v51 = vpack.c.bf16 %v14294_v59, %v14295_v37 }
 0xbc8   :  { %6881 = vmatmul.bf16.gmra.mxu0 %v14273_v31  ;;  %7457 = vst [vmem:[#allocation10 + $0x108] sm:$0xff] %v7347_v58  ;;  %7219 = vmatmul.bf16.gmra.mxu2 %v14279_v61  ;;  %v7012_v7 = vadd.f32 %v7011_v56, %v6843_v62 }
 0xbca   :  { %7050 = vmatmul.bf16.gmra.mxu1 %v14276_v18  ;;  %7388 = vmatmul.bf16.gmra.mxu3 %v14282_v53 }
 0xbcb   :  { %v7180_v0 = vpop.f32.mrf.mxu2 }
 0xbcc   :  { %v7181_v48 = vadd.f32 %v7180_v0, %v7012_v7  ;;  %v14298_v7 = vld [vmem:[#allocation52_spill] sm:$0xff] }
 0xbcd   :  { %v7349_v45 = vpop.f32.mrf.mxu3  ;;  %v6844_v19 = vpop.f32.mrf.mxu0 }
 0xbce   :  { %v7350_v24 = vadd.f32 %v7349_v45, %v7181_v48  ;;  %v6845_v12 = vadd.f32 %v6844_v19, %v14283_v11  ;;  %v14299_v48 = vld [vmem:[#allocation399_spill] sm:$0xff]  ;;  %v14300_v45 = vld [vmem:[#allocation398_spill] sm:$0xff] }
 0xbcf   :  { %v7013_v1 = vpop.f32.mrf.mxu1  ;;  %v14301_v19 = vpack.c.bf16 %v14299_v48, %v14300_v45 }
 0xbd0   :  { %7458 = vst [vmem:[#allocation10 + $0x110] sm:$0xff] %v7350_v24  ;;  %v7014_v28 = vadd.f32 %v7013_v1, %v6845_v12  ;;  %v14302_v1 = vld [vmem:[#allocation401_spill] sm:$0xff]  ;;  %v14303_v24 = vld [vmem:[#allocation400_spill] sm:$0xff]  ;;  %v14305_v12 = vld [vmem:[#allocation174_spill] sm:$0xff] }
 0xbd1   :  { %v14304_v11 = vpack.c.bf16 %v14302_v1, %v14303_v24  ;;  %v14325_v1 = vld [vmem:[#allocation200_spill] sm:$0xff] }
 0xbd3   :  { %v7182_v40 = vpop.f32.mrf.mxu2 }
 0xbd4   :  { %v7183_v6 = vadd.f32 %v7182_v40, %v7014_v28  ;;  %v14306_v28 = vld [vmem:[#allocation175_spill] sm:$0xff] }
 0xbd5   :  { %v7351_v14 = vpop.f32.mrf.mxu3  ;;  %v6847_v26 = vpop.f32.mrf.mxu0  ;;  %v14307_v40 = vpack.c.bf16 %v14305_v12, %v14306_v28 }
 0xbd6   :  { %v7352_v34 = vadd.f32 %v7351_v14, %v7183_v6  ;;  %v6848_v17 = vadd.f32 %v6847_v26, %v14284_v50  ;;  %v14308_v6 = vld [vmem:[#allocation25_spill] sm:$0xff]  ;;  %v14309_v14 = vld [vmem:[#allocation26_spill] sm:$0xff] }
 0xbd7   :  { %v7016_v49 = vpop.f32.mrf.mxu1  ;;  %v14310_v26 = vpack.c.bf16 %v14308_v6, %v14309_v14 }
 0xbd8   :  { %6886 = vmatmul.bf16.gmra.mxu0 %v14287_v52  ;;  %7459 = vst [vmem:[#allocation10 + $0x118] sm:$0xff] %v7352_v34  ;;  %7224 = vmatmul.bf16.gmra.mxu2 %v14293_v42  ;;  %v7017_v56 = vadd.f32 %v7016_v49, %v6848_v17 }
 0xbda   :  { %7055 = vmatmul.bf16.gmra.mxu1 %v14290_v47  ;;  %7393 = vmatmul.bf16.gmra.mxu3 %v14296_v51 }
 0xbdb   :  { %v7185_v58 = vpop.f32.mrf.mxu2 }
 0xbdc   :  { %v7186_v29 = vadd.f32 %v7185_v58, %v7017_v56  ;;  %v14312_v56 = vld [vmem:[#allocation201_spill] sm:$0xff] }
 0xbdd   :  { %v7354_v62 = vpop.f32.mrf.mxu3  ;;  %v6849_v3 = vpop.f32.mrf.mxu0 }
 0xbde   :  { %v7355_v31 = vadd.f32 %v7354_v62, %v7186_v29  ;;  %v6850_v10 = vadd.f32 %v6849_v3, %v14297_v33  ;;  %v14313_v29 = vld [vmem:[#allocation403_spill] sm:$0xff]  ;;  %v14314_v62 = vld [vmem:[#allocation402_spill] sm:$0xff] }
 0xbdf   :  { %v7018_v23 = vpop.f32.mrf.mxu1  ;;  %v14315_v3 = vpack.c.bf16 %v14313_v29, %v14314_v62 }
 0xbe0   :  { %7460 = vst [vmem:[#allocation10 + $0x120] sm:$0xff] %v7355_v31  ;;  %v7019_v18 = vadd.f32 %v7018_v23, %v6850_v10  ;;  %v14316_v23 = vld [vmem:[#allocation405_spill] sm:$0xff]  ;;  %v14317_v31 = vld [vmem:[#allocation404_spill] sm:$0xff]  ;;  %v14319_v10 = vld [vmem:[#allocation27_spill] sm:$0xff] }
 0xbe1   :  { %v14318_v33 = vpack.c.bf16 %v14316_v23, %v14317_v31  ;;  %v14339_v23 = vld [vmem:[#allocation202_spill] sm:$0xff] }
 0xbe3   :  { %v7187_v4 = vpop.f32.mrf.mxu2 }
 0xbe4   :  { %v7188_v22 = vadd.f32 %v7187_v4, %v7019_v18  ;;  %v14320_v18 = vld [vmem:[#allocation28_spill] sm:$0xff] }
 0xbe5   :  { %v7356_v61 = vpop.f32.mrf.mxu3  ;;  %v6852_v30 = vpop.f32.mrf.mxu0  ;;  %v14321_v4 = vpack.c.bf16 %v14319_v10, %v14320_v18 }
 0xbe6   :  { %v7357_v53 = vadd.f32 %v7356_v61, %v7188_v22  ;;  %v6853_v0 = vadd.f32 %v6852_v30, %v14298_v7  ;;  %v14322_v22 = vld [vmem:[#allocation176_spill] sm:$0xff]  ;;  %v14323_v61 = vld [vmem:[#allocation177_spill] sm:$0xff] }
 0xbe7   :  { %v7021_v57 = vpop.f32.mrf.mxu1  ;;  %v14324_v30 = vpack.c.bf16 %v14322_v22, %v14323_v61 }
 0xbe8   :  { %6891 = vmatmul.bf16.gmra.mxu0 %v14301_v19  ;;  %7461 = vst [vmem:[#allocation10 + $0x128] sm:$0xff] %v7357_v53  ;;  %7229 = vmatmul.bf16.gmra.mxu2 %v14307_v40  ;;  %v7022_v49 = vadd.f32 %v7021_v57, %v6853_v0 }
 0xbea   :  { %7060 = vmatmul.bf16.gmra.mxu1 %v14304_v11  ;;  %7398 = vmatmul.bf16.gmra.mxu3 %v14310_v26 }
 0xbeb   :  { %v7190_v34 = vpop.f32.mrf.mxu2 }
 0xbec   :  { %v7191_v50 = vadd.f32 %v7190_v34, %v7022_v49  ;;  %v14326_v49 = vld [vmem:[#allocation203_spill] sm:$0xff] }
 0xbed   :  { %v7359_v17 = vpop.f32.mrf.mxu3  ;;  %v6854_v35 = vpop.f32.mrf.mxu0 }
 0xbee   :  { %v7360_v52 = vadd.f32 %v7359_v17, %v7191_v50  ;;  %v6855_v13 = vadd.f32 %v6854_v35, %v14311_v43  ;;  %v14327_v50 = vld [vmem:[#allocation407_spill] sm:$0xff]  ;;  %v14328_v17 = vld [vmem:[#allocation406_spill] sm:$0xff] }
 0xbef   :  { %v7023_v32 = vpop.f32.mrf.mxu1  ;;  %v14329_v35 = vpack.c.bf16 %v14327_v50, %v14328_v17 }
 0xbf0   :  { %7462 = vst [vmem:[#allocation10 + $0x130] sm:$0xff] %v7360_v52  ;;  %v7024_v47 = vadd.f32 %v7023_v32, %v6855_v13  ;;  %v14330_v32 = vld [vmem:[#allocation409_spill] sm:$0xff]  ;;  %v14331_v52 = vld [vmem:[#allocation408_spill] sm:$0xff]  ;;  %v14333_v13 = vld [vmem:[#allocation178_spill] sm:$0xff] }
 0xbf1   :  { %v14332_v43 = vpack.c.bf16 %v14330_v32, %v14331_v52  ;;  %v14353_v32 = vld [vmem:[#allocation53_spill] sm:$0xff] }
 0xbf3   :  { %v7192_v16 = vpop.f32.mrf.mxu2 }
 0xbf4   :  { %v7193_v63 = vadd.f32 %v7192_v16, %v7024_v47  ;;  %v14334_v47 = vld [vmem:[#allocation179_spill] sm:$0xff] }
 0xbf5   :  { %v7361_v42 = vpop.f32.mrf.mxu3  ;;  %v6857_v59 = vpop.f32.mrf.mxu0  ;;  %v14335_v16 = vpack.c.bf16 %v14333_v13, %v14334_v47 }
 0xbf6   :  { %v7362_v51 = vadd.f32 %v7361_v42, %v7193_v63  ;;  %v6858_v58 = vadd.f32 %v6857_v59, %v14312_v56  ;;  %v14336_v63 = vld [vmem:[#allocation29_spill] sm:$0xff]  ;;  %v14337_v42 = vld [vmem:[#allocation30_spill] sm:$0xff] }
 0xbf7   :  { %v7026_v37 = vpop.f32.mrf.mxu1  ;;  %v14338_v59 = vpack.c.bf16 %v14336_v63, %v14337_v42 }
 0xbf8   :  { %6896 = vmatmul.bf16.gmra.mxu0 %v14315_v3  ;;  %7463 = vst [vmem:[#allocation10 + $0x138] sm:$0xff] %v7362_v51  ;;  %7234 = vmatmul.bf16.gmra.mxu2 %v14321_v4  ;;  %v7027_v57 = vadd.f32 %v7026_v37, %v6858_v58 }
 0xbfa   :  { %7065 = vmatmul.bf16.gmra.mxu1 %v14318_v33  ;;  %7403 = vmatmul.bf16.gmra.mxu3 %v14324_v30 }
 0xbfb   :  { %v7195_v53 = vpop.f32.mrf.mxu2 }
 0xbfc   :  { %v7196_v7 = vadd.f32 %v7195_v53, %v7027_v57  ;;  %v14340_v57 = vld [vmem:[#allocation54_spill] sm:$0xff] }
 0xbfd   :  { %v7364_v0 = vpop.f32.mrf.mxu3  ;;  %v6859_v48 = vpop.f32.mrf.mxu0 }
 0xbfe   :  { %v7365_v19 = vadd.f32 %v7364_v0, %v7196_v7  ;;  %v6860_v24 = vadd.f32 %v6859_v48, %v14325_v1  ;;  %v14341_v7 = vld [vmem:[#allocation411_spill] sm:$0xff]  ;;  %v14342_v0 = vld [vmem:[#allocation410_spill] sm:$0xff] }
 0xbff   :  { %v7028_v45 = vpop.f32.mrf.mxu1  ;;  %v14343_v48 = vpack.c.bf16 %v14341_v7, %v14342_v0 }
 0xc00   :  { %7464 = vst [vmem:[#allocation10 + $0x140] sm:$0xff] %v7365_v19  ;;  %v7029_v11 = vadd.f32 %v7028_v45, %v6860_v24  ;;  %v14344_v45 = vld [vmem:[#allocation413_spill] sm:$0xff]  ;;  %v14345_v19 = vld [vmem:[#allocation412_spill] sm:$0xff]  ;;  %v14347_v24 = vld [vmem:[#allocation31_spill] sm:$0xff] }
 0xc01   :  { %v14346_v1 = vpack.c.bf16 %v14344_v45, %v14345_v19 }
 0xc03   :  { %v7197_v12 = vpop.f32.mrf.mxu2 }
 0xc04   :  { %v7198_v28 = vadd.f32 %v7197_v12, %v7029_v11  ;;  %v14348_v11 = vld [vmem:[#allocation32_spill] sm:$0xff] }
 0xc05   :  { %v7366_v40 = vpop.f32.mrf.mxu3  ;;  %v6862_v6 = vpop.f32.mrf.mxu0  ;;  %v14349_v12 = vpack.c.bf16 %v14347_v24, %v14348_v11 }
 0xc06   :  { %v7367_v26 = vadd.f32 %v7366_v40, %v7198_v28  ;;  %v6863_v34 = vadd.f32 %v6862_v6, %v14326_v49  ;;  %v14350_v28 = vld [vmem:[#allocation180_spill] sm:$0xff]  ;;  %v14351_v40 = vld [vmem:[#allocation181_spill] sm:$0xff] }
 0xc07   :  { %v7031_v14 = vpop.f32.mrf.mxu1  ;;  %v14352_v6 = vpack.c.bf16 %v14350_v28, %v14351_v40 }
 0xc08   :  { %6901 = vmatmul.bf16.gmra.mxu0 %v14329_v35  ;;  %7465 = vst [vmem:[#allocation10 + $0x148] sm:$0xff] %v7367_v26  ;;  %7239 = vmatmul.bf16.gmra.mxu2 %v14335_v16  ;;  %v7032_v37 = vadd.f32 %v7031_v14, %v6863_v34 }
 0xc0a   :  { %7070 = vmatmul.bf16.gmra.mxu1 %v14332_v43  ;;  %7408 = vmatmul.bf16.gmra.mxu3 %v14338_v59 }
 0xc0b   :  { %v7200_v51 = vpop.f32.mrf.mxu2 }
 0xc0c   :  { %v7201_v56 = vadd.f32 %v7200_v51, %v7032_v37  ;;  %v14354_v51 = vld [vmem:[#allocation415_spill] sm:$0xff] }
 0xc0d   :  { %v7369_v58 = vpop.f32.mrf.mxu3  ;;  %v6864_v29 = vpop.f32.mrf.mxu0 }
 0xc0e   :  { %v7370_v3 = vadd.f32 %v7369_v58, %v7201_v56  ;;  %v6865_v31 = vadd.f32 %v6864_v29, %v14339_v23  ;;  %v14355_v56 = vld [vmem:[#allocation414_spill] sm:$0xff]  ;;  %v14357_v29 = vld [vmem:[#allocation417_spill] sm:$0xff] }
 0xc0f   :  { %v7033_v62 = vpop.f32.mrf.mxu1  ;;  %v14356_v58 = vpack.c.bf16 %v14354_v51, %v14355_v56  ;;  %v14360_v23 = vld [vmem:[#allocation182_spill] sm:$0xff] }
 0xc10   :  { %7466 = vst [vmem:[#allocation10 + $0x150] sm:$0xff] %v7370_v3  ;;  %v7034_v33 = vadd.f32 %v7033_v62, %v6865_v31  ;;  %v14358_v62 = vld [vmem:[#allocation416_spill] sm:$0xff]  ;;  %v14361_v31 = vld [vmem:[#allocation183_spill] sm:$0xff] }
 0xc11   :  { %v14359_v3 = vpack.c.bf16 %v14357_v29, %v14358_v62 }
 0xc13   :  { %v7202_v10 = vpop.f32.mrf.mxu2 }
 0xc14   :  { %v7203_v18 = vadd.f32 %v7202_v10, %v7034_v33  ;;  %v14362_v33 = vpack.c.bf16 %v14360_v23, %v14361_v31  ;;  %v14363_v10 = vld [vmem:[#allocation33_spill] sm:$0xff] }
 0xc15   :  { %v7371_v4 = vpop.f32.mrf.mxu3  ;;  %v6867_v22 = vpop.f32.mrf.mxu0 }
 0xc16   :  { %v7372_v30 = vadd.f32 %v7371_v4, %v7203_v18  ;;  %v6868_v53 = vadd.f32 %v6867_v22, %v14340_v57  ;;  %v14364_v18 = vld [vmem:[#allocation34_spill] sm:$0xff] }
 0xc17   :  { %v7036_v61 = vpop.f32.mrf.mxu1  ;;  %v14365_v4 = vpack.c.bf16 %v14363_v10, %v14364_v18 }
 0xc18   :  { %6906 = vmatmul.bf16.gmra.mxu0 %v14343_v48  ;;  %7467 = vst [vmem:[#allocation10 + $0x158] sm:$0xff] %v7372_v30  ;;  %7244 = vmatmul.bf16.gmra.mxu2 %v14349_v12  ;;  %v7037_v14 = vadd.f32 %v7036_v61, %v6868_v53 }
 0xc1a   :  { %7075 = vmatmul.bf16.gmra.mxu1 %v14346_v1  ;;  %7413 = vmatmul.bf16.gmra.mxu3 %v14352_v6 }
 0xc1b   :  { %v7205_v26 = vpop.f32.mrf.mxu2 }
 0xc1c   :  { %v7206_v49 = vadd.f32 %v7205_v26, %v7037_v14 }
 0xc1d   :  { %v7374_v34 = vpop.f32.mrf.mxu3  ;;  %v6869_v50 = vpop.f32.mrf.mxu0 }
 0xc1e   :  { %v7375_v35 = vadd.f32 %v7374_v34, %v7206_v49  ;;  %v6870_v52 = vadd.f32 %v6869_v50, %v14353_v32 }
 0xc1f   :  { %v7038_v17 = vpop.f32.mrf.mxu1 }
 0xc20   :  { %7468 = vst [vmem:[#allocation10 + $0x160] sm:$0xff] %v7375_v35  ;;  %v7039_v43 = vadd.f32 %v7038_v17, %v6870_v52 }
 0xc23   :  { %v7207_v13 = vpop.f32.mrf.mxu2 }
 0xc24   :  { %v7208_v47 = vadd.f32 %v7207_v13, %v7039_v43 }
 0xc25   :  { %v7376_v16 = vpop.f32.mrf.mxu3  ;;  %v6872_v63 = vpop.f32.mrf.mxu0 }
 0xc26   :  { %v7377_v59 = vadd.f32 %v7376_v16, %v7208_v47  ;;  %v6873_v37 = vadd.f32 %v6872_v63, %v11908_v9 }
 0xc27   :  { %v7041_v42 = vpop.f32.mrf.mxu1 }
 0xc28   :  { %6911 = vmatmul.bf16.gmra.mxu0 %v14356_v58  ;;  %7469 = vst [vmem:[#allocation10 + $0x168] sm:$0xff] %v7377_v59  ;;  %7249 = vmatmul.bf16.gmra.mxu2 %v14362_v33  ;;  %v7042_v22 = vadd.f32 %v7041_v42, %v6873_v37 }
 0xc2a   :  { %7080 = vmatmul.bf16.gmra.mxu1 %v14359_v3  ;;  %7418 = vmatmul.bf16.gmra.mxu3 %v14365_v4 }
 0xc2b   :  { %v7210_v61 = vpop.f32.mrf.mxu2 }
 0xc2c   :  { %v7211_v9 = vadd.f32 %v7210_v61, %v7042_v22 }
 0xc2d   :  { %v7379_v30 = vpop.f32.mrf.mxu3  ;;  %v6874_v57 = vpop.f32.mrf.mxu0 }
 0xc2e   :  { %v7380_v7 = vadd.f32 %v7379_v30, %v7211_v9  ;;  %v6875_v0 = vadd.f32 %v6874_v57, %v11911_v38 }
 0xc2f   :  { %v7043_v53 = vpop.f32.mrf.mxu1 }
 0xc30   :  { %7470 = vst [vmem:[#allocation10 + $0x170] sm:$0xff] %v7380_v7  ;;  %v7044_v48 = vadd.f32 %v7043_v53, %v6875_v0 }
 0xc33   :  { %v7212_v45 = vpop.f32.mrf.mxu2 }
 0xc34   :  { %v7213_v19 = vadd.f32 %v7212_v45, %v7044_v48 }
 0xc35   :  { %v7381_v1 = vpop.f32.mrf.mxu3  ;;  %v6877_v24 = vpop.f32.mrf.mxu0 }
 0xc36   :  { %v7382_v12 = vadd.f32 %v7381_v1, %v7213_v19  ;;  %v6878_v28 = vadd.f32 %v6877_v24, %v11926_v44 }
 0xc37   :  { %v7046_v11 = vpop.f32.mrf.mxu1 }
 0xc38   :  { %7471 = vst [vmem:[#allocation10 + $0x178] sm:$0xff] %v7382_v12  ;;  %v7047_v40 = vadd.f32 %v7046_v11, %v6878_v28 }
 0xc3b   :  { %v7215_v6 = vpop.f32.mrf.mxu2 }
 0xc3c   :  { %v7216_v14 = vadd.f32 %v7215_v6, %v7047_v40 }
 0xc3d   :  { %v7384_v26 = vpop.f32.mrf.mxu3  ;;  %v6879_v49 = vpop.f32.mrf.mxu0 }
 0xc3e   :  { %v7385_v50 = vadd.f32 %v7384_v26, %v7216_v14  ;;  %v6880_v38 = vadd.f32 %v6879_v49, %v11929_v55 }
 0xc3f   :  { %v7048_v34 = vpop.f32.mrf.mxu1 }
 0xc40   :  { %7472 = vst [vmem:[#allocation10 + $0x180] sm:$0xff] %v7385_v50  ;;  %v7049_v17 = vadd.f32 %v7048_v34, %v6880_v38 }
 0xc43   :  { %v7217_v35 = vpop.f32.mrf.mxu2 }
 0xc44   :  { %v7218_v32 = vadd.f32 %v7217_v35, %v7049_v17 }
 0xc45   :  { %v7386_v52 = vpop.f32.mrf.mxu3  ;;  %v6882_v43 = vpop.f32.mrf.mxu0 }
 0xc46   :  { %v7387_v47 = vadd.f32 %v7386_v52, %v7218_v32  ;;  %v6883_v44 = vadd.f32 %v6882_v43, %v11944_v27 }
 0xc47   :  { %v7051_v13 = vpop.f32.mrf.mxu1 }
 0xc48   :  { %7473 = vst [vmem:[#allocation10 + $0x188] sm:$0xff] %v7387_v47  ;;  %v7052_v16 = vadd.f32 %v7051_v13, %v6883_v44 }
 0xc4b   :  { %v7220_v63 = vpop.f32.mrf.mxu2 }
 0xc4c   :  { %v7221_v42 = vadd.f32 %v7220_v63, %v7052_v16 }
 0xc4d   :  { %v7389_v59 = vpop.f32.mrf.mxu3  ;;  %v6884_v37 = vpop.f32.mrf.mxu0 }
 0xc4e   :  { %v7390_v56 = vadd.f32 %v7389_v59, %v7221_v42  ;;  %v6885_v55 = vadd.f32 %v6884_v37, %v11947_v60 }
 0xc4f   :  { %v7053_v51 = vpop.f32.mrf.mxu1 }
 0xc50   :  { %7474 = vst [vmem:[#allocation10 + $0x190] sm:$0xff] %v7390_v56  ;;  %v7054_v58 = vadd.f32 %v7053_v51, %v6885_v55 }
 0xc53   :  { %v7222_v29 = vpop.f32.mrf.mxu2 }
 0xc54   :  { %v7223_v62 = vadd.f32 %v7222_v29, %v7054_v58 }
 0xc55   :  { %v7391_v3 = vpop.f32.mrf.mxu3  ;;  %v6887_v23 = vpop.f32.mrf.mxu0 }
 0xc56   :  { %v7392_v33 = vadd.f32 %v7391_v3, %v7223_v62  ;;  %v6888_v27 = vadd.f32 %v6887_v23, %v11962_v46 }
 0xc57   :  { %v7056_v31 = vpop.f32.mrf.mxu1 }
 0xc58   :  { %7475 = vst [vmem:[#allocation10 + $0x198] sm:$0xff] %v7392_v33  ;;  %v7057_v10 = vadd.f32 %v7056_v31, %v6888_v27 }
 0xc5b   :  { %v7225_v18 = vpop.f32.mrf.mxu2 }
 0xc5c   :  { %v7226_v4 = vadd.f32 %v7225_v18, %v7057_v10 }
 0xc5d   :  { %v7394_v22 = vpop.f32.mrf.mxu3  ;;  %v6889_v61 = vpop.f32.mrf.mxu0 }
 0xc5e   :  { %v7395_v30 = vadd.f32 %v7394_v22, %v7226_v4  ;;  %v6890_v60 = vadd.f32 %v6889_v61, %v11965_v5 }
 0xc5f   :  { %v7058_v9 = vpop.f32.mrf.mxu1 }
 0xc60   :  { %7476 = vst [vmem:[#allocation10 + $0x1a0] sm:$0xff] %v7395_v30  ;;  %v7059_v57 = vadd.f32 %v7058_v9, %v6890_v60 }
 0xc63   :  { %v7227_v53 = vpop.f32.mrf.mxu2 }
 0xc64   :  { %v7228_v7 = vadd.f32 %v7227_v53, %v7059_v57 }
 0xc65   :  { %v7396_v0 = vpop.f32.mrf.mxu3  ;;  %v6892_v48 = vpop.f32.mrf.mxu0 }
 0xc66   :  { %v7397_v19 = vadd.f32 %v7396_v0, %v7228_v7  ;;  %v6893_v46 = vadd.f32 %v6892_v48, %v11980_v39 }
 0xc67   :  { %v7061_v45 = vpop.f32.mrf.mxu1 }
 0xc68   :  { %7477 = vst [vmem:[#allocation10 + $0x1a8] sm:$0xff] %v7397_v19  ;;  %v7062_v1 = vadd.f32 %v7061_v45, %v6893_v46 }
 0xc6b   :  { %v7230_v24 = vpop.f32.mrf.mxu2 }
 0xc6c   :  { %v7231_v11 = vadd.f32 %v7230_v24, %v7062_v1 }
 0xc6d   :  { %v7399_v12 = vpop.f32.mrf.mxu3  ;;  %v6894_v28 = vpop.f32.mrf.mxu0 }
 0xc6e   :  { %v7400_v6 = vadd.f32 %v7399_v12, %v7231_v11  ;;  %v6895_v5 = vadd.f32 %v6894_v28, %v11983_v15 }
 0xc6f   :  { %v7063_v40 = vpop.f32.mrf.mxu1 }
 0xc70   :  { %7478 = vst [vmem:[#allocation10 + $0x1b0] sm:$0xff] %v7400_v6  ;;  %v7064_v14 = vadd.f32 %v7063_v40, %v6895_v5 }
 0xc73   :  { %v7232_v26 = vpop.f32.mrf.mxu2 }
 0xc74   :  { %v7233_v49 = vadd.f32 %v7232_v26, %v7064_v14 }
 0xc75   :  { %v7401_v34 = vpop.f32.mrf.mxu3  ;;  %v6897_v50 = vpop.f32.mrf.mxu0 }
 0xc76   :  { %v7402_v17 = vadd.f32 %v7401_v34, %v7233_v49  ;;  %v6898_v39 = vadd.f32 %v6897_v50, %v11998_v54 }
 0xc77   :  { %v7066_v38 = vpop.f32.mrf.mxu1 }
 0xc78   :  { %7479 = vst [vmem:[#allocation10 + $0x1b8] sm:$0xff] %v7402_v17  ;;  %v7067_v35 = vadd.f32 %v7066_v38, %v6898_v39 }
 0xc7b   :  { %v7235_v32 = vpop.f32.mrf.mxu2 }
 0xc7c   :  { %v7236_v52 = vadd.f32 %v7235_v32, %v7067_v35 }
 0xc7d   :  { %v7404_v43 = vpop.f32.mrf.mxu3  ;;  %v6899_v13 = vpop.f32.mrf.mxu0 }
 0xc7e   :  { %v7405_v44 = vadd.f32 %v7404_v43, %v7236_v52  ;;  %v6900_v15 = vadd.f32 %v6899_v13, %v12001_v21 }
 0xc7f   :  { %v7068_v47 = vpop.f32.mrf.mxu1 }
 0xc80   :  { %7480 = vst [vmem:[#allocation10 + $0x1c0] sm:$0xff] %v7405_v44  ;;  %v7069_v16 = vadd.f32 %v7068_v47, %v6900_v15 }
 0xc83   :  { %v7237_v63 = vpop.f32.mrf.mxu2 }
 0xc84   :  { %v7238_v42 = vadd.f32 %v7237_v63, %v7069_v16 }
 0xc85   :  { %v7406_v59 = vpop.f32.mrf.mxu3  ;;  %v6902_v37 = vpop.f32.mrf.mxu0 }
 0xc86   :  { %v7407_v56 = vadd.f32 %v7406_v59, %v7238_v42  ;;  %v6903_v54 = vadd.f32 %v6902_v37, %v12016_v2 }
 0xc87   :  { %v7071_v51 = vpop.f32.mrf.mxu1 }
 0xc88   :  { %7481 = vst [vmem:[#allocation10 + $0x1c8] sm:$0xff] %v7407_v56  ;;  %v7072_v55 = vadd.f32 %v7071_v51, %v6903_v54 }
 0xc8b   :  { %v7240_v58 = vpop.f32.mrf.mxu2 }
 0xc8c   :  { %v7241_v29 = vadd.f32 %v7240_v58, %v7072_v55 }
 0xc8d   :  { %v7409_v62 = vpop.f32.mrf.mxu3  ;;  %v6904_v3 = vpop.f32.mrf.mxu0 }
 0xc8e   :  { %v7410_v31 = vadd.f32 %v7409_v62, %v7241_v29  ;;  %v6905_v21 = vadd.f32 %v6904_v3, %v12019_v25 }
 0xc8f   :  { %v7073_v23 = vpop.f32.mrf.mxu1 }
 0xc90   :  { %7482 = vst [vmem:[#allocation10 + $0x1d0] sm:$0xff] %v7410_v31  ;;  %v7074_v33 = vadd.f32 %v7073_v23, %v6905_v21 }
 0xc93   :  { %v7242_v27 = vpop.f32.mrf.mxu2 }
 0xc94   :  { %v7243_v10 = vadd.f32 %v7242_v27, %v7074_v33 }
 0xc95   :  { %v7411_v18 = vpop.f32.mrf.mxu3  ;;  %v6907_v4 = vpop.f32.mrf.mxu0 }
 0xc96   :  { %v7412_v61 = vadd.f32 %v7411_v18, %v7243_v10  ;;  %v6908_v2 = vadd.f32 %v6907_v4, %v12034_v36 }
 0xc97   :  { %v7076_v22 = vpop.f32.mrf.mxu1 }
 0xc98   :  { %7483 = vst [vmem:[#allocation10 + $0x1d8] sm:$0xff] %v7412_v61  ;;  %v7077_v9 = vadd.f32 %v7076_v22, %v6908_v2 }
 0xc9b   :  { %v7245_v30 = vpop.f32.mrf.mxu2 }
 0xc9c   :  { %v7246_v60 = vadd.f32 %v7245_v30, %v7077_v9 }
 0xc9d   :  { %v7414_v57 = vpop.f32.mrf.mxu3  ;;  %v6909_v53 = vpop.f32.mrf.mxu0 }
 0xc9e   :  { %v7415_v0 = vadd.f32 %v7414_v57, %v7246_v60  ;;  %v6910_v25 = vadd.f32 %v6909_v53, %v12037_v41 }
 0xc9f   :  { %v7078_v7 = vpop.f32.mrf.mxu1 }
 0xca0   :  { %7484 = vst [vmem:[#allocation10 + $0x1e0] sm:$0xff] %v7415_v0  ;;  %v7079_v48 = vadd.f32 %v7078_v7, %v6910_v25 }
 0xca3   :  { %v7247_v45 = vpop.f32.mrf.mxu2 }
 0xca4   :  { %v7248_v19 = vadd.f32 %v7247_v45, %v7079_v48 }
 0xca5   :  { %v7416_v46 = vpop.f32.mrf.mxu3  ;;  %v6912_v1 = vpop.f32.mrf.mxu0 }
 0xca6   :  { %v7417_v24 = vadd.f32 %v7416_v46, %v7248_v19  ;;  %v6913_v11 = vadd.f32 %v6912_v1, %v12052_v20 }
 0xca7   :  { %v7081_v36 = vpop.f32.mrf.mxu1 }
 0xca8   :  { %7485 = vst [vmem:[#allocation10 + $0x1e8] sm:$0xff] %v7417_v24  ;;  %v7082_v12 = vadd.f32 %v7081_v36, %v6913_v11 }
 0xcab   :  { %v7250_v28 = vpop.f32.mrf.mxu2 }
 0xcac   :  { %v7251_v40 = vadd.f32 %v7250_v28, %v7082_v12 }
 0xcad   :  { %v7419_v6 = vpop.f32.mrf.mxu3  ;;  %v6914_v5 = vpop.f32.mrf.mxu0 }
 0xcae   :  { %v7420_v14 = vadd.f32 %v7419_v6, %v7251_v40  ;;  %v6915_v26 = vadd.f32 %v6914_v5, %v12054_v8 }
 0xcaf   :  { %v7083_v41 = vpop.f32.mrf.mxu1 }
 0xcb0   :  { %7486 = vst [vmem:[#allocation10 + $0x1f0] sm:$0xff] %v7420_v14  ;;  %v7084_v49 = vadd.f32 %v7083_v41, %v6915_v26 }
 0xcb3   :  { %v7252_v20 = vpop.f32.mrf.mxu2 }
 0xcb4   :  { %v7253_v34 = vadd.f32 %v7252_v20, %v7084_v49 }
 0xcb5   :  { %v7421_v50 = vpop.f32.mrf.mxu3 }
 0xcb6   :  { %v7422_v38 = vadd.f32 %v7421_v50, %v7253_v34 }
 0xcb8   :  { %7487 = vst [vmem:[#allocation10 + $0x1f8] sm:$0xff] %v7422_v38 }
 0xcb9   :  { %7500 = dma.vmem_to_hbm [thread:$0]  %s7493_s19, 8192, %s7495_s22, [#allocation4], %s8626_s23, %s8626_s23, %s8627_s24  }
 0xcba   :  { %8613 = dma.done.wait [#allocation4], 8192  }
 0xcbb   :  { %8614 = vsyncadd [#allocation4], 4294959104 }
 0xcbc   :  { %7505 = vsyncpa [#allocation3], 1 }
 0xcbd   :  { %7506 = vsyncpa [#allocation6], 1 }
 0xcbe   :  { %7507 = vsyncpa [#allocation9], 1 }
 0xcbf   :  { %7508 = vsyncpa [#allocation4], 1 }

</bundles_post_ra>
